<compile_context>
chip_gen: v7x
topology: tpu7x:2x2x1
jax: 0.10.0
libtpu: 0.0.40
codegen_flags: <defaults>
</compile_context>

<pallas_src>
import functools
import math

import jax
import jax.numpy as jnp
from jax.experimental import pallas as pl
from jax.experimental.pallas import tpu as pltpu
import numpy as np


def _round_up(x, m):
    return ((x + m - 1) // m) * m


# ---------------------------------------------------------------------------
# Pallas kernel: multi-head self-attention + additive-attention pooling for a
# block of G sequences (one grid step = one (G, S, Din) block).
# ---------------------------------------------------------------------------
def _attn_pool_kernel(x_ref, wqkv_ref, bqkv_ref, watt_ref, batt_ref, qatt_ref,
                      out_ref, *, head_num, head_dim):
    G, S, Din = x_ref.shape
    D = head_num * head_dim

    # Fused QKV projection: one (G*S, Din) @ (Din, 3D) MXU matmul.
    # (Merging the two leading dims is layout-neutral.)
    x = x_ref[...].reshape(G * S, Din)
    qkv = jnp.dot(x, wqkv_ref[...],
                  preferred_element_type=jnp.float32) + bqkv_ref[...]
    qkv = qkv.reshape(G, S, 3 * D)          # columns: [Q(D) | K(D) | V(D)]

    scale = 1.0 / math.sqrt(head_dim)

    # Per-head attention, batched over the G sequences (static unrolled loop
    # over the small head count; each einsum is a G-way batched (S,S) matmul).
    ctx_heads = []
    for h in range(head_num):
        lo = h * head_dim
        qh = qkv[:, :, lo:lo + head_dim]                     # (G, S, hd)
        kh = qkv[:, :, D + lo:D + lo + head_dim]             # (G, S, hd)
        vh = qkv[:, :, 2 * D + lo:2 * D + lo + head_dim]     # (G, S, hd)

        s = jnp.einsum("gqd,gkd->gqk", qh, kh,
                       preferred_element_type=jnp.float32) * scale  # (G, S, S)
        s = s - jnp.max(s, axis=-1, keepdims=True)
        p = jnp.exp(s)
        p = p * pl.reciprocal(jnp.sum(p, axis=-1, keepdims=True), approx=True)
        ctx_heads.append(jnp.einsum("gqk,gkd->gqd", p, vh,
                                    preferred_element_type=jnp.float32))
    y = jnp.concatenate(ctx_heads, axis=-1)                  # (G, S, D)

    # Additive attention pooling over the sequence axis.
    y2 = y.reshape(G * S, D)
    h_att = jnp.tanh(jnp.dot(y2, watt_ref[...],
                             preferred_element_type=jnp.float32) + batt_ref[...])
    e = jnp.dot(h_att, qatt_ref[...],
                preferred_element_type=jnp.float32)          # (G*S, 1)
    e = e.reshape(G, S, 1)
    e = e - jnp.max(e, axis=1, keepdims=True)
    w = jnp.exp(e)
    w = w * pl.reciprocal(jnp.sum(w, axis=1, keepdims=True), approx=True)

    out_ref[...] = jnp.sum(w * y, axis=1).astype(out_ref.dtype)   # (G, D)


def attn_pool(x, params, head_num, head_dim):
    """x: (M, S, Din) float32 -> (M, head_num*head_dim) float32."""
    M, S, Din = x.shape
    D = head_num * head_dim
    A = params["w_att"].shape[1]

    # Fuse the three projection weights/biases (done once per call, in JAX).
    w_qkv = jnp.concatenate([params["wq"], params["wk"], params["wv"]], axis=1)
    b_qkv = jnp.concatenate([params["bq"], params["bk"], params["bv"]], axis=1)

    # Batch G sequences per grid step (G multiple of 8); pad M up to a
    # multiple of G so output blocks are full, lane/sublane-dense stores.
    block_m = min(128, _round_up(M, 8))
    m_pad = _round_up(M, block_m)
    if m_pad != M:
        x = jnp.pad(x, ((0, m_pad - M), (0, 0), (0, 0)))

    kernel = functools.partial(_attn_pool_kernel,
                               head_num=head_num, head_dim=head_dim)

    out = pl.pallas_call(
        kernel,
        out_shape=jax.ShapeDtypeStruct((m_pad, D), jnp.float32),
        grid=(m_pad // block_m,),
        in_specs=[
            pl.BlockSpec((block_m, S, Din), lambda i: (i, 0, 0)),  # x block
            pl.BlockSpec((Din, 3 * D), lambda i: (0, 0)),          # fused W_qkv
            pl.BlockSpec((1, 3 * D), lambda i: (0, 0)),            # fused b_qkv
            pl.BlockSpec((D, A), lambda i: (0, 0)),                # additive W
            pl.BlockSpec((1, A), lambda i: (0, 0)),                # additive b
            pl.BlockSpec((A, 1), lambda i: (0, 0)),                # additive query
        ],
        out_specs=pl.BlockSpec((block_m, D), lambda i: (i, 0)),
        compiler_params=pltpu.CompilerParams(
            dimension_semantics=("parallel",)),
    )(x, w_qkv, b_qkv, params["w_att"], params["b_att"], params["q_att"])
    return out[:M]


# ---------------------------------------------------------------------------
# Pure-JAX reference (mirrors the PyTorch SelfAttention + AdditiveAttention)
# ---------------------------------------------------------------------------
def attn_pool_ref(x, p, head_num, head_dim):
    M, S, _ = x.shape
    D = head_num * head_dim
    q = x @ p["wq"] + p["bq"]
    k = x @ p["wk"] + p["bk"]
    v = x @ p["wv"] + p["bv"]
    qh = q.reshape(M, S, head_num, head_dim).transpose(0, 2, 1, 3)
    kh = k.reshape(M, S, head_num, head_dim).transpose(0, 2, 1, 3)
    vh = v.reshape(M, S, head_num, head_dim).transpose(0, 2, 1, 3)
    scores = jnp.einsum("mhqd,mhkd->mhqk", qh, kh) / math.sqrt(head_dim)
    attn = jax.nn.softmax(scores, axis=-1)
    ctx = jnp.einsum("mhqk,mhkd->mhqd", attn, vh)
    y = ctx.transpose(0, 2, 1, 3).reshape(M, S, D)
    e = jnp.tanh(y @ p["w_att"] + p["b_att"]) @ p["q_att"]   # (M, S, 1)
    w = jax.nn.softmax(e, axis=1)
    return jnp.sum(w * y, axis=1)                            # (M, D)


# ---------------------------------------------------------------------------
# UserEncoder forward (news-encoder stage + user stage), kernel for both.
# ---------------------------------------------------------------------------
@functools.partial(jax.jit, static_argnames=("head_num", "head_dim", "use_kernel"))
def user_encoder_forward(history, word_emb, news_params, user_params,
                         head_num, head_dim, use_kernel=True):
    B, N, T = history.shape
    E = word_emb.shape[1]
    D = head_num * head_dim
    fn = attn_pool if use_kernel else attn_pool_ref

    # Embedding lookup (glue) -> encode all B*N news titles in one batch.
    tok_emb = jnp.take(word_emb, history.reshape(-1), axis=0).reshape(B * N, T, E)
    news_repr = fn(tok_emb, news_params, head_num, head_dim)        # (B*N, D)
    hist_repr = news_repr.reshape(B, N, D)

    # User-level self-attention + additive attention over the history axis
    # (tiny B here; the M axis is padded to one 8-row block inside attn_pool).
    user_repr = fn(hist_repr, user_params, head_num, head_dim)      # (B, D)
    return user_repr


def _make_params(key, din, head_num, head_dim, att_hidden):
    D = head_num * head_dim
    ks = jax.random.split(key, 10)
    s = 0.1
    return {
        "wq": s * jax.random.normal(ks[0], (din, D), jnp.float32),
        "bq": s * jax.random.normal(ks[1], (1, D), jnp.float32),
        "wk": s * jax.random.normal(ks[2], (din, D), jnp.float32),
        "bk": s * jax.random.normal(ks[3], (1, D), jnp.float32),
        "wv": s * jax.random.normal(ks[4], (din, D), jnp.float32),
        "bv": s * jax.random.normal(ks[5], (1, D), jnp.float32),
        "w_att": s * jax.random.normal(ks[6], (D, att_hidden), jnp.float32),
        "b_att": s * jax.random.normal(ks[7], (1, att_hidden), jnp.float32),
        "q_att": s * jax.random.normal(ks[8], (att_hidden, 1), jnp.float32),
    }


if __name__ == "__main__":
    # Small hparams: head_num=4, head_dim=8 -> D=32, attention_hidden_dim=16,
    # word embedding dim E=32, vocab=50, batch=2, history=8, title_len=12.
    head_num, head_dim = 4, 8
    att_hidden = 16
    E, vocab = 32, 50
    B, N, T = 2, 8, 12

    root = jax.random.PRNGKey(0)
    k_hist, k_emb, k_news, k_user = jax.random.split(root, 4)

    history = jax.random.randint(k_hist, (B, N, T), 0, vocab, dtype=jnp.int32)
    word_emb = 0.1 * jax.random.normal(k_emb, (vocab, E), jnp.float32)
    news_params = _make_params(k_news, E, head_num, head_dim, att_hidden)
    user_params = _make_params(k_user, head_num * head_dim, head_num, head_dim,
                               att_hidden)

    out = user_encoder_forward(history, word_emb, news_params, user_params,
                               head_num=head_num, head_dim=head_dim,
                               use_kernel=True)
    out = jax.block_until_ready(out)

    ref = user_encoder_forward(history, word_emb, news_params, user_params,
                               head_num=head_num, head_dim=head_dim,
                               use_kernel=False)
    ref = jax.block_until_ready(ref)

    assert out.shape == (B, head_num * head_dim)
    # Tolerance 2e-3 because the softmax denominators use the EUP approximate
    # reciprocal (pl.reciprocal(..., approx=True)).
    np.testing.assert_allclose(np.asarray(out), np.asarray(ref),
                               atol=2e-3, rtol=2e-3)
    print("KERNEL_OK")
</pallas_src>

<mosaic_0001>
module attributes {stable_mosaic.version = 11 : i64} {
  func.func @_attn_pool_kernel(%arg0: i32, %arg1: memref<16x12x32xf32, #tpu.memory_space<vmem>>, %arg2: memref<32x96xf32, #tpu.memory_space<vmem>>, %arg3: memref<1x96xf32, #tpu.memory_space<vmem>>, %arg4: memref<32x16xf32, #tpu.memory_space<vmem>>, %arg5: memref<1x16xf32, #tpu.memory_space<vmem>>, %arg6: memref<16x1xf32, #tpu.memory_space<vmem>>, %arg7: memref<16x32xf32, #tpu.memory_space<vmem>>) attributes {dimension_semantics = [#tpu.dimension_semantics<parallel>], iteration_bounds = array<i64: 1>, scalar_prefetch = 0 : i64, scratch_operands = 0 : i64, tpu.core_type = #tpu.core_type<tc>, window_params = [{transform_indices = @transform_0, window_bounds = array<i64: 16, 12, 32>}, {pipeline_mode = #tpu.pipeline_mode<synchronous>, transform_indices = @transform_1, window_bounds = array<i64: 32, 96>}, {pipeline_mode = #tpu.pipeline_mode<synchronous>, transform_indices = @transform_2, window_bounds = array<i64: 1, 96>}, {pipeline_mode = #tpu.pipeline_mode<synchronous>, transform_indices = @transform_3, window_bounds = array<i64: 32, 16>}, {pipeline_mode = #tpu.pipeline_mode<synchronous>, transform_indices = @transform_4, window_bounds = array<i64: 1, 16>}, {pipeline_mode = #tpu.pipeline_mode<synchronous>, transform_indices = @transform_5, window_bounds = array<i64: 16, 1>}, {transform_indices = @transform_6, window_bounds = array<i64: 16, 32>}]} {
    %c0 = arith.constant 0 : index
    %c0_0 = arith.constant 0 : index
    %c0_1 = arith.constant 0 : index
    %0 = vector.load %arg1[%c0, %c0_0, %c0_1] : memref<16x12x32xf32, #tpu.memory_space<vmem>>, vector<16x12x32xf32>
    %1 = vector.shape_cast %0 : vector<16x12x32xf32> to vector<192x32xf32>
    %c0_2 = arith.constant 0 : index
    %c0_3 = arith.constant 0 : index
    %2 = vector.load %arg2[%c0_2, %c0_3] : memref<32x96xf32, #tpu.memory_space<vmem>>, vector<32x96xf32>
    %cst = arith.constant dense<0.000000e+00> : vector<192x96xf32>
    %3 = tpu.matmul %1, %2, %cst {dimension_numbers = #tpu.dot_dimension_numbers<[1], [0], [0], [1], [0, 0, 1, 1], [], []>} : vector<192x32xf32>, vector<32x96xf32>, vector<192x96xf32> -> vector<192x96xf32>
    %c0_4 = arith.constant 0 : index
    %c0_5 = arith.constant 0 : index
    %4 = vector.load %arg3[%c0_4, %c0_5] : memref<1x96xf32, #tpu.memory_space<vmem>>, vector<1x96xf32>
    %5 = vector.broadcast %4 : vector<1x96xf32> to vector<192x96xf32>
    %6 = arith.addf %3, %5 : vector<192x96xf32>
    %7 = vector.shape_cast %6 : vector<192x96xf32> to vector<16x12x96xf32>
    %8 = vector.extract_strided_slice %7 {offsets = [0, 0, 0], sizes = [16, 12, 8], strides = [1, 1, 1]} : vector<16x12x96xf32> to vector<16x12x8xf32>
    %9 = vector.extract_strided_slice %7 {offsets = [0, 0, 32], sizes = [16, 12, 8], strides = [1, 1, 1]} : vector<16x12x96xf32> to vector<16x12x8xf32>
    %10 = vector.extract_strided_slice %7 {offsets = [0, 0, 64], sizes = [16, 12, 8], strides = [1, 1, 1]} : vector<16x12x96xf32> to vector<16x12x8xf32>
    "tpu.trace_start"() <{level = 10 : i32, message = "gqd,gkd->gqk"}> : () -> ()
    %cst_6 = arith.constant dense<0.000000e+00> : vector<16x12x12xf32>
    %11 = tpu.matmul %8, %9, %cst_6 {dimension_numbers = #tpu.dot_dimension_numbers<[2], [2], [1], [1], [0, 0, 0, 1, 1, 1], [0], [0]>} : vector<16x12x8xf32>, vector<16x12x8xf32>, vector<16x12x12xf32> -> vector<16x12x12xf32>
    "tpu.trace_stop"() : () -> ()
    %cst_7 = arith.constant 0.353553385 : f32
    %12 = vector.broadcast %cst_7 : f32 to vector<16x12x12xf32>
    %13 = arith.mulf %11, %12 : vector<16x12x12xf32>
    %cst_8 = arith.constant dense<0xFF800000> : vector<16x12xf32>
    %14 = vector.multi_reduction <maximumf>, %13, %cst_8 [2] : vector<16x12x12xf32> to vector<16x12xf32>
    %15 = vector.shape_cast %14 : vector<16x12xf32> to vector<16x12x1xf32>
    %16 = vector.broadcast %15 : vector<16x12x1xf32> to vector<16x12x12xf32>
    %17 = arith.subf %13, %16 : vector<16x12x12xf32>
    %18 = math.exp %17 : vector<16x12x12xf32>
    %cst_9 = arith.constant dense<0.000000e+00> : vector<16x12xf32>
    %19 = vector.multi_reduction <add>, %18, %cst_9 [2] : vector<16x12x12xf32> to vector<16x12xf32>
    %20 = vector.shape_cast %19 : vector<16x12xf32> to vector<16x12x1xf32>
    %21 = tpu.reciprocal %20 {approx = true} : vector<16x12x1xf32> -> vector<16x12x1xf32>
    %22 = vector.broadcast %21 : vector<16x12x1xf32> to vector<16x12x12xf32>
    %23 = arith.mulf %18, %22 : vector<16x12x12xf32>
    "tpu.trace_start"() <{level = 10 : i32, message = "gqk,gkd->gqd"}> : () -> ()
    %cst_10 = arith.constant dense<0.000000e+00> : vector<16x12x8xf32>
    %24 = tpu.matmul %23, %10, %cst_10 {dimension_numbers = #tpu.dot_dimension_numbers<[2], [1], [1], [2], [0, 0, 0, 1, 1, 2], [0], [0]>} : vector<16x12x12xf32>, vector<16x12x8xf32>, vector<16x12x8xf32> -> vector<16x12x8xf32>
    "tpu.trace_stop"() : () -> ()
    %25 = vector.extract_strided_slice %7 {offsets = [0, 0, 8], sizes = [16, 12, 8], strides = [1, 1, 1]} : vector<16x12x96xf32> to vector<16x12x8xf32>
    %26 = vector.extract_strided_slice %7 {offsets = [0, 0, 40], sizes = [16, 12, 8], strides = [1, 1, 1]} : vector<16x12x96xf32> to vector<16x12x8xf32>
    %27 = vector.extract_strided_slice %7 {offsets = [0, 0, 72], sizes = [16, 12, 8], strides = [1, 1, 1]} : vector<16x12x96xf32> to vector<16x12x8xf32>
    "tpu.trace_start"() <{level = 10 : i32, message = "gqd,gkd->gqk"}> : () -> ()
    %cst_11 = arith.constant dense<0.000000e+00> : vector<16x12x12xf32>
    %28 = tpu.matmul %25, %26, %cst_11 {dimension_numbers = #tpu.dot_dimension_numbers<[2], [2], [1], [1], [0, 0, 0, 1, 1, 1], [0], [0]>} : vector<16x12x8xf32>, vector<16x12x8xf32>, vector<16x12x12xf32> -> vector<16x12x12xf32>
    "tpu.trace_stop"() : () -> ()
    %cst_12 = arith.constant 0.353553385 : f32
    %29 = vector.broadcast %cst_12 : f32 to vector<16x12x12xf32>
    %30 = arith.mulf %28, %29 : vector<16x12x12xf32>
    %cst_13 = arith.constant dense<0xFF800000> : vector<16x12xf32>
    %31 = vector.multi_reduction <maximumf>, %30, %cst_13 [2] : vector<16x12x12xf32> to vector<16x12xf32>
    %32 = vector.shape_cast %31 : vector<16x12xf32> to vector<16x12x1xf32>
    %33 = vector.broadcast %32 : vector<16x12x1xf32> to vector<16x12x12xf32>
    %34 = arith.subf %30, %33 : vector<16x12x12xf32>
    %35 = math.exp %34 : vector<16x12x12xf32>
    %cst_14 = arith.constant dense<0.000000e+00> : vector<16x12xf32>
    %36 = vector.multi_reduction <add>, %35, %cst_14 [2] : vector<16x12x12xf32> to vector<16x12xf32>
    %37 = vector.shape_cast %36 : vector<16x12xf32> to vector<16x12x1xf32>
    %38 = tpu.reciprocal %37 {approx = true} : vector<16x12x1xf32> -> vector<16x12x1xf32>
    %39 = vector.broadcast %38 : vector<16x12x1xf32> to vector<16x12x12xf32>
    %40 = arith.mulf %35, %39 : vector<16x12x12xf32>
    "tpu.trace_start"() <{level = 10 : i32, message = "gqk,gkd->gqd"}> : () -> ()
    %cst_15 = arith.constant dense<0.000000e+00> : vector<16x12x8xf32>
    %41 = tpu.matmul %40, %27, %cst_15 {dimension_numbers = #tpu.dot_dimension_numbers<[2], [1], [1], [2], [0, 0, 0, 1, 1, 2], [0], [0]>} : vector<16x12x12xf32>, vector<16x12x8xf32>, vector<16x12x8xf32> -> vector<16x12x8xf32>
    "tpu.trace_stop"() : () -> ()
    %42 = vector.extract_strided_slice %7 {offsets = [0, 0, 16], sizes = [16, 12, 8], strides = [1, 1, 1]} : vector<16x12x96xf32> to vector<16x12x8xf32>
    %43 = vector.extract_strided_slice %7 {offsets = [0, 0, 48], sizes = [16, 12, 8], strides = [1, 1, 1]} : vector<16x12x96xf32> to vector<16x12x8xf32>
    %44 = vector.extract_strided_slice %7 {offsets = [0, 0, 80], sizes = [16, 12, 8], strides = [1, 1, 1]} : vector<16x12x96xf32> to vector<16x12x8xf32>
    "tpu.trace_start"() <{level = 10 : i32, message = "gqd,gkd->gqk"}> : () -> ()
    %cst_16 = arith.constant dense<0.000000e+00> : vector<16x12x12xf32>
    %45 = tpu.matmul %42, %43, %cst_16 {dimension_numbers = #tpu.dot_dimension_numbers<[2], [2], [1], [1], [0, 0, 0, 1, 1, 1], [0], [0]>} : vector<16x12x8xf32>, vector<16x12x8xf32>, vector<16x12x12xf32> -> vector<16x12x12xf32>
    "tpu.trace_stop"() : () -> ()
    %cst_17 = arith.constant 0.353553385 : f32
    %46 = vector.broadcast %cst_17 : f32 to vector<16x12x12xf32>
    %47 = arith.mulf %45, %46 : vector<16x12x12xf32>
    %cst_18 = arith.constant dense<0xFF800000> : vector<16x12xf32>
    %48 = vector.multi_reduction <maximumf>, %47, %cst_18 [2] : vector<16x12x12xf32> to vector<16x12xf32>
    %49 = vector.shape_cast %48 : vector<16x12xf32> to vector<16x12x1xf32>
    %50 = vector.broadcast %49 : vector<16x12x1xf32> to vector<16x12x12xf32>
    %51 = arith.subf %47, %50 : vector<16x12x12xf32>
    %52 = math.exp %51 : vector<16x12x12xf32>
    %cst_19 = arith.constant dense<0.000000e+00> : vector<16x12xf32>
    %53 = vector.multi_reduction <add>, %52, %cst_19 [2] : vector<16x12x12xf32> to vector<16x12xf32>
    %54 = vector.shape_cast %53 : vector<16x12xf32> to vector<16x12x1xf32>
    %55 = tpu.reciprocal %54 {approx = true} : vector<16x12x1xf32> -> vector<16x12x1xf32>
    %56 = vector.broadcast %55 : vector<16x12x1xf32> to vector<16x12x12xf32>
    %57 = arith.mulf %52, %56 : vector<16x12x12xf32>
    "tpu.trace_start"() <{level = 10 : i32, message = "gqk,gkd->gqd"}> : () -> ()
    %cst_20 = arith.constant dense<0.000000e+00> : vector<16x12x8xf32>
    %58 = tpu.matmul %57, %44, %cst_20 {dimension_numbers = #tpu.dot_dimension_numbers<[2], [1], [1], [2], [0, 0, 0, 1, 1, 2], [0], [0]>} : vector<16x12x12xf32>, vector<16x12x8xf32>, vector<16x12x8xf32> -> vector<16x12x8xf32>
    "tpu.trace_stop"() : () -> ()
    %59 = vector.extract_strided_slice %7 {offsets = [0, 0, 24], sizes = [16, 12, 8], strides = [1, 1, 1]} : vector<16x12x96xf32> to vector<16x12x8xf32>
    %60 = vector.extract_strided_slice %7 {offsets = [0, 0, 56], sizes = [16, 12, 8], strides = [1, 1, 1]} : vector<16x12x96xf32> to vector<16x12x8xf32>
    %61 = vector.extract_strided_slice %7 {offsets = [0, 0, 88], sizes = [16, 12, 8], strides = [1, 1, 1]} : vector<16x12x96xf32> to vector<16x12x8xf32>
    "tpu.trace_start"() <{level = 10 : i32, message = "gqd,gkd->gqk"}> : () -> ()
    %cst_21 = arith.constant dense<0.000000e+00> : vector<16x12x12xf32>
    %62 = tpu.matmul %59, %60, %cst_21 {dimension_numbers = #tpu.dot_dimension_numbers<[2], [2], [1], [1], [0, 0, 0, 1, 1, 1], [0], [0]>} : vector<16x12x8xf32>, vector<16x12x8xf32>, vector<16x12x12xf32> -> vector<16x12x12xf32>
    "tpu.trace_stop"() : () -> ()
    %cst_22 = arith.constant 0.353553385 : f32
    %63 = vector.broadcast %cst_22 : f32 to vector<16x12x12xf32>
    %64 = arith.mulf %62, %63 : vector<16x12x12xf32>
    %cst_23 = arith.constant dense<0xFF800000> : vector<16x12xf32>
    %65 = vector.multi_reduction <maximumf>, %64, %cst_23 [2] : vector<16x12x12xf32> to vector<16x12xf32>
    %66 = vector.shape_cast %65 : vector<16x12xf32> to vector<16x12x1xf32>
    %67 = vector.broadcast %66 : vector<16x12x1xf32> to vector<16x12x12xf32>
    %68 = arith.subf %64, %67 : vector<16x12x12xf32>
    %69 = math.exp %68 : vector<16x12x12xf32>
    %cst_24 = arith.constant dense<0.000000e+00> : vector<16x12xf32>
    %70 = vector.multi_reduction <add>, %69, %cst_24 [2] : vector<16x12x12xf32> to vector<16x12xf32>
    %71 = vector.shape_cast %70 : vector<16x12xf32> to vector<16x12x1xf32>
    %72 = tpu.reciprocal %71 {approx = true} : vector<16x12x1xf32> -> vector<16x12x1xf32>
    %73 = vector.broadcast %72 : vector<16x12x1xf32> to vector<16x12x12xf32>
    %74 = arith.mulf %69, %73 : vector<16x12x12xf32>
    "tpu.trace_start"() <{level = 10 : i32, message = "gqk,gkd->gqd"}> : () -> ()
    %cst_25 = arith.constant dense<0.000000e+00> : vector<16x12x8xf32>
    %75 = tpu.matmul %74, %61, %cst_25 {dimension_numbers = #tpu.dot_dimension_numbers<[2], [1], [1], [2], [0, 0, 0, 1, 1, 2], [0], [0]>} : vector<16x12x12xf32>, vector<16x12x8xf32>, vector<16x12x8xf32> -> vector<16x12x8xf32>
    "tpu.trace_stop"() : () -> ()
    %76 = tpu.concatenate %24, %41, %58, %75 in 2 : vector<16x12x8xf32>, vector<16x12x8xf32>, vector<16x12x8xf32>, vector<16x12x8xf32> -> vector<16x12x32xf32>
    %77 = vector.shape_cast %76 : vector<16x12x32xf32> to vector<192x32xf32>
    %c0_26 = arith.constant 0 : index
    %c0_27 = arith.constant 0 : index
    %78 = vector.load %arg4[%c0_26, %c0_27] : memref<32x16xf32, #tpu.memory_space<vmem>>, vector<32x16xf32>
    %cst_28 = arith.constant dense<0.000000e+00> : vector<192x16xf32>
    %79 = tpu.matmul %77, %78, %cst_28 {dimension_numbers = #tpu.dot_dimension_numbers<[1], [0], [0], [1], [0, 0, 1, 1], [], []>} : vector<192x32xf32>, vector<32x16xf32>, vector<192x16xf32> -> vector<192x16xf32>
    %c0_29 = arith.constant 0 : index
    %c0_30 = arith.constant 0 : index
    %80 = vector.load %arg5[%c0_29, %c0_30] : memref<1x16xf32, #tpu.memory_space<vmem>>, vector<1x16xf32>
    %81 = vector.broadcast %80 : vector<1x16xf32> to vector<192x16xf32>
    %82 = arith.addf %79, %81 : vector<192x16xf32>
    %83 = math.tanh %82 : vector<192x16xf32>
    %c0_31 = arith.constant 0 : index
    %c0_32 = arith.constant 0 : index
    %84 = vector.load %arg6[%c0_31, %c0_32] : memref<16x1xf32, #tpu.memory_space<vmem>>, vector<16x1xf32>
    %cst_33 = arith.constant dense<0.000000e+00> : vector<192x1xf32>
    %85 = tpu.matmul %83, %84, %cst_33 {dimension_numbers = #tpu.dot_dimension_numbers<[1], [0], [0], [1], [0, 0, 1, 1], [], []>} : vector<192x16xf32>, vector<16x1xf32>, vector<192x1xf32> -> vector<192x1xf32>
    %86 = vector.shape_cast %85 : vector<192x1xf32> to vector<16x12x1xf32>
    %cst_34 = arith.constant dense<0xFF800000> : vector<16x1xf32>
    %87 = vector.multi_reduction <maximumf>, %86, %cst_34 [1] : vector<16x12x1xf32> to vector<16x1xf32>
    %88 = vector.shape_cast %87 : vector<16x1xf32> to vector<16x1x1xf32>
    %89 = vector.broadcast %88 : vector<16x1x1xf32> to vector<16x12x1xf32>
    %90 = arith.subf %86, %89 : vector<16x12x1xf32>
    %91 = math.exp %90 : vector<16x12x1xf32>
    %cst_35 = arith.constant dense<0.000000e+00> : vector<16x1xf32>
    %92 = vector.multi_reduction <add>, %91, %cst_35 [1] : vector<16x12x1xf32> to vector<16x1xf32>
    %93 = vector.shape_cast %92 : vector<16x1xf32> to vector<16x1x1xf32>
    %94 = tpu.reciprocal %93 {approx = true} : vector<16x1x1xf32> -> vector<16x1x1xf32>
    %95 = vector.broadcast %94 : vector<16x1x1xf32> to vector<16x12x1xf32>
    %96 = arith.mulf %91, %95 : vector<16x12x1xf32>
    %97 = vector.broadcast %96 : vector<16x12x1xf32> to vector<16x12x32xf32>
    %98 = arith.mulf %97, %76 : vector<16x12x32xf32>
    %cst_36 = arith.constant dense<0.000000e+00> : vector<16x32xf32>
    %99 = vector.multi_reduction <add>, %98, %cst_36 [1] : vector<16x12x32xf32> to vector<16x32xf32>
    %c0_37 = arith.constant 0 : index
    %c0_38 = arith.constant 0 : index
    %100 = vector.load %arg7[%c0_37, %c0_38] : memref<16x32xf32, #tpu.memory_space<vmem>>, vector<16x32xf32>
    tpu.vector_store %arg7[%c0_37, %c0_38], %99 {strides = array<i32>} : memref<16x32xf32, #tpu.memory_space<vmem>>, vector<16x32xf32>,
    return
  }
  func.func @transform_0(%arg0: i32) -> (i32, i32, i32) {
    %c0_i32 = arith.constant 0 : i32
    %c0_i32_0 = arith.constant 0 : i32
    %c0_i32_1 = arith.constant 0 : i32
    return %arg0, %c0_i32, %c0_i32_0 : i32, i32, i32
  }
  func.func @transform_1(%arg0: i32) -> (i32, i32) {
    %c0_i32 = arith.constant 0 : i32
    %c0_i32_0 = arith.constant 0 : i32
    %c0_i32_1 = arith.constant 0 : i32
    return %c0_i32, %c0_i32_0 : i32, i32
  }
  func.func @transform_2(%arg0: i32) -> (i32, i32) {
    %c0_i32 = arith.constant 0 : i32
    %c0_i32_0 = arith.constant 0 : i32
    %c0_i32_1 = arith.constant 0 : i32
    return %c0_i32, %c0_i32_0 : i32, i32
  }
  func.func @transform_3(%arg0: i32) -> (i32, i32) {
    %c0_i32 = arith.constant 0 : i32
    %c0_i32_0 = arith.constant 0 : i32
    %c0_i32_1 = arith.constant 0 : i32
    return %c0_i32, %c0_i32_0 : i32, i32
  }
  func.func @transform_4(%arg0: i32) -> (i32, i32) {
    %c0_i32 = arith.constant 0 : i32
    %c0_i32_0 = arith.constant 0 : i32
    %c0_i32_1 = arith.constant 0 : i32
    return %c0_i32, %c0_i32_0 : i32, i32
  }
  func.func @transform_5(%arg0: i32) -> (i32, i32) {
    %c0_i32 = arith.constant 0 : i32
    %c0_i32_0 = arith.constant 0 : i32
    %c0_i32_1 = arith.constant 0 : i32
    return %c0_i32, %c0_i32_0 : i32, i32
  }
  func.func @transform_6(%arg0: i32) -> (i32, i32) {
    %c0_i32 = arith.constant 0 : i32
    %c0_i32_0 = arith.constant 0 : i32
    return %arg0, %c0_i32 : i32, i32
  }
}

module attributes {stable_mosaic.version = 11 : i64} {
  func.func @_attn_pool_kernel(%arg0: i32, %arg1: memref<8x8x32xf32, #tpu.memory_space<vmem>>, %arg2: memref<32x96xf32, #tpu.memory_space<vmem>>, %arg3: memref<1x96xf32, #tpu.memory_space<vmem>>, %arg4: memref<32x16xf32, #tpu.memory_space<vmem>>, %arg5: memref<1x16xf32, #tpu.memory_space<vmem>>, %arg6: memref<16x1xf32, #tpu.memory_space<vmem>>, %arg7: memref<8x32xf32, #tpu.memory_space<vmem>>) attributes {dimension_semantics = [#tpu.dimension_semantics<parallel>], iteration_bounds = array<i64: 1>, scalar_prefetch = 0 : i64, scratch_operands = 0 : i64, tpu.core_type = #tpu.core_type<tc>, window_params = [{transform_indices = @transform_0, window_bounds = array<i64: 8, 8, 32>}, {pipeline_mode = #tpu.pipeline_mode<synchronous>, transform_indices = @transform_1, window_bounds = array<i64: 32, 96>}, {pipeline_mode = #tpu.pipeline_mode<synchronous>, transform_indices = @transform_2, window_bounds = array<i64: 1, 96>}, {pipeline_mode = #tpu.pipeline_mode<synchronous>, transform_indices = @transform_3, window_bounds = array<i64: 32, 16>}, {pipeline_mode = #tpu.pipeline_mode<synchronous>, transform_indices = @transform_4, window_bounds = array<i64: 1, 16>}, {pipeline_mode = #tpu.pipeline_mode<synchronous>, transform_indices = @transform_5, window_bounds = array<i64: 16, 1>}, {transform_indices = @transform_6, window_bounds = array<i64: 8, 32>}]} {
    %c0 = arith.constant 0 : index
    %c0_0 = arith.constant 0 : index
    %c0_1 = arith.constant 0 : index
    %0 = vector.load %arg1[%c0, %c0_0, %c0_1] : memref<8x8x32xf32, #tpu.memory_space<vmem>>, vector<8x8x32xf32>
    %1 = vector.shape_cast %0 : vector<8x8x32xf32> to vector<64x32xf32>
    %c0_2 = arith.constant 0 : index
    %c0_3 = arith.constant 0 : index
    %2 = vector.load %arg2[%c0_2, %c0_3] : memref<32x96xf32, #tpu.memory_space<vmem>>, vector<32x96xf32>
    %cst = arith.constant dense<0.000000e+00> : vector<64x96xf32>
    %3 = tpu.matmul %1, %2, %cst {dimension_numbers = #tpu.dot_dimension_numbers<[1], [0], [0], [1], [0, 0, 1, 1], [], []>} : vector<64x32xf32>, vector<32x96xf32>, vector<64x96xf32> -> vector<64x96xf32>
    %c0_4 = arith.constant 0 : index
    %c0_5 = arith.constant 0 : index
    %4 = vector.load %arg3[%c0_4, %c0_5] : memref<1x96xf32, #tpu.memory_space<vmem>>, vector<1x96xf32>
    %5 = vector.broadcast %4 : vector<1x96xf32> to vector<64x96xf32>
    %6 = arith.addf %3, %5 : vector<64x96xf32>
    %7 = vector.shape_cast %6 : vector<64x96xf32> to vector<8x8x96xf32>
    %8 = vector.extract_strided_slice %7 {offsets = [0, 0, 0], sizes = [8, 8, 8], strides = [1, 1, 1]} : vector<8x8x96xf32> to vector<8x8x8xf32>
    %9 = vector.extract_strided_slice %7 {offsets = [0, 0, 32], sizes = [8, 8, 8], strides = [1, 1, 1]} : vector<8x8x96xf32> to vector<8x8x8xf32>
    %10 = vector.extract_strided_slice %7 {offsets = [0, 0, 64], sizes = [8, 8, 8], strides = [1, 1, 1]} : vector<8x8x96xf32> to vector<8x8x8xf32>
    "tpu.trace_start"() <{level = 10 : i32, message = "gqd,gkd->gqk"}> : () -> ()
    %cst_6 = arith.constant dense<0.000000e+00> : vector<8x8x8xf32>
    %11 = tpu.matmul %8, %9, %cst_6 {dimension_numbers = #tpu.dot_dimension_numbers<[2], [2], [1], [1], [0, 0, 0, 1, 1, 1], [0], [0]>} : vector<8x8x8xf32>, vector<8x8x8xf32>, vector<8x8x8xf32> -> vector<8x8x8xf32>
    "tpu.trace_stop"() : () -> ()
    %cst_7 = arith.constant 0.353553385 : f32
    %12 = vector.broadcast %cst_7 : f32 to vector<8x8x8xf32>
    %13 = arith.mulf %11, %12 : vector<8x8x8xf32>
    %cst_8 = arith.constant dense<0xFF800000> : vector<8x8xf32>
    %14 = vector.multi_reduction <maximumf>, %13, %cst_8 [2] : vector<8x8x8xf32> to vector<8x8xf32>
    %15 = vector.shape_cast %14 : vector<8x8xf32> to vector<8x8x1xf32>
    %16 = vector.broadcast %15 : vector<8x8x1xf32> to vector<8x8x8xf32>
    %17 = arith.subf %13, %16 : vector<8x8x8xf32>
    %18 = math.exp %17 : vector<8x8x8xf32>
    %cst_9 = arith.constant dense<0.000000e+00> : vector<8x8xf32>
    %19 = vector.multi_reduction <add>, %18, %cst_9 [2] : vector<8x8x8xf32> to vector<8x8xf32>
    %20 = vector.shape_cast %19 : vector<8x8xf32> to vector<8x8x1xf32>
    %21 = tpu.reciprocal %20 {approx = true} : vector<8x8x1xf32> -> vector<8x8x1xf32>
    %22 = vector.broadcast %21 : vector<8x8x1xf32> to vector<8x8x8xf32>
    %23 = arith.mulf %18, %22 : vector<8x8x8xf32>
    "tpu.trace_start"() <{level = 10 : i32, message = "gqk,gkd->gqd"}> : () -> ()
    %cst_10 = arith.constant dense<0.000000e+00> : vector<8x8x8xf32>
    %24 = tpu.matmul %23, %10, %cst_10 {dimension_numbers = #tpu.dot_dimension_numbers<[2], [1], [1], [2], [0, 0, 0, 1, 1, 2], [0], [0]>} : vector<8x8x8xf32>, vector<8x8x8xf32>, vector<8x8x8xf32> -> vector<8x8x8xf32>
    "tpu.trace_stop"() : () -> ()
    %25 = vector.extract_strided_slice %7 {offsets = [0, 0, 8], sizes = [8, 8, 8], strides = [1, 1, 1]} : vector<8x8x96xf32> to vector<8x8x8xf32>
    %26 = vector.extract_strided_slice %7 {offsets = [0, 0, 40], sizes = [8, 8, 8], strides = [1, 1, 1]} : vector<8x8x96xf32> to vector<8x8x8xf32>
    %27 = vector.extract_strided_slice %7 {offsets = [0, 0, 72], sizes = [8, 8, 8], strides = [1, 1, 1]} : vector<8x8x96xf32> to vector<8x8x8xf32>
    "tpu.trace_start"() <{level = 10 : i32, message = "gqd,gkd->gqk"}> : () -> ()
    %cst_11 = arith.constant dense<0.000000e+00> : vector<8x8x8xf32>
    %28 = tpu.matmul %25, %26, %cst_11 {dimension_numbers = #tpu.dot_dimension_numbers<[2], [2], [1], [1], [0, 0, 0, 1, 1, 1], [0], [0]>} : vector<8x8x8xf32>, vector<8x8x8xf32>, vector<8x8x8xf32> -> vector<8x8x8xf32>
    "tpu.trace_stop"() : () -> ()
    %cst_12 = arith.constant 0.353553385 : f32
    %29 = vector.broadcast %cst_12 : f32 to vector<8x8x8xf32>
    %30 = arith.mulf %28, %29 : vector<8x8x8xf32>
    %cst_13 = arith.constant dense<0xFF800000> : vector<8x8xf32>
    %31 = vector.multi_reduction <maximumf>, %30, %cst_13 [2] : vector<8x8x8xf32> to vector<8x8xf32>
    %32 = vector.shape_cast %31 : vector<8x8xf32> to vector<8x8x1xf32>
    %33 = vector.broadcast %32 : vector<8x8x1xf32> to vector<8x8x8xf32>
    %34 = arith.subf %30, %33 : vector<8x8x8xf32>
    %35 = math.exp %34 : vector<8x8x8xf32>
    %cst_14 = arith.constant dense<0.000000e+00> : vector<8x8xf32>
    %36 = vector.multi_reduction <add>, %35, %cst_14 [2] : vector<8x8x8xf32> to vector<8x8xf32>
    %37 = vector.shape_cast %36 : vector<8x8xf32> to vector<8x8x1xf32>
    %38 = tpu.reciprocal %37 {approx = true} : vector<8x8x1xf32> -> vector<8x8x1xf32>
    %39 = vector.broadcast %38 : vector<8x8x1xf32> to vector<8x8x8xf32>
    %40 = arith.mulf %35, %39 : vector<8x8x8xf32>
    "tpu.trace_start"() <{level = 10 : i32, message = "gqk,gkd->gqd"}> : () -> ()
    %cst_15 = arith.constant dense<0.000000e+00> : vector<8x8x8xf32>
    %41 = tpu.matmul %40, %27, %cst_15 {dimension_numbers = #tpu.dot_dimension_numbers<[2], [1], [1], [2], [0, 0, 0, 1, 1, 2], [0], [0]>} : vector<8x8x8xf32>, vector<8x8x8xf32>, vector<8x8x8xf32> -> vector<8x8x8xf32>
    "tpu.trace_stop"() : () -> ()
    %42 = vector.extract_strided_slice %7 {offsets = [0, 0, 16], sizes = [8, 8, 8], strides = [1, 1, 1]} : vector<8x8x96xf32> to vector<8x8x8xf32>
    %43 = vector.extract_strided_slice %7 {offsets = [0, 0, 48], sizes = [8, 8, 8], strides = [1, 1, 1]} : vector<8x8x96xf32> to vector<8x8x8xf32>
    %44 = vector.extract_strided_slice %7 {offsets = [0, 0, 80], sizes = [8, 8, 8], strides = [1, 1, 1]} : vector<8x8x96xf32> to vector<8x8x8xf32>
    "tpu.trace_start"() <{level = 10 : i32, message = "gqd,gkd->gqk"}> : () -> ()
    %cst_16 = arith.constant dense<0.000000e+00> : vector<8x8x8xf32>
    %45 = tpu.matmul %42, %43, %cst_16 {dimension_numbers = #tpu.dot_dimension_numbers<[2], [2], [1], [1], [0, 0, 0, 1, 1, 1], [0], [0]>} : vector<8x8x8xf32>, vector<8x8x8xf32>, vector<8x8x8xf32> -> vector<8x8x8xf32>
    "tpu.trace_stop"() : () -> ()
    %cst_17 = arith.constant 0.353553385 : f32
    %46 = vector.broadcast %cst_17 : f32 to vector<8x8x8xf32>
    %47 = arith.mulf %45, %46 : vector<8x8x8xf32>
    %cst_18 = arith.constant dense<0xFF800000> : vector<8x8xf32>
    %48 = vector.multi_reduction <maximumf>, %47, %cst_18 [2] : vector<8x8x8xf32> to vector<8x8xf32>
    %49 = vector.shape_cast %48 : vector<8x8xf32> to vector<8x8x1xf32>
    %50 = vector.broadcast %49 : vector<8x8x1xf32> to vector<8x8x8xf32>
    %51 = arith.subf %47, %50 : vector<8x8x8xf32>
    %52 = math.exp %51 : vector<8x8x8xf32>
    %cst_19 = arith.constant dense<0.000000e+00> : vector<8x8xf32>
    %53 = vector.multi_reduction <add>, %52, %cst_19 [2] : vector<8x8x8xf32> to vector<8x8xf32>
    %54 = vector.shape_cast %53 : vector<8x8xf32> to vector<8x8x1xf32>
    %55 = tpu.reciprocal %54 {approx = true} : vector<8x8x1xf32> -> vector<8x8x1xf32>
    %56 = vector.broadcast %55 : vector<8x8x1xf32> to vector<8x8x8xf32>
    %57 = arith.mulf %52, %56 : vector<8x8x8xf32>
    "tpu.trace_start"() <{level = 10 : i32, message = "gqk,gkd->gqd"}> : () -> ()
    %cst_20 = arith.constant dense<0.000000e+00> : vector<8x8x8xf32>
    %58 = tpu.matmul %57, %44, %cst_20 {dimension_numbers = #tpu.dot_dimension_numbers<[2], [1], [1], [2], [0, 0, 0, 1, 1, 2], [0], [0]>} : vector<8x8x8xf32>, vector<8x8x8xf32>, vector<8x8x8xf32> -> vector<8x8x8xf32>
    "tpu.trace_stop"() : () -> ()
    %59 = vector.extract_strided_slice %7 {offsets = [0, 0, 24], sizes = [8, 8, 8], strides = [1, 1, 1]} : vector<8x8x96xf32> to vector<8x8x8xf32>
    %60 = vector.extract_strided_slice %7 {offsets = [0, 0, 56], sizes = [8, 8, 8], strides = [1, 1, 1]} : vector<8x8x96xf32> to vector<8x8x8xf32>
    %61 = vector.extract_strided_slice %7 {offsets = [0, 0, 88], sizes = [8, 8, 8], strides = [1, 1, 1]} : vector<8x8x96xf32> to vector<8x8x8xf32>
    "tpu.trace_start"() <{level = 10 : i32, message = "gqd,gkd->gqk"}> : () -> ()
    %cst_21 = arith.constant dense<0.000000e+00> : vector<8x8x8xf32>
    %62 = tpu.matmul %59, %60, %cst_21 {dimension_numbers = #tpu.dot_dimension_numbers<[2], [2], [1], [1], [0, 0, 0, 1, 1, 1], [0], [0]>} : vector<8x8x8xf32>, vector<8x8x8xf32>, vector<8x8x8xf32> -> vector<8x8x8xf32>
    "tpu.trace_stop"() : () -> ()
    %cst_22 = arith.constant 0.353553385 : f32
    %63 = vector.broadcast %cst_22 : f32 to vector<8x8x8xf32>
    %64 = arith.mulf %62, %63 : vector<8x8x8xf32>
    %cst_23 = arith.constant dense<0xFF800000> : vector<8x8xf32>
    %65 = vector.multi_reduction <maximumf>, %64, %cst_23 [2] : vector<8x8x8xf32> to vector<8x8xf32>
    %66 = vector.shape_cast %65 : vector<8x8xf32> to vector<8x8x1xf32>
    %67 = vector.broadcast %66 : vector<8x8x1xf32> to vector<8x8x8xf32>
    %68 = arith.subf %64, %67 : vector<8x8x8xf32>
    %69 = math.exp %68 : vector<8x8x8xf32>
    %cst_24 = arith.constant dense<0.000000e+00> : vector<8x8xf32>
    %70 = vector.multi_reduction <add>, %69, %cst_24 [2] : vector<8x8x8xf32> to vector<8x8xf32>
    %71 = vector.shape_cast %70 : vector<8x8xf32> to vector<8x8x1xf32>
    %72 = tpu.reciprocal %71 {approx = true} : vector<8x8x1xf32> -> vector<8x8x1xf32>
    %73 = vector.broadcast %72 : vector<8x8x1xf32> to vector<8x8x8xf32>
    %74 = arith.mulf %69, %73 : vector<8x8x8xf32>
    "tpu.trace_start"() <{level = 10 : i32, message = "gqk,gkd->gqd"}> : () -> ()
    %cst_25 = arith.constant dense<0.000000e+00> : vector<8x8x8xf32>
    %75 = tpu.matmul %74, %61, %cst_25 {dimension_numbers = #tpu.dot_dimension_numbers<[2], [1], [1], [2], [0, 0, 0, 1, 1, 2], [0], [0]>} : vector<8x8x8xf32>, vector<8x8x8xf32>, vector<8x8x8xf32> -> vector<8x8x8xf32>
    "tpu.trace_stop"() : () -> ()
    %76 = tpu.concatenate %24, %41, %58, %75 in 2 : vector<8x8x8xf32>, vector<8x8x8xf32>, vector<8x8x8xf32>, vector<8x8x8xf32> -> vector<8x8x32xf32>
    %77 = vector.shape_cast %76 : vector<8x8x32xf32> to vector<64x32xf32>
    %c0_26 = arith.constant 0 : index
    %c0_27 = arith.constant 0 : index
    %78 = vector.load %arg4[%c0_26, %c0_27] : memref<32x16xf32, #tpu.memory_space<vmem>>, vector<32x16xf32>
    %cst_28 = arith.constant dense<0.000000e+00> : vector<64x16xf32>
    %79 = tpu.matmul %77, %78, %cst_28 {dimension_numbers = #tpu.dot_dimension_numbers<[1], [0], [0], [1], [0, 0, 1, 1], [], []>} : vector<64x32xf32>, vector<32x16xf32>, vector<64x16xf32> -> vector<64x16xf32>
    %c0_29 = arith.constant 0 : index
    %c0_30 = arith.constant 0 : index
    %80 = vector.load %arg5[%c0_29, %c0_30] : memref<1x16xf32, #tpu.memory_space<vmem>>, vector<1x16xf32>
    %81 = vector.broadcast %80 : vector<1x16xf32> to vector<64x16xf32>
    %82 = arith.addf %79, %81 : vector<64x16xf32>
    %83 = math.tanh %82 : vector<64x16xf32>
    %c0_31 = arith.constant 0 : index
    %c0_32 = arith.constant 0 : index
    %84 = vector.load %arg6[%c0_31, %c0_32] : memref<16x1xf32, #tpu.memory_space<vmem>>, vector<16x1xf32>
    %cst_33 = arith.constant dense<0.000000e+00> : vector<64x1xf32>
    %85 = tpu.matmul %83, %84, %cst_33 {dimension_numbers = #tpu.dot_dimension_numbers<[1], [0], [0], [1], [0, 0, 1, 1], [], []>} : vector<64x16xf32>, vector<16x1xf32>, vector<64x1xf32> -> vector<64x1xf32>
    %86 = vector.shape_cast %85 : vector<64x1xf32> to vector<8x8x1xf32>
    %cst_34 = arith.constant dense<0xFF800000> : vector<8x1xf32>
    %87 = vector.multi_reduction <maximumf>, %86, %cst_34 [1] : vector<8x8x1xf32> to vector<8x1xf32>
    %88 = vector.shape_cast %87 : vector<8x1xf32> to vector<8x1x1xf32>
    %89 = vector.broadcast %88 : vector<8x1x1xf32> to vector<8x8x1xf32>
    %90 = arith.subf %86, %89 : vector<8x8x1xf32>
    %91 = math.exp %90 : vector<8x8x1xf32>
    %cst_35 = arith.constant dense<0.000000e+00> : vector<8x1xf32>
    %92 = vector.multi_reduction <add>, %91, %cst_35 [1] : vector<8x8x1xf32> to vector<8x1xf32>
    %93 = vector.shape_cast %92 : vector<8x1xf32> to vector<8x1x1xf32>
    %94 = tpu.reciprocal %93 {approx = true} : vector<8x1x1xf32> -> vector<8x1x1xf32>
    %95 = vector.broadcast %94 : vector<8x1x1xf32> to vector<8x8x1xf32>
    %96 = arith.mulf %91, %95 : vector<8x8x1xf32>
    %97 = vector.broadcast %96 : vector<8x8x1xf32> to vector<8x8x32xf32>
    %98 = arith.mulf %97, %76 : vector<8x8x32xf32>
    %cst_36 = arith.constant dense<0.000000e+00> : vector<8x32xf32>
    %99 = vector.multi_reduction <add>, %98, %cst_36 [1] : vector<8x8x32xf32> to vector<8x32xf32>
    %c0_37 = arith.constant 0 : index
    %c0_38 = arith.constant 0 : index
    %100 = vector.load %arg7[%c0_37, %c0_38] : memref<8x32xf32, #tpu.memory_space<vmem>>, vector<8x32xf32>
    tpu.vector_store %arg7[%c0_37, %c0_38], %99 {strides = array<i32>} : memref<8x32xf32, #tpu.memory_space<vmem>>, vector<8x32xf32>,
    return
  }
  func.func @transform_0(%arg0: i32) -> (i32, i32, i32) {
    %c0_i32 = arith.constant 0 : i32
    %c0_i32_0 = arith.constant 0 : i32
    %c0_i32_1 = arith.constant 0 : i32
    return %arg0, %c0_i32, %c0_i32_0 : i32, i32, i32
  }
  func.func @transform_1(%arg0: i32) -> (i32, i32) {
    %c0_i32 = arith.constant 0 : i32
    %c0_i32_0 = arith.constant 0 : i32
    %c0_i32_1 = arith.constant 0 : i32
    return %c0_i32, %c0_i32_0 : i32, i32
  }
  func.func @transform_2(%arg0: i32) -> (i32, i32) {
    %c0_i32 = arith.constant 0 : i32
    %c0_i32_0 = arith.constant 0 : i32
    %c0_i32_1 = arith.constant 0 : i32
    return %c0_i32, %c0_i32_0 : i32, i32
  }
  func.func @transform_3(%arg0: i32) -> (i32, i32) {
    %c0_i32 = arith.constant 0 : i32
    %c0_i32_0 = arith.constant 0 : i32
    %c0_i32_1 = arith.constant 0 : i32
    return %c0_i32, %c0_i32_0 : i32, i32
  }
  func.func @transform_4(%arg0: i32) -> (i32, i32) {
    %c0_i32 = arith.constant 0 : i32
    %c0_i32_0 = arith.constant 0 : i32
    %c0_i32_1 = arith.constant 0 : i32
    return %c0_i32, %c0_i32_0 : i32, i32
  }
  func.func @transform_5(%arg0: i32) -> (i32, i32) {
    %c0_i32 = arith.constant 0 : i32
    %c0_i32_0 = arith.constant 0 : i32
    %c0_i32_1 = arith.constant 0 : i32
    return %c0_i32, %c0_i32_0 : i32, i32
  }
  func.func @transform_6(%arg0: i32) -> (i32, i32) {
    %c0_i32 = arith.constant 0 : i32
    %c0_i32_0 = arith.constant 0 : i32
    return %arg0, %c0_i32 : i32, i32
  }
}

</mosaic_0001>

<bundles_post_ra>
// kernel: user_encoder_forward.3
= control target key start
LH: loop header
LB: loop body
LE: loop exit
PB: predicated region body
PF: predicated region fallthrough
CT: control target
= control target key end

     0   :  { %vm42_vm0 = vcmask 261120   ;;  %v7038_v14 = vmov 0.0   ;;  %vm7039_vm1 = vmmov 0   ;;  %vm175_vm2 = vcmask 64512   ;;  %s7042_s22 = smov 88   ;;  %s7043_s23 = smov 120   ;;  %s8087_s1 = inlined_call_operand.vmem [shape: f32[32,96], index: 1, kind: input, shape index: {}]   ;;  %s8088_s0 = inlined_call_operand.vmem [shape: f32[8,8,32], index: 0, kind: input, shape index: {}]   ;;  %s8089_s2 = inlined_call_operand.vmem [shape: f32[1,96], index: 2, kind: input, shape index: {}]   ;;  %s8090_s3 = inlined_call_operand.vmem [shape: f32[32,16], index: 3, kind: input, shape index: {}]   ;;  %s8091_s5 = inlined_call_operand.vmem [shape: f32[16,1], index: 5, kind: input, shape index: {}]   ;;  %s8092_s4 = inlined_call_operand.vmem [shape: f32[1,16], index: 4, kind: input, shape index: {}]   ;;  %s8093_s6 = inlined_call_operand.vmem [shape: f32[8,32], index: 6, kind: output, shape index: {}]  }
   0x1   :  { %v31_v0 = vld [vmem:[%s8087_s1] sm:$0xff]  ;;  %v32_v1 = vld [vmem:[%s8087_s1 + $0x8] sm:$0xff]  ;;  %v33_v2 = vld [vmem:[%s8087_s1 + $0x10] sm:$0xff]  ;;  %6467 = vmatprep.subr.mxu1 %v7038_v14  ;;  %6469 = vmatprep.mubr.msk.f32.mxu1 %vm7039_vm1, %v7038_v14  ;;  %s7044_s24 = smov 56   ;;  %s7045_s25 = smov 80   ;;  %vm5590_vm3 = vcmask 195584  }
   0x2   :  { %v6823_v3 = vpack.c.bf16 %v32_v1, %v31_v0  ;;  %v34_v4 = vld [vmem:[%s8087_s1 + $0x18] sm:$0xff]  ;;  %v23_v5 = vld [vmem:[%s8088_s0] sm:$0xff]  ;;  %v24_v7 = vld [vmem:[%s8088_s0 + $0x8] sm:$0xff]  ;;  %s7046_s26 = smov 112   ;;  %s7047_s27 = smov 48   ;;  %vm5581_vm4 = vcmask 130048  }
   0x3   :  { %v6827_v6 = vpack.c.bf16 %v34_v4, %v33_v2  ;;  %6455 = vmatprep.mubr.msk.f32.mxu0 %vm42_vm0, %v23_v5  ;;  %v25_v8 = vld [vmem:[%s8088_s0 + $0x10] sm:$0xff]  ;;  %v26_v9 = vld [vmem:[%s8088_s0 + $0x18] sm:$0xff]  ;;  %v27_v10 = vld [vmem:[%s8088_s0 + $0x20] sm:$0xff]  ;;  %s7048_s28 = smov 72   ;;  %s7049_s29 = smov 104   ;;  %vm5878_vm5 = vcmask 7168  }
   0x4   :  { %6824 = vmatprep.subr.bf16.mxu0 %v6823_v3  ;;  %v28_v11 = vld [vmem:[%s8088_s0 + $0x28] sm:$0xff]  ;;  %v29_v12 = vld [vmem:[%s8088_s0 + $0x30] sm:$0xff]  ;;  %v30_v13 = vld [vmem:[%s8088_s0 + $0x38] sm:$0xff]  ;;  %s7040_s0 = smov 96   ;;  %s7050_s30 = smov 40   ;;  %vm6143_vm6 = vcmask 1041409  }
   0x5   :  { %6826 = vmatpush3.bf16.msra.mxu0 %v6823_v3  ;;  %v6163_v15 = vld [vmem:[%s8089_s2] ss:$0 sm:$0xff]  ;;  %s7041_s2 = smov 64   ;;  %s7051_s7 = smov 8   ;;  %vm6145_vm7 = vcmask 1042434   ;;  %vm6147_vm8 = vcmask 1043459  }
   0x6   :  { %6828 = vmatprep.subr.bf16.mxu0 %v6827_v6  ;;  %s7052_s8 = smov 16   ;;  %s7053_s16 = smov 24   ;;  %vm6149_vm9 = vcmask 1044484   ;;  %vm6151_vm10 = vcmask 1045509   ;;  %vm6153_vm11 = vcmask 1046534   ;;  %vm6155_vm12 = vcmask 1047559  }
   0x9   :  { %6830 = vmatpush3.bf16.msra.mxu0 %v6827_v6 }
   0xa   :  { %6492 = vmatprep.subr.mxu0 %v7038_v14 }
   0xc   :  { %6456 = vmatmul.mubr.msk.f32.vlgmr.msra.gmra.mrb[0].mxu0 %vm42_vm0, %v24_v7 }
   0xd   :  { %6458 = vmatprep.mubr.msk.f32.mxu0 %vm42_vm0, %v25_v8 }
  0x10   :  { %6459 = vmatmul.mubr.msk.f32.gmra.mrb[2].mxu0 %vm42_vm0, %v26_v9 }
  0x11   :  { %6461 = vmatprep.mubr.msk.f32.mxu0 %vm42_vm0, %v27_v10 }
  0x14   :  { %6462 = vmatmul.mubr.msk.f32.gmra.mrb[4].mxu0 %vm42_vm0, %v28_v11 }
  0x15   :  { %6464 = vmatprep.mubr.msk.f32.mxu0 %vm42_vm0, %v29_v12 }
  0x18   :  { %6465 = vmatmul.mubr.msk.f32.gmra.mrb[6].mxu0 %vm42_vm0, %v30_v13 }
  0x19   :  { %6494 = vmatprep.mubr.msk.f32.mxu0 %vm7039_vm1, %v7038_v14 }
  0xdf   :  { %v6457_v16 = vpop.f32.mrb[0].mxu0 }
  0xe0   :  { %v133_v17 = vpop.f32.mrb[1].mxu0  ;;  %v7146_v21 = vadd.f32 %v6457_v16, %v6163_v15 }
  0xe1   :  { %v7143_v18 = vadd.f32 %v6163_v15, %v133_v17 }
  0xe3   :  { %v6460_v19 = vpop.f32.mrb[2].mxu0  ;;  %173 = vrot.lane.b32.xlu0 %v7143_v18, %s7040_s0 }
  0xe4   :  { %v143_v20 = vpop.f32.mrb[3].mxu0  ;;  %v7150_v23 = vadd.f32 %v6460_v19, %v6163_v15 }
  0xe5   :  { %v7148_v22 = vadd.f32 %v6163_v15, %v143_v20 }
  0xe7   :  { %328 = vrot.lane.b32.xlu1 %v7148_v22, %s7040_s0  ;;  %251 = vrot.lane.b32.xlu0 %v7146_v21, %s7040_s0  ;;  %v6463_v24 = vpop.f32.mrb[4].mxu0 }
  0xe8   :  { %v153_v25 = vpop.f32.mrb[5].mxu0  ;;  %v7157_v27 = vadd.f32 %v6463_v24, %v6163_v15 }
  0xe9   :  { %v7154_v26 = vadd.f32 %v6163_v15, %v153_v25 }
  0xeb   :  { %405 = vrot.lane.b32.xlu1 %v7150_v23, %s7040_s0  ;;  %v6466_v28 = vpop.f32.mrb[6].mxu0  ;;  %482 = vrot.lane.b32.xlu0 %v7154_v26, %s7040_s0 }
  0xec   :  { %v163_v29 = vpop.f32.mrb[7].mxu0  ;;  %v7163_v31 = vadd.f32 %v6466_v28, %v6163_v15 }
  0xed   :  { %v7160_v30 = vadd.f32 %v6163_v15, %v163_v29 }
  0xef   :  { %559 = vrot.lane.b32.xlu1 %v7157_v27, %s7040_s0  ;;  %636 = vrot.lane.b32.xlu0 %v7160_v30, %s7040_s0 }
  0xf3   :  { %713 = vrot.lane.b32.xlu1 %v7163_v31, %s7040_s0 }
 0x155   :  { %v174_v32 = vpop.permute.xlu0 %173 }
 0x156   :  { %6468 = vmatpush3.xpose.msk.msra.mxu1 %vm175_vm2, %v174_v32 }
 0x157   :  { %6472 = vmatprep.subr.mxu1 %v7038_v14 }
 0x159   :  { %v329_v33 = vpop.permute.xlu1 %328  ;;  %6470 = vmatmul.mubr.msk.f32.vlgmr.msra.gmra.mrb[0].mxu1 %vm175_vm2, %v7143_v18  ;;  %v252_v34 = vpop.permute.xlu0 %251 }
 0x15a   :  { %6473 = vmatpush3.xpose.msk.msra.mxu1 %vm175_vm2, %v252_v34  ;;  %6474 = vmatprep.mubr.msk.f32.mxu1 %vm7039_vm1, %v7038_v14 }
 0x15b   :  { %6477 = vmatprep.subr.mxu1 %v7038_v14 }
 0x15d   :  { %v406_v35 = vpop.permute.xlu1 %405  ;;  %6475 = vmatmul.mubr.msk.f32.vlgmr.msra.gmra.mrb[2].mxu1 %vm175_vm2, %v7146_v21  ;;  %v483_v37 = vpop.permute.xlu0 %482 }
 0x15e   :  { %6478 = vmatpush3.xpose.msk.msra.mxu1 %vm175_vm2, %v329_v33  ;;  %6479 = vmatprep.mubr.msk.f32.mxu1 %vm7039_vm1, %v7038_v14 }
 0x15f   :  { %6482 = vmatprep.subr.mxu1 %v7038_v14 }
 0x161   :  { %v560_v36 = vpop.permute.xlu1 %559  ;;  %6480 = vmatmul.mubr.msk.f32.vlgmr.msra.gmra.mrb[4].mxu1 %vm175_vm2, %v7148_v22  ;;  %v637_v39 = vpop.permute.xlu0 %636 }
 0x162   :  { %6483 = vmatpush3.xpose.msk.msra.mxu1 %vm175_vm2, %v406_v35  ;;  %6493 = vmatpush3.xpose.msk.msra.mxu0 %vm175_vm2, %v560_v36 }
 0x163   :  { %6484 = vmatprep.mubr.msk.f32.mxu1 %vm7039_vm1, %v7038_v14  ;;  %6502 = vmatprep.subr.mxu0 %v7038_v14 }
 0x164   :  { %6487 = vmatprep.subr.mxu1 %v7038_v14 }
 0x165   :  { %6495 = vmatmul.mubr.msk.f32.vlgmr.msra.gmra.mrb[8].mxu0 %vm175_vm2, %v7157_v27  ;;  %v714_v38 = vpop.permute.xlu1 %713  ;;  %6485 = vmatmul.mubr.msk.f32.vlgmr.msra.gmra.mrb[6].mxu1 %vm175_vm2, %v7150_v23 }
 0x166   :  { %6488 = vmatpush3.xpose.msk.msra.mxu1 %vm175_vm2, %v483_v37  ;;  %6503 = vmatpush3.xpose.msk.msra.mxu0 %vm175_vm2, %v714_v38 }
 0x167   :  { %6489 = vmatprep.mubr.msk.f32.mxu1 %vm7039_vm1, %v7038_v14  ;;  %6504 = vmatprep.mubr.msk.f32.mxu0 %vm7039_vm1, %v7038_v14 }
 0x168   :  { %6497 = vmatprep.subr.mxu1 %v7038_v14  ;;  %6512 = vmatprep.subr.mxu0 %v7038_v14 }
 0x169   :  { %6490 = vmatmul.mubr.msk.f32.vlgmr.msra.gmra.mrb[8].mxu1 %vm175_vm2, %v7154_v26  ;;  %6505 = vmatmul.mubr.msk.f32.vlgmr.msra.gmra.mrb[10].mxu0 %vm175_vm2, %v7163_v31 }
 0x16a   :  { %6498 = vmatpush3.xpose.msk.msra.mxu1 %vm175_vm2, %v637_v39  ;;  %6499 = vmatprep.mubr.msk.f32.mxu1 %vm7039_vm1, %v7038_v14 }
 0x16b   :  { %6507 = vmatprep.subr.mxu1 %v7038_v14  ;;  %6514 = vmatprep.mubr.msk.f32.mxu0 %vm7039_vm1, %v7038_v14 }
 0x16d   :  { %6500 = vmatmul.mubr.msk.f32.vlgmr.msra.gmra.mrb[10].mxu1 %vm175_vm2, %v7160_v30 }
 0x16e   :  { %6509 = vmatprep.mubr.msk.f32.mxu1 %vm7039_vm1, %v7038_v14 }
 0x22c   :  { %v246_v40 = vpop.f32.mrb[0].mxu1 }
 0x22d   :  { %v789_v41 = vmul.f32 0.35355338, %v246_v40  ;;  %v6471_v42 = vpop.f32.mrb[1].mxu1 }
 0x22f   :  { %v797_v43 = vsel %vm175_vm2, %v789_v41, -inf }
 0x230   :  { %798 = vmax.xlane.f32.xlu0 %v797_v43  ;;  %v323_v44 = vpop.f32.mrb[2].mxu1 }
 0x231   :  { %v790_v45 = vmul.f32 0.35355338, %v323_v44  ;;  %v6476_v46 = vpop.f32.mrb[3].mxu1 }
 0x233   :  { %v800_v47 = vsel %vm175_vm2, %v790_v45, -inf }
 0x234   :  { %801 = vmax.xlane.f32.xlu1 %v800_v47  ;;  %v400_v48 = vpop.f32.mrb[4].mxu1 }
 0x235   :  { %v791_v49 = vmul.f32 0.35355338, %v400_v48  ;;  %v6481_v50 = vpop.f32.mrb[5].mxu1 }
 0x237   :  { %v803_v51 = vsel %vm175_vm2, %v791_v49, -inf }
 0x238   :  { %v631_v52 = vpop.f32.mrb[8].mxu0  ;;  %804 = vmax.xlane.f32.xlu0 %v803_v51  ;;  %v477_v53 = vpop.f32.mrb[6].mxu1 }
 0x239   :  { %v7218_v54 = vmul.f32 0.35355338, %v477_v53  ;;  %v6486_v55 = vpop.f32.mrb[7].mxu1  ;;  %v6496_v56 = vpop.f32.mrb[9].mxu0  ;;  %v794_v57 = vmul.f32 0.35355338, %v631_v52 }
 0x23b   :  { %v806_v58 = vsel %vm175_vm2, %v7218_v54, -inf  ;;  %v812_v0 = vsel %vm175_vm2, %v794_v57, -inf }
 0x23c   :  { %v785_v59 = vpop.f32.mrb[10].mxu0  ;;  %807 = vmax.xlane.f32.xlu0 %v806_v58  ;;  %v554_v60 = vpop.f32.mrb[8].mxu1 }
 0x23d   :  { %v6491_v61 = vpop.f32.mrb[9].mxu1  ;;  %v6506_v62 = vpop.f32.mrb[11].mxu0  ;;  %v796_v63 = vmul.f32 0.35355338, %v785_v59  ;;  %v7234_v4 = vmul.f32 0.35355338, %v554_v60 }
 0x23f   :  { %v818_v3 = vsel %vm175_vm2, %v796_v63, -inf  ;;  %v809_v6 = vsel %vm175_vm2, %v7234_v4, -inf }
 0x240   :  { %813 = vmax.xlane.f32.xlu0 %v812_v0  ;;  %v708_v1 = vpop.f32.mrb[10].mxu1 }
 0x241   :  { %v6501_v2 = vpop.f32.mrb[11].mxu1  ;;  %v7236_v5 = vmul.f32 0.35355338, %v708_v1 }
 0x243   :  { %v815_v7 = vsel %vm175_vm2, %v7236_v5, -inf }
 0x244   :  { %819 = vmax.xlane.f32.xlu0 %v818_v3 }
 0x245   :  { %885 = vrot.lane.b32.xlu1 %v7143_v18, %s7041_s2 }
 0x249   :  { %1037 = vrot.lane.b32.xlu1 %v7148_v22, %s7041_s2 }
 0x24d   :  { %1113 = vrot.lane.b32.xlu1 %v7150_v23, %s7041_s2 }
 0x251   :  { %1265 = vrot.lane.b32.xlu1 %v7157_v27, %s7041_s2 }
 0x255   :  { %1417 = vrot.lane.b32.xlu1 %v7163_v31, %s7041_s2 }
 0x25a   :  { %961 = vrot.lane.b32.xlu0 %v7146_v21, %s7041_s2 }
 0x25e   :  { %1189 = vrot.lane.b32.xlu0 %v7154_v26, %s7041_s2 }
 0x262   :  { %1341 = vrot.lane.b32.xlu0 %v7160_v30, %s7041_s2 }
 0x266   :  { %1495 = vrot.lane.b32.xlu0 %v7143_v18, %s7042_s22 }
 0x279   :  { %810 = vmax.xlane.f32.xlu1 %v809_v6 }
 0x27d   :  { %816 = vmax.xlane.f32.xlu1 %v815_v7 }
 0x28e   :  { %1573 = vrot.lane.b32.xlu1 %v7146_v21, %s7042_s22 }
 0x2bd   :  { %v799_v8 = vpop.xlane.xlu0 %798 }
 0x2be   :  { %v821_v9 = vsub.f32 %v789_v41, %v799_v8 }
 0x2c0   :  { %v829_v10 = vmul.f32 1.442695, %v821_v9 }
 0x2c1   :  { %v802_v11 = vpop.xlane.xlu1 %801 }
 0x2c2   :  { %6862 = vpow2.f32 %v829_v10  ;;  %v822_v12 = vsub.f32 %v790_v45, %v802_v11 }
 0x2c4   :  { %v831_v13 = vmul.f32 1.442695, %v822_v12 }
 0x2c5   :  { %v886_v15 = vpop.permute.xlu1 %885  ;;  %v805_v16 = vpop.xlane.xlu0 %804 }
 0x2c6   :  { %6864 = vpow2.f32 %v831_v13  ;;  %v823_v17 = vsub.f32 %v791_v49, %v805_v16  ;;  %6508 = vmatpush3.msra.mxu1 %v886_v15 }
 0x2c7   :  { %6517 = vmatprep.subr.mxu1 %v7038_v14 }
 0x2c8   :  { %v833_v19 = vmul.f32 1.442695, %v823_v17 }
 0x2c9   :  { %v808_v20 = vpop.xlane.xlu0 %807  ;;  %v1038_v49 = vpop.permute.xlu1 %1037 }
 0x2ca   :  { %6866 = vpow2.f32 %v833_v19  ;;  %v824_v33 = vsub.f32 %v7218_v54, %v808_v20 }
 0x2cc   :  { %v7245_v24 = vpop.eup %6862  ;;  %v835_v39 = vmul.f32 1.442695, %v824_v33 }
 0x2cd   :  { %v814_v25 = vpop.xlane.xlu0 %813  ;;  %v845_v28 = vsel %vm175_vm2, %v7245_v24, 0.0  ;;  %v1114_v50 = vpop.permute.xlu1 %1113 }
 0x2ce   :  { %v826_v29 = vsub.f32 %v794_v57, %v814_v25  ;;  %846 = vadd.xlane.f32.xlu1 %v845_v28 }
 0x2d0   :  { %v7249_v32 = vpop.eup %6864  ;;  %v839_v34 = vmul.f32 1.442695, %v826_v29 }
 0x2d1   :  { %v820_v35 = vpop.xlane.xlu0 %819  ;;  %v848_v36 = vsel %vm175_vm2, %v7249_v32, 0.0  ;;  %v7277_v51 = vpop.permute.xlu1 %1265 }
 0x2d2   :  { %6868 = vpow2.f32 %v839_v34  ;;  %v828_v37 = vsub.f32 %v796_v63, %v820_v35  ;;  %849 = vadd.xlane.f32.xlu0 %v848_v36 }
 0x2d4   :  { %v7254_v38 = vpop.eup %6866  ;;  %v843_v40 = vmul.f32 1.442695, %v828_v37 }
 0x2d5   :  { %v962_v41 = vpop.permute.xlu0 %961  ;;  %v851_v42 = vsel %vm175_vm2, %v7254_v38, 0.0  ;;  %v7283_v52 = vpop.permute.xlu1 %1417 }
 0x2d6   :  { %6870 = vpow2.f32 %v843_v40  ;;  %852 = vadd.xlane.f32.xlu1 %v851_v42  ;;  %6513 = vmatpush3.msra.mxu0 %v962_v41 }
 0x2d7   :  { %6522 = vmatprep.subr.mxu0 %v7038_v14  ;;  %6872 = vpow2.f32 %v835_v39 }
 0x2d9   :  { %v1190_v63 = vpop.permute.xlu0 %1189 }
 0x2dc   :  { %v7259_v43 = vpop.eup %6868 }
 0x2dd   :  { %v860_v44 = vsel %vm175_vm2, %v7259_v43, 0.0  ;;  %v7313_v0 = vpop.permute.xlu0 %1341 }
 0x2de   :  { %861 = vadd.xlane.f32.xlu0 %v860_v44 }
 0x2e0   :  { %v7263_v45 = vpop.eup %6870 }
 0x2e1   :  { %v866_v46 = vsel %vm175_vm2, %v7263_v45, 0.0  ;;  %v7267_v47 = vpop.eup %6872  ;;  %v7315_v2 = vpop.permute.xlu0 %1495 }
 0x2e2   :  { %867 = vadd.xlane.f32.xlu0 %v866_v46  ;;  %v854_v48 = vsel %vm175_vm2, %v7267_v47, 0.0 }
 0x2e6   :  { %855 = vadd.xlane.f32.xlu0 %v854_v48 }
 0x2e7   :  { %1571 = vrot.lane.b32.xlu1 %v7146_v21, %s7043_s23 }
 0x2eb   :  { %1729 = vrot.lane.b32.xlu1 %v7150_v23, %s7042_s22 }
 0x2ef   :  { %1727 = vrot.lane.b32.xlu1 %v7150_v23, %s7043_s23 }
 0x2fc   :  { %1493 = vrot.lane.b32.xlu0 %v7143_v18, %s7043_s23 }
 0x300   :  { %1651 = vrot.lane.b32.xlu0 %v7148_v22, %s7042_s22 }
 0x304   :  { %1649 = vrot.lane.b32.xlu0 %v7148_v22, %s7043_s23 }
 0x306   :  { %v811_v53 = vpop.xlane.xlu1 %810 }
 0x307   :  { %v825_v54 = vsub.f32 %v7234_v4, %v811_v53 }
 0x308   :  { %1807 = vrot.lane.b32.xlu0 %v7154_v26, %s7042_s22 }
 0x309   :  { %v837_v55 = vmul.f32 1.442695, %v825_v54 }
 0x30a   :  { %v817_v56 = vpop.xlane.xlu1 %816 }
 0x30b   :  { %6874 = vpow2.f32 %v837_v55  ;;  %v827_v57 = vsub.f32 %v7236_v5, %v817_v56 }
 0x30c   :  { %1805 = vrot.lane.b32.xlu0 %v7154_v26, %s7043_s23 }
 0x30d   :  { %v841_v58 = vmul.f32 1.442695, %v827_v57 }
 0x30e   :  { %v1574_v1 = vpop.permute.xlu1 %1573 }
 0x30f   :  { %6876 = vpow2.f32 %v841_v58 }
 0x310   :  { %1963 = vrot.lane.b32.xlu0 %v7160_v30, %s7042_s22 }
 0x314   :  { %1961 = vrot.lane.b32.xlu0 %v7160_v30, %s7043_s23 }
 0x315   :  { %v7297_v59 = vpop.eup %6874 }
 0x316   :  { %v857_v60 = vsel %vm175_vm2, %v7297_v59, 0.0 }
 0x317   :  { %858 = vadd.xlane.f32.xlu1 %v857_v60 }
 0x319   :  { %v7301_v61 = vpop.eup %6876 }
 0x31a   :  { %v863_v62 = vsel %vm175_vm2, %v7301_v61, 0.0 }
 0x31b   :  { %864 = vadd.xlane.f32.xlu1 %v863_v62 }
 0x32c   :  { %1885 = vrot.lane.b32.xlu1 %v7157_v27, %s7042_s22 }
 0x330   :  { %1883 = vrot.lane.b32.xlu1 %v7157_v27, %s7043_s23 }
 0x334   :  { %2041 = vrot.lane.b32.xlu1 %v7163_v31, %s7042_s22 }
 0x338   :  { %2039 = vrot.lane.b32.xlu1 %v7163_v31, %s7043_s23 }
 0x35b   :  { %v847_v3 = vpop.xlane.xlu1 %846 }
 0x35c   :  { %6878 = vrcp.f32 %v847_v3 }
 0x35f   :  { %v850_v4 = vpop.xlane.xlu0 %849 }
 0x360   :  { %6880 = vrcp.f32 %v850_v4 }
 0x363   :  { %v853_v5 = vpop.xlane.xlu1 %852 }
 0x364   :  { %6882 = vrcp.f32 %v853_v5 }
 0x366   :  { %v6879_v6 = vpop.eup %6878 }
 0x367   :  { %v877_v7 = vmul.f32 %v6879_v6, %v7245_v24  ;;  %v1572_v25 = vpop.permute.xlu1 %1571 }
 0x369   :  { %6510 = vmatmul.mubr.msk.f32.vlgmr.msra.gmra.mrb[12].mxu1 %vm175_vm2, %v877_v7 }
 0x36a   :  { %v6881_v8 = vpop.eup %6880  ;;  %6518 = vmatpush3.msra.mxu1 %v1038_v49  ;;  %6519 = vmatprep.mubr.msk.f32.mxu1 %vm7039_vm1, %v7038_v14 }
 0x36b   :  { %v862_v9 = vpop.xlane.xlu0 %861  ;;  %v878_v10 = vmul.f32 %v6881_v8, %v7249_v32  ;;  %6527 = vmatprep.subr.mxu1 %v7038_v14  ;;  %v1730_v29 = vpop.permute.xlu1 %1729 }
 0x36d   :  { %6515 = vmatmul.mubr.msk.f32.vlgmr.msra.gmra.mrb[12].mxu0 %vm175_vm2, %v878_v10 }
 0x36e   :  { %v6883_v11 = vpop.eup %6882  ;;  %6523 = vmatpush3.msra.mxu0 %v1114_v50  ;;  %6524 = vmatprep.mubr.msk.f32.mxu0 %vm7039_vm1, %v7038_v14 }
 0x36f   :  { %v868_v12 = vpop.xlane.xlu0 %867  ;;  %v879_v13 = vmul.f32 %v6883_v11, %v7254_v38  ;;  %6532 = vmatprep.subr.mxu0 %v7038_v14  ;;  %v1728_v32 = vpop.permute.xlu1 %1727 }
 0x371   :  { %6520 = vmatmul.mubr.msk.f32.vlgmr.msra.gmra.mrb[14].mxu1 %vm175_vm2, %v879_v13 }
 0x372   :  { %6528 = vmatpush3.msra.mxu1 %v1190_v63  ;;  %6529 = vmatprep.mubr.msk.f32.mxu1 %vm7039_vm1, %v7038_v14 }
 0x373   :  { %v856_v15 = vpop.xlane.xlu0 %855  ;;  %6537 = vmatprep.subr.mxu1 %v7038_v14 }
 0x374   :  { %6884 = vrcp.f32 %v856_v15 }
 0x375   :  { %6886 = vrcp.f32 %v862_v9 }
 0x376   :  { %6888 = vrcp.f32 %v868_v12 }
 0x377   :  { %v1494_v33 = vpop.permute.xlu0 %1493 }
 0x37b   :  { %v1652_v36 = vpop.permute.xlu0 %1651 }
 0x37e   :  { %v6885_v16 = vpop.eup %6884 }
 0x37f   :  { %v880_v17 = vmul.f32 %v6885_v16, %v7267_v47  ;;  %v6887_v19 = vpop.eup %6886  ;;  %v1650_v39 = vpop.permute.xlu0 %1649 }
 0x380   :  { %v882_v20 = vmul.f32 %v6887_v19, %v7259_v43  ;;  %v6889_v24 = vpop.eup %6888 }
 0x381   :  { %6525 = vmatmul.mubr.msk.f32.vlgmr.msra.gmra.mrb[14].mxu0 %vm175_vm2, %v880_v17  ;;  %v884_v28 = vmul.f32 %v6889_v24, %v7263_v45 }
 0x382   :  { %6533 = vmatpush3.msra.mxu0 %v7277_v51  ;;  %6534 = vmatprep.mubr.msk.f32.mxu0 %vm7039_vm1, %v7038_v14 }
 0x383   :  { %6542 = vmatprep.subr.mxu0 %v7038_v14  ;;  %v1808_v45 = vpop.permute.xlu0 %1807 }
 0x385   :  { %6535 = vmatmul.mubr.msk.f32.vlgmr.msra.gmra.mrb[16].mxu0 %vm175_vm2, %v882_v20 }
 0x386   :  { %6543 = vmatpush3.msra.mxu0 %v7283_v52  ;;  %6544 = vmatprep.mubr.msk.f32.mxu0 %vm7039_vm1, %v7038_v14 }
 0x387   :  { %6552 = vmatprep.subr.mxu0 %v7038_v14  ;;  %v1806_v47 = vpop.permute.xlu0 %1805 }
 0x389   :  { %6545 = vmatmul.mubr.msk.f32.vlgmr.msra.gmra.mrb[18].mxu0 %vm175_vm2, %v884_v28 }
 0x38a   :  { %6554 = vmatprep.mubr.msk.f32.mxu0 %vm7039_vm1, %v7038_v14 }
 0x38b   :  { %v1964_v48 = vpop.permute.xlu0 %1963 }
 0x38d   :  { %6553 = vmatpush3.xpose.msk.msra.mxu0 %vm175_vm2, %v1574_v1 }
 0x38e   :  { %6562 = vmatprep.subr.mxu0 %v7038_v14 }
 0x38f   :  { %v1962_v49 = vpop.permute.xlu0 %1961 }
 0x390   :  { %6555 = vmatmul.mubr.msk.f32.vlgmr.msra.gmra.mrb[20].mxu0 %vm175_vm2, %v1572_v25 }
 0x391   :  { %6563 = vmatpush3.xpose.msk.msra.mxu0 %vm175_vm2, %v1730_v29  ;;  %6564 = vmatprep.mubr.msk.f32.mxu0 %vm7039_vm1, %v7038_v14 }
 0x392   :  { %6572 = vmatprep.subr.mxu0 %v7038_v14 }
 0x394   :  { %6565 = vmatmul.mubr.msk.f32.vlgmr.msra.gmra.mrb[22].mxu0 %vm175_vm2, %v1728_v32 }
 0x395   :  { %6574 = vmatprep.mubr.msk.f32.mxu0 %vm7039_vm1, %v7038_v14 }
 0x3a4   :  { %v859_v34 = vpop.xlane.xlu1 %858 }
 0x3a5   :  { %6890 = vrcp.f32 %v859_v34 }
 0x3a8   :  { %v865_v35 = vpop.xlane.xlu1 %864 }
 0x3a9   :  { %6892 = vrcp.f32 %v865_v35 }
 0x3ac   :  { %v1886_v37 = vpop.permute.xlu1 %1885 }
 0x3ad   :  { %6573 = vmatpush3.xpose.msk.msra.mxu0 %vm175_vm2, %v1886_v37 }
 0x3ae   :  { %6582 = vmatprep.subr.mxu0 %v7038_v14 }
 0x3af   :  { %v6891_v38 = vpop.eup %6890 }
 0x3b0   :  { %v1884_v40 = vpop.permute.xlu1 %1883  ;;  %v881_v41 = vmul.f32 %v6891_v38, %v7297_v59 }
 0x3b1   :  { %6575 = vmatmul.mubr.msk.f32.vlgmr.msra.gmra.mrb[24].mxu0 %vm175_vm2, %v1884_v40 }
 0x3b2   :  { %6530 = vmatmul.mubr.msk.f32.vlgmr.msra.gmra.mrb[16].mxu1 %vm175_vm2, %v881_v41  ;;  %6584 = vmatprep.mubr.msk.f32.mxu0 %vm7039_vm1, %v7038_v14 }
 0x3b3   :  { %v6893_v42 = vpop.eup %6892  ;;  %6538 = vmatpush3.msra.mxu1 %v7313_v0  ;;  %6539 = vmatprep.mubr.msk.f32.mxu1 %vm7039_vm1, %v7038_v14 }
 0x3b4   :  { %v2042_v43 = vpop.permute.xlu1 %2041  ;;  %v883_v44 = vmul.f32 %v6893_v42, %v7301_v61  ;;  %6547 = vmatprep.subr.mxu1 %v7038_v14 }
 0x3b5   :  { %6583 = vmatpush3.xpose.msk.msra.mxu0 %vm175_vm2, %v2042_v43 }
 0x3b6   :  { %6540 = vmatmul.mubr.msk.f32.vlgmr.msra.gmra.mrb[18].mxu1 %vm175_vm2, %v883_v44  ;;  %6592 = vmatprep.subr.mxu0 %v7038_v14 }
 0x3b7   :  { %6549 = vmatprep.mubr.msk.f32.mxu1 %vm7039_vm1, %v7038_v14 }
 0x3b8   :  { %v2040_v46 = vpop.permute.xlu1 %2039 }
 0x3b9   :  { %6585 = vmatmul.mubr.msk.f32.vlgmr.msra.gmra.mrb[26].mxu0 %vm175_vm2, %v2040_v46 }
 0x3ba   :  { %6548 = vmatpush3.xpose.msk.msra.mxu1 %vm175_vm2, %v7315_v2  ;;  %6594 = vmatprep.mubr.msk.f32.mxu0 %vm7039_vm1, %v7038_v14 }
 0x3bb   :  { %6557 = vmatprep.subr.mxu1 %v7038_v14 }
 0x3bd   :  { %6550 = vmatmul.mubr.msk.f32.vlgmr.msra.gmra.mrb[20].mxu1 %vm175_vm2, %v1494_v33 }
 0x3be   :  { %6558 = vmatpush3.xpose.msk.msra.mxu1 %vm175_vm2, %v1652_v36  ;;  %6559 = vmatprep.mubr.msk.f32.mxu1 %vm7039_vm1, %v7038_v14 }
 0x3bf   :  { %6567 = vmatprep.subr.mxu1 %v7038_v14 }
 0x3c1   :  { %6560 = vmatmul.mubr.msk.f32.vlgmr.msra.gmra.mrb[22].mxu1 %vm175_vm2, %v1650_v39 }
 0x3c2   :  { %6568 = vmatpush3.xpose.msk.msra.mxu1 %vm175_vm2, %v1808_v45  ;;  %6569 = vmatprep.mubr.msk.f32.mxu1 %vm7039_vm1, %v7038_v14 }
 0x3c3   :  { %6577 = vmatprep.subr.mxu1 %v7038_v14 }
 0x3c5   :  { %6570 = vmatmul.mubr.msk.f32.vlgmr.msra.gmra.mrb[24].mxu1 %vm175_vm2, %v1806_v47 }
 0x3c6   :  { %6578 = vmatpush3.xpose.msk.msra.mxu1 %vm175_vm2, %v1964_v48  ;;  %6579 = vmatprep.mubr.msk.f32.mxu1 %vm7039_vm1, %v7038_v14 }
 0x3c7   :  { %6587 = vmatprep.subr.mxu1 %v7038_v14 }
 0x3c9   :  { %6580 = vmatmul.mubr.msk.f32.vlgmr.msra.gmra.mrb[26].mxu1 %vm175_vm2, %v1962_v49 }
 0x3ca   :  { %6589 = vmatprep.mubr.msk.f32.mxu1 %vm7039_vm1, %v7038_v14 }
 0x43c   :  { %v7399_v50 = vpop.f32.mrb[12].mxu1 }
 0x43d   :  { %v6511_v51 = vpop.f32.mrb[13].mxu1 }
 0x440   :  { %v7401_v52 = vpop.f32.mrb[12].mxu0 }
 0x441   :  { %v6516_v53 = vpop.f32.mrb[13].mxu0 }
 0x444   :  { %v7403_v54 = vpop.f32.mrb[14].mxu1 }
 0x445   :  { %v6521_v55 = vpop.f32.mrb[15].mxu1 }
 0x454   :  { %v7405_v56 = vpop.f32.mrb[14].mxu0 }
 0x455   :  { %v6526_v57 = vpop.f32.mrb[15].mxu0 }
 0x458   :  { %v7407_v58 = vpop.f32.mrb[16].mxu0 }
 0x459   :  { %v6536_v59 = vpop.f32.mrb[17].mxu0 }
 0x45c   :  { %v7409_v60 = vpop.f32.mrb[18].mxu0 }
 0x45d   :  { %v6546_v61 = vpop.f32.mrb[19].mxu0 }
 0x463   :  { %v1645_v62 = vpop.f32.mrb[20].mxu0 }
 0x464   :  { %v2118_v63 = vmul.f32 0.35355338, %v1645_v62  ;;  %v6556_v0 = vpop.f32.mrb[21].mxu0 }
 0x466   :  { %v2128_v1 = vsel %vm175_vm2, %v2118_v63, -inf }
 0x467   :  { %2129 = vmax.xlane.f32.xlu1 %v2128_v1  ;;  %v1801_v2 = vpop.f32.mrb[22].mxu0 }
 0x468   :  { %v6566_v3 = vpop.f32.mrb[23].mxu0  ;;  %v2120_v24 = vmul.f32 0.35355338, %v1801_v2 }
 0x46a   :  { %v2134_v34 = vsel %vm175_vm2, %v2120_v24, -inf }
 0x484   :  { %v1957_v4 = vpop.f32.mrb[24].mxu0 }
 0x485   :  { %v7412_v5 = vpop.f32.mrb[16].mxu1  ;;  %v6576_v6 = vpop.f32.mrb[25].mxu0  ;;  %v2122_v33 = vmul.f32 0.35355338, %v1957_v4 }
 0x486   :  { %v6531_v7 = vpop.f32.mrb[17].mxu1 }
 0x487   :  { %v2140_v39 = vsel %vm175_vm2, %v2122_v33, -inf }
 0x489   :  { %v7414_v8 = vpop.f32.mrb[18].mxu1 }
 0x48a   :  { %v6541_v9 = vpop.f32.mrb[19].mxu1 }
 0x48c   :  { %v2113_v10 = vpop.f32.mrb[26].mxu0 }
 0x48d   :  { %v6586_v11 = vpop.f32.mrb[27].mxu0  ;;  %v2124_v38 = vmul.f32 0.35355338, %v2113_v10 }
 0x48f   :  { %v2146_v40 = vsel %vm175_vm2, %v2124_v38, -inf }
 0x490   :  { %v1567_v12 = vpop.f32.mrb[20].mxu1 }
 0x491   :  { %v2117_v13 = vmul.f32 0.35355338, %v1567_v12  ;;  %v6551_v15 = vpop.f32.mrb[21].mxu1 }
 0x493   :  { %v2125_v16 = vsel %vm175_vm2, %v2117_v13, -inf }
 0x494   :  { %2126 = vmax.xlane.f32.xlu0 %v2125_v16  ;;  %v1723_v17 = vpop.f32.mrb[22].mxu1 }
 0x495   :  { %v2119_v19 = vmul.f32 0.35355338, %v1723_v17  ;;  %v6561_v20 = vpop.f32.mrb[23].mxu1 }
 0x497   :  { %v2131_v25 = vsel %vm175_vm2, %v2119_v19, -inf }
 0x498   :  { %2132 = vmax.xlane.f32.xlu0 %v2131_v25  ;;  %v1879_v28 = vpop.f32.mrb[24].mxu1 }
 0x499   :  { %v2121_v29 = vmul.f32 0.35355338, %v1879_v28  ;;  %v6571_v32 = vpop.f32.mrb[25].mxu1 }
 0x49b   :  { %v2137_v35 = vsel %vm175_vm2, %v2121_v29, -inf }
 0x49c   :  { %2135 = vmax.xlane.f32.xlu0 %v2134_v34  ;;  %2138 = vmax.xlane.f32.xlu1 %v2137_v35  ;;  %v2035_v36 = vpop.f32.mrb[26].mxu1 }
 0x49d   :  { %v6581_v37 = vpop.f32.mrb[27].mxu1  ;;  %v7430_v41 = vmul.f32 0.35355338, %v2035_v36 }
 0x49f   :  { %v2143_v42 = vsel %vm175_vm2, %v7430_v41, -inf }
 0x4a0   :  { %2141 = vmax.xlane.f32.xlu0 %v2140_v39 }
 0x4a4   :  { %2147 = vmax.xlane.f32.xlu0 %v2146_v40 }
 0x4ad   :  { %2213 = vrot.lane.b32.xlu1 %v7143_v18, %s7044_s24 }
 0x4ba   :  { %2289 = vrot.lane.b32.xlu0 %v7146_v21, %s7044_s24 }
 0x4be   :  { %2517 = vrot.lane.b32.xlu0 %v7154_v26, %s7044_s24 }
 0x4c2   :  { %2669 = vrot.lane.b32.xlu0 %v7160_v30, %s7044_s24 }
 0x4c6   :  { %2823 = vrot.lane.b32.xlu0 %v7143_v18, %s7045_s25 }
 0x4ca   :  { %2821 = vrot.lane.b32.xlu0 %v7143_v18, %s7046_s26 }
 0x4ce   :  { %2979 = vrot.lane.b32.xlu0 %v7148_v22, %s7045_s25 }
 0x4d1   :  { %2144 = vmax.xlane.f32.xlu1 %v2143_v42 }
 0x4e2   :  { %2365 = vrot.lane.b32.xlu1 %v7148_v22, %s7044_s24 }
 0x4e6   :  { %2441 = vrot.lane.b32.xlu1 %v7150_v23, %s7044_s24 }
 0x4ea   :  { %2593 = vrot.lane.b32.xlu1 %v7157_v27, %s7044_s24 }
 0x4ee   :  { %2745 = vrot.lane.b32.xlu1 %v7163_v31, %s7044_s24 }
 0x4f2   :  { %2901 = vrot.lane.b32.xlu1 %v7146_v21, %s7045_s25 }
 0x4f4   :  { %v2130_v43 = vpop.xlane.xlu1 %2129 }
 0x4f5   :  { %v2150_v44 = vsub.f32 %v2118_v63, %v2130_v43 }
 0x4f6   :  { %2899 = vrot.lane.b32.xlu1 %v7146_v21, %s7046_s26 }
 0x4f7   :  { %v2159_v45 = vmul.f32 1.442695, %v2150_v44 }
 0x4f9   :  { %6894 = vpow2.f32 %v2159_v45 }
 0x4fa   :  { %3057 = vrot.lane.b32.xlu1 %v7150_v23, %s7045_s25 }
 0x503   :  { %v7446_v46 = vpop.eup %6894 }
 0x504   :  { %v2176_v47 = vsel %vm175_vm2, %v7446_v46, 0.0 }
 0x505   :  { %2177 = vadd.xlane.f32.xlu0 %v2176_v47 }
 0x521   :  { %v2127_v48 = vpop.xlane.xlu0 %2126 }
 0x522   :  { %v2149_v49 = vsub.f32 %v2117_v13, %v2127_v48 }
 0x524   :  { %v2157_v51 = vmul.f32 1.442695, %v2149_v49 }
 0x525   :  { %v2133_v53 = vpop.xlane.xlu0 %2132 }
 0x526   :  { %6896 = vpow2.f32 %v2157_v51  ;;  %v2151_v55 = vsub.f32 %v2119_v19, %v2133_v53 }
 0x528   :  { %v2161_v57 = vmul.f32 1.442695, %v2151_v55 }
 0x529   :  { %v2139_v59 = vpop.xlane.xlu1 %2138  ;;  %v2136_v61 = vpop.xlane.xlu0 %2135 }
 0x52a   :  { %6898 = vpow2.f32 %v2161_v57  ;;  %v2153_v62 = vsub.f32 %v2121_v29, %v2139_v59  ;;  %v2152_v63 = vsub.f32 %v2120_v24, %v2136_v61 }
 0x52c   :  { %v2165_v0 = vmul.f32 1.442695, %v2153_v62  ;;  %v2163_v1 = vmul.f32 1.442695, %v2152_v63 }
 0x52d   :  { %v2214_v2 = vpop.permute.xlu1 %2213  ;;  %v2142_v3 = vpop.xlane.xlu0 %2141 }
 0x52e   :  { %6900 = vpow2.f32 %v2165_v0  ;;  %v2154_v4 = vsub.f32 %v2122_v33, %v2142_v3  ;;  %6588 = vmatpush3.msra.mxu1 %v2214_v2 }
 0x52f   :  { %6902 = vpow2.f32 %v2163_v1  ;;  %6597 = vmatprep.subr.mxu1 %v7038_v14 }
 0x530   :  { %v7451_v6 = vpop.eup %6896  ;;  %v2167_v7 = vmul.f32 1.442695, %v2154_v4 }
 0x531   :  { %v2148_v9 = vpop.xlane.xlu0 %2147  ;;  %v2173_v10 = vsel %vm175_vm2, %v7451_v6, 0.0 }
 0x532   :  { %6904 = vpow2.f32 %v2167_v7  ;;  %v2156_v11 = vsub.f32 %v2124_v38, %v2148_v9  ;;  %2174 = vadd.xlane.f32.xlu1 %v2173_v10 }
 0x534   :  { %v7455_v12 = vpop.eup %6898  ;;  %v2171_v13 = vmul.f32 1.442695, %v2156_v11 }
 0x535   :  { %v2290_v15 = vpop.permute.xlu0 %2289  ;;  %v2179_v16 = vsel %vm175_vm2, %v7455_v12, 0.0 }
 0x536   :  { %6906 = vpow2.f32 %v2171_v13  ;;  %2180 = vadd.xlane.f32.xlu1 %v2179_v16  ;;  %6593 = vmatpush3.msra.mxu0 %v2290_v15 }
 0x537   :  { %6602 = vmatprep.subr.mxu0 %v7038_v14 }
 0x538   :  { %v7460_v17 = vpop.eup %6900 }
 0x539   :  { %v7462_v19 = vpop.eup %6902  ;;  %v2185_v20 = vsel %vm175_vm2, %v7460_v17, 0.0  ;;  %v2518_v38 = vpop.permute.xlu0 %2517 }
 0x53a   :  { %2186 = vadd.xlane.f32.xlu1 %v2185_v20  ;;  %v2182_v24 = vsel %vm175_vm2, %v7462_v19, 0.0 }
 0x53b   :  { %2183 = vadd.xlane.f32.xlu0 %v2182_v24 }
 0x53c   :  { %v7468_v25 = vpop.eup %6904 }
 0x53d   :  { %v2188_v28 = vsel %vm175_vm2, %v7468_v25, 0.0  ;;  %v7499_v39 = vpop.permute.xlu0 %2669 }
 0x53f   :  { %2189 = vadd.xlane.f32.xlu0 %v2188_v28 }
 0x540   :  { %v7472_v29 = vpop.eup %6906 }
 0x541   :  { %v2194_v32 = vsel %vm175_vm2, %v7472_v29, 0.0  ;;  %v7505_v40 = vpop.permute.xlu0 %2823 }
 0x543   :  { %2195 = vadd.xlane.f32.xlu0 %v2194_v32 }
 0x559   :  { %2977 = vrot.lane.b32.xlu0 %v7148_v22, %s7046_s26 }
 0x55d   :  { %3135 = vrot.lane.b32.xlu0 %v7154_v26, %s7045_s25 }
 0x55e   :  { %v2145_v33 = vpop.xlane.xlu1 %2144 }
 0x55f   :  { %v2155_v34 = vsub.f32 %v7430_v41, %v2145_v33  ;;  %v7509_v41 = vpop.permute.xlu0 %2821 }
 0x561   :  { %v2169_v35 = vmul.f32 1.442695, %v2155_v34  ;;  %3133 = vrot.lane.b32.xlu0 %v7154_v26, %s7046_s26 }
 0x562   :  { %v2366_v44 = vpop.permute.xlu1 %2365 }
 0x563   :  { %6908 = vpow2.f32 %v2169_v35  ;;  %v7515_v42 = vpop.permute.xlu0 %2979 }
 0x565   :  { %3291 = vrot.lane.b32.xlu0 %v7160_v30, %s7045_s25 }
 0x566   :  { %v2442_v47 = vpop.permute.xlu1 %2441 }
 0x569   :  { %3289 = vrot.lane.b32.xlu0 %v7160_v30, %s7046_s26 }
 0x56a   :  { %v2594_v49 = vpop.permute.xlu1 %2593 }
 0x56d   :  { %v7487_v36 = vpop.eup %6908  ;;  %3617 = vrot.lane.b32.xlu0 %v7146_v21, %s7047_s27 }
 0x56e   :  { %v2191_v37 = vsel %vm175_vm2, %v7487_v36, 0.0  ;;  %v2746_v51 = vpop.permute.xlu1 %2745 }
 0x56f   :  { %2192 = vadd.xlane.f32.xlu1 %v2191_v37 }
 0x571   :  { %3845 = vrot.lane.b32.xlu0 %v7154_v26, %s7047_s27 }
 0x575   :  { %3997 = vrot.lane.b32.xlu0 %v7160_v30, %s7047_s27 }
 0x579   :  { %4151 = vrot.lane.b32.xlu0 %v7143_v18, %s7048_s28 }
 0x57d   :  { %4149 = vrot.lane.b32.xlu0 %v7143_v18, %s7049_s29 }
 0x580   :  { %3055 = vrot.lane.b32.xlu1 %v7150_v23, %s7046_s26 }
 0x584   :  { %3213 = vrot.lane.b32.xlu1 %v7157_v27, %s7045_s25 }
 0x588   :  { %3211 = vrot.lane.b32.xlu1 %v7157_v27, %s7046_s26 }
 0x58c   :  { %3369 = vrot.lane.b32.xlu1 %v7163_v31, %s7045_s25 }
 0x590   :  { %3367 = vrot.lane.b32.xlu1 %v7163_v31, %s7046_s26 }
 0x592   :  { %v2178_v43 = vpop.xlane.xlu0 %2177 }
 0x593   :  { %6910 = vrcp.f32 %v2178_v43 }
 0x594   :  { %3541 = vrot.lane.b32.xlu1 %v7143_v18, %s7047_s27 }
 0x598   :  { %3693 = vrot.lane.b32.xlu1 %v7148_v22, %s7047_s27 }
 0x59c   :  { %3769 = vrot.lane.b32.xlu1 %v7150_v23, %s7047_s27 }
 0x59d   :  { %v6911_v45 = vpop.eup %6910 }
 0x59e   :  { %v2206_v48 = vmul.f32 %v6911_v45, %v7446_v46  ;;  %v2902_v46 = vpop.permute.xlu1 %2901 }
 0x5a0   :  { %3921 = vrot.lane.b32.xlu1 %v7157_v27, %s7047_s27  ;;  %6595 = vmatmul.mubr.msk.f32.vlgmr.msra.gmra.mrb[28].mxu0 %vm175_vm2, %v2206_v48 }
 0x5a1   :  { %6603 = vmatpush3.msra.mxu0 %v2442_v47  ;;  %6604 = vmatprep.mubr.msk.f32.mxu0 %vm7039_vm1, %v7038_v14 }
 0x5a2   :  { %6612 = vmatprep.subr.mxu0 %v7038_v14  ;;  %v2900_v53 = vpop.permute.xlu1 %2899 }
 0x5a4   :  { %4073 = vrot.lane.b32.xlu1 %v7163_v31, %s7047_s27 }
 0x5a6   :  { %v3058_v55 = vpop.permute.xlu1 %3057 }
 0x5a8   :  { %4229 = vrot.lane.b32.xlu1 %v7146_v21, %s7048_s28 }
 0x5ac   :  { %4227 = vrot.lane.b32.xlu1 %v7146_v21, %s7049_s29 }
 0x5bf   :  { %v2175_v57 = vpop.xlane.xlu1 %2174 }
 0x5c0   :  { %6912 = vrcp.f32 %v2175_v57 }
 0x5c3   :  { %v2181_v59 = vpop.xlane.xlu1 %2180 }
 0x5c4   :  { %6914 = vrcp.f32 %v2181_v59 }
 0x5c7   :  { %v2187_v61 = vpop.xlane.xlu1 %2186 }
 0x5c8   :  { %6916 = vrcp.f32 %v2187_v61  ;;  %v2184_v62 = vpop.xlane.xlu0 %2183 }
 0x5c9   :  { %6918 = vrcp.f32 %v2184_v62 }
 0x5ca   :  { %v6913_v63 = vpop.eup %6912 }
 0x5cb   :  { %v2205_v0 = vmul.f32 %v6913_v63, %v7451_v6 }
 0x5cc   :  { %v2190_v1 = vpop.xlane.xlu0 %2189 }
 0x5cd   :  { %6920 = vrcp.f32 %v2190_v1  ;;  %6590 = vmatmul.mubr.msk.f32.vlgmr.msra.gmra.mrb[28].mxu1 %vm175_vm2, %v2205_v0 }
 0x5ce   :  { %v6915_v2 = vpop.eup %6914  ;;  %6598 = vmatpush3.msra.mxu1 %v2366_v44  ;;  %6599 = vmatprep.mubr.msk.f32.mxu1 %vm7039_vm1, %v7038_v14 }
 0x5cf   :  { %6607 = vmatprep.subr.mxu1 %v7038_v14  ;;  %v2207_v3 = vmul.f32 %v6915_v2, %v7455_v12 }
 0x5d0   :  { %v2196_v4 = vpop.xlane.xlu0 %2195 }
 0x5d1   :  { %6922 = vrcp.f32 %v2196_v4  ;;  %6600 = vmatmul.mubr.msk.f32.vlgmr.msra.gmra.mrb[30].mxu1 %vm175_vm2, %v2207_v3 }
 0x5d2   :  { %v6917_v7 = vpop.eup %6916  ;;  %6608 = vmatpush3.msra.mxu1 %v2518_v38  ;;  %6609 = vmatprep.mubr.msk.f32.mxu1 %vm7039_vm1, %v7038_v14 }
 0x5d3   :  { %v6919_v6 = vpop.eup %6918  ;;  %6617 = vmatprep.subr.mxu1 %v7038_v14  ;;  %v2209_v9 = vmul.f32 %v6917_v7, %v7460_v17 }
 0x5d4   :  { %v2208_v10 = vmul.f32 %v6919_v6, %v7462_v19  ;;  %v2978_v16 = vpop.permute.xlu0 %2977 }
 0x5d5   :  { %6610 = vmatmul.mubr.msk.f32.vlgmr.msra.gmra.mrb[32].mxu1 %vm175_vm2, %v2209_v9 }
 0x5d6   :  { %6605 = vmatmul.mubr.msk.f32.vlgmr.msra.gmra.mrb[30].mxu0 %vm175_vm2, %v2208_v10  ;;  %6618 = vmatpush3.msra.mxu1 %v7499_v39 }
 0x5d7   :  { %v6921_v11 = vpop.eup %6920  ;;  %6613 = vmatpush3.msra.mxu0 %v2594_v49  ;;  %6614 = vmatprep.mubr.msk.f32.mxu0 %vm7039_vm1, %v7038_v14 }
 0x5d8   :  { %6622 = vmatprep.subr.mxu0 %v7038_v14  ;;  %v2210_v12 = vmul.f32 %v6921_v11, %v7468_v25  ;;  %6619 = vmatprep.mubr.msk.f32.mxu1 %vm7039_vm1, %v7038_v14  ;;  %v3136_v17 = vpop.permute.xlu0 %3135 }
 0x5d9   :  { %6627 = vmatprep.subr.mxu1 %v7038_v14 }
 0x5da   :  { %6615 = vmatmul.mubr.msk.f32.vlgmr.msra.gmra.mrb[32].mxu0 %vm175_vm2, %v2210_v12 }
 0x5db   :  { %v6923_v13 = vpop.eup %6922  ;;  %6623 = vmatpush3.msra.mxu0 %v2746_v51  ;;  %6624 = vmatprep.mubr.msk.f32.mxu0 %vm7039_vm1, %v7038_v14 }
 0x5dc   :  { %v2212_v15 = vmul.f32 %v6923_v13, %v7472_v29  ;;  %6632 = vmatprep.subr.mxu0 %v7038_v14  ;;  %v3134_v20 = vpop.permute.xlu0 %3133 }
 0x5de   :  { %6625 = vmatmul.mubr.msk.f32.vlgmr.msra.gmra.mrb[34].mxu0 %vm175_vm2, %v2212_v15 }
 0x5df   :  { %6634 = vmatprep.mubr.msk.f32.mxu0 %vm7039_vm1, %v7038_v14 }
 0x5e0   :  { %v3292_v28 = vpop.permute.xlu0 %3291 }
 0x5e2   :  { %6633 = vmatpush3.xpose.msk.msra.mxu0 %vm175_vm2, %v2902_v46 }
 0x5e3   :  { %6642 = vmatprep.subr.mxu0 %v7038_v14 }
 0x5e4   :  { %v3290_v34 = vpop.permute.xlu0 %3289 }
 0x5e5   :  { %6635 = vmatmul.mubr.msk.f32.vlgmr.msra.gmra.mrb[36].mxu0 %vm175_vm2, %v2900_v53 }
 0x5e6   :  { %6643 = vmatpush3.xpose.msk.msra.mxu0 %vm175_vm2, %v3058_v55  ;;  %6644 = vmatprep.mubr.msk.f32.mxu0 %vm7039_vm1, %v7038_v14 }
 0x5e7   :  { %6652 = vmatprep.subr.mxu0 %v7038_v14 }
 0x5e8   :  { %v3618_v37 = vpop.permute.xlu0 %3617 }
 0x5fc   :  { %v2193_v19 = vpop.xlane.xlu1 %2192 }
 0x5fd   :  { %6924 = vrcp.f32 %v2193_v19 }
 0x600   :  { %v3056_v24 = vpop.permute.xlu1 %3055 }
 0x601   :  { %6645 = vmatmul.mubr.msk.f32.vlgmr.msra.gmra.mrb[38].mxu0 %vm175_vm2, %v3056_v24 }
 0x602   :  { %6654 = vmatprep.mubr.msk.f32.mxu0 %vm7039_vm1, %v7038_v14 }
 0x604   :  { %v3214_v25 = vpop.permute.xlu1 %3213 }
 0x605   :  { %6653 = vmatpush3.xpose.msk.msra.mxu0 %vm175_vm2, %v3214_v25 }
 0x606   :  { %6662 = vmatprep.subr.mxu0 %v7038_v14 }
 0x607   :  { %v6925_v29 = vpop.eup %6924 }
 0x608   :  { %v3212_v32 = vpop.permute.xlu1 %3211  ;;  %v2211_v33 = vmul.f32 %v6925_v29, %v7487_v36 }
 0x609   :  { %6655 = vmatmul.mubr.msk.f32.vlgmr.msra.gmra.mrb[40].mxu0 %vm175_vm2, %v3212_v32 }
 0x60a   :  { %6620 = vmatmul.mubr.msk.f32.vlgmr.msra.gmra.mrb[34].mxu1 %vm175_vm2, %v2211_v33  ;;  %6664 = vmatprep.mubr.msk.f32.mxu0 %vm7039_vm1, %v7038_v14 }
 0x60b   :  { %6628 = vmatpush3.xpose.msk.msra.mxu1 %vm175_vm2, %v7505_v40  ;;  %6629 = vmatprep.mubr.msk.f32.mxu1 %vm7039_vm1, %v7038_v14 }
 0x60c   :  { %v3370_v35 = vpop.permute.xlu1 %3369  ;;  %6637 = vmatprep.subr.mxu1 %v7038_v14 }
 0x60d   :  { %6663 = vmatpush3.xpose.msk.msra.mxu0 %vm175_vm2, %v3370_v35 }
 0x60e   :  { %6630 = vmatmul.mubr.msk.f32.vlgmr.msra.gmra.mrb[36].mxu1 %vm175_vm2, %v7509_v41  ;;  %6672 = vmatprep.subr.mxu0 %v7038_v14 }
 0x60f   :  { %6638 = vmatpush3.xpose.msk.msra.mxu1 %vm175_vm2, %v7515_v42  ;;  %6639 = vmatprep.mubr.msk.f32.mxu1 %vm7039_vm1, %v7038_v14 }
 0x610   :  { %v3368_v36 = vpop.permute.xlu1 %3367  ;;  %6647 = vmatprep.subr.mxu1 %v7038_v14 }
 0x611   :  { %6665 = vmatmul.mubr.msk.f32.vlgmr.msra.gmra.mrb[42].mxu0 %vm175_vm2, %v3368_v36 }
 0x612   :  { %6673 = vmatpush3.msra.mxu0 %v3618_v37  ;;  %6640 = vmatmul.mubr.msk.f32.vlgmr.msra.gmra.mrb[38].mxu1 %vm175_vm2, %v2978_v16 }
 0x613   :  { %6648 = vmatpush3.xpose.msk.msra.mxu1 %vm175_vm2, %v3136_v17  ;;  %6649 = vmatprep.mubr.msk.f32.mxu1 %vm7039_vm1, %v7038_v14 }
 0x614   :  { %6657 = vmatprep.subr.mxu1 %v7038_v14  ;;  %6674 = vmatprep.mubr.msk.f32.mxu0 %vm7039_vm1, %v7038_v14  ;;  %v3542_v38 = vpop.permute.xlu1 %3541 }
 0x615   :  { %6682 = vmatprep.subr.mxu0 %v7038_v14 }
 0x616   :  { %6650 = vmatmul.mubr.msk.f32.vlgmr.msra.gmra.mrb[40].mxu1 %vm175_vm2, %v3134_v20 }
 0x617   :  { %6658 = vmatpush3.xpose.msk.msra.mxu1 %vm175_vm2, %v3292_v28  ;;  %6659 = vmatprep.mubr.msk.f32.mxu1 %vm7039_vm1, %v7038_v14 }
 0x618   :  { %6667 = vmatprep.subr.mxu1 %v7038_v14 }
 0x61a   :  { %6660 = vmatmul.mubr.msk.f32.vlgmr.msra.gmra.mrb[42].mxu1 %vm175_vm2, %v3290_v34 }
 0x61b   :  { %6668 = vmatpush3.msra.mxu1 %v3542_v38  ;;  %6669 = vmatprep.mubr.msk.f32.mxu1 %vm7039_vm1, %v7038_v14 }
 0x61c   :  { %6677 = vmatprep.subr.mxu1 %v7038_v14 }
 0x673   :  { %v7617_v39 = vpop.f32.mrb[28].mxu0 }
 0x674   :  { %v6596_v40 = vpop.f32.mrb[29].mxu0 }
 0x6a0   :  { %v7619_v41 = vpop.f32.mrb[28].mxu1 }
 0x6a1   :  { %v6591_v42 = vpop.f32.mrb[29].mxu1 }
 0x6a2   :  { %v7651_v42 = vpop.permute.xlu1 %3693 }
 0x6a4   :  { %v7621_v43 = vpop.f32.mrb[30].mxu1 }
 0x6a5   :  { %v6601_v44 = vpop.f32.mrb[31].mxu1 }
 0x6a6   :  { %v7653_v44 = vpop.permute.xlu1 %3769 }
 0x6a8   :  { %v7623_v45 = vpop.f32.mrb[32].mxu1 }
 0x6a9   :  { %v7625_v47 = vpop.f32.mrb[30].mxu0  ;;  %v6611_v48 = vpop.f32.mrb[33].mxu1 }
 0x6aa   :  { %v6606_v49 = vpop.f32.mrb[31].mxu0  ;;  %v7655_v48 = vpop.permute.xlu1 %3921 }
 0x6ad   :  { %v7627_v51 = vpop.f32.mrb[32].mxu0 }
 0x6ae   :  { %v6616_v46 = vpop.f32.mrb[33].mxu0  ;;  %v7657_v49 = vpop.permute.xlu1 %4073 }
 0x6b1   :  { %v7629_v53 = vpop.f32.mrb[34].mxu0 }
 0x6b2   :  { %v6626_v55 = vpop.f32.mrb[35].mxu0  ;;  %v7659_v46 = vpop.permute.xlu1 %4229 }
 0x6b6   :  { %v7661_v55 = vpop.permute.xlu1 %4227 }
 0x6b8   :  { %v2973_v57 = vpop.f32.mrb[36].mxu0 }
 0x6b9   :  { %v3446_v59 = vmul.f32 0.35355338, %v2973_v57  ;;  %v6636_v61 = vpop.f32.mrb[37].mxu0 }
 0x6bb   :  { %v3456_v62 = vsel %vm175_vm2, %v3446_v59, -inf }
 0x6bc   :  { %3457 = vmax.xlane.f32.xlu1 %v3456_v62 }
 0x6d4   :  { %v3129_v63 = vpop.f32.mrb[38].mxu0 }
 0x6d5   :  { %v6646_v0 = vpop.f32.mrb[39].mxu0  ;;  %v3448_v17 = vmul.f32 0.35355338, %v3129_v63 }
 0x6d7   :  { %v3462_v29 = vsel %vm175_vm2, %v3448_v17, -inf }
 0x6dc   :  { %v3285_v1 = vpop.f32.mrb[40].mxu0 }
 0x6dd   :  { %v7632_v2 = vpop.f32.mrb[34].mxu1  ;;  %v6656_v3 = vpop.f32.mrb[41].mxu0  ;;  %v3450_v28 = vmul.f32 0.35355338, %v3285_v1 }
 0x6de   :  { %v6621_v4 = vpop.f32.mrb[35].mxu1  ;;  %v7667_v1 = vpop.permute.xlu0 %3845 }
 0x6df   :  { %v3468_v37 = vsel %vm175_vm2, %v3450_v28, -inf }
 0x6e1   :  { %v2895_v7 = vpop.f32.mrb[36].mxu1 }
 0x6e2   :  { %v3445_v6 = vmul.f32 0.35355338, %v2895_v7  ;;  %v6631_v9 = vpop.f32.mrb[37].mxu1  ;;  %v7669_v3 = vpop.permute.xlu0 %3997 }
 0x6e4   :  { %v3441_v10 = vpop.f32.mrb[42].mxu0  ;;  %v3453_v11 = vsel %vm175_vm2, %v3445_v6, -inf }
 0x6e5   :  { %3454 = vmax.xlane.f32.xlu0 %v3453_v11  ;;  %v3051_v12 = vpop.f32.mrb[38].mxu1  ;;  %v6666_v13 = vpop.f32.mrb[43].mxu0  ;;  %v7640_v36 = vmul.f32 0.35355338, %v3441_v10 }
 0x6e6   :  { %v3447_v15 = vmul.f32 0.35355338, %v3051_v12  ;;  %v6641_v16 = vpop.f32.mrb[39].mxu1  ;;  %v7671_v4 = vpop.permute.xlu0 %4151 }
 0x6e7   :  { %v3474_v40 = vsel %vm175_vm2, %v7640_v36, -inf }
 0x6e8   :  { %v3459_v19 = vsel %vm175_vm2, %v3447_v15, -inf }
 0x6e9   :  { %3460 = vmax.xlane.f32.xlu0 %v3459_v19  ;;  %v3207_v20 = vpop.f32.mrb[40].mxu1 }
 0x6ea   :  { %v3449_v24 = vmul.f32 0.35355338, %v3207_v20  ;;  %v6651_v25 = vpop.f32.mrb[41].mxu1  ;;  %v7673_v7 = vpop.permute.xlu0 %4149 }
 0x6ec   :  { %v3465_v32 = vsel %vm175_vm2, %v3449_v24, -inf }
 0x6ed   :  { %3463 = vmax.xlane.f32.xlu0 %v3462_v29  ;;  %3466 = vmax.xlane.f32.xlu1 %v3465_v32  ;;  %v3363_v33 = vpop.f32.mrb[42].mxu1 }
 0x6ee   :  { %v7638_v34 = vmul.f32 0.35355338, %v3363_v33  ;;  %v6661_v35 = vpop.f32.mrb[43].mxu1 }
 0x6f0   :  { %v3471_v38 = vsel %vm175_vm2, %v7638_v34, -inf }
 0x6f1   :  { %3469 = vmax.xlane.f32.xlu0 %v3468_v37  ;;  %3472 = vmax.xlane.f32.xlu1 %v3471_v38 }
 0x6f5   :  { %3475 = vmax.xlane.f32.xlu0 %v3474_v40 }
 0x702   :  { %4385 = vrot.lane.b32.xlu1 %v7150_v23, %s7048_s28 }
 0x70b   :  { %4307 = vrot.lane.b32.xlu0 %v7148_v22, %s7048_s28 }
 0x749   :  { %v3458_v57 = vpop.xlane.xlu1 %3457 }
 0x74a   :  { %v3478_v61 = vsub.f32 %v3446_v59, %v3458_v57 }
 0x74c   :  { %v3487_v62 = vmul.f32 1.442695, %v3478_v61 }
 0x74e   :  { %6926 = vpow2.f32 %v3487_v62 }
 0x758   :  { %v7663_v63 = vpop.eup %6926 }
 0x759   :  { %v3504_v0 = vsel %vm175_vm2, %v7663_v63, 0.0 }
 0x75a   :  { %3505 = vadd.xlane.f32.xlu0 %v3504_v0 }
 0x772   :  { %v3455_v9 = vpop.xlane.xlu0 %3454 }
 0x773   :  { %v3477_v10 = vsub.f32 %v3445_v6, %v3455_v9 }
 0x775   :  { %v3485_v11 = vmul.f32 1.442695, %v3477_v10 }
 0x776   :  { %v3461_v59 = vpop.xlane.xlu0 %3460 }
 0x777   :  { %6928 = vpow2.f32 %v3485_v11  ;;  %v3479_v12 = vsub.f32 %v3447_v15, %v3461_v59 }
 0x779   :  { %v3489_v13 = vmul.f32 1.442695, %v3479_v12 }
 0x77a   :  { %v3467_v16 = vpop.xlane.xlu1 %3466  ;;  %v3464_v19 = vpop.xlane.xlu0 %3463 }
 0x77b   :  { %6930 = vpow2.f32 %v3489_v13  ;;  %v3481_v20 = vsub.f32 %v3449_v24, %v3467_v16  ;;  %v3480_v25 = vsub.f32 %v3448_v17, %v3464_v19 }
 0x77d   :  { %v3493_v29 = vmul.f32 1.442695, %v3481_v20  ;;  %v3491_v32 = vmul.f32 1.442695, %v3480_v25 }
 0x77e   :  { %v3470_v33 = vpop.xlane.xlu0 %3469  ;;  %v3473_v0 = vpop.xlane.xlu1 %3472 }
 0x77f   :  { %6932 = vpow2.f32 %v3493_v29  ;;  %v3482_v35 = vsub.f32 %v3450_v28, %v3470_v33  ;;  %v3483_v9 = vsub.f32 %v7638_v34, %v3473_v0 }
 0x780   :  { %6934 = vpow2.f32 %v3491_v32 }
 0x781   :  { %v6929_v37 = vpop.eup %6928  ;;  %v3495_v38 = vmul.f32 1.442695, %v3482_v35  ;;  %v3497_v11 = vmul.f32 1.442695, %v3483_v9 }
 0x782   :  { %v3501_v6 = vsel %vm175_vm2, %v6929_v37, 0.0  ;;  %v3476_v10 = vpop.xlane.xlu0 %3475  ;;  %v7727_v32 = vpop.permute.xlu1 %4385 }
 0x783   :  { %3502 = vadd.xlane.f32.xlu1 %v3501_v6  ;;  %6936 = vpow2.f32 %v3495_v38  ;;  %v3484_v59 = vsub.f32 %v7640_v36, %v3476_v10 }
 0x784   :  { %6938 = vpow2.f32 %v3497_v11 }
 0x785   :  { %v6931_v40 = vpop.eup %6930  ;;  %v3499_v12 = vmul.f32 1.442695, %v3484_v59 }
 0x786   :  { %v3507_v15 = vsel %vm175_vm2, %v6931_v40, 0.0  ;;  %v7715_v34 = vpop.permute.xlu0 %4307 }
 0x787   :  { %3508 = vadd.xlane.f32.xlu1 %v3507_v15  ;;  %6940 = vpow2.f32 %v3499_v12 }
 0x789   :  { %v7677_v57 = vpop.eup %6932 }
 0x78a   :  { %v7679_v24 = vpop.eup %6934  ;;  %v3513_v17 = vsel %vm175_vm2, %v7677_v57, 0.0 }
 0x78b   :  { %3514 = vadd.xlane.f32.xlu1 %v3513_v17  ;;  %v3510_v28 = vsel %vm175_vm2, %v7679_v24, 0.0 }
 0x78c   :  { %3511 = vadd.xlane.f32.xlu0 %v3510_v28 }
 0x78d   :  { %v7685_v61 = vpop.eup %6936 }
 0x78e   :  { %v3516_v62 = vsel %vm175_vm2, %v7685_v61, 0.0  ;;  %v7695_v13 = vpop.eup %6938 }
 0x78f   :  { %v3519_v16 = vsel %vm175_vm2, %v7695_v13, 0.0 }
 0x790   :  { %3517 = vadd.xlane.f32.xlu0 %v3516_v62 }
 0x791   :  { %v7699_v19 = vpop.eup %6940 }
 0x792   :  { %v3522_v20 = vsel %vm175_vm2, %v7699_v19, 0.0 }
 0x79c   :  { %4383 = vrot.lane.b32.xlu1 %v7150_v23, %s7049_s29 }
 0x7a6   :  { %4305 = vrot.lane.b32.xlu0 %v7148_v22, %s7049_s29 }
 0x7c0   :  { %3520 = vadd.xlane.f32.xlu1 %v3519_v16 }
 0x7c5   :  { %3523 = vadd.xlane.f32.xlu0 %v3522_v20 }
 0x7d1   :  { %4541 = vrot.lane.b32.xlu1 %v7157_v27, %s7048_s28 }
 0x7d5   :  { %4539 = vrot.lane.b32.xlu1 %v7157_v27, %s7049_s29 }
 0x7d9   :  { %4697 = vrot.lane.b32.xlu1 %v7163_v31, %s7048_s28 }
 0x7db   :  { %4463 = vrot.lane.b32.xlu0 %v7154_v26, %s7048_s28 }
 0x7dd   :  { %4695 = vrot.lane.b32.xlu1 %v7163_v31, %s7049_s29 }
 0x7df   :  { %4461 = vrot.lane.b32.xlu0 %v7154_v26, %s7049_s29 }
 0x7e3   :  { %4619 = vrot.lane.b32.xlu0 %v7160_v30, %s7048_s28 }
 0x7e7   :  { %v3506_v36 = vpop.xlane.xlu0 %3505  ;;  %4617 = vrot.lane.b32.xlu0 %v7160_v30, %s7049_s29 }
 0x7e8   :  { %6942 = vrcp.f32 %v3506_v36 }
 0x7f2   :  { %v6943_v25 = vpop.eup %6942 }
 0x7f3   :  { %v3534_v29 = vmul.f32 %v6943_v25, %v7663_v63 }
 0x7f5   :  { %6675 = vmatmul.mubr.msk.f32.vlgmr.msra.gmra.mrb[44].mxu0 %vm175_vm2, %v3534_v29 }
 0x7f6   :  { %6683 = vmatpush3.msra.mxu0 %v7653_v44  ;;  %6684 = vmatprep.mubr.msk.f32.mxu0 %vm7039_vm1, %v7038_v14 }
 0x7f7   :  { %6692 = vmatprep.subr.mxu0 %v7038_v14 }
 0x810   :  { %v3503_v33 = vpop.xlane.xlu1 %3502 }
 0x811   :  { %6944 = vrcp.f32 %v3503_v33 }
 0x814   :  { %v3509_v35 = vpop.xlane.xlu1 %3508 }
 0x815   :  { %6946 = vrcp.f32 %v3509_v35 }
 0x818   :  { %v3515_v38 = vpop.xlane.xlu1 %3514 }
 0x819   :  { %6948 = vrcp.f32 %v3515_v38  ;;  %v3512_v6 = vpop.xlane.xlu0 %3511 }
 0x81a   :  { %6950 = vrcp.f32 %v3512_v6 }
 0x81b   :  { %v6945_v63 = vpop.eup %6944 }
 0x81c   :  { %v3533_v15 = vmul.f32 %v6945_v63, %v6929_v37 }
 0x81d   :  { %v3518_v17 = vpop.xlane.xlu0 %3517 }
 0x81e   :  { %6952 = vrcp.f32 %v3518_v17  ;;  %6670 = vmatmul.mubr.msk.f32.vlgmr.msra.gmra.mrb[44].mxu1 %vm175_vm2, %v3533_v15 }
 0x81f   :  { %v6947_v44 = vpop.eup %6946  ;;  %6678 = vmatpush3.msra.mxu1 %v7651_v42  ;;  %6679 = vmatprep.mubr.msk.f32.mxu1 %vm7039_vm1, %v7038_v14 }
 0x820   :  { %v3535_v28 = vmul.f32 %v6947_v44, %v6931_v40  ;;  %6687 = vmatprep.subr.mxu1 %v7038_v14 }
 0x822   :  { %6680 = vmatmul.mubr.msk.f32.vlgmr.msra.gmra.mrb[46].mxu1 %vm175_vm2, %v3535_v28 }
 0x823   :  { %v6949_v62 = vpop.eup %6948  ;;  %6688 = vmatpush3.msra.mxu1 %v7667_v1  ;;  %6689 = vmatprep.mubr.msk.f32.mxu1 %vm7039_vm1, %v7038_v14 }
 0x824   :  { %v6951_v37 = vpop.eup %6950  ;;  %v3537_v0 = vmul.f32 %v6949_v62, %v7677_v57  ;;  %6697 = vmatprep.subr.mxu1 %v7038_v14  ;;  %v4306_v57 = vpop.permute.xlu0 %4305 }
 0x825   :  { %v3536_v42 = vmul.f32 %v6951_v37, %v7679_v24 }
 0x826   :  { %6690 = vmatmul.mubr.msk.f32.vlgmr.msra.gmra.mrb[48].mxu1 %vm175_vm2, %v3537_v0 }
 0x827   :  { %6685 = vmatmul.mubr.msk.f32.vlgmr.msra.gmra.mrb[46].mxu0 %vm175_vm2, %v3536_v42  ;;  %6698 = vmatpush3.msra.mxu1 %v7669_v3 }
 0x828   :  { %v6953_v40 = vpop.eup %6952  ;;  %6693 = vmatpush3.msra.mxu0 %v7655_v48  ;;  %6694 = vmatprep.mubr.msk.f32.mxu0 %vm7039_vm1, %v7038_v14  ;;  %v4384_v48 = vpop.permute.xlu1 %4383 }
 0x829   :  { %v3538_v1 = vmul.f32 %v6953_v40, %v7685_v61  ;;  %6702 = vmatprep.subr.mxu0 %v7038_v14  ;;  %6699 = vmatprep.mubr.msk.f32.mxu1 %vm7039_vm1, %v7038_v14 }
 0x82a   :  { %6707 = vmatprep.subr.mxu1 %v7038_v14 }
 0x82b   :  { %6695 = vmatmul.mubr.msk.f32.vlgmr.msra.gmra.mrb[48].mxu0 %vm175_vm2, %v3538_v1 }
 0x82c   :  { %6703 = vmatpush3.msra.mxu0 %v7657_v49  ;;  %6704 = vmatprep.mubr.msk.f32.mxu0 %vm7039_vm1, %v7038_v14 }
 0x82d   :  { %6712 = vmatprep.subr.mxu0 %v7038_v14 }
 0x84d   :  { %v3521_v3 = vpop.xlane.xlu1 %3520 }
 0x84e   :  { %6954 = vrcp.f32 %v3521_v3 }
 0x851   :  { %v4542_v11 = vpop.permute.xlu1 %4541 }
 0x852   :  { %v3524_v24 = vpop.xlane.xlu0 %3523 }
 0x853   :  { %6956 = vrcp.f32 %v3524_v24 }
 0x856   :  { %v4464_v9 = vpop.permute.xlu0 %4463 }
 0x858   :  { %v6955_v61 = vpop.eup %6954 }
 0x859   :  { %v3539_v10 = vmul.f32 %v6955_v61, %v7695_v13 }
 0x85a   :  { %v4462_v12 = vpop.permute.xlu0 %4461 }
 0x85b   :  { %6700 = vmatmul.mubr.msk.f32.vlgmr.msra.gmra.mrb[50].mxu1 %vm175_vm2, %v3539_v10 }
 0x85c   :  { %6708 = vmatpush3.xpose.msk.msra.mxu1 %vm175_vm2, %v7671_v4  ;;  %6709 = vmatprep.mubr.msk.f32.mxu1 %vm7039_vm1, %v7038_v14  ;;  %v4540_v4 = vpop.permute.xlu1 %4539 }
 0x85d   :  { %v6957_v49 = vpop.eup %6956  ;;  %6717 = vmatprep.subr.mxu1 %v7038_v14 }
 0x85e   :  { %v3540_v59 = vmul.f32 %v6957_v49, %v7699_v19 }
 0x85f   :  { %6710 = vmatmul.mubr.msk.f32.vlgmr.msra.gmra.mrb[52].mxu1 %vm175_vm2, %v7673_v7  ;;  %v4620_v7 = vpop.permute.xlu0 %4619 }
 0x860   :  { %6705 = vmatmul.mubr.msk.f32.vlgmr.msra.gmra.mrb[50].mxu0 %vm175_vm2, %v3540_v59  ;;  %6718 = vmatpush3.xpose.msk.msra.mxu1 %vm175_vm2, %v7715_v34 }
 0x861   :  { %6713 = vmatpush3.xpose.msk.msra.mxu0 %vm175_vm2, %v7659_v46  ;;  %6714 = vmatprep.mubr.msk.f32.mxu0 %vm7039_vm1, %v7038_v14  ;;  %v4698_v46 = vpop.permute.xlu1 %4697 }
 0x862   :  { %6719 = vmatprep.mubr.msk.f32.mxu1 %vm7039_vm1, %v7038_v14  ;;  %6722 = vmatprep.subr.mxu0 %v7038_v14 }
 0x863   :  { %6727 = vmatprep.subr.mxu1 %v7038_v14  ;;  %6720 = vmatmul.mubr.msk.f32.vlgmr.msra.gmra.mrb[54].mxu1 %vm175_vm2, %v4306_v57 }
 0x864   :  { %6715 = vmatmul.mubr.msk.f32.vlgmr.msra.gmra.mrb[52].mxu0 %vm175_vm2, %v7661_v55  ;;  %6728 = vmatpush3.xpose.msk.msra.mxu1 %vm175_vm2, %v4464_v9  ;;  %v4618_v55 = vpop.permute.xlu0 %4617 }
 0x865   :  { %6723 = vmatpush3.xpose.msk.msra.mxu0 %vm175_vm2, %v7727_v32  ;;  %6724 = vmatprep.mubr.msk.f32.mxu0 %vm7039_vm1, %v7038_v14  ;;  %v4696_v13 = vpop.permute.xlu1 %4695 }
 0x866   :  { %6729 = vmatprep.mubr.msk.f32.mxu1 %vm7039_vm1, %v7038_v14  ;;  %6732 = vmatprep.subr.mxu0 %v7038_v14 }
 0x867   :  { %6737 = vmatprep.subr.mxu1 %v7038_v14  ;;  %6730 = vmatmul.mubr.msk.f32.vlgmr.msra.gmra.mrb[56].mxu1 %vm175_vm2, %v4462_v12 }
 0x868   :  { %6725 = vmatmul.mubr.msk.f32.vlgmr.msra.gmra.mrb[54].mxu0 %vm175_vm2, %v4384_v48  ;;  %6738 = vmatpush3.xpose.msk.msra.mxu1 %vm175_vm2, %v4620_v7 }
 0x869   :  { %6733 = vmatpush3.xpose.msk.msra.mxu0 %vm175_vm2, %v4542_v11  ;;  %6734 = vmatprep.mubr.msk.f32.mxu0 %vm7039_vm1, %v7038_v14 }
 0x86a   :  { %6739 = vmatprep.mubr.msk.f32.mxu1 %vm7039_vm1, %v7038_v14  ;;  %6742 = vmatprep.subr.mxu0 %v7038_v14 }
 0x86b   :  { %6740 = vmatmul.mubr.msk.f32.vlgmr.msra.gmra.mrb[58].mxu1 %vm175_vm2, %v4618_v55  ;;  %6747 = vmatprep.subr.mxu1 %v7038_v14 }
 0x86c   :  { %6735 = vmatmul.mubr.msk.f32.vlgmr.msra.gmra.mrb[56].mxu0 %vm175_vm2, %v4540_v4  ;;  %6749 = vmatprep.mubr.msk.f32.mxu1 %vm7039_vm1, %v7038_v14 }
 0x86d   :  { %6743 = vmatpush3.xpose.msk.msra.mxu0 %vm175_vm2, %v4698_v46  ;;  %6744 = vmatprep.mubr.msk.f32.mxu0 %vm7039_vm1, %v7038_v14 }
 0x86e   :  { %6752 = vmatprep.subr.mxu0 %v7038_v14 }
 0x870   :  { %6745 = vmatmul.mubr.msk.f32.vlgmr.msra.gmra.mrb[58].mxu0 %vm175_vm2, %v4696_v13 }
 0x871   :  { %6754 = vmatprep.mubr.msk.f32.mxu0 %vm7039_vm1, %v7038_v14 }
 0x8c8   :  { %v7811_v16 = vpop.f32.mrb[44].mxu0 }
 0x8c9   :  { %v6676_v19 = vpop.f32.mrb[45].mxu0 }
 0x8f1   :  { %v7813_v20 = vpop.f32.mrb[44].mxu1 }
 0x8f2   :  { %v6671_v34 = vpop.f32.mrb[45].mxu1 }
 0x8f5   :  { %v7815_v36 = vpop.f32.mrb[46].mxu1 }
 0x8f6   :  { %v6681_v25 = vpop.f32.mrb[47].mxu1 }
 0x8f9   :  { %v7817_v29 = vpop.f32.mrb[48].mxu1 }
 0x8fa   :  { %v7819_v32 = vpop.f32.mrb[46].mxu0  ;;  %v6691_v33 = vpop.f32.mrb[49].mxu1 }
 0x8fb   :  { %v6686_v35 = vpop.f32.mrb[47].mxu0 }
 0x8fe   :  { %v7821_v38 = vpop.f32.mrb[48].mxu0 }
 0x8ff   :  { %v6696_v6 = vpop.f32.mrb[49].mxu0 }
 0x92e   :  { %v7823_v63 = vpop.f32.mrb[50].mxu1 }
 0x92f   :  { %v6701_v15 = vpop.f32.mrb[51].mxu1 }
 0x932   :  { %v4223_v17 = vpop.f32.mrb[52].mxu1 }
 0x933   :  { %v7825_v44 = vpop.f32.mrb[50].mxu0  ;;  %v4773_v28 = vmul.f32 0.35355338, %v4223_v17  ;;  %v6711_v62 = vpop.f32.mrb[53].mxu1 }
 0x934   :  { %v6706_v37 = vpop.f32.mrb[51].mxu0 }
 0x935   :  { %v4781_v0 = vsel %vm175_vm2, %v4773_v28, -inf }
 0x936   :  { %4782 = vmax.xlane.f32.xlu0 %v4781_v0  ;;  %v4379_v42 = vpop.f32.mrb[54].mxu1 }
 0x937   :  { %v4301_v40 = vpop.f32.mrb[52].mxu0  ;;  %v4775_v1 = vmul.f32 0.35355338, %v4379_v42  ;;  %v6721_v48 = vpop.f32.mrb[55].mxu1 }
 0x938   :  { %v4774_v3 = vmul.f32 0.35355338, %v4301_v40  ;;  %v6716_v57 = vpop.f32.mrb[53].mxu0 }
 0x939   :  { %v4787_v24 = vsel %vm175_vm2, %v4775_v1, -inf }
 0x93a   :  { %4788 = vmax.xlane.f32.xlu0 %v4787_v24  ;;  %v4784_v61 = vsel %vm175_vm2, %v4774_v3, -inf  ;;  %v4535_v9 = vpop.f32.mrb[56].mxu1 }
 0x93b   :  { %4785 = vmax.xlane.f32.xlu1 %v4784_v61  ;;  %v4457_v10 = vpop.f32.mrb[54].mxu0  ;;  %v4777_v49 = vmul.f32 0.35355338, %v4535_v9  ;;  %v6731_v11 = vpop.f32.mrb[57].mxu1 }
 0x93c   :  { %v4776_v59 = vmul.f32 0.35355338, %v4457_v10  ;;  %v6726_v12 = vpop.f32.mrb[55].mxu0 }
 0x93d   :  { %v4793_v4 = vsel %vm175_vm2, %v4777_v49, -inf }
 0x93e   :  { %v4790_v7 = vsel %vm175_vm2, %v4776_v59, -inf  ;;  %v4691_v46 = vpop.f32.mrb[58].mxu1 }
 0x93f   :  { %4791 = vmax.xlane.f32.xlu0 %v4790_v7  ;;  %v4613_v55 = vpop.f32.mrb[56].mxu0  ;;  %4794 = vmax.xlane.f32.xlu1 %v4793_v4  ;;  %v4779_v13 = vmul.f32 0.35355338, %v4691_v46  ;;  %v6741_v19 = vpop.f32.mrb[59].mxu1 }
 0x940   :  { %v4778_v34 = vmul.f32 0.35355338, %v4613_v55  ;;  %v6736_v25 = vpop.f32.mrb[57].mxu0 }
 0x941   :  { %v4799_v33 = vsel %vm175_vm2, %v4779_v13, -inf }
 0x942   :  { %v4796_v35 = vsel %vm175_vm2, %v4778_v34, -inf }
 0x943   :  { %4797 = vmax.xlane.f32.xlu0 %v4796_v35  ;;  %v4769_v6 = vpop.f32.mrb[58].mxu0  ;;  %4800 = vmax.xlane.f32.xlu1 %v4799_v33 }
 0x944   :  { %v4780_v15 = vmul.f32 0.35355338, %v4769_v6  ;;  %v6746_v17 = vpop.f32.mrb[59].mxu0 }
 0x946   :  { %v4802_v62 = vsel %vm175_vm2, %v4780_v15, -inf }
 0x947   :  { %4803 = vmax.xlane.f32.xlu0 %v4802_v62 }
 0x954   :  { %4869 = vrot.lane.b32.xlu1 %v7143_v18, %s7050_s30 }
 0x958   :  { %5021 = vrot.lane.b32.xlu1 %v7148_v22, %s7050_s30 }
 0x95c   :  { %5097 = vrot.lane.b32.xlu1 %v7150_v23, %s7050_s30 }
 0x95d   :  { %4945 = vrot.lane.b32.xlu0 %v7146_v21, %s7050_s30 }
 0x960   :  { %5249 = vrot.lane.b32.xlu1 %v7157_v27, %s7050_s30 }
 0x961   :  { %5173 = vrot.lane.b32.xlu0 %v7154_v26, %s7050_s30 }
 0x9c3   :  { %v4783_v37 = vpop.xlane.xlu0 %4782 }
 0x9c4   :  { %v4805_v0 = vsub.f32 %v4773_v28, %v4783_v37 }
 0x9c6   :  { %v4813_v42 = vmul.f32 1.442695, %v4805_v0 }
 0x9c7   :  { %v4789_v40 = vpop.xlane.xlu0 %4788 }
 0x9c8   :  { %6958 = vpow2.f32 %v4813_v42  ;;  %v4786_v18 = vpop.xlane.xlu1 %4785  ;;  %v4807_v48 = vsub.f32 %v4775_v1, %v4789_v40 }
 0x9c9   :  { %v4806_v22 = vsub.f32 %v4774_v3, %v4786_v18 }
 0x9ca   :  { %v4817_v57 = vmul.f32 1.442695, %v4807_v48 }
 0x9cb   :  { %v4815_v24 = vmul.f32 1.442695, %v4806_v22 }
 0x9cc   :  { %6960 = vpow2.f32 %v4817_v57  ;;  %v4795_v23 = vpop.xlane.xlu1 %4794  ;;  %v4792_v61 = vpop.xlane.xlu0 %4791 }
 0x9cd   :  { %6962 = vpow2.f32 %v4815_v24  ;;  %v4809_v21 = vsub.f32 %v4777_v49, %v4795_v23  ;;  %v4808_v9 = vsub.f32 %v4776_v59, %v4792_v61 }
 0x9cf   :  { %v4821_v27 = vmul.f32 1.442695, %v4809_v21  ;;  %v4819_v10 = vmul.f32 1.442695, %v4808_v9 }
 0x9d0   :  { %v4801_v11 = vpop.xlane.xlu1 %4800  ;;  %v4798_v26 = vpop.xlane.xlu0 %4797 }
 0x9d1   :  { %6964 = vpow2.f32 %v4821_v27  ;;  %v4811_v28 = vsub.f32 %v4779_v13, %v4801_v11  ;;  %v4810_v12 = vsub.f32 %v4778_v34, %v4798_v26 }
 0x9d2   :  { %v7847_v4 = vpop.eup %6958  ;;  %6966 = vpow2.f32 %v4819_v10 }
 0x9d3   :  { %v4825_v1 = vmul.f32 1.442695, %v4811_v28  ;;  %v4823_v3 = vmul.f32 1.442695, %v4810_v12  ;;  %v4829_v7 = vsel %vm175_vm2, %v7847_v4, 0.0  ;;  %v5599_v28 = vld [vmem:[%s8090_s3] sm:$0xff] }
 0x9d4   :  { %v4870_v46 = vpop.permute.xlu1 %4869  ;;  %v4804_v55 = vpop.xlane.xlu0 %4803  ;;  %4830 = vadd.xlane.f32.xlu1 %v4829_v7  ;;  %v5600_v12 = vld [vmem:[%s8090_s3 + $0x8] sm:$0xff] }
 0x9d5   :  { %6968 = vpow2.f32 %v4825_v1  ;;  %v4812_v49 = vsub.f32 %v4780_v15, %v4804_v55  ;;  %6748 = vmatpush3.msra.mxu1 %v4870_v46  ;;  %v5601_v1 = vld [vmem:[%s8090_s3 + $0x10] sm:$0xff] }
 0x9d6   :  { %v7851_v59 = vpop.eup %6960  ;;  %6970 = vpow2.f32 %v4823_v3  ;;  %6757 = vmatprep.subr.mxu1 %v7038_v14 }
 0x9d7   :  { %v7854_v13 = vpop.eup %6962  ;;  %v4827_v19 = vmul.f32 1.442695, %v4812_v49  ;;  %v4835_v34 = vsel %vm175_vm2, %v7851_v59, 0.0 }
 0x9d8   :  { %v4946_v25 = vpop.permute.xlu0 %4945  ;;  %v4832_v33 = vsel %vm175_vm2, %v7854_v13, 0.0  ;;  %4836 = vadd.xlane.f32.xlu1 %v4835_v34 }
 0x9d9   :  { %6972 = vpow2.f32 %v4827_v19  ;;  %4833 = vadd.xlane.f32.xlu0 %v4832_v33  ;;  %6753 = vmatpush3.msra.mxu0 %v4946_v25 }
 0x9da   :  { %6762 = vmatprep.subr.mxu0 %v7038_v14 }
 0x9db   :  { %v7861_v35 = vpop.eup %6964 }
 0x9dc   :  { %v7863_v6 = vpop.eup %6966  ;;  %v4841_v15 = vsel %vm175_vm2, %v7861_v35, 0.0 }
 0x9dd   :  { %4842 = vadd.xlane.f32.xlu1 %v4841_v15  ;;  %v4838_v17 = vsel %vm175_vm2, %v7863_v6, 0.0 }
 0x9de   :  { %4839 = vadd.xlane.f32.xlu0 %v4838_v17 }
 0x9df   :  { %v7869_v62 = vpop.eup %6968 }
 0x9e0   :  { %v7871_v37 = vpop.eup %6970  ;;  %v4847_v0 = vsel %vm175_vm2, %v7869_v62, 0.0 }
 0x9e1   :  { %4848 = vadd.xlane.f32.xlu1 %v4847_v0  ;;  %v4844_v42 = vsel %vm175_vm2, %v7871_v37, 0.0 }
 0x9e2   :  { %4845 = vadd.xlane.f32.xlu0 %v4844_v42 }
 0x9e3   :  { %v7877_v40 = vpop.eup %6972 }
 0x9e4   :  { %v4850_v18 = vsel %vm175_vm2, %v7877_v40, 0.0 }
 0x9e6   :  { %4851 = vadd.xlane.f32.xlu0 %v4850_v18 }
 0x9f2   :  { %5401 = vrot.lane.b32.xlu1 %v7163_v31, %s7050_s30 }
 0x9f6   :  { %5487 = vrot.lane.b32.xlu1 %v7617_v39, %s7051_s7 }
 0x9fa   :  { %5519 = vrot.lane.b32.xlu1 %v7811_v16, %s7052_s8 }
 0x9fc   :  { %5325 = vrot.lane.b32.xlu0 %v7160_v30, %s7050_s30  ;;  %v5022_v30 = vpop.permute.xlu1 %5021 }
 0x9fe   :  { %5491 = vrot.lane.b32.xlu1 %v7625_v47, %s7051_s7 }
 0xa00   :  { %5485 = vrot.lane.b32.xlu0 %v7619_v41, %s7051_s7  ;;  %v5098_v31 = vpop.permute.xlu1 %5097 }
 0xa02   :  { %5523 = vrot.lane.b32.xlu1 %v7819_v32, %s7052_s8 }
 0xa04   :  { %5517 = vrot.lane.b32.xlu0 %v7813_v20, %s7052_s8  ;;  %v5250_v39 = vpop.permute.xlu1 %5249 }
 0xa06   :  { %5495 = vrot.lane.b32.xlu1 %v7627_v51, %s7051_s7 }
 0xa08   :  { %5489 = vrot.lane.b32.xlu0 %v7621_v43, %s7051_s7  ;;  %v5174_v43 = vpop.permute.xlu0 %5173 }
 0xa0a   :  { %5527 = vrot.lane.b32.xlu1 %v7821_v38, %s7052_s8 }
 0xa0c   :  { %5521 = vrot.lane.b32.xlu0 %v7815_v36, %s7052_s8 }
 0xa0e   :  { %5499 = vrot.lane.b32.xlu1 %v7629_v53, %s7051_s7 }
 0xa10   :  { %5493 = vrot.lane.b32.xlu0 %v7623_v45, %s7051_s7 }
 0xa12   :  { %5531 = vrot.lane.b32.xlu1 %v7825_v44, %s7052_s8 }
 0xa14   :  { %5525 = vrot.lane.b32.xlu0 %v7817_v29, %s7052_s8 }
 0xa18   :  { %5497 = vrot.lane.b32.xlu0 %v7632_v2, %s7051_s7 }
 0xa1c   :  { %5529 = vrot.lane.b32.xlu0 %v7823_v63, %s7052_s8 }
 0xa61   :  { %v4831_v41 = vpop.xlane.xlu1 %4830 }
 0xa62   :  { %6974 = vrcp.f32 %v4831_v41 }
 0xa65   :  { %v4837_v47 = vpop.xlane.xlu1 %4836 }
 0xa66   :  { %6976 = vrcp.f32 %v4837_v47  ;;  %v4834_v51 = vpop.xlane.xlu0 %4833 }
 0xa67   :  { %6978 = vrcp.f32 %v4834_v51 }
 0xa6a   :  { %v4843_v53 = vpop.xlane.xlu1 %4842 }
 0xa6b   :  { %6980 = vrcp.f32 %v4843_v53  ;;  %v4840_v45 = vpop.xlane.xlu0 %4839 }
 0xa6c   :  { %v6975_v16 = vpop.eup %6974  ;;  %6982 = vrcp.f32 %v4840_v45 }
 0xa6d   :  { %v4861_v20 = vmul.f32 %v6975_v16, %v7847_v4  ;;  %v6831_v4 = vpack.c.bf16 %v5600_v12, %v5599_v28 }
 0xa6e   :  { %v4849_v2 = vpop.xlane.xlu1 %4848 }
 0xa6f   :  { %6984 = vrcp.f32 %v4849_v2  ;;  %v4846_v36 = vpop.xlane.xlu0 %4845  ;;  %6750 = vmatmul.mubr.msk.f32.vlgmr.msra.gmra.mrb[60].mxu1 %vm175_vm2, %v4861_v20 }
 0xa70   :  { %v6977_v29 = vpop.eup %6976  ;;  %6986 = vrcp.f32 %v4846_v36  ;;  %6758 = vmatpush3.msra.mxu1 %v5022_v30  ;;  %6759 = vmatprep.mubr.msk.f32.mxu1 %vm7039_vm1, %v7038_v14 }
 0xa71   :  { %v6979_v32 = vpop.eup %6978  ;;  %v4863_v38 = vmul.f32 %v6977_v29, %v7851_v59  ;;  %6767 = vmatprep.subr.mxu1 %v7038_v14 }
 0xa72   :  { %v4862_v63 = vmul.f32 %v6979_v32, %v7854_v13  ;;  %v5402_v10 = vpop.permute.xlu1 %5401 }
 0xa73   :  { %v4852_v44 = vpop.xlane.xlu0 %4851  ;;  %6760 = vmatmul.mubr.msk.f32.vlgmr.msra.gmra.mrb[62].mxu1 %vm175_vm2, %v4863_v38 }
 0xa74   :  { %6988 = vrcp.f32 %v4852_v44  ;;  %6755 = vmatmul.mubr.msk.f32.vlgmr.msra.gmra.mrb[60].mxu0 %vm175_vm2, %v4862_v63  ;;  %6768 = vmatpush3.msra.mxu1 %v5174_v43 }
 0xa75   :  { %v6981_v48 = vpop.eup %6980  ;;  %6763 = vmatpush3.msra.mxu0 %v5098_v31  ;;  %6764 = vmatprep.mubr.msk.f32.mxu0 %vm7039_vm1, %v7038_v14 }
 0xa76   :  { %v6983_v22 = vpop.eup %6982  ;;  %v4865_v57 = vmul.f32 %v6981_v48, %v7861_v35  ;;  %6769 = vmatprep.mubr.msk.f32.mxu1 %vm7039_vm1, %v7038_v14  ;;  %6772 = vmatprep.subr.mxu0 %v7038_v14  ;;  %v5488_v42 = vpop.permute.xlu1 %5487 }
 0xa77   :  { %v4864_v24 = vmul.f32 %v6983_v22, %v7863_v6  ;;  %v5326_v23 = vpop.permute.xlu0 %5325  ;;  %6777 = vmatprep.subr.mxu1 %v7038_v14  ;;  %v5574_v44 = vsel %vm175_vm2, %v7401_v52, %v5488_v42 }
 0xa78   :  { %6770 = vmatmul.mubr.msk.f32.vlgmr.msra.gmra.mrb[64].mxu1 %vm175_vm2, %v4865_v57 }
 0xa79   :  { %v6985_v61 = vpop.eup %6984  ;;  %6765 = vmatmul.mubr.msk.f32.vlgmr.msra.gmra.mrb[62].mxu0 %vm175_vm2, %v4864_v24  ;;  %6778 = vmatpush3.msra.mxu1 %v5326_v23 }
 0xa7a   :  { %v6987_v21 = vpop.eup %6986  ;;  %v4867_v9 = vmul.f32 %v6985_v61, %v7869_v62  ;;  %6773 = vmatpush3.msra.mxu0 %v5250_v39  ;;  %6774 = vmatprep.mubr.msk.f32.mxu0 %vm7039_vm1, %v7038_v14  ;;  %v5520_v18 = vpop.permute.xlu1 %5519 }
 0xa7b   :  { %v4866_v27 = vmul.f32 %v6987_v21, %v7871_v37  ;;  %6779 = vmatprep.mubr.msk.f32.mxu1 %vm7039_vm1, %v7038_v14  ;;  %6782 = vmatprep.subr.mxu0 %v7038_v14  ;;  %v5486_v0 = vpop.permute.xlu0 %5485 }
 0xa7c   :  { %6780 = vmatmul.mubr.msk.f32.vlgmr.msra.gmra.mrb[66].mxu1 %vm175_vm2, %v4867_v9  ;;  %6832 = vmatprep.subr.bf16.mxu1 %v6831_v4  ;;  %v5573_v2 = vsel %vm175_vm2, %v7399_v50, %v5486_v0  ;;  %v5583_v50 = vsel %vm5581_vm4, %v5574_v44, %v5520_v18 }
 0xa7d   :  { %6775 = vmatmul.mubr.msk.f32.vlgmr.msra.gmra.mrb[64].mxu0 %vm175_vm2, %v4866_v27  ;;  %6834 = vmatpush3.bf16.msra.mxu1 %v6831_v4 }
 0xa7e   :  { %v6989_v11 = vpop.eup %6988  ;;  %6783 = vmatpush3.msra.mxu0 %v5402_v10  ;;  %6784 = vmatprep.mubr.msk.f32.mxu0 %vm7039_vm1, %v7038_v14  ;;  %v5602_v14 = vld [vmem:[%s8090_s3 + $0x18] sm:$0xff]  ;;  %v5492_v31 = vpop.permute.xlu1 %5491 }
 0xa7f   :  { %v4868_v26 = vmul.f32 %v6989_v11, %v7877_v40  ;;  %v6835_v3 = vpack.c.bf16 %v5602_v14, %v5601_v1  ;;  %v5518_v40 = vpop.permute.xlu0 %5517  ;;  %v5576_v52 = vsel %vm175_vm2, %v7405_v56, %v5492_v31 }
 0xa80   :  { %v5582_v36 = vsel %vm5581_vm4, %v5573_v2, %v5518_v40 }
 0xa81   :  { %6785 = vmatmul.mubr.msk.f32.vlgmr.msra.gmra.mrb[66].mxu0 %vm175_vm2, %v4868_v26  ;;  %6836 = vmatprep.subr.bf16.mxu1 %v6835_v3 }
 0xa82   :  { %6838 = vmatpush3.bf16.msra.mxu1 %v6835_v3  ;;  %v5524_v41 = vpop.permute.xlu1 %5523 }
 0xa83   :  { %v5490_v30 = vpop.permute.xlu0 %5489  ;;  %v5585_v9 = vsel %vm5581_vm4, %v5576_v52, %v5524_v41 }
 0xa84   :  { %v5575_v63 = vsel %vm175_vm2, %v7403_v54, %v5490_v30 }
 0xa86   :  { %v5496_v47 = vpop.permute.xlu1 %5495 }
 0xa87   :  { %v5522_v39 = vpop.permute.xlu0 %5521  ;;  %v5578_v56 = vsel %vm175_vm2, %v7407_v58, %v5496_v47 }
 0xa88   :  { %v5584_v48 = vsel %vm5581_vm4, %v5575_v63, %v5522_v39 }
 0xa8a   :  { %v5528_v53 = vpop.permute.xlu1 %5527 }
 0xa8b   :  { %v5494_v43 = vpop.permute.xlu0 %5493  ;;  %v5587_v12 = vsel %vm5581_vm4, %v5578_v56, %v5528_v53 }
 0xa8c   :  { %v5577_v54 = vsel %vm175_vm2, %v7412_v5, %v5494_v43 }
 0xa8e   :  { %v5500_v16 = vpop.permute.xlu1 %5499 }
 0xa8f   :  { %v5526_v51 = vpop.permute.xlu0 %5525  ;;  %v5580_v58 = vsel %vm175_vm2, %v7409_v60, %v5500_v16  ;;  %v5748_v60 = vld [vmem:[%s8091_s5 + $0x8] sm:$0xff] }
 0xa90   :  { %v5586_v61 = vsel %vm5581_vm4, %v5577_v54, %v5526_v51 }
 0xa92   :  { %v5532_v32 = vpop.permute.xlu1 %5531 }
 0xa93   :  { %v5498_v45 = vpop.permute.xlu0 %5497  ;;  %v5589_v14 = vsel %vm5581_vm4, %v5580_v58, %v5532_v32 }
 0xa94   :  { %v5579_v5 = vsel %vm175_vm2, %v7414_v8, %v5498_v45  ;;  %v7054_v45 = vmov 0  }
 0xa95   :  { %6860 = vset.pattern.permute.xlu1 %v7054_v45  ;;  %6861 = vset.pattern.permute.xlu0 %v7054_v45 }
 0xa97   :  { %v5530_v20 = vpop.permute.xlu0 %5529 }
 0xa98   :  { %v5588_v26 = vsel %vm5581_vm4, %v5579_v5, %v5530_v20 }
 0xb42   :  { %v4941_v7 = vpop.f32.mrb[60].mxu1 }
 0xb43   :  { %v6751_v46 = vpop.f32.mrb[61].mxu1  ;;  %5549 = vrot.lane.b32.xlu0 %v4941_v7, %s7053_s16 }
 0xb44   :  { %v5747_v46 = vld [vmem:[%s8091_s5] sm:$0xff] }
 0xb46   :  { %v5093_v55 = vpop.f32.mrb[62].mxu1 }
 0xb47   :  { %v5017_v49 = vpop.f32.mrb[60].mxu0  ;;  %v6761_v59 = vpop.f32.mrb[63].mxu1  ;;  %5553 = vrot.lane.b32.xlu0 %v5093_v55, %s7053_s16  ;;  %v6839_v55 = vpack.c.bf16 %v5748_v60, %v5747_v46 }
 0xb48   :  { %5551 = vrot.lane.b32.xlu1 %v5017_v49, %s7053_s16  ;;  %v6756_v13 = vpop.f32.mrb[61].mxu0  ;;  %v6268_v49 = vld [vmem:[%s8092_s4] ss:$0 sm:$0xff] }
 0xb49   :  { %6840 = vmatprep.subr.bf16.mxu0 %v6839_v55 }
 0xb4a   :  { %6842 = vmatpush3.bf16.msra.mxu0 %v6839_v55 }
 0xb4b   :  { %v5245_v19 = vpop.f32.mrb[64].mxu1 }
 0xb4c   :  { %v5169_v34 = vpop.f32.mrb[62].mxu0  ;;  %5557 = vrot.lane.b32.xlu0 %v5245_v19, %s7053_s16  ;;  %v6771_v25 = vpop.f32.mrb[65].mxu1 }
 0xb4d   :  { %5555 = vrot.lane.b32.xlu1 %v5169_v34, %s7053_s16  ;;  %v6766_v33 = vpop.f32.mrb[63].mxu0 }
 0xb4f   :  { %v5397_v35 = vpop.f32.mrb[66].mxu1 }
 0xb50   :  { %v5321_v6 = vpop.f32.mrb[64].mxu0  ;;  %5561 = vrot.lane.b32.xlu0 %v5397_v35, %s7053_s16  ;;  %v6781_v15 = vpop.f32.mrb[67].mxu1 }
 0xb51   :  { %5559 = vrot.lane.b32.xlu1 %v5321_v6, %s7053_s16  ;;  %v6776_v17 = vpop.f32.mrb[65].mxu0 }
 0xb54   :  { %v5473_v62 = vpop.f32.mrb[66].mxu0 }
 0xb55   :  { %5563 = vrot.lane.b32.xlu1 %v5473_v62, %s7053_s16  ;;  %v6786_v37 = vpop.f32.mrb[67].mxu0 }
 0xbb5   :  { %v5550_v29 = vpop.permute.xlu0 %5549 }
 0xbb6   :  { %v7949_v38 = vsel %vm5590_vm3, %v5582_v36, %v5550_v29 }
 0xbb7   :  { %6795 = vmatprep.mubr.msk.f32.mxu1 %vm42_vm0, %v7949_v38 }
 0xbb9   :  { %v5554_v22 = vpop.permute.xlu0 %5553 }
 0xbba   :  { %v5552_v57 = vpop.permute.xlu1 %5551  ;;  %v7960_v24 = vsel %vm5590_vm3, %v5584_v48, %v5554_v22 }
 0xbbb   :  { %v7963_v23 = vsel %vm5590_vm3, %v5583_v50, %v5552_v57 }
 0xbbc   :  { %6796 = vmatmul.mubr.msk.f32.vlgmr.msra.gmra.mrb[68].mxu1 %vm42_vm0, %v7963_v23 }
 0xbbd   :  { %6798 = vmatprep.mubr.msk.f32.mxu1 %vm42_vm0, %v7960_v24 }
 0xbbe   :  { %v5558_v21 = vpop.permute.xlu0 %5557 }
 0xbbf   :  { %v5556_v27 = vpop.permute.xlu1 %5555  ;;  %v7976_v10 = vsel %vm5590_vm3, %v5586_v61, %v5558_v21 }
 0xbc0   :  { %v7979_v11 = vsel %vm5590_vm3, %v5585_v9, %v5556_v27 }
 0xbc1   :  { %6799 = vmatmul.mubr.msk.f32.gmra.mrb[70].mxu1 %vm42_vm0, %v7979_v11 }
 0xbc2   :  { %6801 = vmatprep.mubr.msk.f32.mxu1 %vm42_vm0, %v7976_v10  ;;  %v5562_v28 = vpop.permute.xlu0 %5561 }
 0xbc3   :  { %v5560_v4 = vpop.permute.xlu1 %5559  ;;  %v7992_v1 = vsel %vm5590_vm3, %v5588_v26, %v5562_v28 }
 0xbc4   :  { %v7995_v8 = vsel %vm5590_vm3, %v5587_v12, %v5560_v4 }
 0xbc5   :  { %6802 = vmatmul.mubr.msk.f32.gmra.mrb[72].mxu1 %vm42_vm0, %v7995_v8 }
 0xbc6   :  { %6804 = vmatprep.mubr.msk.f32.mxu1 %vm42_vm0, %v7992_v1 }
 0xbc7   :  { %v5564_v3 = vpop.permute.xlu1 %5563 }
 0xbc8   :  { %v8005_v7 = vsel %vm5590_vm3, %v5589_v14, %v5564_v3 }
 0xbc9   :  { %6805 = vmatmul.mubr.msk.f32.gmra.mrb[74].mxu1 %vm42_vm0, %v8005_v7 }
 0xc8f   :  { %v6797_v59 = vpop.f32.mrb[68].mxu1 }
 0xc90   :  { %v5706_v13 = vadd.f32 %v6797_v59, %v6268_v49  ;;  %v5700_v19 = vpop.f32.mrb[69].mxu1 }
 0xc91   :  { %v5701_v34 = vadd.f32 %v6268_v49, %v5700_v19 }
 0xc93   :  { %6990 = vtanh.f32 %v5701_v34 }
 0xc94   :  { %6992 = vtanh.f32 %v5706_v13  ;;  %v6800_v25 = vpop.f32.mrb[70].mxu1 }
 0xc95   :  { %v5716_v33 = vadd.f32 %v6800_v25, %v6268_v49  ;;  %v5710_v35 = vpop.f32.mrb[71].mxu1 }
 0xc96   :  { %v5711_v6 = vadd.f32 %v6268_v49, %v5710_v35 }
 0xc98   :  { %6994 = vtanh.f32 %v5711_v6  ;;  %v6803_v15 = vpop.f32.mrb[72].mxu1 }
 0xc99   :  { %6996 = vtanh.f32 %v5716_v33  ;;  %v5726_v17 = vadd.f32 %v6803_v15, %v6268_v49  ;;  %v5720_v62 = vpop.f32.mrb[73].mxu1 }
 0xc9a   :  { %v5721_v37 = vadd.f32 %v6268_v49, %v5720_v62 }
 0xc9c   :  { %6998 = vtanh.f32 %v5721_v37  ;;  %v6806_v0 = vpop.f32.mrb[74].mxu1 }
 0xc9d   :  { %v6991_v42 = vpop.eup %6990  ;;  %7000 = vtanh.f32 %v5726_v17  ;;  %v5736_v40 = vadd.f32 %v6806_v0, %v6268_v49  ;;  %v5730_v18 = vpop.f32.mrb[75].mxu1 }
 0xc9e   :  { %v6993_v30 = vpop.eup %6992  ;;  %v5731_v31 = vadd.f32 %v6268_v49, %v5730_v18  ;;  %6811 = vmatprep.mubr.msk.f32.mxu0 %vm5581_vm4, %v6991_v42 }
 0xc9f   :  { %6812 = vmatmul.mubr.msk.f32.vlgmr.msra.gmra.mrb[68].mxu0 %vm5581_vm4, %v6993_v30 }
 0xca0   :  { %7002 = vtanh.f32 %v5731_v31 }
 0xca1   :  { %7004 = vtanh.f32 %v5736_v40 }
 0xca2   :  { %v6995_v39 = vpop.eup %6994 }
 0xca3   :  { %v6997_v41 = vpop.eup %6996  ;;  %6814 = vmatprep.mubr.msk.f32.mxu0 %vm5581_vm4, %v6995_v39 }
 0xca4   :  { %6815 = vmatmul.mubr.msk.f32.gmra.mrb[70].mxu0 %vm5581_vm4, %v6997_v41 }
 0xca6   :  { %v6999_v43 = vpop.eup %6998 }
 0xca7   :  { %v7001_v47 = vpop.eup %7000  ;;  %6817 = vmatprep.mubr.msk.f32.mxu0 %vm5581_vm4, %v6999_v43 }
 0xca8   :  { %6818 = vmatmul.mubr.msk.f32.gmra.mrb[72].mxu0 %vm5581_vm4, %v7001_v47 }
 0xcaa   :  { %v7003_v51 = vpop.eup %7002 }
 0xcab   :  { %v7005_v53 = vpop.eup %7004  ;;  %6820 = vmatprep.mubr.msk.f32.mxu0 %vm5581_vm4, %v7003_v51 }
 0xcac   :  { %6821 = vmatmul.mubr.msk.f32.gmra.mrb[74].mxu0 %vm5581_vm4, %v7005_v53 }
 0xd72   :  { %v6813_v16 = vpop.f32.mrb[68].mxu0 }
 0xd73   :  { %v5886_v20 = vsel %vm5878_vm5, %v6813_v16, -inf  ;;  %v5839_v2 = vpop.f32.mrb[69].mxu0 }
 0xd74   :  { %v5887_v36 = vrot.slane %v5886_v20, 4  ;;  %v5879_v29 = vsel %vm5878_vm5, %v5839_v2, -inf }
 0xd75   :  { %v5880_v32 = vrot.slane %v5879_v29, 4 }
 0xd76   :  { %v5888_v63 = vmax.f32 %v5886_v20, %v5887_v36 }
 0xd77   :  { %v5881_v44 = vmax.f32 %v5879_v29, %v5880_v32  ;;  %v6816_v48 = vpop.f32.mrb[70].mxu0 }
 0xd78   :  { %v5889_v22 = vrot.slane %v5888_v63, 2  ;;  %v5900_v50 = vsel %vm5878_vm5, %v6816_v48, -inf  ;;  %v5849_v57 = vpop.f32.mrb[71].mxu0 }
 0xd79   :  { %v5882_v54 = vrot.slane %v5881_v44, 2  ;;  %v5901_v52 = vrot.slane %v5900_v50, 4  ;;  %v5893_v61 = vsel %vm5878_vm5, %v5849_v57, -inf }
 0xd7a   :  { %v5890_v21 = vmax.f32 %v5888_v63, %v5889_v22  ;;  %v5894_v9 = vrot.slane %v5893_v61, 4 }
 0xd7b   :  { %v5883_v27 = vmax.f32 %v5881_v44, %v5882_v54  ;;  %v5902_v5 = vmax.f32 %v5900_v50, %v5901_v52  ;;  %v6819_v56 = vpop.f32.mrb[72].mxu0 }
 0xd7c   :  { %v5891_v26 = vrot.slane %v5890_v21, 1  ;;  %v5895_v28 = vmax.f32 %v5893_v61, %v5894_v9  ;;  %v5914_v12 = vsel %vm5878_vm5, %v6819_v56, -inf  ;;  %v5859_v4 = vpop.f32.mrb[73].mxu0 }
 0xd7d   :  { %v5884_v58 = vrot.slane %v5883_v27, 1  ;;  %v5903_v14 = vrot.slane %v5902_v5, 2  ;;  %v5915_v3 = vrot.slane %v5914_v12, 4  ;;  %v5907_v46 = vsel %vm5878_vm5, %v5859_v4, -inf }
 0xd7e   :  { %v5892_v60 = vmax.f32 %v5890_v21, %v5891_v26  ;;  %v5896_v55 = vrot.slane %v5895_v28, 2  ;;  %v5908_v49 = vrot.slane %v5907_v46, 4 }
 0xd7f   :  { %v5885_v59 = vmax.f32 %v5883_v27, %v5884_v58  ;;  %v5904_v13 = vmax.f32 %v5902_v5, %v5903_v14  ;;  %v5916_v19 = vmax.f32 %v5914_v12, %v5915_v3  ;;  %v6822_v34 = vpop.f32.mrb[74].mxu0 }
 0xd80   :  { %v5936_v25 = vsub.f32 %v6813_v16, %v5892_v60  ;;  %v5897_v33 = vmax.f32 %v5895_v28, %v5896_v55  ;;  %v5909_v35 = vmax.f32 %v5907_v46, %v5908_v49  ;;  %v5928_v6 = vsel %vm5878_vm5, %v6822_v34, -inf  ;;  %v5869_v15 = vpop.f32.mrb[75].mxu0 }
 0xd81   :  { %v5935_v17 = vsub.f32 %v5839_v2, %v5885_v59  ;;  %v5905_v62 = vrot.slane %v5904_v13, 1  ;;  %v5917_v37 = vrot.slane %v5916_v19, 2  ;;  %v5929_v0 = vrot.slane %v5928_v6, 4 }
 0xd82   :  { %v5945_v42 = vmul.f32 1.442695, %v5936_v25  ;;  %v5898_v40 = vrot.slane %v5897_v33, 1  ;;  %v5910_v18 = vrot.slane %v5909_v35, 2  ;;  %v5921_v30 = vsel %vm5878_vm5, %v5869_v15, -inf }
 0xd83   :  { %v5943_v31 = vmul.f32 1.442695, %v5935_v17  ;;  %v5906_v39 = vmax.f32 %v5904_v13, %v5905_v62  ;;  %v5918_v41 = vmax.f32 %v5916_v19, %v5917_v37  ;;  %v5930_v43 = vmax.f32 %v5928_v6, %v5929_v0 }
 0xd84   :  { %7006 = vpow2.f32 %v5945_v42  ;;  %v5899_v47 = vmax.f32 %v5897_v33, %v5898_v40  ;;  %v5911_v51 = vmax.f32 %v5909_v35, %v5910_v18  ;;  %v5922_v53 = vrot.slane %v5921_v30, 4 }
 0xd85   :  { %7008 = vpow2.f32 %v5943_v31  ;;  %v5938_v45 = vsub.f32 %v6816_v48, %v5906_v39  ;;  %v5919_v16 = vrot.slane %v5918_v41, 1  ;;  %v5931_v20 = vrot.slane %v5930_v43, 2 }
 0xd86   :  { %v5937_v2 = vsub.f32 %v5849_v57, %v5899_v47  ;;  %v5912_v36 = vrot.slane %v5911_v51, 1  ;;  %v5923_v29 = vmax.f32 %v5921_v30, %v5922_v53 }
 0xd87   :  { %v5949_v32 = vmul.f32 1.442695, %v5938_v45  ;;  %v5920_v63 = vmax.f32 %v5918_v41, %v5919_v16  ;;  %v5932_v44 = vmax.f32 %v5930_v43, %v5931_v20 }
 0xd88   :  { %v5947_v22 = vmul.f32 1.442695, %v5937_v2  ;;  %v5913_v50 = vmax.f32 %v5911_v51, %v5912_v36  ;;  %v5924_v54 = vrot.slane %v5923_v29, 2 }
 0xd89   :  { %7010 = vpow2.f32 %v5949_v32  ;;  %v5940_v52 = vsub.f32 %v6819_v56, %v5920_v63  ;;  %v5933_v61 = vrot.slane %v5932_v44, 1 }
 0xd8a   :  { %7012 = vpow2.f32 %v5947_v22  ;;  %v5939_v21 = vsub.f32 %v5859_v4, %v5913_v50  ;;  %v5925_v9 = vmax.f32 %v5923_v29, %v5924_v54 }
 0xd8b   :  { %v5953_v27 = vmul.f32 1.442695, %v5940_v52  ;;  %v5934_v5 = vmax.f32 %v5932_v44, %v5933_v61 }
 0xd8c   :  { %v5951_v48 = vmul.f32 1.442695, %v5939_v21  ;;  %v5926_v26 = vrot.slane %v5925_v9, 1 }
 0xd8d   :  { %7014 = vpow2.f32 %v5953_v27  ;;  %v5942_v57 = vsub.f32 %v6822_v34, %v5934_v5 }
 0xd8e   :  { %v8034_v28 = vpop.eup %7006  ;;  %7016 = vpow2.f32 %v5951_v48  ;;  %v5927_v12 = vmax.f32 %v5925_v9, %v5926_v26 }
 0xd8f   :  { %v8036_v58 = vpop.eup %7008  ;;  %v5966_v14 = vsel %vm5878_vm5, %v8034_v28, 0.0  ;;  %v5957_v56 = vmul.f32 1.442695, %v5942_v57 }
 0xd90   :  { %v5967_v3 = vrot.slane %v5966_v14, 4  ;;  %v5959_v4 = vsel %vm5878_vm5, %v8036_v58, 0.0  ;;  %v5941_v46 = vsub.f32 %v5869_v15, %v5927_v12 }
 0xd91   :  { %v5960_v60 = vrot.slane %v5959_v4, 4  ;;  %7018 = vpow2.f32 %v5957_v56 }
 0xd92   :  { %v5968_v55 = vadd.f32 %v5967_v3, %v5966_v14  ;;  %v5955_v49 = vmul.f32 1.442695, %v5941_v46 }
 0xd93   :  { %v8042_v59 = vpop.eup %7010  ;;  %v5961_v13 = vadd.f32 %v5960_v60, %v5959_v4 }
 0xd94   :  { %v8044_v19 = vpop.eup %7012  ;;  %v5969_v34 = vrot.slane %v5968_v55, 2  ;;  %v5980_v25 = vsel %vm5878_vm5, %v8042_v59, 0.0  ;;  %7020 = vpow2.f32 %v5955_v49 }
 0xd95   :  { %v5962_v33 = vrot.slane %v5961_v13, 2  ;;  %v5981_v35 = vrot.slane %v5980_v25, 4  ;;  %v5973_v6 = vsel %vm5878_vm5, %v8044_v19, 0.0 }
 0xd96   :  { %v5970_v15 = vadd.f32 %v5969_v34, %v5968_v55  ;;  %v5974_v17 = vrot.slane %v5973_v6, 4 }
 0xd97   :  { %v8050_v62 = vpop.eup %7014  ;;  %v5963_v37 = vadd.f32 %v5962_v33, %v5961_v13  ;;  %v5982_v0 = vadd.f32 %v5981_v35, %v5980_v25 }
 0xd98   :  { %v8052_v42 = vpop.eup %7016  ;;  %v5971_v40 = vrot.slane %v5970_v15, 1  ;;  %v5975_v18 = vadd.f32 %v5974_v17, %v5973_v6  ;;  %v5994_v30 = vsel %vm5878_vm5, %v8050_v62, 0.0 }
 0xd99   :  { %v5964_v31 = vrot.slane %v5963_v37, 1  ;;  %v5983_v39 = vrot.slane %v5982_v0, 2  ;;  %v5995_v41 = vrot.slane %v5994_v30, 4  ;;  %v5987_v43 = vsel %vm5878_vm5, %v8052_v42, 0.0 }
 0xd9a   :  { %v5972_v47 = vadd.f32 %v5971_v40, %v5970_v15  ;;  %v5976_v51 = vrot.slane %v5975_v18, 2  ;;  %v5988_v53 = vrot.slane %v5987_v43, 4 }
 0xd9b   :  { %v7019_v45 = vpop.eup %7018  ;;  %v5965_v16 = vadd.f32 %v5964_v31, %v5963_v37  ;;  %v5984_v20 = vadd.f32 %v5983_v39, %v5982_v0  ;;  %v5996_v2 = vadd.f32 %v5995_v41, %v5994_v30 }
 0xd9c   :  { %v5977_v36 = vadd.f32 %v5976_v51, %v5975_v18  ;;  %v5989_v29 = vadd.f32 %v5988_v53, %v5987_v43  ;;  %v6008_v32 = vsel %vm5878_vm5, %v7019_v45, 0.0  ;;  %7022 = vrcp.f32 %v5972_v47 }
 0xd9d   :  { %v5985_v63 = vrot.slane %v5984_v20, 1  ;;  %v5997_v44 = vrot.slane %v5996_v2, 2  ;;  %v6009_v22 = vrot.slane %v6008_v32, 4  ;;  %7024 = vrcp.f32 %v5965_v16 }
 0xd9e   :  { %v7021_v50 = vpop.eup %7020  ;;  %v5978_v54 = vrot.slane %v5977_v36, 1  ;;  %v5990_v52 = vrot.slane %v5989_v29, 2 }
 0xd9f   :  { %v5986_v61 = vadd.f32 %v5985_v63, %v5984_v20  ;;  %v5998_v21 = vadd.f32 %v5997_v44, %v5996_v2  ;;  %v6010_v9 = vadd.f32 %v6009_v22, %v6008_v32  ;;  %v6001_v27 = vsel %vm5878_vm5, %v7021_v50, 0.0 }
 0xda0   :  { %v5979_v5 = vadd.f32 %v5978_v54, %v5977_v36  ;;  %v5991_v48 = vadd.f32 %v5990_v52, %v5989_v29  ;;  %v6002_v26 = vrot.slane %v6001_v27, 4 }
 0xda1   :  { %v5999_v57 = vrot.slane %v5998_v21, 1  ;;  %v6011_v12 = vrot.slane %v6010_v9, 2  ;;  %7026 = vrcp.f32 %v5986_v61 }
 0xda2   :  { %v5992_v14 = vrot.slane %v5991_v48, 1  ;;  %v6003_v56 = vadd.f32 %v6002_v26, %v6001_v27  ;;  %7028 = vrcp.f32 %v5979_v5 }
 0xda3   :  { %v6000_v3 = vadd.f32 %v5999_v57, %v5998_v21  ;;  %v6012_v4 = vadd.f32 %v6011_v12, %v6010_v9 }
 0xda4   :  { %v5993_v46 = vadd.f32 %v5992_v14, %v5991_v48  ;;  %v6004_v60 = vrot.slane %v6003_v56, 2 }
 0xda5   :  { %v6013_v55 = vrot.slane %v6012_v4, 1  ;;  %7030 = vrcp.f32 %v6000_v3 }
 0xda6   :  { %v7023_v49 = vpop.eup %7022  ;;  %v6005_v13 = vadd.f32 %v6004_v60, %v6003_v56  ;;  %7032 = vrcp.f32 %v5993_v46 }
 0xda7   :  { %v7025_v34 = vpop.eup %7024  ;;  %v6014_v25 = vadd.f32 %v6013_v55, %v6012_v4  ;;  %v6024_v33 = vmul.f32 %v7023_v49, %v8034_v28 }
 0xda8   :  { %v6006_v35 = vrot.slane %v6005_v13, 1  ;;  %v6023_v6 = vmul.f32 %v7025_v34, %v8036_v58 }
 0xda9   :  { %6038 = vperm.xlu1 %6860, %v6024_v33   ;;  %7034 = vrcp.f32 %v6014_v25 }
 0xdaa   :  { %v6007_v15 = vadd.f32 %v6006_v35, %v6005_v13  ;;  %6033 = vperm.xlu0 %6861, %v6023_v6  }
 0xdab   :  { %v7027_v17 = vpop.eup %7026 }
 0xdac   :  { %v7029_v37 = vpop.eup %7028  ;;  %7036 = vrcp.f32 %v6007_v15  ;;  %v6026_v0 = vmul.f32 %v7027_v17, %v8042_v59 }
 0xdad   :  { %v6025_v40 = vmul.f32 %v7029_v37, %v8044_v19 }
 0xdae   :  { %6048 = vperm.xlu0 %6861, %v6026_v0  }
 0xdaf   :  { %v7031_v18 = vpop.eup %7030  ;;  %6043 = vperm.xlu1 %6860, %v6025_v40  }
 0xdb0   :  { %v7033_v30 = vpop.eup %7032  ;;  %v6028_v28 = vmul.f32 %v7031_v18, %v8050_v62 }
 0xdb1   :  { %v6027_v31 = vmul.f32 %v7033_v30, %v8052_v42 }
 0xdb2   :  { %6058 = vperm.xlu0 %6861, %v6028_v28  }
 0xdb3   :  { %v7035_v58 = vpop.eup %7034  ;;  %6053 = vperm.xlu1 %6860, %v6027_v31  }
 0xdb4   :  { %v6030_v39 = vmul.f32 %v7035_v58, %v7019_v45 }
 0xdb6   :  { %v7037_v41 = vpop.eup %7036  ;;  %6068 = vperm.xlu0 %6861, %v6030_v39  }
 0xdb7   :  { %v6029_v43 = vmul.f32 %v7037_v41, %v7021_v50 }
 0xdb9   :  { %6063 = vperm.xlu1 %6860, %v6029_v43  }
 0xe28   :  { %v6039_v47 = vpop.permute.xlu1 %6038 }
 0xe29   :  { %v6072_v59 = vmul.f32 %v6039_v47, %v7963_v23  ;;  %v6034_v19 = vpop.permute.xlu0 %6033 }
 0xe2a   :  { %v6071_v51 = vmul.f32 %v6034_v19, %v7949_v38 }
 0xe2b   :  { %v6086_v53 = vsel %vm42_vm0, %v6072_v59, 0.0 }
 0xe2c   :  { %v6087_v16 = vrot.slane %v6086_v53, 4  ;;  %v6079_v62 = vsel %vm42_vm0, %v6071_v51, 0.0 }
 0xe2d   :  { %v6080_v42 = vrot.slane %v6079_v62, 4  ;;  %v6049_v20 = vpop.permute.xlu0 %6048 }
 0xe2e   :  { %v6088_v2 = vadd.f32 %v6087_v16, %v6086_v53  ;;  %v6044_v36 = vpop.permute.xlu1 %6043  ;;  %v6074_v45 = vmul.f32 %v6049_v20, %v7979_v11 }
 0xe2f   :  { %v6081_v29 = vadd.f32 %v6080_v42, %v6079_v62  ;;  %v6073_v32 = vmul.f32 %v6044_v36, %v7960_v24 }
 0xe30   :  { %v6089_v63 = vrot.slane %v6088_v2, 2  ;;  %v6100_v23 = vsel %vm42_vm0, %v6074_v45, 0.0 }
 0xe31   :  { %v6082_v44 = vrot.slane %v6081_v29, 2  ;;  %v6093_v38 = vsel %vm42_vm0, %v6073_v32, 0.0  ;;  %v6101_v22 = vrot.slane %v6100_v23, 4  ;;  %v6059_v50 = vpop.permute.xlu0 %6058 }
 0xe32   :  { %v6090_v54 = vadd.f32 %v6089_v63, %v6088_v2  ;;  %v6094_v52 = vrot.slane %v6093_v38, 4  ;;  %v6054_v61 = vpop.permute.xlu1 %6053  ;;  %v6076_v21 = vmul.f32 %v6059_v50, %v7995_v8 }
 0xe33   :  { %v6083_v9 = vadd.f32 %v6082_v44, %v6081_v29  ;;  %v6102_v27 = vadd.f32 %v6101_v22, %v6100_v23  ;;  %v6075_v11 = vmul.f32 %v6054_v61, %v7976_v10 }
 0xe34   :  { %v6095_v5 = vadd.f32 %v6094_v52, %v6093_v38  ;;  %v6114_v24 = vsel %vm42_vm0, %v6076_v21, 0.0  ;;  %v6091_v14 = vrot.slane %v6090_v54, 1 }
 0xe35   :  { %v6103_v48 = vrot.slane %v6102_v27, 2  ;;  %v6107_v26 = vsel %vm42_vm0, %v6075_v11, 0.0  ;;  %v6115_v57 = vrot.slane %v6114_v24, 4  ;;  %v6069_v12 = vpop.permute.xlu0 %6068  ;;  %v6084_v46 = vrot.slane %v6083_v9, 1 }
 0xe36   :  { %v6096_v56 = vrot.slane %v6095_v5, 2  ;;  %v6108_v3 = vrot.slane %v6107_v26, 4  ;;  %v6078_v4 = vmul.f32 %v6069_v12, %v8005_v7  ;;  %v6092_v33 = vadd.f32 %v6091_v14, %v6090_v54 }
 0xe37   :  { %v6104_v60 = vadd.f32 %v6103_v48, %v6102_v27  ;;  %v6116_v8 = vadd.f32 %v6115_v57, %v6114_v24  ;;  %v6085_v17 = vadd.f32 %v6084_v46, %v6083_v9 }
 0xe38   :  { %v6097_v55 = vadd.f32 %v6096_v56, %v6095_v5  ;;  %v6109_v49 = vadd.f32 %v6108_v3, %v6107_v26  ;;  %v6064_v13 = vpop.permute.xlu1 %6063  ;;  %v6128_v10 = vsel %vm42_vm0, %v6078_v4, 0.0 }
 0xe39   :  { %v6117_v34 = vrot.slane %v6116_v8, 2  ;;  %v6077_v25 = vmul.f32 %v6064_v13, %v7992_v1  ;;  %v6129_v15 = vrot.slane %v6128_v10, 4  ;;  %v6105_v37 = vrot.slane %v6104_v60, 1 }
 0xe3a   :  { %v6098_v35 = vrot.slane %v6097_v55, 1  ;;  %v6110_v6 = vrot.slane %v6109_v49, 2  ;;  %v6144_v41 = vsel %vm6143_vm6, %v6092_v33, %v6085_v17 }
 0xe3b   :  { %v6118_v0 = vadd.f32 %v6117_v34, %v6116_v8  ;;  %v6121_v7 = vsel %vm42_vm0, %v6077_v25, 0.0  ;;  %v6130_v28 = vadd.f32 %v6129_v15, %v6128_v10  ;;  %v6106_v1 = vadd.f32 %v6105_v37, %v6104_v60 }
 0xe3c   :  { %v6099_v40 = vadd.f32 %v6098_v35, %v6097_v55  ;;  %v6111_v18 = vadd.f32 %v6110_v6, %v6109_v49  ;;  %v6122_v30 = vrot.slane %v6121_v7, 4 }
 0xe3d   :  { %v6131_v39 = vrot.slane %v6130_v28, 2  ;;  %v6119_v43 = vrot.slane %v6118_v0, 1 }
 0xe3e   :  { %v6112_v31 = vrot.slane %v6111_v18, 1  ;;  %v6123_v58 = vadd.f32 %v6122_v30, %v6121_v7  ;;  %v6146_v47 = vsel %vm6145_vm7, %v6099_v40, %v6144_v41 }
 0xe3f   :  { %v6132_v51 = vadd.f32 %v6131_v39, %v6130_v28  ;;  %v6148_v62 = vsel %vm6147_vm8, %v6106_v1, %v6146_v47  ;;  %v6120_v42 = vadd.f32 %v6119_v43, %v6118_v0 }
 0xe40   :  { %v6113_v59 = vadd.f32 %v6112_v31, %v6111_v18  ;;  %v6124_v19 = vrot.slane %v6123_v58, 2 }
 0xe41   :  { %v6133_v16 = vrot.slane %v6132_v51, 1 }
 0xe42   :  { %v6125_v53 = vadd.f32 %v6124_v19, %v6123_v58  ;;  %v6150_v20 = vsel %vm6149_vm9, %v6113_v59, %v6148_v62 }
 0xe43   :  { %v6134_v36 = vadd.f32 %v6133_v16, %v6132_v51  ;;  %v6152_v29 = vsel %vm6151_vm10, %v6120_v42, %v6150_v20 }
 0xe44   :  { %v6126_v2 = vrot.slane %v6125_v53, 1 }
 0xe46   :  { %v6127_v45 = vadd.f32 %v6126_v2, %v6125_v53 }
 0xe48   :  { %v6154_v32 = vsel %vm6153_vm11, %v6127_v45, %v6152_v29 }
 0xe49   :  { %v6156_v63 = vsel %vm6155_vm12, %v6134_v36, %v6154_v32 }
 0xe4a   :  { %6158 = vst.msk [vmem:[%s8093_s6] sm:$0xff] %vm42_vm0, %v6156_v63 }

// kernel: user_encoder_forward.2
= control target key start
LH: loop header
LB: loop body
LE: loop exit
PB: predicated region body
PF: predicated region fallthrough
CT: control target
= control target key end

     0   :  { %vm138_vm0 = vcmask 261120   ;;  %vm425_vm1 = vcmask 64512   ;;  %s20406_s20 = smov 88   ;;  %s20407_s21 = smov 120   ;;  %vm2226_vm3 = vcmask 1043456   ;;  %vm20408_vm4 = vmmov 1   ;;  %s25361_s1 = inlined_call_operand.vmem [shape: f32[32,96], index: 1, kind: input, shape index: {}]   ;;  %s25362_s0 = inlined_call_operand.vmem [shape: f32[16,12,32], index: 0, kind: input, shape index: {}]   ;;  %s25363_s2 = inlined_call_operand.vmem [shape: f32[1,96], index: 2, kind: input, shape index: {}]   ;;  %s25364_s3 = inlined_call_operand.vmem [shape: f32[32,16], index: 3, kind: input, shape index: {}]   ;;  %s25365_s5 = inlined_call_operand.vmem [shape: f32[16,1], index: 5, kind: input, shape index: {}]   ;;  %s25366_s4 = inlined_call_operand.vmem [shape: f32[1,16], index: 4, kind: input, shape index: {}]   ;;  %s25367_s6 = inlined_call_operand.vmem [shape: f32[16,32], index: 6, kind: output, shape index: {}]  }
   0x1   :  { %v103_v0 = vld [vmem:[%s25361_s1] sm:$0xff]  ;;  %v104_v1 = vld [vmem:[%s25361_s1 + $0x8] sm:$0xff]  ;;  %v105_v2 = vld [vmem:[%s25361_s1 + $0x10] sm:$0xff]  ;;  %vm1865_vm6 = vcmask 93184   ;;  %vm1861_vm7 = vcmask 97280   ;;  %s20409_s22 = smov 56  }
   0x2   :  { %v18245_v3 = vpack.c.bf16 %v104_v1, %v103_v0  ;;  %v106_v4 = vld [vmem:[%s25361_s1 + $0x18] sm:$0xff]  ;;  %v23_v5 = vld [vmem:[%s25362_s0] sm:$0xff]  ;;  %v25_v8 = vld [vmem:[%s25362_s0 + $0x10] sm:$0xff]  ;;  %s20410_s23 = smov 80   ;;  %s20411_s24 = smov 112   ;;  %vm13784_vm8 = vcmask 130048  }
   0x3   :  { %v18249_v6 = vpack.c.bf16 %v106_v4, %v105_v2  ;;  %v87_v7 = vcombine.high %v23_v5, %v23_v5  ;;  %v24_v10 = vld [vmem:[%s25362_s0 + $0x8] sm:$0xf]  ;;  %v88_v11 = vcombine.high %v25_v8, %v25_v8  ;;  %v27_v12 = vld [vmem:[%s25362_s0 + $0x20] sm:$0xff]  ;;  %v26_v13 = vld [vmem:[%s25362_s0 + $0x18] sm:$0xf]  ;;  %s20412_s25 = smov 48  }
   0x4   :  { %18246 = vmatprep.subr.bf16.mxu0 %v18245_v3  ;;  %v115_v14 = vcombine.low %v24_v10, %v25_v8  ;;  %v89_v15 = vcombine.high %v27_v12, %v27_v12  ;;  %v29_v17 = vld [vmem:[%s25362_s0 + $0x30] sm:$0xff]  ;;  %v28_v18 = vld [vmem:[%s25362_s0 + $0x28] sm:$0xf]  ;;  %v31_v19 = vld [vmem:[%s25362_s0 + $0x40] sm:$0xff]  ;;  %s20413_s26 = smov 72   ;;  %s20414_s27 = smov 104  }
   0x5   :  { %18248 = vmatpush3.bf16.msra.mxu0 %v18245_v3  ;;  %v114_v9 = vcombine.low %v23_v5, %v87_v7  ;;  %v116_v16 = vcombine.low %v88_v11, %v26_v13  ;;  %v90_v21 = vcombine.high %v29_v17, %v29_v17  ;;  %v118_v22 = vcombine.low %v28_v18, %v29_v17  ;;  %v30_v23 = vld [vmem:[%s25362_s0 + $0x38] sm:$0xf]  ;;  %v33_v25 = vld [vmem:[%s25362_s0 + $0x50] sm:$0xff]  ;;  %v32_v28 = vld [vmem:[%s25362_s0 + $0x48] sm:$0xf]  ;;  %s20415_s28 = smov 40  }
   0x6   :  { %18250 = vmatprep.subr.bf16.mxu0 %v18249_v6  ;;  %v117_v20 = vcombine.low %v27_v12, %v89_v15  ;;  %v91_v24 = vcombine.high %v31_v19, %v31_v19  ;;  %v92_v29 = vcombine.high %v33_v25, %v33_v25  ;;  %v35_v30 = vld [vmem:[%s25362_s0 + $0x60] sm:$0xff]  ;;  %v34_v31 = vld [vmem:[%s25362_s0 + $0x58] sm:$0xf]  ;;  %v121_v32 = vcombine.low %v32_v28, %v33_v25  ;;  %v37_v35 = vld [vmem:[%s25362_s0 + $0x70] sm:$0xff]  ;;  %s20416_s29 = smov 8   ;;  %s20417_s30 = smov 16  }
   0x7   :  { %17229 = vmatprep.mubr.msk.f32.mxu0 %vm138_vm0, %v114_v9  ;;  %v119_v26 = vcombine.low %v90_v21, %v30_v23  ;;  %v93_v33 = vcombine.high %v35_v30, %v35_v30  ;;  %v36_v36 = vld [vmem:[%s25362_s0 + $0x68] sm:$0xf]  ;;  %v39_v37 = vld [vmem:[%s25362_s0 + $0x80] sm:$0xff]  ;;  %v94_v39 = vcombine.high %v37_v35, %v37_v35  ;;  %v38_v41 = vld [vmem:[%s25362_s0 + $0x78] sm:$0xf]  ;;  %s20418_s7 = smov 24  }
   0x8   :  { %v120_v27 = vcombine.low %v31_v19, %v91_v24  ;;  %v122_v34 = vcombine.low %v92_v29, %v34_v31  ;;  %v124_v40 = vcombine.low %v36_v36, %v37_v35  ;;  %v95_v42 = vcombine.high %v39_v37, %v39_v37  ;;  %v41_v43 = vld [vmem:[%s25362_s0 + $0x90] sm:$0xff]  ;;  %v40_v46 = vld [vmem:[%s25362_s0 + $0x88] sm:$0xf]  ;;  %v43_v48 = vld [vmem:[%s25362_s0 + $0xa0] sm:$0xff] }
   0x9   :  { %18252 = vmatpush3.bf16.msra.mxu0 %v18249_v6  ;;  %v123_v38 = vcombine.low %v35_v30, %v93_v33  ;;  %v125_v44 = vcombine.low %v94_v39, %v38_v41  ;;  %v96_v47 = vcombine.high %v41_v43, %v41_v43  ;;  %v42_v49 = vld [vmem:[%s25362_s0 + $0x98] sm:$0xf]  ;;  %v127_v50 = vcombine.low %v40_v46, %v41_v43  ;;  %v45_v53 = vld [vmem:[%s25362_s0 + $0xb0] sm:$0xff]  ;;  %v44_v54 = vld [vmem:[%s25362_s0 + $0xa8] sm:$0xf] }
   0xa   :  { %v126_v45 = vcombine.low %v39_v37, %v95_v42  ;;  %v97_v51 = vcombine.high %v43_v48, %v43_v48  ;;  %v47_v55 = vld [vmem:[%s25362_s0 + $0xc0] sm:$0xff]  ;;  %v98_v57 = vcombine.high %v45_v53, %v45_v53  ;;  %v130_v58 = vcombine.low %v44_v54, %v45_v53  ;;  %v46_v59 = vld [vmem:[%s25362_s0 + $0xb8] sm:$0xf]  ;;  %v49_v61 = vld [vmem:[%s25362_s0 + $0xd0] sm:$0xff] }
   0xb   :  { %v128_v52 = vcombine.low %v96_v47, %v42_v49  ;;  %v99_v60 = vcombine.high %v47_v55, %v47_v55  ;;  %v48_v0 = vld [vmem:[%s25362_s0 + $0xc8] sm:$0xf]  ;;  %v100_v1 = vcombine.high %v49_v61, %v49_v61  ;;  %v51_v2 = vld [vmem:[%s25362_s0 + $0xe0] sm:$0xff]  ;;  %v50_v3 = vld [vmem:[%s25362_s0 + $0xd8] sm:$0xf]  ;;  %vm13817_vm9 = vcmask 195584  }
   0xc   :  { %17230 = vmatmul.mubr.msk.f32.vlgmr.msra.gmra.mrb[0].mxu0 %vm138_vm0, %v115_v14  ;;  %v129_v56 = vcombine.low %v43_v48, %v97_v51  ;;  %v131_v62 = vcombine.low %v98_v57, %v46_v59  ;;  %v133_v4 = vcombine.low %v48_v0, %v49_v61  ;;  %v101_v5 = vcombine.high %v51_v2, %v51_v2  ;;  %v53_v7 = vld [vmem:[%s25362_s0 + $0xf0] sm:$0xff]  ;;  %v52_v8 = vld [vmem:[%s25362_s0 + $0xe8] sm:$0xf]  ;;  %v54_v12 = vld [vmem:[%s25362_s0 + $0xf8] sm:$0xf]  ;;  %s20404_s0 = smov 96  }
   0xd   :  { %17232 = vmatprep.mubr.msk.f32.mxu0 %vm138_vm0, %v116_v16  ;;  %v132_v63 = vcombine.low %v47_v55, %v99_v60  ;;  %v134_v6 = vcombine.low %v100_v1, %v50_v3  ;;  %v102_v10 = vcombine.high %v53_v7, %v53_v7  ;;  %v136_v11 = vcombine.low %v52_v8, %v53_v7  ;;  %v20591_v14 = vld [vmem:[%s25363_s2] ss:$0 sm:$0xff]  ;;  %s20405_s2 = smov 64   ;;  %vm20859_vm2 = vmpackc.low %vm425_vm1, %vm425_vm1 }
   0xe   :  { %v135_v9 = vcombine.low %v51_v2, %v101_v5  ;;  %vm20941_vm5 = vmpackc.low %vm2226_vm3, %vm20408_vm4  ;;  %vm14555_vm10 = vcmask 3072   ;;  %vm14553_vm11 = vcmask 7168   ;;  %vm15916_vm12 = vcmask 257024  }
   0xf   :  { %v137_v13 = vcombine.low %v102_v10, %v54_v12  ;;  %vm16076_vm13 = vcmask 1041409   ;;  %vm16078_vm14 = vcmask 1042434   ;;  %vm16080_vm15 = vcmask 1043459  }
  0x10   :  { %17233 = vmatmul.mubr.msk.f32.gmra.mrb[2].mxu0 %vm138_vm0, %v117_v20  ;;  %vm16086_vm3 = vcmask 1046534   ;;  %vm16088_vm4 = vcmask 1047559  }
  0x11   :  { %17235 = vmatprep.mubr.msk.f32.mxu0 %vm138_vm0, %v118_v22 }
  0x14   :  { %17236 = vmatmul.mubr.msk.f32.gmra.mrb[4].mxu0 %vm138_vm0, %v119_v26 }
  0x15   :  { %17238 = vmatprep.mubr.msk.f32.mxu0 %vm138_vm0, %v120_v27 }
  0x18   :  { %17239 = vmatmul.mubr.msk.f32.gmra.mrb[6].mxu0 %vm138_vm0, %v121_v32 }
  0x19   :  { %17241 = vmatprep.mubr.msk.f32.mxu0 %vm138_vm0, %v122_v34 }
  0x1c   :  { %17242 = vmatmul.mubr.msk.f32.gmra.mrb[8].mxu0 %vm138_vm0, %v123_v38 }
  0x1d   :  { %17244 = vmatprep.mubr.msk.f32.mxu0 %vm138_vm0, %v124_v40 }
  0x20   :  { %17245 = vmatmul.mubr.msk.f32.gmra.mrb[10].mxu0 %vm138_vm0, %v125_v44 }
  0x21   :  { %17247 = vmatprep.mubr.msk.f32.mxu0 %vm138_vm0, %v126_v45 }
  0x24   :  { %17248 = vmatmul.mubr.msk.f32.gmra.mrb[12].mxu0 %vm138_vm0, %v127_v50 }
  0x25   :  { %17250 = vmatprep.mubr.msk.f32.mxu0 %vm138_vm0, %v128_v52 }
  0x28   :  { %17251 = vmatmul.mubr.msk.f32.gmra.mrb[14].mxu0 %vm138_vm0, %v129_v56 }
  0x29   :  { %17253 = vmatprep.mubr.msk.f32.mxu0 %vm138_vm0, %v130_v58 }
  0x2c   :  { %17254 = vmatmul.mubr.msk.f32.gmra.mrb[16].mxu0 %vm138_vm0, %v131_v62 }
  0x2d   :  { %17256 = vmatprep.mubr.msk.f32.mxu0 %vm138_vm0, %v132_v63 }
  0x30   :  { %17257 = vmatmul.mubr.msk.f32.gmra.mrb[18].mxu0 %vm138_vm0, %v133_v4 }
  0x31   :  { %17259 = vmatprep.mubr.msk.f32.mxu0 %vm138_vm0, %v134_v6 }
  0x34   :  { %17260 = vmatmul.mubr.msk.f32.gmra.mrb[20].mxu0 %vm138_vm0, %v135_v9 }
  0x35   :  { %17262 = vmatprep.mubr.msk.f32.mxu0 %vm138_vm0, %v136_v11 }
  0x38   :  { %17263 = vmatmul.mubr.msk.f32.gmra.mrb[22].mxu0 %vm138_vm0, %v137_v13 }
  0xdf   :  { %v17231_v15 = vpop.f32.mrb[0].mxu0 }
  0xe0   :  { %v253_v16 = vpop.f32.mrb[1].mxu0  ;;  %v20594_v17 = vadd.f32 %v17231_v15, %v20591_v14 }
  0xe1   :  { %v254_v18 = vadd.f32 %v20591_v14, %v253_v16 }
  0xe2   :  { %25565 = vst [vmem:[#allocation2_spill] sm:$0xff] %v20594_v17  ;;  %v397_v25 = vcombine.high %v20594_v17, %v20594_v17 }
  0xe3   :  { %v396_v19 = vcombine.high %v254_v18, %v254_v18  ;;  %v17234_v20 = vpop.f32.mrb[2].mxu0 }
  0xe4   :  { %v269_v21 = vadd.f32 %v17234_v20, %v20591_v14  ;;  %v263_v22 = vpop.f32.mrb[3].mxu0 }
  0xe5   :  { %v20598_v23 = vcombine.low %v254_v18, %v396_v19  ;;  %v264_v24 = vadd.f32 %v20591_v14, %v263_v22 }
  0xe6   :  { %v399_v26 = vcombine.high %v269_v21, %v269_v21 }
  0xe7   :  { %25566 = vst [vmem:[#allocation3_spill] sm:$0xff] %v20598_v23  ;;  %v20603_v27 = vcombine.high %v264_v24, %v264_v24  ;;  %v20605_v28 = vcombine.low %v397_v25, %v264_v24  ;;  %v17237_v29 = vpop.f32.mrb[4].mxu0  ;;  %17269 = vmatprep.mubr.msk.f32.mxu1 %vm425_vm1, %v20598_v23  ;;  %v20611_v30 = vpack.i.bf16 %v20594_v17, %v20598_v23 }
  0xe8   :  { %v20613_v31 = vcombine.low %v269_v21, %v399_v26  ;;  %v279_v32 = vadd.f32 %v17237_v29, %v20591_v14  ;;  %v273_v33 = vpop.f32.mrb[5].mxu0 }
  0xe9   :  { %25567 = vst [vmem:[#allocation4_spill] sm:$0xff] %v20603_v27  ;;  %25568 = vst [vmem:[#allocation5_spill] sm:$0xff] %v20605_v28  ;;  %v20617_v34 = vadd.f32 %v20591_v14, %v273_v33  ;;  %19051 = vrot.lane.b32.xlu0 %v20611_v30, %s20404_s0  ;;  %v20629_v38 = vpack.i.bf16 %v20603_v27, %v20605_v28 }
  0xea   :  { %25569 = vst [vmem:[#allocation6_spill] sm:$0xff] %v20611_v30  ;;  %25570 = vst [vmem:[#allocation7_spill] sm:$0xff] %v20613_v31  ;;  %v20621_v35 = vcombine.high %v279_v32, %v279_v32 }
  0xeb   :  { %25571 = vst [vmem:[#allocation8_spill] sm:$0xff] %v20617_v34  ;;  %v17240_v36 = vpop.f32.mrb[6].mxu0  ;;  %v20625_v37 = vpack.i.bf16 %v20617_v34, %v20613_v31  ;;  %25574 = vst [vmem:[#allocation11_spill] sm:$0xff] %v20629_v38  ;;  %v400_v39 = vcombine.high %v20617_v34, %v20617_v34 }
  0xec   :  { %25572 = vst [vmem:[#allocation9_spill] sm:$0xff] %v20621_v35  ;;  %v283_v40 = vpop.f32.mrb[7].mxu0  ;;  %v20634_v41 = vadd.f32 %v17240_v36, %v20591_v14 }
  0xed   :  { %25573 = vst [vmem:[#allocation10_spill] sm:$0xff] %v20625_v37  ;;  %v284_v42 = vadd.f32 %v20591_v14, %v283_v40  ;;  %19061 = vrot.lane.b32.xlu1 %v20625_v37, %s20404_s0  ;;  %19056 = vrot.lane.b32.xlu0 %v20629_v38, %s20404_s0  ;;  %v20641_v43 = vcombine.low %v400_v39, %v279_v32 }
  0xee   :  { %v403_v46 = vcombine.high %v20634_v41, %v20634_v41 }
  0xef   :  { %25575 = vst [vmem:[#allocation12_spill] sm:$0xff] %v20641_v43  ;;  %v402_v44 = vcombine.high %v284_v42, %v284_v42  ;;  %v17243_v45 = vpop.f32.mrb[8].mxu0  ;;  %v20647_v47 = vpack.i.bf16 %v20621_v35, %v20641_v43 }
  0xf0   :  { %v299_v48 = vadd.f32 %v17243_v45, %v20591_v14  ;;  %v293_v49 = vpop.f32.mrb[9].mxu0 }
  0xf1   :  { %25576 = vst [vmem:[#allocation13_spill] sm:$0xff] %v20647_v47  ;;  %v20650_v50 = vcombine.low %v284_v42, %v402_v44  ;;  %v294_v51 = vadd.f32 %v20591_v14, %v293_v49  ;;  %19066 = vrot.lane.b32.xlu1 %v20647_v47, %s20404_s0 }
  0xf2   :  { %v405_v52 = vcombine.high %v299_v48, %v299_v48 }
  0xf3   :  { %v20655_v53 = vcombine.high %v294_v51, %v294_v51  ;;  %v20657_v54 = vcombine.low %v403_v46, %v294_v51  ;;  %v17246_v55 = vpop.f32.mrb[10].mxu0  ;;  %v20661_v56 = vpack.i.bf16 %v20634_v41, %v20650_v50 }
  0xf4   :  { %v20663_v57 = vcombine.low %v299_v48, %v405_v52  ;;  %v309_v58 = vadd.f32 %v17246_v55, %v20591_v14  ;;  %v303_v59 = vpop.f32.mrb[11].mxu0 }
  0xf5   :  { %25577 = vst [vmem:[#allocation14_spill] sm:$0xff] %v20655_v53  ;;  %25578 = vst [vmem:[#allocation15_spill] sm:$0xff] %v20661_v56  ;;  %v20667_v60 = vadd.f32 %v20591_v14, %v303_v59  ;;  %19071 = vrot.lane.b32.xlu0 %v20661_v56, %s20404_s0  ;;  %v20673_v61 = vpack.i.bf16 %v20655_v53, %v20657_v54 }
  0xf6   :  { %25579 = vst [vmem:[#allocation16_spill] sm:$0xff] %v20663_v57  ;;  %17311 = vmatprep.mubr.msk.f32.mxu0 %vm425_vm1, %v20663_v57  ;;  %v20677_v62 = vcombine.high %v309_v58, %v309_v58 }
  0xf7   :  { %25580 = vst [vmem:[#allocation17_spill] sm:$0xff] %v20673_v61  ;;  %v17249_v63 = vpop.f32.mrb[12].mxu0  ;;  %19076 = vrot.lane.b32.xlu1 %v20673_v61, %s20404_s0  ;;  %v20683_v0 = vpack.i.bf16 %v20667_v60, %v20663_v57  ;;  %v406_v1 = vcombine.high %v20667_v60, %v20667_v60 }
  0xf8   :  { %25581 = vst [vmem:[#allocation18_spill] sm:$0xff] %v20677_v62  ;;  %v313_v2 = vpop.f32.mrb[13].mxu0  ;;  %v20688_v3 = vadd.f32 %v17249_v63, %v20591_v14 }
  0xf9   :  { %v314_v4 = vadd.f32 %v20591_v14, %v313_v2  ;;  %19081 = vrot.lane.b32.xlu0 %v20683_v0, %s20404_s0  ;;  %v20693_v5 = vcombine.low %v406_v1, %v309_v58 }
  0xfa   :  { %v409_v9 = vcombine.high %v20688_v3, %v20688_v3 }
  0xfb   :  { %v408_v6 = vcombine.high %v314_v4, %v314_v4  ;;  %v20697_v7 = vpack.i.bf16 %v20677_v62, %v20693_v5  ;;  %v17252_v8 = vpop.f32.mrb[14].mxu0 }
  0xfc   :  { %v329_v10 = vadd.f32 %v17252_v8, %v20591_v14  ;;  %v323_v11 = vpop.f32.mrb[15].mxu0 }
  0xfd   :  { %v20702_v12 = vcombine.low %v314_v4, %v408_v6  ;;  %19086 = vrot.lane.b32.xlu1 %v20697_v7, %s20404_s0  ;;  %v324_v13 = vadd.f32 %v20591_v14, %v323_v11 }
  0xfe   :  { %v411_v15 = vcombine.high %v329_v10, %v329_v10 }
  0xff   :  { %25582 = vst [vmem:[#allocation19_spill] sm:$0xff] %v20702_v12  ;;  %v20707_v16 = vcombine.high %v324_v13, %v324_v13  ;;  %v20709_v18 = vcombine.low %v409_v9, %v324_v13  ;;  %v17255_v19 = vpop.f32.mrb[16].mxu0  ;;  %v20713_v20 = vpack.i.bf16 %v20688_v3, %v20702_v12 }
 0x100   :  { %v20715_v21 = vcombine.low %v329_v10, %v411_v15  ;;  %v339_v22 = vadd.f32 %v17255_v19, %v20591_v14  ;;  %v333_v24 = vpop.f32.mrb[17].mxu0 }
 0x101   :  { %25583 = vst [vmem:[#allocation20_spill] sm:$0xff] %v20707_v16  ;;  %19091 = vrot.lane.b32.xlu0 %v20713_v20, %s20404_s0  ;;  %v20721_v25 = vadd.f32 %v20591_v14, %v333_v24  ;;  %v20725_v26 = vpack.i.bf16 %v20707_v16, %v20709_v18 }
 0x102   :  { %25584 = vst [vmem:[#allocation21_spill] sm:$0xff] %v20715_v21  ;;  %v20727_v29 = vcombine.high %v339_v22, %v339_v22 }
 0x103   :  { %25585 = vst [vmem:[#allocation22_spill] sm:$0xff] %v20721_v25  ;;  %25586 = vst [vmem:[#allocation23_spill] sm:$0xff] %v20725_v26  ;;  %v17258_v32 = vpop.f32.mrb[18].mxu0  ;;  %19096 = vrot.lane.b32.xlu1 %v20725_v26, %s20404_s0  ;;  %v20733_v33 = vpack.i.bf16 %v20721_v25, %v20715_v21  ;;  %v412_v36 = vcombine.high %v20721_v25, %v20721_v25 }
 0x104   :  { %25587 = vst [vmem:[#allocation24_spill] sm:$0xff] %v20727_v29  ;;  %v20738_v39 = vadd.f32 %v17258_v32, %v20591_v14  ;;  %v343_v40 = vpop.f32.mrb[19].mxu0 }
 0x105   :  { %v344_v42 = vadd.f32 %v20591_v14, %v343_v40  ;;  %19101 = vrot.lane.b32.xlu0 %v20733_v33, %s20404_s0  ;;  %v20743_v44 = vcombine.low %v412_v36, %v339_v22  ;;  %v25601_v40 = vmov 0 }
 0x106   :  { %25588 = vst [vmem:[#allocation25_spill] sm:$0xff] %v20738_v39  ;;  %v415_v48 = vcombine.high %v20738_v39, %v20738_v39  ;;  %v25602_v40 = vsel %vm20859_vm2, 4294967295, %v25601_v40 }
 0x107   :  { %25589 = vst [vmem:[#allocation26_spill] sm:$0xff] %v20743_v44  ;;  %v414_v45 = vcombine.high %v344_v42, %v344_v42  ;;  %v17261_v46 = vpop.f32.mrb[20].mxu0  ;;  %v20749_v49 = vpack.i.bf16 %v20727_v29, %v20743_v44  ;;  %25603 = vst [vmem:[#allocation38_spill] sm:$0xff] %v25602_v40 }
 0x108   :  { %v359_v51 = vadd.f32 %v17261_v46, %v20591_v14  ;;  %v353_v52 = vpop.f32.mrb[21].mxu0 }
 0x109   :  { %25590 = vst [vmem:[#allocation27_spill] sm:$0xff] %v20749_v49  ;;  %v20752_v55 = vcombine.low %v344_v42, %v414_v45  ;;  %v354_v58 = vadd.f32 %v20591_v14, %v353_v52  ;;  %19106 = vrot.lane.b32.xlu1 %v20749_v49, %s20404_s0 }
 0x10a   :  { %v417_v59 = vcombine.high %v359_v51, %v359_v51 }
 0x10b   :  { %25591 = vst [vmem:[#allocation28_spill] sm:$0xff] %v20752_v55  ;;  %v20757_v63 = vcombine.high %v354_v58, %v354_v58  ;;  %v20759_v1 = vcombine.low %v415_v48, %v354_v58  ;;  %v17264_v2 = vpop.f32.mrb[22].mxu0  ;;  %v20763_v4 = vpack.i.bf16 %v20738_v39, %v20752_v55 }
 0x10c   :  { %v20765_v6 = vcombine.low %v359_v51, %v417_v59  ;;  %v369_v8 = vadd.f32 %v17264_v2, %v20591_v14  ;;  %v363_v9 = vpop.f32.mrb[23].mxu0 }
 0x10d   :  { %25592 = vst [vmem:[#allocation29_spill] sm:$0xff] %v20757_v63  ;;  %25593 = vst [vmem:[#allocation30_spill] sm:$0xff] %v20759_v1  ;;  %v20769_v10 = vadd.f32 %v20591_v14, %v363_v9  ;;  %19111 = vrot.lane.b32.xlu0 %v20763_v4, %s20404_s0  ;;  %v20775_v11 = vpack.i.bf16 %v20757_v63, %v20759_v1 }
 0x10e   :  { %25594 = vst [vmem:[#allocation31_spill] sm:$0xff] %v20765_v6  ;;  %v20777_v13 = vcombine.high %v369_v8, %v369_v8 }
 0x10f   :  { %25595 = vst [vmem:[#allocation32_spill] sm:$0xff] %v20769_v10  ;;  %25596 = vst [vmem:[#allocation33_spill] sm:$0xff] %v20775_v11  ;;  %19116 = vrot.lane.b32.xlu1 %v20775_v11, %s20404_s0  ;;  %v20783_v15 = vpack.i.bf16 %v20769_v10, %v20765_v6  ;;  %v418_v14 = vcombine.high %v20769_v10, %v20769_v10 }
 0x110   :  { %25597 = vst [vmem:[#allocation34_spill] sm:$0xff] %v20777_v13 }
 0x111   :  { %25598 = vst [vmem:[#allocation35_spill] sm:$0xff] %v20783_v15  ;;  %19121 = vrot.lane.b32.xlu0 %v20783_v15, %s20404_s0  ;;  %v20789_v19 = vcombine.low %v418_v14, %v369_v8 }
 0x113   :  { %25599 = vst [vmem:[#allocation36_spill] sm:$0xff] %v20789_v19  ;;  %v20793_v22 = vpack.i.bf16 %v20777_v13, %v20789_v19 }
 0x115   :  { %25600 = vst [vmem:[#allocation37_spill] sm:$0xff] %v20793_v22  ;;  %19126 = vrot.lane.b32.xlu1 %v20793_v22, %s20404_s0  ;;  %19141 = vrot.lane.b32.xlu0 %v20625_v37, %s20405_s2 }
 0x119   :  { %19131 = vrot.lane.b32.xlu1 %v20611_v30, %s20405_s2  ;;  %19151 = vrot.lane.b32.xlu0 %v20661_v56, %s20405_s2 }
 0x11d   :  { %19136 = vrot.lane.b32.xlu1 %v20629_v38, %s20405_s2  ;;  %19156 = vrot.lane.b32.xlu0 %v20673_v61, %s20405_s2 }
 0x121   :  { %19146 = vrot.lane.b32.xlu1 %v20647_v47, %s20405_s2  ;;  %19161 = vrot.lane.b32.xlu0 %v20683_v0, %s20405_s2 }
 0x125   :  { %19166 = vrot.lane.b32.xlu1 %v20697_v7, %s20405_s2  ;;  %19181 = vrot.lane.b32.xlu0 %v20733_v33, %s20405_s2 }
 0x129   :  { %19171 = vrot.lane.b32.xlu1 %v20713_v20, %s20405_s2  ;;  %19206 = vrot.lane.b32.xlu0 %v20611_v30, %s20406_s20 }
 0x12d   :  { %19176 = vrot.lane.b32.xlu1 %v20725_v26, %s20405_s2  ;;  %19216 = vrot.lane.b32.xlu0 %v20625_v37, %s20406_s20 }
 0x131   :  { %19186 = vrot.lane.b32.xlu1 %v20749_v49, %s20405_s2  ;;  %3626 = vrot.lane.b32.xlu0 %v20594_v17, %s20407_s21 }
 0x135   :  { %19191 = vrot.lane.b32.xlu1 %v20763_v4, %s20405_s2  ;;  %3715 = vrot.lane.b32.xlu0 %v20605_v28, %s20407_s21 }
 0x139   :  { %19196 = vrot.lane.b32.xlu1 %v20775_v11, %s20405_s2  ;;  %19226 = vrot.lane.b32.xlu0 %v20661_v56, %s20406_s20 }
 0x13d   :  { %19201 = vrot.lane.b32.xlu1 %v20783_v15, %s20405_s2  ;;  %3808 = vrot.lane.b32.xlu0 %v20617_v34, %s20407_s21 }
 0x141   :  { %19211 = vrot.lane.b32.xlu1 %v20629_v38, %s20406_s20  ;;  %3897 = vrot.lane.b32.xlu0 %v20641_v43, %s20407_s21 }
 0x145   :  { %3624 = vrot.lane.b32.xlu1 %v20598_v23, %s20407_s21 }
 0x149   :  { %19221 = vrot.lane.b32.xlu1 %v20647_v47, %s20406_s20 }
 0x14d   :  { %3717 = vrot.lane.b32.xlu1 %v20603_v27, %s20407_s21 }
 0x151   :  { %3806 = vrot.lane.b32.xlu1 %v20613_v31, %s20407_s21 }
 0x155   :  { %19231 = vrot.lane.b32.xlu1 %v20673_v61, %s20406_s20 }
 0x159   :  { %3899 = vrot.lane.b32.xlu1 %v20621_v35, %s20407_s21 }
 0x15b   :  { %v19052_v24 = vpop.permute.xlu0 %19051 }
 0x15c   :  { %v19054_v32 = vunpack.i.h.bf16 %v19052_v24  ;;  %v19053_v36 = vunpack.i.l.bf16 %v19052_v24 }
 0x15d   :  { %19236 = vrot.lane.b32.xlu1 %v20793_v22, %s20405_s2 }
 0x15e   :  { %v18253_v42 = vpack.c.bf16 %v19054_v32, %v19053_v36 }
 0x15f   :  { %v19057_v45 = vpop.permute.xlu0 %19056  ;;  %v19062_v51 = vpop.permute.xlu1 %19061 }
 0x160   :  { %v19059_v46 = vunpack.i.h.bf16 %v19057_v45  ;;  %v19058_v48 = vunpack.i.l.bf16 %v19057_v45  ;;  %18255 = vmatprep.subr.msk.bf16.mxu1 %vm20859_vm2, %v18253_v42  ;;  %v19064_v58 = vunpack.i.h.bf16 %v19062_v51  ;;  %v19063_v59 = vunpack.i.l.bf16 %v19062_v51 }
 0x161   :  { %18258 = vmatpush3.bf16.xpose.msk.msra.mxu1 %vm20859_vm2, %v18253_v42 }
 0x162   :  { %v18259_v52 = vpack.c.bf16 %v19059_v46, %v19058_v48  ;;  %v18265_v8 = vpack.c.bf16 %v19064_v58, %v19063_v59 }
 0x163   :  { %v19067_v9 = vpop.permute.xlu1 %19066 }
 0x164   :  { %18261 = vmatprep.subr.msk.bf16.mxu1 %vm20859_vm2, %v18259_v52  ;;  %v19069_v24 = vunpack.i.h.bf16 %v19067_v9  ;;  %v19068_v32 = vunpack.i.l.bf16 %v19067_v9 }
 0x166   :  { %v18271_v48 = vpack.c.bf16 %v19069_v24, %v19068_v32 }
 0x167   :  { %v19072_v2 = vpop.permute.xlu0 %19071 }
 0x168   :  { %17270 = vmatmul.mubr.msk.f32.vlgmr.msra.gmra.mrb[0].mxu1 %vm425_vm1, %v20594_v17  ;;  %v19074_v9 = vunpack.i.h.bf16 %v19072_v2 }
 0x169   :  { %18264 = vmatpush3.bf16.xpose.msk.msra.mxu1 %vm20859_vm2, %v18259_v52  ;;  %17276 = vmatprep.mubr.msk.f32.mxu1 %vm425_vm1, %v20605_v28  ;;  %v19077_v46 = vpop.permute.xlu1 %19076 }
 0x16a   :  { %18267 = vmatprep.subr.msk.bf16.mxu1 %vm20859_vm2, %v18265_v8 }
 0x16b   :  { %v19082_v14 = vpop.permute.xlu0 %19081 }
 0x16c   :  { %v19084_v36 = vunpack.i.h.bf16 %v19082_v14  ;;  %v19083_v42 = vunpack.i.l.bf16 %v19082_v14  ;;  %v19073_v14 = vunpack.i.l.bf16 %v19072_v2 }
 0x16e   :  { %v18289_v45 = vpack.c.bf16 %v19084_v36, %v19083_v42 }
 0x16f   :  { %v19087_v51 = vpop.permute.xlu1 %19086 }
 0x170   :  { %17277 = vmatmul.mubr.msk.f32.vlgmr.msra.gmra.mrb[2].mxu1 %vm425_vm1, %v20603_v27  ;;  %18291 = vmatprep.subr.msk.bf16.mxu0 %vm20859_vm2, %v18289_v45 }
 0x171   :  { %18270 = vmatpush3.bf16.xpose.msk.msra.mxu1 %vm20859_vm2, %v18265_v8  ;;  %17283 = vmatprep.mubr.msk.f32.mxu1 %vm425_vm1, %v20613_v31 }
 0x172   :  { %18294 = vmatpush3.bf16.xpose.msk.msra.mxu0 %vm20859_vm2, %v18289_v45  ;;  %18273 = vmatprep.subr.msk.bf16.mxu1 %vm20859_vm2, %v18271_v48  ;;  %v18277_v45 = vpack.c.bf16 %v19074_v9, %v19073_v14 }
 0x173   :  { %v19092_v52 = vpop.permute.xlu0 %19091 }
 0x174   :  { %v19094_v58 = vunpack.i.h.bf16 %v19092_v52  ;;  %v19093_v59 = vunpack.i.l.bf16 %v19092_v52 }
 0x175   :  { %v19097_v32 = vpop.permute.xlu1 %19096 }
 0x176   :  { %v18301_v24 = vpack.c.bf16 %v19094_v58, %v19093_v59  ;;  %v19079_v58 = vunpack.i.h.bf16 %v19077_v46  ;;  %v19078_v59 = vunpack.i.l.bf16 %v19077_v46 }
 0x177   :  { %v19102_v36 = vpop.permute.xlu0 %19101 }
 0x178   :  { %17284 = vmatmul.mubr.msk.f32.vlgmr.msra.gmra.mrb[4].mxu1 %vm425_vm1, %v20617_v34  ;;  %18303 = vmatprep.subr.msk.bf16.mxu0 %vm20859_vm2, %v18301_v24  ;;  %v19104_v8 = vunpack.i.h.bf16 %v19102_v36  ;;  %v19103_v42 = vunpack.i.l.bf16 %v19102_v36 }
 0x179   :  { %17312 = vmatmul.mubr.msk.f32.vlgmr.msra.gmra.mrb[24].mxu0 %vm425_vm1, %v20667_v60  ;;  %18276 = vmatpush3.bf16.xpose.msk.msra.mxu1 %vm20859_vm2, %v18271_v48 }
 0x17a   :  { %17290 = vmatprep.mubr.msk.f32.mxu1 %vm425_vm1, %v20641_v43  ;;  %18306 = vmatpush3.bf16.xpose.msk.msra.mxu0 %vm20859_vm2, %v18301_v24  ;;  %v18313_v2 = vpack.c.bf16 %v19104_v8, %v19103_v42  ;;  %v18283_v24 = vpack.c.bf16 %v19079_v58, %v19078_v59  ;;  %v19088_v59 = vunpack.i.l.bf16 %v19087_v51 }
 0x17b   :  { %17325 = vmatprep.mubr.msk.f32.mxu0 %vm425_vm1, %v20702_v12  ;;  %18279 = vmatprep.subr.msk.bf16.mxu1 %vm20859_vm2, %v18277_v45  ;;  %v19107_v52 = vpop.permute.xlu1 %19106 }
 0x17c   :  { %18315 = vmatprep.subr.msk.bf16.mxu0 %vm20859_vm2, %v18313_v2 }
 0x17f   :  { %v19112_v48 = vpop.permute.xlu0 %19111 }
 0x180   :  { %v19114_v9 = vunpack.i.h.bf16 %v19112_v48  ;;  %v19113_v14 = vunpack.i.l.bf16 %v19112_v48  ;;  %17291 = vmatmul.mubr.msk.f32.vlgmr.msra.gmra.mrb[6].mxu1 %vm425_vm1, %v20621_v35 }
 0x181   :  { %17326 = vmatmul.mubr.msk.f32.vlgmr.msra.gmra.mrb[26].mxu0 %vm425_vm1, %v20688_v3  ;;  %18282 = vmatpush3.bf16.xpose.msk.msra.mxu1 %vm20859_vm2, %v18277_v45  ;;  %v19117_v36 = vpop.permute.xlu1 %19116  ;;  %v19089_v45 = vunpack.i.h.bf16 %v19087_v51 }
 0x182   :  { %v18325_v8 = vpack.c.bf16 %v19114_v9, %v19113_v14  ;;  %17297 = vmatprep.mubr.msk.f32.mxu1 %vm425_vm1, %v20650_v50  ;;  %18318 = vmatpush3.bf16.xpose.msk.msra.mxu0 %vm20859_vm2, %v18313_v2 }
 0x183   :  { %17339 = vmatprep.mubr.msk.f32.mxu0 %vm425_vm1, %v20715_v21  ;;  %18285 = vmatprep.subr.msk.bf16.mxu1 %vm20859_vm2, %v18283_v24  ;;  %v19122_v46 = vpop.permute.xlu0 %19121  ;;  %v18295_v2 = vpack.c.bf16 %v19089_v45, %v19088_v59 }
 0x184   :  { %v19124_v42 = vunpack.i.h.bf16 %v19122_v46  ;;  %v19123_v58 = vunpack.i.l.bf16 %v19122_v46  ;;  %18327 = vmatprep.subr.msk.bf16.mxu0 %vm20859_vm2, %v18325_v8 }
 0x186   :  { %v18337_v9 = vpack.c.bf16 %v19124_v42, %v19123_v58  ;;  %v19098_v42 = vunpack.i.l.bf16 %v19097_v32 }
 0x187   :  { %v19127_v48 = vpop.permute.xlu1 %19126  ;;  %v19142_v59 = vpop.permute.xlu0 %19141 }
 0x188   :  { %17298 = vmatmul.mubr.msk.f32.vlgmr.msra.gmra.mrb[8].mxu1 %vm425_vm1, %v20634_v41 }
 0x189   :  { %17340 = vmatmul.mubr.msk.f32.vlgmr.msra.gmra.mrb[28].mxu0 %vm425_vm1, %v20721_v25  ;;  %18288 = vmatpush3.bf16.xpose.msk.msra.mxu1 %vm20859_vm2, %v18283_v24  ;;  %v19099_v24 = vunpack.i.h.bf16 %v19097_v32  ;;  %v19109_v32 = vunpack.i.h.bf16 %v19107_v52 }
 0x18a   :  { %17304 = vmatprep.mubr.msk.f32.mxu1 %vm425_vm1, %v20657_v54  ;;  %18330 = vmatpush3.bf16.xpose.msk.msra.mxu0 %vm20859_vm2, %v18325_v8 }
 0x18b   :  { %17353 = vmatprep.mubr.msk.f32.mxu0 %vm425_vm1, %v20752_v55  ;;  %18297 = vmatprep.subr.msk.bf16.mxu1 %vm20859_vm2, %v18295_v2  ;;  %v19132_v51 = vpop.permute.xlu1 %19131  ;;  %v18307_v45 = vpack.c.bf16 %v19099_v24, %v19098_v42 }
 0x18c   :  { %18339 = vmatprep.subr.msk.bf16.mxu0 %vm20859_vm2, %v18337_v9  ;;  %v19134_v14 = vunpack.i.h.bf16 %v19132_v51  ;;  %v19133_v46 = vunpack.i.l.bf16 %v19132_v51  ;;  %v19108_v51 = vunpack.i.l.bf16 %v19107_v52  ;;  %v19119_v52 = vunpack.i.h.bf16 %v19117_v36 }
 0x18e   :  { %v18349_v58 = vpack.c.bf16 %v19134_v14, %v19133_v46  ;;  %v19143_v14 = vunpack.i.l.bf16 %v19142_v59  ;;  %v18319_v46 = vpack.c.bf16 %v19109_v32, %v19108_v51 }
 0x190   :  { %17305 = vmatmul.mubr.msk.f32.vlgmr.msra.gmra.mrb[10].mxu1 %vm425_vm1, %v20655_v53 }
 0x191   :  { %17354 = vmatmul.mubr.msk.f32.vlgmr.msra.gmra.mrb[30].mxu0 %vm425_vm1, %v20738_v39  ;;  %18300 = vmatpush3.bf16.xpose.msk.msra.mxu1 %vm20859_vm2, %v18295_v2  ;;  %v19144_v2 = vunpack.i.h.bf16 %v19142_v59 }
 0x192   :  { %17318 = vmatprep.mubr.msk.f32.mxu1 %vm425_vm1, %v20693_v5  ;;  %18342 = vmatpush3.bf16.xpose.msk.msra.mxu0 %vm20859_vm2, %v18337_v9  ;;  %v19118_v9 = vunpack.i.l.bf16 %v19117_v36  ;;  %v19137_v36 = vpop.permute.xlu1 %19136 }
 0x193   :  { %17367 = vmatprep.mubr.msk.f32.mxu0 %vm425_vm1, %v20765_v6  ;;  %18351 = vmatprep.subr.msk.bf16.mxu0 %vm20941_vm5, %v18349_v58  ;;  %v20961_v24 = vpack.c.bf16 %v19144_v2, %v19143_v14  ;;  %v19139_v32 = vunpack.i.h.bf16 %v19137_v36  ;;  %v19138_v51 = vunpack.i.l.bf16 %v19137_v36 }
 0x194   :  { %18309 = vmatprep.subr.msk.bf16.mxu1 %vm20859_vm2, %v18307_v45  ;;  %v18331_v42 = vpack.c.bf16 %v19119_v52, %v19118_v9 }
 0x195   :  { %v18355_v2 = vpack.c.bf16 %v19139_v32, %v19138_v51 }
 0x198   :  { %17319 = vmatmul.mubr.msk.f32.vlgmr.msra.gmra.mrb[12].mxu1 %vm425_vm1, %v20677_v62 }
 0x199   :  { %17368 = vmatmul.mubr.msk.f32.vlgmr.msra.gmra.mrb[32].mxu0 %vm425_vm1, %v20769_v10  ;;  %18312 = vmatpush3.bf16.xpose.msk.msra.mxu1 %vm20859_vm2, %v18307_v45  ;;  %v19128_v45 = vunpack.i.l.bf16 %v19127_v48 }
 0x19a   :  { %17332 = vmatprep.mubr.msk.f32.mxu1 %vm425_vm1, %v20709_v18  ;;  %18354 = vmatpush3.bf16.msk.msra.mxu0 %vm20941_vm5, %v18349_v58  ;;  %v19129_v58 = vunpack.i.h.bf16 %v19127_v48  ;;  %v19147_v48 = vpop.permute.xlu1 %19146 }
 0x19b   :  { %18363 = vmatprep.subr.msk.bf16.mxu0 %vm20941_vm5, %v20961_v24  ;;  %18321 = vmatprep.subr.msk.bf16.mxu1 %vm20859_vm2, %v18319_v46  ;;  %v19149_v14 = vunpack.i.h.bf16 %v19147_v48 }
 0x19c   :  { %v18343_v59 = vpack.c.bf16 %v19129_v58, %v19128_v45 }
 0x19e   :  { %v21093_v11 = vpop.permute.xlu1 %19166 }
 0x1a0   :  { %17333 = vmatmul.mubr.msk.f32.vlgmr.msra.gmra.mrb[14].mxu1 %vm425_vm1, %v20707_v16 }
 0x1a1   :  { %18324 = vmatpush3.bf16.xpose.msk.msra.mxu1 %vm20859_vm2, %v18319_v46  ;;  %17346 = vmatprep.mubr.msk.f32.mxu1 %vm425_vm1, %v20743_v44  ;;  %v19148_v46 = vunpack.i.l.bf16 %v19147_v48 }
 0x1a2   :  { %18333 = vmatprep.subr.msk.bf16.mxu1 %vm20859_vm2, %v18331_v42 }
 0x1a3   :  { %v21000_v52 = vpack.c.bf16 %v19149_v14, %v19148_v46 }
 0x1a8   :  { %17347 = vmatmul.mubr.msk.f32.vlgmr.msra.gmra.mrb[16].mxu1 %vm425_vm1, %v20727_v29 }
 0x1a9   :  { %18336 = vmatpush3.bf16.xpose.msk.msra.mxu1 %vm20859_vm2, %v18331_v42  ;;  %17360 = vmatprep.mubr.msk.f32.mxu1 %vm425_vm1, %v20759_v1 }
 0x1aa   :  { %18345 = vmatprep.subr.msk.bf16.mxu1 %vm20859_vm2, %v18343_v59 }
 0x1b0   :  { %17361 = vmatmul.mubr.msk.f32.vlgmr.msra.gmra.mrb[18].mxu1 %vm425_vm1, %v20757_v63 }
 0x1b1   :  { %18348 = vmatpush3.bf16.xpose.msk.msra.mxu1 %vm20859_vm2, %v18343_v59  ;;  %17374 = vmatprep.mubr.msk.f32.mxu1 %vm425_vm1, %v20789_v19 }
 0x1b2   :  { %18357 = vmatprep.subr.msk.bf16.mxu1 %vm20941_vm5, %v18355_v2 }
 0x1b8   :  { %17375 = vmatmul.mubr.msk.f32.vlgmr.msra.gmra.mrb[20].mxu1 %vm425_vm1, %v20777_v13 }
 0x1b9   :  { %18360 = vmatpush3.bf16.msk.msra.mxu1 %vm20941_vm5, %v18355_v2 }
 0x1ba   :  { %18369 = vmatprep.subr.msk.bf16.mxu1 %vm20941_vm5, %v21000_v52 }
 0x23b   :  { %v17271_v9 = vpop.f32.mrb[0].mxu1 }
 0x23c   :  { %v21009_v42 = vmul.f32 0.35355338, %v17271_v9  ;;  %v500_v58 = vpop.f32.mrb[1].mxu1 }
 0x23d   :  { %v21011_v45 = vmul.f32 0.35355338, %v500_v58 }
 0x23e   :  { %v1866_v59 = vsel %vm1865_vm6, %v21009_v42, -inf }
 0x23f   :  { %1867 = vmax.xlane.f32.xlu1 %v1866_v59  ;;  %v1862_v36 = vsel %vm1861_vm7, %v21011_v45, -inf }
 0x240   :  { %1863 = vmax.xlane.f32.xlu0 %v1862_v36 }
 0x243   :  { %v17278_v32 = vpop.f32.mrb[2].mxu1 }
 0x244   :  { %v21017_v51 = vmul.f32 0.35355338, %v17278_v32  ;;  %v588_v2 = vpop.f32.mrb[3].mxu1 }
 0x245   :  { %v21019_v48 = vmul.f32 0.35355338, %v588_v2 }
 0x246   :  { %v1872_v14 = vsel %vm1865_vm6, %v21017_v51, -inf }
 0x247   :  { %1873 = vmax.xlane.f32.xlu1 %v1872_v14  ;;  %v1869_v46 = vsel %vm1861_vm7, %v21019_v48, -inf }
 0x248   :  { %1870 = vmax.xlane.f32.xlu0 %v1869_v46 }
 0x24b   :  { %v17285_v9 = vpop.f32.mrb[4].mxu1 }
 0x24c   :  { %v21025_v58 = vmul.f32 0.35355338, %v17285_v9  ;;  %v17313_v59 = vpop.f32.mrb[24].mxu0  ;;  %v676_v35 = vpop.f32.mrb[5].mxu1 }
 0x24d   :  { %v1028_v36 = vpop.f32.mrb[25].mxu0  ;;  %v21027_v31 = vmul.f32 0.35355338, %v17313_v59  ;;  %v21031_v2 = vmul.f32 0.35355338, %v676_v35 }
 0x24e   :  { %v1878_v32 = vsel %vm1865_vm6, %v21025_v58, -inf  ;;  %v21037_v47 = vmul.f32 0.35355338, %v1028_v36 }
 0x24f   :  { %1879 = vmax.xlane.f32.xlu0 %v1878_v32  ;;  %v1902_v14 = vsel %vm1865_vm6, %v21027_v31, -inf  ;;  %v1875_v34 = vsel %vm1861_vm7, %v21031_v2, -inf }
 0x253   :  { %1903 = vmax.xlane.f32.xlu0 %v1902_v14  ;;  %v17292_v27 = vpop.f32.mrb[6].mxu1 }
 0x254   :  { %v17327_v46 = vpop.f32.mrb[26].mxu0  ;;  %v21035_v23 = vmul.f32 0.35355338, %v17292_v27  ;;  %v764_v9 = vpop.f32.mrb[7].mxu1  ;;  %v1899_v27 = vsel %vm1861_vm7, %v21037_v47, -inf }
 0x255   :  { %v1204_v43 = vpop.f32.mrb[27].mxu0  ;;  %v21039_v59 = vmul.f32 0.35355338, %v764_v9  ;;  %v21045_v32 = vmul.f32 0.35355338, %v17327_v46 }
 0x256   :  { %v1884_v35 = vsel %vm1865_vm6, %v21035_v23, -inf  ;;  %v21051_v13 = vmul.f32 0.35355338, %v1204_v43 }
 0x257   :  { %1876 = vmax.xlane.f32.xlu0 %v1875_v34  ;;  %1885 = vmax.xlane.f32.xlu1 %v1884_v35  ;;  %v1881_v14 = vsel %vm1861_vm7, %v21039_v59, -inf  ;;  %v1914_v34 = vsel %vm1865_vm6, %v21045_v32, -inf }
 0x258   :  { %v1911_v35 = vsel %vm1861_vm7, %v21051_v13, -inf }
 0x25b   :  { %1900 = vmax.xlane.f32.xlu0 %v1899_v27  ;;  %1882 = vmax.xlane.f32.xlu1 %v1881_v14  ;;  %v17299_v36 = vpop.f32.mrb[8].mxu1 }
 0x25c   :  { %v17341_v9 = vpop.f32.mrb[28].mxu0  ;;  %v852_v38 = vpop.f32.mrb[9].mxu1  ;;  %v21055_v46 = vmul.f32 0.35355338, %v17299_v36 }
 0x25d   :  { %v1380_v28 = vpop.f32.mrb[29].mxu0  ;;  %v21061_v30 = vmul.f32 0.35355338, %v17341_v9 }
 0x25e   :  { %v1890_v1 = vsel %vm1865_vm6, %v21055_v46, -inf  ;;  %v21077_v40 = vmul.f32 0.35355338, %v1380_v28 }
 0x25f   :  { %1915 = vmax.xlane.f32.xlu0 %v1914_v34  ;;  %v21069_v34 = vmul.f32 0.35355338, %v852_v38 }
 0x261   :  { %v1887_v38 = vsel %vm1861_vm7, %v21069_v34, -inf }
 0x263   :  { %1912 = vmax.xlane.f32.xlu0 %v1911_v35  ;;  %v17306_v17 = vpop.f32.mrb[10].mxu1 }
 0x264   :  { %v17355_v10 = vpop.f32.mrb[30].mxu0  ;;  %v21059_v27 = vmul.f32 0.35355338, %v17306_v17  ;;  %v940_v14 = vpop.f32.mrb[11].mxu1  ;;  %v1926_v17 = vsel %vm1865_vm6, %v21061_v30, -inf }
 0x265   :  { %v1556_v63 = vpop.f32.mrb[31].mxu0  ;;  %v21063_v43 = vmul.f32 0.35355338, %v940_v14 }
 0x266   :  { %v1896_v36 = vsel %vm1865_vm6, %v21059_v27, -inf  ;;  %v21095_v21 = vmul.f32 0.35355338, %v1556_v63 }
 0x267   :  { %1891 = vmax.xlane.f32.xlu0 %v1890_v1  ;;  %1897 = vmax.xlane.f32.xlu1 %v1896_v36  ;;  %v1893_v35 = vsel %vm1861_vm7, %v21063_v43, -inf }
 0x268   :  { %v1935_v63 = vsel %vm1861_vm7, %v21095_v21, -inf }
 0x26b   :  { %1927 = vmax.xlane.f32.xlu0 %v1926_v17  ;;  %1894 = vmax.xlane.f32.xlu1 %v1893_v35  ;;  %v17320_v9 = vpop.f32.mrb[12].mxu1  ;;  %v21085_v17 = vmul.f32 0.35355338, %v17355_v10 }
 0x26c   :  { %v17369_v14 = vpop.f32.mrb[32].mxu0  ;;  %v21075_v15 = vmul.f32 0.35355338, %v17320_v9  ;;  %v1116_v29 = vpop.f32.mrb[13].mxu1  ;;  %v1923_v9 = vsel %vm1861_vm7, %v21077_v40, -inf }
 0x26d   :  { %v1732_v61 = vpop.f32.mrb[33].mxu0  ;;  %v21079_v1 = vmul.f32 0.35355338, %v1116_v29 }
 0x26e   :  { %v1908_v36 = vsel %vm1865_vm6, %v21075_v15, -inf  ;;  %v21087_v35 = vmul.f32 0.35355338, %v1732_v61  ;;  %v1938_v61 = vsel %vm1865_vm6, %v21085_v17, -inf }
 0x26f   :  { %1888 = vmax.xlane.f32.xlu0 %v1887_v38  ;;  %1909 = vmax.xlane.f32.xlu1 %v1908_v36  ;;  %v1905_v28 = vsel %vm1861_vm7, %v21079_v1, -inf  ;;  %v21103_v36 = vpop.permute.xlu1 %19171 }
 0x270   :  { %v1947_v10 = vsel %vm1861_vm7, %v21087_v35, -inf  ;;  %25606 = vst [vmem:[#allocation39_spill] sm:$0xff] %v21103_v36 }
 0x273   :  { %1924 = vmax.xlane.f32.xlu0 %v1923_v9  ;;  %1906 = vmax.xlane.f32.xlu1 %v1905_v28  ;;  %v17334_v29 = vpop.f32.mrb[14].mxu1  ;;  %v21105_v9 = vmul.f32 0.35355338, %v17369_v14 }
 0x274   :  { %v1292_v56 = vpop.f32.mrb[15].mxu1  ;;  %v21097_v38 = vmul.f32 0.35355338, %v17334_v29 }
 0x275   :  { %v21107_v28 = vmul.f32 0.35355338, %v1292_v56  ;;  %v21119_v56 = vpop.permute.xlu1 %19176 }
 0x276   :  { %v1920_v29 = vsel %vm1865_vm6, %v21097_v38, -inf  ;;  %25607 = vst [vmem:[#allocation40_spill] sm:$0xff] %v21119_v56 }
 0x277   :  { %1939 = vmax.xlane.f32.xlu0 %v1938_v61  ;;  %1948 = vmax.xlane.f32.xlu1 %v1947_v10  ;;  %v1950_v61 = vsel %vm1865_vm6, %v21105_v9, -inf  ;;  %v1917_v14 = vsel %vm1861_vm7, %v21107_v28, -inf }
 0x279   :  { %v21127_v6 = vpop.permute.xlu1 %19186 }
 0x27a   :  { %25608 = vst [vmem:[#allocation41_spill] sm:$0xff] %v21127_v6 }
 0x27b   :  { %1936 = vmax.xlane.f32.xlu0 %v1935_v63  ;;  %1921 = vmax.xlane.f32.xlu1 %v1920_v29  ;;  %v17348_v37 = vpop.f32.mrb[16].mxu1 }
 0x27c   :  { %v1468_v16 = vpop.f32.mrb[17].mxu1  ;;  %v21113_v19 = vmul.f32 0.35355338, %v17348_v37 }
 0x27d   :  { %v21121_v10 = vmul.f32 0.35355338, %v1468_v16 }
 0x27e   :  { %v1932_v63 = vsel %vm1865_vm6, %v21113_v19, -inf }
 0x27f   :  { %1951 = vmax.xlane.f32.xlu0 %v1950_v61  ;;  %1918 = vmax.xlane.f32.xlu1 %v1917_v14  ;;  %v1929_v61 = vsel %vm1861_vm7, %v21121_v10, -inf }
 0x283   :  { %1933 = vmax.xlane.f32.xlu1 %v1932_v63  ;;  %v17362_v29 = vpop.f32.mrb[18].mxu1 }
 0x284   :  { %v21125_v49 = vmul.f32 0.35355338, %v17362_v29  ;;  %v1644_v37 = vpop.f32.mrb[19].mxu1  ;;  %v21137_v29 = vpop.permute.xlu1 %19191 }
 0x285   :  { %v21129_v12 = vmul.f32 0.35355338, %v1644_v37  ;;  %25609 = vst [vmem:[#allocation42_spill] sm:$0xff] %v21137_v29  ;;  %v21141_v37 = vpop.permute.xlu0 %19151 }
 0x286   :  { %v1944_v14 = vsel %vm1865_vm6, %v21125_v49, -inf }
 0x287   :  { %1930 = vmax.xlane.f32.xlu1 %v1929_v61  ;;  %1945 = vmax.xlane.f32.xlu0 %v1944_v14  ;;  %v1941_v16 = vsel %vm1861_vm7, %v21129_v12, -inf }
 0x288   :  { %v21149_v14 = vpop.permute.xlu1 %19196 }
 0x289   :  { %25610 = vst [vmem:[#allocation43_spill] sm:$0xff] %v21149_v14 }
 0x28b   :  { %1942 = vmax.xlane.f32.xlu1 %v1941_v16  ;;  %v17376_v63 = vpop.f32.mrb[20].mxu1  ;;  %v21151_v16 = vpop.permute.xlu0 %19156 }
 0x28c   :  { %v21139_v22 = vmul.f32 0.35355338, %v17376_v63  ;;  %v1820_v6 = vpop.f32.mrb[21].mxu1  ;;  %v21153_v29 = vpop.permute.xlu1 %19201 }
 0x28d   :  { %v21143_v36 = vmul.f32 0.35355338, %v1820_v6  ;;  %25611 = vst [vmem:[#allocation44_spill] sm:$0xff] %v21153_v29 }
 0x28e   :  { %v1956_v62 = vsel %vm1865_vm6, %v21139_v22, -inf }
 0x28f   :  { %1957 = vmax.xlane.f32.xlu0 %v1956_v62  ;;  %v1953_v61 = vsel %vm1861_vm7, %v21143_v36, -inf  ;;  %v21155_v63 = vpop.permute.xlu0 %19161 }
 0x290   :  { %1954 = vmax.xlane.f32.xlu1 %v1953_v61  ;;  %v21157_v39 = vpop.permute.xlu1 %19211 }
 0x291   :  { %25612 = vst [vmem:[#allocation45_spill] sm:$0xff] %v21157_v39 }
 0x293   :  { %v21159_v6 = vpop.permute.xlu0 %19181 }
 0x294   :  { %25613 = vst [vmem:[#allocation46_spill] sm:$0xff] %v21159_v6  ;;  %v21161_v56 = vpop.permute.xlu1 %3624 }
 0x295   :  { %25614 = vst [vmem:[#allocation47_spill] sm:$0xff] %v21161_v56 }
 0x297   :  { %v21163_v26 = vpop.permute.xlu0 %19206 }
 0x298   :  { %25615 = vst [vmem:[#allocation48_spill] sm:$0xff] %v21163_v26  ;;  %v21165_v62 = vpop.permute.xlu1 %19221 }
 0x299   :  { %25616 = vst [vmem:[#allocation49_spill] sm:$0xff] %v21165_v62 }
 0x29b   :  { %v21167_v55 = vpop.permute.xlu0 %19216 }
 0x29c   :  { %25617 = vst [vmem:[#allocation50_spill] sm:$0xff] %v21167_v55  ;;  %v21169_v61 = vpop.permute.xlu1 %3717 }
 0x29d   :  { %25618 = vst [vmem:[#allocation51_spill] sm:$0xff] %v21169_v61 }
 0x29f   :  { %v21171_v14 = vpop.permute.xlu0 %3626 }
 0x2a0   :  { %25619 = vst [vmem:[#allocation52_spill] sm:$0xff] %v21171_v14  ;;  %v21173_v57 = vpop.permute.xlu1 %3806 }
 0x2a1   :  { %25620 = vst [vmem:[#allocation53_spill] sm:$0xff] %v21173_v57 }
 0x2a3   :  { %v21175_v29 = vpop.permute.xlu0 %3715 }
 0x2a4   :  { %25621 = vst [vmem:[#allocation54_spill] sm:$0xff] %v21175_v29  ;;  %v21177_v44 = vpop.permute.xlu1 %19231 }
 0x2a5   :  { %25622 = vst [vmem:[#allocation55_spill] sm:$0xff] %v21177_v44 }
 0x2a7   :  { %v21179_v39 = vpop.permute.xlu0 %19226 }
 0x2a8   :  { %25623 = vst [vmem:[#allocation56_spill] sm:$0xff] %v21179_v39  ;;  %v21181_v6 = vpop.permute.xlu1 %3899 }
 0x2a9   :  { %25624 = vst [vmem:[#allocation57_spill] sm:$0xff] %v21181_v6 }
 0x2ab   :  { %v21183_v56 = vpop.permute.xlu0 %3808 }
 0x2ac   :  { %25625 = vst [vmem:[#allocation58_spill] sm:$0xff] %v21183_v56  ;;  %v21185_v26 = vpop.permute.xlu1 %19236 }
 0x2ad   :  { %25626 = vst [vmem:[#allocation59_spill] sm:$0xff] %v21185_v26 }
 0x2af   :  { %v21187_v62 = vpop.permute.xlu0 %3897 }
 0x2b0   :  { %25627 = vst [vmem:[#allocation60_spill] sm:$0xff] %v21187_v62 }
 0x2cc   :  { %v1868_v55 = vpop.xlane.xlu1 %1867 }
 0x2cd   :  { %v1960_v61 = vsub.f32 %v21009_v42, %v1868_v55  ;;  %v1864_v14 = vpop.xlane.xlu0 %1863 }
 0x2ce   :  { %v1959_v57 = vsub.f32 %v21011_v45, %v1864_v14 }
 0x2cf   :  { %v1993_v53 = vmul.f32 1.442695, %v1960_v61 }
 0x2d0   :  { %v1991_v29 = vmul.f32 1.442695, %v1959_v57 }
 0x2d1   :  { %19716 = vpow2.f32 %v1993_v53 }
 0x2d2   :  { %19718 = vpow2.f32 %v1991_v29 }
 0x2d4   :  { %v1874_v44 = vpop.xlane.xlu1 %1873 }
 0x2d5   :  { %v1962_v39 = vsub.f32 %v21017_v51, %v1874_v44  ;;  %v1871_v6 = vpop.xlane.xlu0 %1870 }
 0x2d6   :  { %v1961_v56 = vsub.f32 %v21019_v48, %v1871_v6 }
 0x2d7   :  { %v1997_v25 = vmul.f32 1.442695, %v1962_v39 }
 0x2d8   :  { %v1995_v26 = vmul.f32 1.442695, %v1961_v56 }
 0x2d9   :  { %19720 = vpow2.f32 %v1997_v25 }
 0x2da   :  { %19722 = vpow2.f32 %v1995_v26 }
 0x2db   :  { %v21193_v62 = vpop.eup %19716 }
 0x2dc   :  { %v21195_v55 = vpop.eup %19718  ;;  %v1880_v42 = vpop.xlane.xlu0 %1879  ;;  %v2058_v57 = vsel %vm1865_vm6, %v21193_v62, 0.0 }
 0x2dd   :  { %v1964_v53 = vsub.f32 %v21025_v58, %v1880_v42  ;;  %2059 = vadd.xlane.f32.xlu0 %v2058_v57  ;;  %v2055_v44 = vsel %vm1861_vm7, %v21195_v55, 0.0 }
 0x2de   :  { %2056 = vadd.xlane.f32.xlu1 %v2055_v44 }
 0x2df   :  { %v2001_v45 = vmul.f32 1.442695, %v1964_v53 }
 0x2e0   :  { %v1904_v39 = vpop.xlane.xlu0 %1903 }
 0x2e1   :  { %19724 = vpow2.f32 %v2001_v45  ;;  %v1972_v25 = vsub.f32 %v21027_v31, %v1904_v39 }
 0x2e3   :  { %v21203_v51 = vpop.eup %19720  ;;  %v2017_v26 = vmul.f32 1.442695, %v1972_v25 }
 0x2e4   :  { %v1877_v48 = vpop.xlane.xlu0 %1876  ;;  %v1886_v56 = vpop.xlane.xlu1 %1885  ;;  %v2064_v29 = vsel %vm1865_vm6, %v21203_v51, 0.0 }
 0x2e5   :  { %v21207_v14 = vpop.eup %19722  ;;  %19726 = vpow2.f32 %v2017_v26  ;;  %v1963_v58 = vsub.f32 %v21031_v2, %v1877_v48  ;;  %v1966_v6 = vsub.f32 %v21035_v23, %v1886_v56  ;;  %2065 = vadd.xlane.f32.xlu1 %v2064_v29 }
 0x2e6   :  { %v2061_v53 = vsel %vm1861_vm7, %v21207_v14, 0.0 }
 0x2e7   :  { %v1999_v61 = vmul.f32 1.442695, %v1963_v58  ;;  %v2005_v42 = vmul.f32 1.442695, %v1966_v6 }
 0x2e8   :  { %v1901_v57 = vpop.xlane.xlu0 %1900  ;;  %v1883_v31 = vpop.xlane.xlu1 %1882 }
 0x2e9   :  { %19728 = vpow2.f32 %v1999_v61  ;;  %v1971_v44 = vsub.f32 %v21037_v47, %v1901_v57  ;;  %v1965_v45 = vsub.f32 %v21039_v59, %v1883_v31  ;;  %2062 = vadd.xlane.f32.xlu1 %v2061_v53 }
 0x2ea   :  { %19730 = vpow2.f32 %v2005_v42 }
 0x2eb   :  { %v21215_v39 = vpop.eup %19724  ;;  %v2015_v2 = vmul.f32 1.442695, %v1971_v44  ;;  %v2003_v25 = vmul.f32 1.442695, %v1965_v45 }
 0x2ec   :  { %v1916_v23 = vpop.xlane.xlu0 %1915  ;;  %v2070_v26 = vsel %vm1865_vm6, %v21215_v39, 0.0 }
 0x2ed   :  { %19732 = vpow2.f32 %v2015_v2  ;;  %v1976_v48 = vsub.f32 %v21045_v32, %v1916_v23  ;;  %2071 = vadd.xlane.f32.xlu0 %v2070_v26 }
 0x2ee   :  { %19734 = vpow2.f32 %v2003_v25 }
 0x2ef   :  { %v21220_v56 = vpop.eup %19726  ;;  %v2025_v47 = vmul.f32 1.442695, %v1976_v48 }
 0x2f0   :  { %v1913_v29 = vpop.xlane.xlu0 %1912  ;;  %v2094_v59 = vsel %vm1865_vm6, %v21220_v56, 0.0 }
 0x2f1   :  { %19736 = vpow2.f32 %v2025_v47  ;;  %v1975_v58 = vsub.f32 %v21051_v13, %v1913_v29  ;;  %2095 = vadd.xlane.f32.xlu0 %v2094_v59 }
 0x2f3   :  { %v21225_v6 = vpop.eup %19728  ;;  %v2023_v61 = vmul.f32 1.442695, %v1975_v58 }
 0x2f4   :  { %v21227_v42 = vpop.eup %19730  ;;  %v1892_v57 = vpop.xlane.xlu0 %1891  ;;  %v2067_v31 = vsel %vm1861_vm7, %v21225_v6, 0.0 }
 0x2f5   :  { %v1898_v32 = vpop.xlane.xlu1 %1897  ;;  %19738 = vpow2.f32 %v2023_v61  ;;  %v1968_v53 = vsub.f32 %v21055_v46, %v1892_v57  ;;  %2068 = vadd.xlane.f32.xlu0 %v2067_v31  ;;  %v2076_v13 = vsel %vm1865_vm6, %v21227_v42, 0.0 }
 0x2f6   :  { %v1970_v44 = vsub.f32 %v21059_v27, %v1898_v32  ;;  %2077 = vadd.xlane.f32.xlu1 %v2076_v13 }
 0x2f7   :  { %v21235_v45 = vpop.eup %19732  ;;  %v2009_v2 = vmul.f32 1.442695, %v1968_v53 }
 0x2f8   :  { %v2013_v25 = vmul.f32 1.442695, %v1970_v44  ;;  %v21237_v23 = vpop.eup %19734  ;;  %v1928_v26 = vpop.xlane.xlu0 %1927  ;;  %v2091_v47 = vsel %vm1861_vm7, %v21235_v45, 0.0 }
 0x2f9   :  { %v1895_v48 = vpop.xlane.xlu1 %1894  ;;  %19740 = vpow2.f32 %v2009_v2  ;;  %v1980_v46 = vsub.f32 %v21061_v30, %v1928_v26  ;;  %2092 = vadd.xlane.f32.xlu0 %v2091_v47  ;;  %v2073_v29 = vsel %vm1861_vm7, %v21237_v23, 0.0 }
 0x2fa   :  { %v1969_v27 = vsub.f32 %v21063_v43, %v1895_v48  ;;  %19742 = vpow2.f32 %v2013_v25  ;;  %2074 = vadd.xlane.f32.xlu1 %v2073_v29 }
 0x2fb   :  { %v21245_v59 = vpop.eup %19736  ;;  %v2033_v58 = vmul.f32 1.442695, %v1980_v46 }
 0x2fc   :  { %v2011_v61 = vmul.f32 1.442695, %v1969_v27  ;;  %v1889_v57 = vpop.xlane.xlu0 %1888  ;;  %v2106_v31 = vsel %vm1865_vm6, %v21245_v59, 0.0 }
 0x2fd   :  { %v1910_v32 = vpop.xlane.xlu1 %1909  ;;  %19744 = vpow2.f32 %v2033_v58  ;;  %v1967_v30 = vsub.f32 %v21069_v34, %v1889_v57  ;;  %2107 = vadd.xlane.f32.xlu0 %v2106_v31 }
 0x2fe   :  { %v1974_v43 = vsub.f32 %v21075_v15, %v1910_v32  ;;  %19746 = vpow2.f32 %v2011_v61 }
 0x2ff   :  { %v21251_v53 = vpop.eup %19738  ;;  %v2007_v44 = vmul.f32 1.442695, %v1967_v30 }
 0x300   :  { %v2021_v13 = vmul.f32 1.442695, %v1974_v43  ;;  %v1925_v2 = vpop.xlane.xlu0 %1924  ;;  %v2103_v26 = vsel %vm1861_vm7, %v21251_v53, 0.0 }
 0x301   :  { %v1907_v25 = vpop.xlane.xlu1 %1906  ;;  %19748 = vpow2.f32 %v2007_v44  ;;  %v1979_v48 = vsub.f32 %v21077_v40, %v1925_v2  ;;  %2104 = vadd.xlane.f32.xlu0 %v2103_v26 }
 0x302   :  { %v1973_v47 = vsub.f32 %v21079_v1, %v1907_v25  ;;  %19750 = vpow2.f32 %v2021_v13 }
 0x303   :  { %v21257_v34 = vpop.eup %19740  ;;  %v2031_v15 = vmul.f32 1.442695, %v1979_v48 }
 0x304   :  { %v2019_v46 = vmul.f32 1.442695, %v1973_v47  ;;  %v21259_v27 = vpop.eup %19742  ;;  %v1940_v29 = vpop.xlane.xlu0 %1939  ;;  %v2082_v61 = vsel %vm1865_vm6, %v21257_v34, 0.0 }
 0x305   :  { %v1949_v58 = vpop.xlane.xlu1 %1948  ;;  %19752 = vpow2.f32 %v2031_v15  ;;  %v1984_v57 = vsub.f32 %v21085_v17, %v1940_v29  ;;  %2083 = vadd.xlane.f32.xlu0 %v2082_v61  ;;  %v2088_v1 = vsel %vm1865_vm6, %v21259_v27, 0.0 }
 0x306   :  { %v1987_v40 = vsub.f32 %v21087_v35, %v1949_v58  ;;  %19754 = vpow2.f32 %v2019_v46  ;;  %2089 = vadd.xlane.f32.xlu1 %v2088_v1 }
 0x307   :  { %v21267_v32 = vpop.eup %19744  ;;  %v2041_v31 = vmul.f32 1.442695, %v1984_v57 }
 0x308   :  { %v2047_v30 = vmul.f32 1.442695, %v1987_v40  ;;  %v21269_v43 = vpop.eup %19746  ;;  %v1937_v44 = vpop.xlane.xlu0 %1936  ;;  %v2118_v2 = vsel %vm1865_vm6, %v21267_v32, 0.0 }
 0x309   :  { %v1922_v13 = vpop.xlane.xlu1 %1921  ;;  %19756 = vpow2.f32 %v2041_v31  ;;  %v1983_v17 = vsub.f32 %v21095_v21, %v1937_v44  ;;  %2119 = vadd.xlane.f32.xlu0 %v2118_v2  ;;  %v2085_v25 = vsel %vm1861_vm7, %v21269_v43, 0.0 }
 0x30a   :  { %v1978_v35 = vsub.f32 %v21097_v38, %v1922_v13  ;;  %19758 = vpow2.f32 %v2047_v30  ;;  %2086 = vadd.xlane.f32.xlu1 %v2085_v25 }
 0x30b   :  { %v21277_v26 = vpop.eup %19748  ;;  %v2039_v48 = vmul.f32 1.442695, %v1983_v17 }
 0x30c   :  { %v2029_v47 = vmul.f32 1.442695, %v1978_v35  ;;  %v21279_v15 = vpop.eup %19750  ;;  %v1952_v46 = vpop.xlane.xlu0 %1951  ;;  %v2079_v58 = vsel %vm1861_vm7, %v21277_v26, 0.0 }
 0x30d   :  { %v1919_v29 = vpop.xlane.xlu1 %1918  ;;  %19760 = vpow2.f32 %v2039_v48  ;;  %v1988_v21 = vsub.f32 %v21105_v9, %v1952_v46  ;;  %2080 = vadd.xlane.f32.xlu0 %v2079_v58  ;;  %v2100_v61 = vsel %vm1865_vm6, %v21279_v15, 0.0 }
 0x30e   :  { %v1977_v38 = vsub.f32 %v21107_v28, %v1919_v29  ;;  %19762 = vpow2.f32 %v2029_v47  ;;  %2101 = vadd.xlane.f32.xlu1 %v2100_v61 }
 0x30f   :  { %v21287_v57 = vpop.eup %19752  ;;  %v2049_v40 = vmul.f32 1.442695, %v1988_v21 }
 0x310   :  { %v2027_v1 = vmul.f32 1.442695, %v1977_v38  ;;  %v21289_v31 = vpop.eup %19754  ;;  %v2115_v44 = vsel %vm1861_vm7, %v21287_v57, 0.0 }
 0x311   :  { %v1934_v30 = vpop.xlane.xlu1 %1933  ;;  %19764 = vpow2.f32 %v2049_v40  ;;  %2116 = vadd.xlane.f32.xlu0 %v2115_v44  ;;  %v2097_v28 = vsel %vm1861_vm7, %v21289_v31, 0.0 }
 0x312   :  { %v1982_v9 = vsub.f32 %v21113_v19, %v1934_v30  ;;  %19766 = vpow2.f32 %v2027_v1  ;;  %2098 = vadd.xlane.f32.xlu1 %v2097_v28 }
 0x313   :  { %v21296_v13 = vpop.eup %19756 }
 0x314   :  { %v2037_v2 = vmul.f32 1.442695, %v1982_v9  ;;  %v21298_v17 = vpop.eup %19758  ;;  %v1946_v25 = vpop.xlane.xlu0 %1945  ;;  %v2130_v48 = vsel %vm1865_vm6, %v21296_v13, 0.0 }
 0x315   :  { %v1931_v35 = vpop.xlane.xlu1 %1930  ;;  %v1986_v19 = vsub.f32 %v21125_v49, %v1946_v25  ;;  %2131 = vadd.xlane.f32.xlu0 %v2130_v48  ;;  %v2139_v46 = vsel %vm1861_vm7, %v21298_v17, 0.0 }
 0x316   :  { %19768 = vpow2.f32 %v2037_v2  ;;  %v1981_v47 = vsub.f32 %v21121_v10, %v1931_v35  ;;  %2140 = vadd.xlane.f32.xlu1 %v2139_v46 }
 0x317   :  { %v21306_v29 = vpop.eup %19760  ;;  %v2045_v21 = vmul.f32 1.442695, %v1986_v19 }
 0x318   :  { %v2035_v58 = vmul.f32 1.442695, %v1981_v47  ;;  %v21308_v38 = vpop.eup %19762  ;;  %v2127_v61 = vsel %vm1861_vm7, %v21306_v29, 0.0 }
 0x319   :  { %2128 = vadd.xlane.f32.xlu0 %v2127_v61  ;;  %v2112_v10 = vsel %vm1865_vm6, %v21308_v38, 0.0  ;;  %v1943_v48 = vpop.xlane.xlu1 %1942 }
 0x31a   :  { %19770 = vpow2.f32 %v2035_v58  ;;  %2113 = vadd.xlane.f32.xlu1 %v2112_v10  ;;  %v1985_v47 = vsub.f32 %v21129_v12, %v1943_v48 }
 0x31b   :  { %v21314_v49 = vpop.eup %19764  ;;  %19772 = vpow2.f32 %v2045_v21 }
 0x31c   :  { %v21316_v40 = vpop.eup %19766  ;;  %v2142_v1 = vsel %vm1865_vm6, %v21314_v49, 0.0  ;;  %v2043_v19 = vmul.f32 1.442695, %v1985_v47  ;;  %v1958_v46 = vpop.xlane.xlu0 %1957 }
 0x31d   :  { %2143 = vadd.xlane.f32.xlu0 %v2142_v1  ;;  %v2109_v30 = vsel %vm1861_vm7, %v21316_v40, 0.0  ;;  %v1990_v58 = vsub.f32 %v21139_v22, %v1958_v46  ;;  %v19153_v46 = vunpack.i.l.bf16 %v21141_v37 }
 0x31e   :  { %2110 = vadd.xlane.f32.xlu1 %v2109_v30  ;;  %19774 = vpow2.f32 %v2043_v19  ;;  %v1955_v30 = vpop.xlane.xlu1 %1954  ;;  %v19154_v19 = vunpack.i.h.bf16 %v21141_v37 }
 0x31f   :  { %v2053_v21 = vmul.f32 1.442695, %v1990_v58 }
 0x320   :  { %v21322_v44 = vpop.eup %19768 }
 0x321   :  { %v2124_v9 = vsel %vm1865_vm6, %v21322_v44, 0.0  ;;  %19776 = vpow2.f32 %v2053_v21 }
 0x322   :  { %2125 = vadd.xlane.f32.xlu0 %v2124_v9 }
 0x324   :  { %v21326_v28 = vpop.eup %19770 }
 0x325   :  { %v2121_v2 = vsel %vm1861_vm7, %v21326_v28, 0.0  ;;  %v21330_v35 = vpop.eup %19772 }
 0x326   :  { %2122 = vadd.xlane.f32.xlu0 %v2121_v2  ;;  %v2136_v25 = vsel %vm1865_vm6, %v21330_v35, 0.0  ;;  %v1989_v2 = vsub.f32 %v21143_v36, %v1955_v30 }
 0x328   :  { %v21340_v61 = vpop.eup %19774  ;;  %v2051_v58 = vmul.f32 1.442695, %v1989_v2 }
 0x329   :  { %v2133_v10 = vsel %vm1861_vm7, %v21340_v61, 0.0 }
 0x32a   :  { %2137 = vadd.xlane.f32.xlu0 %v2136_v25 }
 0x32b   :  { %v21344_v1 = vpop.eup %19776 }
 0x32c   :  { %v2148_v12 = vsel %vm1865_vm6, %v21344_v1, 0.0 }
 0x32f   :  { %3988 = vrot.lane.b32.xlu1 %v20650_v50, %s20407_s21 }
 0x340   :  { %19241 = vrot.lane.b32.xlu0 %v20683_v0, %s20406_s20 }
 0x353   :  { %2134 = vadd.xlane.f32.xlu1 %v2133_v10 }
 0x35f   :  { %2149 = vadd.xlane.f32.xlu0 %v2148_v12  ;;  %v18373_v12 = vpack.c.bf16 %v19154_v19, %v19153_v46 }
 0x364   :  { %19246 = vrot.lane.b32.xlu1 %v20697_v7, %s20406_s20 }
 0x36a   :  { %v2060_v9 = vpop.xlane.xlu0 %2059 }
 0x36b   :  { %19778 = vrcp.f32 %v2060_v9  ;;  %v2057_v22 = vpop.xlane.xlu1 %2056  ;;  %v19159_v9 = vunpack.i.h.bf16 %v21151_v16 }
 0x36c   :  { %19780 = vrcp.f32 %v2057_v22  ;;  %v19158_v22 = vunpack.i.l.bf16 %v21151_v16 }
 0x36e   :  { %v18379_v19 = vpack.c.bf16 %v19159_v9, %v19158_v22 }
 0x372   :  { %v2066_v25 = vpop.xlane.xlu1 %2065 }
 0x373   :  { %19782 = vrcp.f32 %v2066_v25 }
 0x375   :  { %3990 = vrot.lane.b32.xlu0 %v20634_v41, %s20407_s21  ;;  %v19779_v48 = vpop.eup %19778 }
 0x376   :  { %v19781_v47 = vpop.eup %19780  ;;  %v2063_v21 = vpop.xlane.xlu1 %2062  ;;  %v2184_v36 = vmul.f32 %v19779_v48, %v21193_v62 }
 0x377   :  { %19784 = vrcp.f32 %v2063_v21  ;;  %v2183_v10 = vmul.f32 %v19781_v47, %v21195_v55  ;;  %v19164_v21 = vunpack.i.h.bf16 %v21155_v63 }
 0x378   :  { %19786 = vpow2.f32 %v2051_v58 }
 0x379   :  { %4079 = vrot.lane.b32.xlu0 %v20657_v54, %s20407_s21  ;;  %17381 = vmatprep.mubr.msk.f32.mxu0 %vm1861_vm7, %v2183_v10  ;;  %v19163_v10 = vunpack.i.l.bf16 %v21155_v63  ;;  %v19168_v63 = vunpack.i.l.bf16 %v21093_v11 }
 0x37a   :  { %v2072_v30 = vpop.xlane.xlu0 %2071  ;;  %17382 = vmatmul.mubr.msk.f32.vlgmr.msra.gmra.mrb[34].mxu0 %vm1861_vm7, %v2184_v36 }
 0x37b   :  { %18366 = vmatpush3.bf16.msk.msra.mxu0 %vm20941_vm5, %v20961_v24  ;;  %19788 = vrcp.f32 %v2072_v30  ;;  %v21400_v9 = vpack.c.bf16 %v19164_v21, %v19163_v10  ;;  %v25632_v10 = vld [vmem:[#allocation28_spill] sm:$0xff] }
 0x37c   :  { %18375 = vmatprep.subr.msk.bf16.mxu0 %vm20941_vm5, %v18373_v12 }
 0x37d   :  { %19251 = vrot.lane.b32.xlu0 %v20713_v20, %s20406_s20  ;;  %v19783_v62 = vpop.eup %19782 }
 0x37e   :  { %v21368_v37 = vpop.xlane.xlu0 %2095  ;;  %v2186_v48 = vmul.f32 %v19783_v62, %v21203_v51 }
 0x381   :  { %4172 = vrot.lane.b32.xlu0 %v20667_v60, %s20407_s21  ;;  %v19785_v55 = vpop.eup %19784 }
 0x382   :  { %v2069_v2 = vpop.xlane.xlu0 %2068  ;;  %v2185_v24 = vmul.f32 %v19785_v55, %v21207_v14  ;;  %v21376_v47 = vpop.eup %19786 }
 0x383   :  { %19790 = vrcp.f32 %v2069_v2  ;;  %v2078_v25 = vpop.xlane.xlu1 %2077  ;;  %v2145_v14 = vsel %vm1861_vm7, %v21376_v47, 0.0  ;;  %v19169_v2 = vunpack.i.h.bf16 %v21093_v11 }
 0x384   :  { %17388 = vmatprep.mubr.msk.f32.mxu1 %vm1861_vm7, %v2185_v24  ;;  %19792 = vrcp.f32 %v2078_v25 }
 0x385   :  { %4261 = vrot.lane.b32.xlu0 %v20693_v5, %s20407_s21  ;;  %17389 = vmatmul.mubr.msk.f32.vlgmr.msra.gmra.mrb[22].mxu1 %vm1861_vm7, %v2186_v48  ;;  %v19789_v58 = vpop.eup %19788  ;;  %v18391_v48 = vpack.c.bf16 %v19169_v2, %v19168_v63 }
 0x386   :  { %18372 = vmatpush3.bf16.msk.msra.mxu1 %vm20941_vm5, %v21000_v52  ;;  %v2093_v16 = vpop.xlane.xlu0 %2092  ;;  %v2188_v62 = vmul.f32 %v19789_v58, %v21215_v39  ;;  %v25630_v58 = vld [vmem:[#allocation26_spill] sm:$0xff] }
 0x387   :  { %18381 = vmatprep.subr.msk.bf16.mxu1 %vm20941_vm5, %v18379_v19  ;;  %v2075_v51 = vpop.xlane.xlu1 %2074 }
 0x388   :  { %19794 = vrcp.f32 %v2075_v51  ;;  %2146 = vadd.xlane.f32.xlu1 %v2145_v14 }
 0x389   :  { %19261 = vrot.lane.b32.xlu0 %v20733_v33, %s20406_s20 }
 0x38a   :  { %v2108_v46 = vpop.xlane.xlu0 %2107 }
 0x38d   :  { %4354 = vrot.lane.b32.xlu0 %v20688_v3, %s20407_s21  ;;  %v19791_v52 = vpop.eup %19790 }
 0x38e   :  { %v2105_v36 = vpop.xlane.xlu0 %2104  ;;  %v2187_v30 = vmul.f32 %v19791_v52, %v21225_v6  ;;  %v19793_v55 = vpop.eup %19792 }
 0x38f   :  { %v2190_v25 = vmul.f32 %v19793_v55, %v21227_v42  ;;  %v25629_v42 = vld [vmem:[#allocation14_spill] sm:$0xff]  ;;  %v25634_v55 = vld [vmem:[#allocation40_spill] sm:$0xff] }
 0x390   :  { %17395 = vmatprep.mubr.msk.f32.mxu0 %vm1861_vm7, %v2187_v30  ;;  %v19178_v2 = vunpack.i.l.bf16 %v25634_v55 }
 0x391   :  { %4443 = vrot.lane.b32.xlu0 %v20709_v18, %s20407_s21  ;;  %17396 = vmatmul.mubr.msk.f32.vlgmr.msra.gmra.mrb[36].mxu0 %vm1861_vm7, %v2188_v62  ;;  %v25633_v62 = vld [vmem:[#allocation23_spill] sm:$0xff] }
 0x392   :  { %v19795_v22 = vpop.eup %19794  ;;  %18378 = vmatpush3.bf16.msk.msra.mxu0 %vm20941_vm5, %v18373_v12  ;;  %v2084_v6 = vpop.xlane.xlu0 %2083 }
 0x393   :  { %18387 = vmatprep.subr.msk.bf16.mxu0 %vm20941_vm5, %v21400_v9  ;;  %v2090_v39 = vpop.xlane.xlu1 %2089  ;;  %v2189_v24 = vmul.f32 %v19795_v22, %v21237_v23  ;;  %v25628_v23 = vld [vmem:[#allocation22_spill] sm:$0xff]  ;;  %v19179_v22 = vunpack.i.h.bf16 %v25634_v55 }
 0x394   :  { %19796 = vrcp.f32 %v2090_v39 }
 0x395   :  { %19271 = vrot.lane.b32.xlu0 %v20763_v4, %s20406_s20  ;;  %17402 = vmatprep.mubr.msk.f32.mxu1 %vm1861_vm7, %v2189_v24  ;;  %v25635_v24 = vld [vmem:[#allocation25_spill] sm:$0xff]  ;;  %v18403_v55 = vpack.c.bf16 %v19179_v22, %v19178_v2 }
 0x396   :  { %17403 = vmatmul.mubr.msk.f32.vlgmr.msra.gmra.mrb[24].mxu1 %vm1861_vm7, %v2190_v25  ;;  %v2120_v11 = vpop.xlane.xlu0 %2119 }
 0x397   :  { %18384 = vmatpush3.bf16.msk.msra.mxu1 %vm20941_vm5, %v18379_v19  ;;  %v2087_v12 = vpop.xlane.xlu1 %2086  ;;  %v25631_v19 = vld [vmem:[#allocation16_spill] sm:$0xff] }
 0x398   :  { %18393 = vmatprep.subr.msk.bf16.mxu1 %vm20941_vm5, %v18391_v48  ;;  %19798 = vrcp.f32 %v2087_v12  ;;  %v25636_v12 = vld [vmem:[#allocation18_spill] sm:$0xff] }
 0x399   :  { %4536 = vrot.lane.b32.xlu0 %v25628_v23, %s20407_s21  ;;  %4081 = vrot.lane.b32.xlu1 %v25629_v42, %s20407_s21  ;;  %19800 = vrcp.f32 %v2084_v6 }
 0x39a   :  { %v2081_v51 = vpop.xlane.xlu0 %2080 }
 0x39b   :  { %19802 = vrcp.f32 %v2081_v51  ;;  %v2102_v14 = vpop.xlane.xlu1 %2101 }
 0x39c   :  { %19804 = vrcp.f32 %v2093_v16 }
 0x39d   :  { %4625 = vrot.lane.b32.xlu0 %v25630_v58, %s20407_s21  ;;  %4170 = vrot.lane.b32.xlu1 %v25631_v19, %s20407_s21  ;;  %19806 = vrcp.f32 %v21368_v37 }
 0x39e   :  { %v2117_v52 = vpop.xlane.xlu0 %2116  ;;  %19808 = vrcp.f32 %v2102_v14  ;;  %v19797_v30 = vpop.eup %19796  ;;  %v25637_v14 = vld [vmem:[#allocation39_spill] sm:$0xff] }
 0x39f   :  { %v2099_v21 = vpop.xlane.xlu1 %2098 }
 0x3a0   :  { %19810 = vrcp.f32 %v2099_v21  ;;  %v19174_v21 = vunpack.i.h.bf16 %v25637_v14 }
 0x3a1   :  { %4716 = vrot.lane.b32.xlu0 %v25632_v10, %s20407_s21  ;;  %19812 = vrcp.f32 %v2105_v36  ;;  %19256 = vrot.lane.b32.xlu1 %v25633_v62, %s20406_s20  ;;  %v2194_v36 = vmul.f32 %v19797_v30, %v21259_v27 }
 0x3a2   :  { %v19799_v16 = vpop.eup %19798  ;;  %v2132_v63 = vpop.xlane.xlu0 %2131  ;;  %19814 = vrcp.f32 %v2108_v46  ;;  %v19173_v46 = vunpack.i.l.bf16 %v25637_v14 }
 0x3a3   :  { %v2141_v37 = vpop.xlane.xlu1 %2140  ;;  %v2193_v6 = vmul.f32 %v19799_v16, %v21269_v43  ;;  %v19801_v39 = vpop.eup %19800  ;;  %19816 = vrcp.f32 %v2117_v52  ;;  %v25638_v16 = vld [vmem:[#allocation37_spill] sm:$0xff] }
 0x3a4   :  { %19818 = vrcp.f32 %v2120_v11  ;;  %v2192_v22 = vmul.f32 %v19801_v39, %v21257_v34  ;;  %v25640_v11 = vld [vmem:[#allocation19_spill] sm:$0xff]  ;;  %v18397_v14 = vpack.c.bf16 %v19174_v21, %v19173_v46  ;;  %v25641_v34 = vld [vmem:[#allocation41_spill] sm:$0xff] }
 0x3a5   :  { %4718 = vrot.lane.b32.xlu0 %v25635_v24, %s20407_s21  ;;  %v19803_v25 = vpop.eup %19802  ;;  %4263 = vrot.lane.b32.xlu1 %v25636_v12, %s20407_s21  ;;  %v19189_v39 = vunpack.i.h.bf16 %v25641_v34  ;;  %v19188_v24 = vunpack.i.l.bf16 %v25641_v34 }
 0x3a6   :  { %17416 = vmatprep.mubr.msk.f32.mxu1 %vm1861_vm7, %v2193_v6  ;;  %v19805_v51 = vpop.eup %19804  ;;  %v2129_v43 = vpop.xlane.xlu0 %2128  ;;  %v2191_v52 = vmul.f32 %v19803_v25, %v21277_v26  ;;  %v25639_v6 = vld [vmem:[#allocation46_spill] sm:$0xff] }
 0x3a7   :  { %17417 = vmatmul.mubr.msk.f32.vlgmr.msra.gmra.mrb[26].mxu1 %vm1861_vm7, %v2194_v36  ;;  %v2114_v27 = vpop.xlane.xlu1 %2113  ;;  %v19807_v30 = vpop.eup %19806  ;;  %19820 = vrcp.f32 %v2129_v43  ;;  %v19184_v36 = vunpack.i.h.bf16 %v25639_v6  ;;  %v19183_v26 = vunpack.i.l.bf16 %v25639_v6 }
 0x3a8   :  { %18396 = vmatpush3.bf16.msk.msra.mxu1 %vm20941_vm5, %v18391_v48  ;;  %v19809_v2 = vpop.eup %19808  ;;  %17409 = vmatprep.mubr.msk.f32.mxu0 %vm1861_vm7, %v2191_v52  ;;  %v2195_v48 = vmul.f32 %v19805_v51, %v21235_v45  ;;  %19822 = vrcp.f32 %v2132_v63  ;;  %v25642_v63 = vld [vmem:[#allocation31_spill] sm:$0xff]  ;;  %v2196_v51 = vmul.f32 %v19807_v30, %v21220_v56  ;;  %v18415_v30 = vpack.c.bf16 %v19189_v39, %v19188_v24  ;;  %v25648_v39 = vld [vmem:[#allocation10_spill] sm:$0xff] }
 0x3a9   :  { %18405 = vmatprep.subr.msk.bf16.mxu1 %vm20941_vm5, %v18403_v55  ;;  %19286 = vrot.lane.b32.xlu0 %v25638_v16, %s20406_s20  ;;  %19824 = vrcp.f32 %v2114_v27  ;;  %v2198_v21 = vmul.f32 %v19809_v2, %v21279_v15  ;;  %v18409_v27 = vpack.c.bf16 %v19184_v36, %v19183_v26 }
 0x3aa   :  { %4352 = vrot.lane.b32.xlu1 %v25640_v11, %s20407_s21  ;;  %v19811_v25 = vpop.eup %19810  ;;  %17410 = vmatmul.mubr.msk.f32.vlgmr.msra.gmra.mrb[38].mxu0 %vm1861_vm7, %v2192_v22  ;;  %v2144_v43 = vpop.xlane.xlu0 %2143 }
 0x3ab   :  { %v19813_v12 = vpop.eup %19812  ;;  %18390 = vmatpush3.bf16.msk.msra.mxu0 %vm20941_vm5, %v21400_v9  ;;  %17423 = vmatprep.mubr.msk.f32.mxu0 %vm1861_vm7, %v2195_v48  ;;  %v2111_v52 = vpop.xlane.xlu1 %2110  ;;  %v2197_v45 = vmul.f32 %v19811_v25, %v21289_v31  ;;  %v25643_v9 = vld [vmem:[#allocation27_spill] sm:$0xff]  ;;  %v25644_v31 = vld [vmem:[#allocation42_spill] sm:$0xff] }
 0x3ac   :  { %18399 = vmatprep.subr.msk.bf16.mxu0 %vm20941_vm5, %v18397_v14  ;;  %19826 = vrcp.f32 %v2111_v52  ;;  %v19815_v46 = vpop.eup %19814  ;;  %v19194_v6 = vunpack.i.h.bf16 %v25644_v31  ;;  %v19193_v48 = vunpack.i.l.bf16 %v25644_v31  ;;  %v2199_v15 = vmul.f32 %v19813_v12, %v21251_v53  ;;  %v25645_v53 = vld [vmem:[#allocation36_spill] sm:$0xff] }
 0x3ad   :  { %4898 = vrot.lane.b32.xlu0 %v25642_v63, %s20407_s21  ;;  %17430 = vmatprep.mubr.msk.f32.mxu1 %vm1861_vm7, %v2197_v45  ;;  %v19817_v22 = vpop.eup %19816  ;;  %19828 = vrcp.f32 %v2141_v37  ;;  %v2200_v37 = vmul.f32 %v19815_v46, %v21245_v59  ;;  %v25651_v31 = vld [vmem:[#allocation48_spill] sm:$0xff] }
 0x3ae   :  { %19266 = vrot.lane.b32.xlu1 %v25643_v9, %s20406_s20  ;;  %17424 = vmatmul.mubr.msk.f32.vlgmr.msra.gmra.mrb[40].mxu0 %vm1861_vm7, %v2196_v51  ;;  %19830 = vrcp.f32 %v2144_v43  ;;  %v19819_v2 = vpop.eup %19818  ;;  %v2203_v24 = vmul.f32 %v19817_v22, %v21287_v57  ;;  %v18421_v36 = vpack.c.bf16 %v19194_v6, %v19193_v48  ;;  %v25649_v51 = vld [vmem:[#allocation43_spill] sm:$0xff]  ;;  %v25650_v22 = vld [vmem:[#allocation21_spill] sm:$0xff]  ;;  %v19208_v6 = vunpack.i.l.bf16 %v25651_v31 }
 0x3af   :  { %17431 = vmatmul.mubr.msk.f32.vlgmr.msra.gmra.mrb[28].mxu1 %vm1861_vm7, %v2198_v21  ;;  %v2126_v56 = vpop.xlane.xlu0 %2125  ;;  %18402 = vmatpush3.bf16.msk.msra.mxu0 %vm20941_vm5, %v18397_v14  ;;  %v25647_v14 = vld [vmem:[#allocation20_spill] sm:$0xff]  ;;  %v2204_v43 = vmul.f32 %v19819_v2, %v21267_v32  ;;  %v19199_v21 = vunpack.i.h.bf16 %v25649_v51  ;;  %v19198_v46 = vunpack.i.l.bf16 %v25649_v51  ;;  %v19209_v32 = vunpack.i.h.bf16 %v25651_v31  ;;  %v25659_v51 = vld [vmem:[#allocation47_spill] sm:$0xff] }
 0x3b0   :  { %18408 = vmatpush3.bf16.msk.msra.mxu1 %vm20941_vm5, %v18403_v55  ;;  %17437 = vmatprep.mubr.msk.f32.mxu0 %vm1861_vm7, %v2199_v15  ;;  %v25646_v55 = vld [vmem:[#allocation44_spill] sm:$0xff]  ;;  %19832 = vrcp.f32 %v2126_v56  ;;  %v25652_v15 = vld [vmem:[#allocation15_spill] sm:$0xff] }
 0x3b1   :  { %18411 = vmatprep.subr.msk.bf16.mxu0 %vm20941_vm5, %v18409_v27  ;;  %18417 = vmatprep.subr.msk.bf16.mxu1 %vm20941_vm5, %v18415_v30  ;;  %v19821_v12 = vpop.eup %19820  ;;  %v19204_v26 = vunpack.i.h.bf16 %v25646_v55  ;;  %v19203_v25 = vunpack.i.l.bf16 %v25646_v55  ;;  %v25662_v31 = vld [vmem:[#allocation56_spill] sm:$0xff] }
 0x3b2   :  { %4989 = vrot.lane.b32.xlu0 %v25645_v53, %s20407_s21  ;;  %4445 = vrot.lane.b32.xlu1 %v25647_v14, %s20407_s21  ;;  %v19823_v57 = vpop.eup %19822  ;;  %v2207_v52 = vmul.f32 %v19821_v12, %v21306_v29  ;;  %v25653_v12 = vld [vmem:[#allocation33_spill] sm:$0xff] }
 0x3b3   :  { %17438 = vmatmul.mubr.msk.f32.vlgmr.msra.gmra.mrb[42].mxu0 %vm1861_vm7, %v2200_v37  ;;  %v2123_v59 = vpop.xlane.xlu0 %2122  ;;  %v19825_v34 = vpop.eup %19824  ;;  %v2208_v37 = vmul.f32 %v19823_v57, %v21296_v13  ;;  %v25657_v57 = vld [vmem:[#allocation24_spill] sm:$0xff] }
 0x3b4   :  { %18414 = vmatpush3.bf16.msk.msra.mxu0 %vm20941_vm5, %v18409_v27  ;;  %19834 = vrcp.f32 %v2123_v59  ;;  %17451 = vmatprep.mubr.msk.f32.mxu0 %vm1861_vm7, %v2203_v24  ;;  %v18433_v27 = vpack.c.bf16 %v19204_v26, %v19203_v25  ;;  %v2202_v56 = vmul.f32 %v19825_v34, %v21308_v38  ;;  %v18427_v24 = vpack.c.bf16 %v19199_v21, %v19198_v46 }
 0x3b5   :  { %18423 = vmatprep.subr.msk.bf16.mxu0 %vm20941_vm5, %v18421_v36 }
 0x3b6   :  { %19301 = vrot.lane.b32.xlu0 %v25648_v39, %s20409_s22  ;;  %v19827_v45 = vpop.eup %19826  ;;  %4534 = vrot.lane.b32.xlu1 %v25650_v22, %s20407_s21 }
 0x3b7   :  { %17452 = vmatmul.mubr.msk.f32.vlgmr.msra.gmra.mrb[44].mxu0 %vm1861_vm7, %v2204_v43  ;;  %v2201_v29 = vmul.f32 %v19827_v45, %v21316_v40  ;;  %v19829_v48 = vpop.eup %19828  ;;  %v18445_v40 = vpack.c.bf16 %v19209_v32, %v19208_v6  ;;  %v2138_v46 = vpop.xlane.xlu0 %2137  ;;  %v19229_v32 = vunpack.i.h.bf16 %v25662_v31  ;;  %v19228_v6 = vunpack.i.l.bf16 %v25662_v31 }
 0x3b8   :  { %18426 = vmatpush3.bf16.msk.msra.mxu0 %vm20941_vm5, %v18421_v36  ;;  %17465 = vmatprep.mubr.msk.f32.mxu0 %vm1861_vm7, %v2207_v52  ;;  %v19831_v2 = vpop.eup %19830  ;;  %v2211_v38 = vmul.f32 %v19829_v48, %v21298_v17  ;;  %v25656_v17 = vld [vmem:[#allocation17_spill] sm:$0xff]  ;;  %v25658_v52 = vld [vmem:[#allocation50_spill] sm:$0xff]  ;;  %19836 = vrcp.f32 %v2138_v46 }
 0x3b9   :  { %18435 = vmatprep.subr.msk.bf16.mxu0 %vm20941_vm5, %v18433_v27  ;;  %17444 = vmatprep.mubr.msk.f32.mxu1 %vm1861_vm7, %v2201_v29  ;;  %v2212_v26 = vmul.f32 %v19831_v2, %v21314_v49  ;;  %v19219_v45 = vunpack.i.h.bf16 %v25658_v52  ;;  %v19218_v49 = vunpack.i.l.bf16 %v25658_v52  ;;  %v25663_v29 = vld [vmem:[#allocation6_spill] sm:$0xff]  ;;  %v25664_v48 = vld [vmem:[#allocation29_spill] sm:$0xff]  ;;  %v25673_v52 = vld [vmem:[#allocation8_spill] sm:$0xff] }
 0x3ba   :  { %19311 = vrot.lane.b32.xlu0 %v25652_v15, %s20409_s22  ;;  %19276 = vrot.lane.b32.xlu1 %v25653_v12, %s20406_s20  ;;  %v19833_v36 = vpop.eup %19832 }
 0x3bb   :  { %17445 = vmatmul.mubr.msk.f32.vlgmr.msra.gmra.mrb[30].mxu1 %vm1861_vm7, %v2202_v56  ;;  %17466 = vmatmul.mubr.msk.f32.vlgmr.msra.gmra.mrb[46].mxu0 %vm1861_vm7, %v2208_v37  ;;  %v2206_v34 = vmul.f32 %v19833_v36, %v21322_v44  ;;  %v18457_v44 = vpack.c.bf16 %v19219_v45, %v19218_v49  ;;  %v18469_v56 = vpack.c.bf16 %v19229_v32, %v19228_v6  ;;  %v25665_v37 = vld [vmem:[#allocation52_spill] sm:$0xff]  ;;  %v19242_v2 = vpop.permute.xlu0 %19241  ;;  %v25674_v45 = vld [vmem:[#allocation13_spill] sm:$0xff] }
 0x3bc   :  { %18420 = vmatpush3.bf16.msk.msra.mxu1 %vm20941_vm5, %v18415_v30  ;;  %18438 = vmatpush3.bf16.msk.msra.mxu0 %vm20941_vm5, %v18433_v27  ;;  %v25655_v30 = vld [vmem:[#allocation59_spill] sm:$0xff]  ;;  %v25661_v27 = vld [vmem:[#allocation30_spill] sm:$0xff]  ;;  %v19243_v36 = vunpack.i.l.bf16 %v19242_v2  ;;  %v25676_v32 = vld [vmem:[#allocation45_spill] sm:$0xff] }
 0x3bd   :  { %18429 = vmatprep.subr.msk.bf16.mxu1 %vm20941_vm5, %v18427_v24  ;;  %17479 = vmatprep.mubr.msk.f32.mxu0 %vm1861_vm7, %v2211_v38  ;;  %v19239_v25 = vunpack.i.h.bf16 %v25655_v30  ;;  %v19238_v59 = vunpack.i.l.bf16 %v25655_v30  ;;  %v19244_v38 = vunpack.i.h.bf16 %v19242_v2  ;;  %v3989_v30 = vpop.permute.xlu1 %3988  ;;  %v19214_v6 = vunpack.i.h.bf16 %v25676_v32 }
 0x3be   :  { %v19835_v13 = vpop.eup %19834  ;;  %18447 = vmatprep.subr.msk.bf16.mxu0 %vm20859_vm2, %v18445_v40  ;;  %19316 = vrot.lane.b32.xlu0 %v25656_v17, %s20409_s22 }
 0x3bf   :  { %4627 = vrot.lane.b32.xlu1 %v25657_v57, %s20407_s21  ;;  %v2205_v43 = vmul.f32 %v19835_v13, %v21326_v28  ;;  %17480 = vmatmul.mubr.msk.f32.vlgmr.msra.gmra.mrb[48].mxu0 %vm1861_vm7, %v2212_v26  ;;  %v18439_v21 = vpack.c.bf16 %v19239_v25, %v19238_v59  ;;  %v25660_v28 = vld [vmem:[#allocation35_spill] sm:$0xff]  ;;  %v25668_v13 = vld [vmem:[#allocation2_spill] sm:$0xff]  ;;  %v18481_v25 = vpack.c.bf16 %v19244_v38, %v19243_v36 }
 0x3c0   :  { %17493 = vmatprep.mubr.msk.f32.mxu0 %vm425_vm1, %v25659_v51  ;;  %v25669_v26 = vld [vmem:[#allocation34_spill] sm:$0xff]  ;;  %v25675_v51 = vld [vmem:[#allocation12_spill] sm:$0xff] }
 0x3c1   :  { %17458 = vmatprep.mubr.msk.f32.mxu1 %vm1861_vm7, %v2205_v43  ;;  %v25670_v59 = vld [vmem:[#allocation58_spill] sm:$0xff]  ;;  %v25671_v43 = vld [vmem:[#allocation5_spill] sm:$0xff] }
 0x3c2   :  { %17459 = vmatmul.mubr.msk.f32.vlgmr.msra.gmra.mrb[32].mxu1 %vm1861_vm7, %v2206_v34  ;;  %19321 = vrot.lane.b32.xlu0 %v20683_v0, %s20409_s22  ;;  %v25672_v34 = vld [vmem:[#allocation11_spill] sm:$0xff] }
 0x3c3   :  { %19281 = vrot.lane.b32.xlu1 %v25660_v28, %s20406_s20  ;;  %18432 = vmatpush3.bf16.msk.msra.mxu1 %vm20941_vm5, %v18427_v24  ;;  %v25666_v24 = vld [vmem:[#allocation53_spill] sm:$0xff] }
 0x3c4   :  { %18441 = vmatprep.subr.msk.bf16.mxu1 %vm20941_vm5, %v18439_v21 }
 0x3c5   :  { %18450 = vmatpush3.bf16.xpose.msk.msra.mxu0 %vm20859_vm2, %v18445_v40  ;;  %v25667_v40 = vld [vmem:[#allocation32_spill] sm:$0xff] }
 0x3c6   :  { %18459 = vmatprep.subr.msk.bf16.mxu0 %vm20859_vm2, %v18457_v44  ;;  %19341 = vrot.lane.b32.xlu0 %v20733_v33, %s20409_s22 }
 0x3c7   :  { %4807 = vrot.lane.b32.xlu1 %v25661_v27, %s20407_s21 }
 0x3ca   :  { %19371 = vrot.lane.b32.xlu0 %v25663_v29, %s20410_s23 }
 0x3cb   :  { %4809 = vrot.lane.b32.xlu1 %v25664_v48, %s20407_s21 }
 0x3cc   :  { %17494 = vmatmul.mubr.msk.f32.vlgmr.msra.gmra.mrb[50].mxu0 %vm425_vm1, %v25665_v37 }
 0x3cd   :  { %18462 = vmatpush3.bf16.xpose.msk.msra.mxu0 %vm20859_vm2, %v18457_v44  ;;  %17507 = vmatprep.mubr.msk.f32.mxu0 %vm425_vm1, %v25666_v24  ;;  %v19837_v44 = vpop.eup %19836 }
 0x3ce   :  { %18471 = vmatprep.subr.msk.bf16.mxu0 %vm20859_vm2, %v18469_v56  ;;  %19381 = vrot.lane.b32.xlu0 %v25648_v39, %s20410_s23  ;;  %v2210_v2 = vmul.f32 %v19837_v44, %v21330_v35 }
 0x3cf   :  { %4900 = vrot.lane.b32.xlu1 %v25667_v40, %s20407_s21 }
 0x3d2   :  { %6874 = vrot.lane.b32.xlu0 %v25668_v13, %s20411_s24 }
 0x3d3   :  { %4991 = vrot.lane.b32.xlu1 %v25669_v26, %s20407_s21 }
 0x3d4   :  { %17508 = vmatmul.mubr.msk.f32.vlgmr.msra.gmra.mrb[52].mxu0 %vm425_vm1, %v25670_v59 }
 0x3d5   :  { %18474 = vmatpush3.bf16.xpose.msk.msra.mxu0 %vm20859_vm2, %v18469_v56  ;;  %17521 = vmatprep.mubr.msk.f32.mxu0 %vm425_vm1, %v3989_v30  ;;  %v19213_v56 = vunpack.i.l.bf16 %v25676_v32  ;;  %v25678_v32 = vld [vmem:[#allocation4_spill] sm:$0xff] }
 0x3d6   :  { %18483 = vmatprep.subr.msk.bf16.mxu0 %vm20859_vm2, %v18481_v25  ;;  %6963 = vrot.lane.b32.xlu0 %v25671_v43, %s20411_s24 }
 0x3d7   :  { %19291 = vrot.lane.b32.xlu1 %v25663_v29, %s20409_s22  ;;  %v18451_v24 = vpack.c.bf16 %v19214_v6, %v19213_v56  ;;  %v25679_v56 = vld [vmem:[#allocation7_spill] sm:$0xff] }
 0x3da   :  { %19391 = vrot.lane.b32.xlu0 %v25652_v15, %s20410_s23 }
 0x3db   :  { %19296 = vrot.lane.b32.xlu1 %v25672_v34, %s20409_s22 }
 0x3de   :  { %7056 = vrot.lane.b32.xlu0 %v25673_v52, %s20411_s24 }
 0x3df   :  { %19306 = vrot.lane.b32.xlu1 %v25674_v45, %s20409_s22 }
 0x3e0   :  { %v2135_v49 = vpop.xlane.xlu1 %2134 }
 0x3e1   :  { %19838 = vrcp.f32 %v2135_v49  ;;  %v25677_v49 = vld [vmem:[#allocation3_spill] sm:$0xff] }
 0x3e2   :  { %7145 = vrot.lane.b32.xlu0 %v25675_v51, %s20411_s24 }
 0x3e3   :  { %19326 = vrot.lane.b32.xlu1 %v20697_v7, %s20409_s22 }
 0x3e4   :  { %v19247_v6 = vpop.permute.xlu1 %19246 }
 0x3e7   :  { %19331 = vrot.lane.b32.xlu1 %v20713_v20, %s20409_s22 }
 0x3eb   :  { %v19839_v31 = vpop.eup %19838  ;;  %19336 = vrot.lane.b32.xlu1 %v25633_v62, %s20409_s22 }
 0x3ec   :  { %v2150_v46 = vpop.xlane.xlu0 %2149  ;;  %v2209_v37 = vmul.f32 %v19839_v31, %v21340_v61 }
 0x3ed   :  { %19840 = vrcp.f32 %v2150_v46 }
 0x3ee   :  { %17472 = vmatprep.mubr.msk.f32.mxu1 %vm1861_vm7, %v2209_v37 }
 0x3ef   :  { %19346 = vrot.lane.b32.xlu1 %v25643_v9, %s20409_s22  ;;  %17473 = vmatmul.mubr.msk.f32.vlgmr.msra.gmra.mrb[34].mxu1 %vm1861_vm7, %v2210_v2 }
 0x3f0   :  { %v3991_v38 = vpop.permute.xlu0 %3990  ;;  %18444 = vmatpush3.bf16.msk.msra.mxu1 %vm20941_vm5, %v18439_v21 }
 0x3f1   :  { %17522 = vmatmul.mubr.msk.f32.vlgmr.msra.gmra.mrb[54].mxu0 %vm425_vm1, %v3991_v38  ;;  %18453 = vmatprep.subr.msk.bf16.mxu1 %vm20859_vm2, %v18451_v24 }
 0x3f2   :  { %18486 = vmatpush3.bf16.xpose.msk.msra.mxu0 %vm20859_vm2, %v18481_v25 }
 0x3f3   :  { %19351 = vrot.lane.b32.xlu1 %v20763_v4, %s20409_s22 }
 0x3f4   :  { %v21638_v35 = vpop.permute.xlu0 %4079 }
 0x3f7   :  { %19356 = vrot.lane.b32.xlu1 %v25653_v12, %s20409_s22 }
 0x3f8   :  { %v19252_v61 = vpop.permute.xlu0 %19251 }
 0x3f9   :  { %v19254_v36 = vunpack.i.h.bf16 %v19252_v61  ;;  %v19253_v30 = vunpack.i.l.bf16 %v19252_v61 }
 0x3fb   :  { %v18493_v21 = vpack.c.bf16 %v19254_v36, %v19253_v30  ;;  %19361 = vrot.lane.b32.xlu1 %v25660_v28, %s20409_s22 }
 0x3fc   :  { %v4173_v59 = vpop.permute.xlu0 %4172 }
 0x3fd   :  { %18495 = vmatprep.subr.msk.bf16.mxu0 %vm20859_vm2, %v18493_v21 }
 0x3ff   :  { %19366 = vrot.lane.b32.xlu1 %v25638_v16, %s20409_s22 }
 0x400   :  { %v21648_v25 = vpop.permute.xlu0 %4261 }
 0x403   :  { %19376 = vrot.lane.b32.xlu1 %v25672_v34, %s20410_s23 }
 0x404   :  { %v19262_v44 = vpop.permute.xlu0 %19261 }
 0x405   :  { %v19264_v61 = vunpack.i.h.bf16 %v19262_v44  ;;  %v19263_v36 = vunpack.i.l.bf16 %v19262_v44 }
 0x407   :  { %6872 = vrot.lane.b32.xlu1 %v25677_v49, %s20411_s24  ;;  %v25680_v49 = vld [vmem:[#allocation9_spill] sm:$0xff]  ;;  %v18505_v46 = vpack.c.bf16 %v19264_v61, %v19263_v36  ;;  %v25682_v61 = vld [vmem:[#allocation54_spill] sm:$0xff] }
 0x408   :  { %v4355_v31 = vpop.permute.xlu0 %4354 }
 0x40b   :  { %19386 = vrot.lane.b32.xlu1 %v25674_v45, %s20410_s23 }
 0x40c   :  { %v21660_v37 = vpop.permute.xlu0 %4443 }
 0x40f   :  { %6965 = vrot.lane.b32.xlu1 %v25678_v32, %s20411_s24 }
 0x410   :  { %v19272_v30 = vpop.permute.xlu0 %19271 }
 0x413   :  { %7054 = vrot.lane.b32.xlu1 %v25679_v56, %s20411_s24  ;;  %v19841_v56 = vpop.eup %19840 }
 0x414   :  { %v4537_v44 = vpop.permute.xlu0 %4536 }
 0x415   :  { %v2147_v2 = vpop.xlane.xlu1 %2146 }
 0x416   :  { %19842 = vrcp.f32 %v2147_v2  ;;  %v25681_v2 = vld [vmem:[#allocation49_spill] sm:$0xff] }
 0x417   :  { %19396 = vrot.lane.b32.xlu1 %v25656_v17, %s20410_s23  ;;  %v19224_v45 = vunpack.i.h.bf16 %v25681_v2  ;;  %v19223_v52 = vunpack.i.l.bf16 %v25681_v2  ;;  %v25684_v2 = vld [vmem:[#allocation51_spill] sm:$0xff] }
 0x418   :  { %v21686_v36 = vpop.permute.xlu0 %4625 }
 0x419   :  { %v21664_v38 = vpop.permute.xlu1 %4081 }
 0x41b   :  { %7147 = vrot.lane.b32.xlu1 %v25680_v49, %s20411_s24 }
 0x41d   :  { %v4171_v32 = vpop.permute.xlu1 %4170 }
 0x41e   :  { %17535 = vmatprep.mubr.msk.f32.mxu0 %vm425_vm1, %v4171_v32  ;;  %v2214_v32 = vmul.f32 %v19841_v56, %v21344_v1 }
 0x41f   :  { %17536 = vmatmul.mubr.msk.f32.vlgmr.msra.gmra.mrb[56].mxu0 %vm425_vm1, %v4173_v59  ;;  %v18463_v59 = vpack.c.bf16 %v19224_v45, %v19223_v52  ;;  %v19273_v52 = vunpack.i.l.bf16 %v19272_v30 }
 0x420   :  { %v19843_v51 = vpop.eup %19842  ;;  %18498 = vmatpush3.bf16.xpose.msk.msra.mxu0 %vm20859_vm2, %v18493_v21 }
 0x421   :  { %18507 = vmatprep.subr.msk.bf16.mxu0 %vm20859_vm2, %v18505_v46  ;;  %v19257_v49 = vpop.permute.xlu1 %19256  ;;  %v2213_v34 = vmul.f32 %v19843_v51, %v21376_v47  ;;  %v25683_v47 = vld [vmem:[#allocation55_spill] sm:$0xff] }
 0x422   :  { %v19234_v51 = vunpack.i.h.bf16 %v25683_v47  ;;  %v19233_v1 = vunpack.i.l.bf16 %v25683_v47  ;;  %v19248_v47 = vunpack.i.l.bf16 %v19247_v6 }
 0x423   :  { %17486 = vmatprep.mubr.msk.f32.mxu1 %vm1861_vm7, %v2213_v34  ;;  %v19274_v34 = vunpack.i.h.bf16 %v19272_v30 }
 0x424   :  { %17487 = vmatmul.mubr.msk.f32.vlgmr.msra.gmra.mrb[36].mxu1 %vm1861_vm7, %v2214_v32  ;;  %v4717_v32 = vpop.permute.xlu0 %4716 }
 0x425   :  { %18456 = vmatpush3.bf16.xpose.msk.msra.mxu1 %vm20859_vm2, %v18451_v24  ;;  %17500 = vmatprep.mubr.msk.f32.mxu1 %vm425_vm1, %v25682_v61  ;;  %v4264_v21 = vpop.permute.xlu1 %4263  ;;  %v18475_v24 = vpack.c.bf16 %v19234_v51, %v19233_v1  ;;  %v18517_v56 = vpack.c.bf16 %v19274_v34, %v19273_v52  ;;  %v25685_v61 = vld [vmem:[#allocation60_spill] sm:$0xff]  ;;  %v19258_v52 = vunpack.i.l.bf16 %v19257_v49 }
 0x426   :  { %18465 = vmatprep.subr.msk.bf16.mxu1 %vm20859_vm2, %v18463_v59 }
 0x428   :  { %v4719_v1 = vpop.permute.xlu0 %4718 }
 0x429   :  { %v4353_v45 = vpop.permute.xlu1 %4352 }
 0x42a   :  { %17549 = vmatprep.mubr.msk.f32.mxu0 %vm425_vm1, %v4353_v45 }
 0x42b   :  { %17550 = vmatmul.mubr.msk.f32.vlgmr.msra.gmra.mrb[58].mxu0 %vm425_vm1, %v4355_v31  ;;  %v19249_v31 = vunpack.i.h.bf16 %v19247_v6  ;;  %v19259_v6 = vunpack.i.h.bf16 %v19257_v49 }
 0x42c   :  { %17501 = vmatmul.mubr.msk.f32.vlgmr.msra.gmra.mrb[38].mxu1 %vm425_vm1, %v25684_v2  ;;  %18510 = vmatpush3.bf16.xpose.msk.msra.mxu0 %vm20859_vm2, %v18505_v46  ;;  %v25686_v46 = vld [vmem:[#allocation57_spill] sm:$0xff]  ;;  %v19287_v45 = vpop.permute.xlu0 %19286 }
 0x42d   :  { %18468 = vmatpush3.bf16.xpose.msk.msra.mxu1 %vm20859_vm2, %v18463_v59  ;;  %17514 = vmatprep.mubr.msk.f32.mxu1 %vm425_vm1, %v25685_v61  ;;  %v19267_v30 = vpop.permute.xlu1 %19266  ;;  %v18487_v34 = vpack.c.bf16 %v19249_v31, %v19248_v47  ;;  %v18499_v2 = vpack.c.bf16 %v19259_v6, %v19258_v52  ;;  %v19289_v52 = vunpack.i.h.bf16 %v19287_v45 }
 0x42e   :  { %18519 = vmatprep.subr.msk.bf16.mxu0 %vm20859_vm2, %v18517_v56  ;;  %18477 = vmatprep.subr.msk.bf16.mxu1 %vm20859_vm2, %v18475_v24 }
 0x430   :  { %v4899_v49 = vpop.permute.xlu0 %4898 }
 0x431   :  { %v4446_v51 = vpop.permute.xlu1 %4445 }
 0x434   :  { %17515 = vmatmul.mubr.msk.f32.vlgmr.msra.gmra.mrb[40].mxu1 %vm425_vm1, %v25686_v46 }
 0x435   :  { %18480 = vmatpush3.bf16.xpose.msk.msra.mxu1 %vm20859_vm2, %v18475_v24  ;;  %17528 = vmatprep.mubr.msk.f32.mxu1 %vm425_vm1, %v21638_v35  ;;  %v4535_v59 = vpop.permute.xlu1 %4534 }
 0x436   :  { %18489 = vmatprep.subr.msk.bf16.mxu1 %vm20859_vm2, %v18487_v34  ;;  %17563 = vmatprep.mubr.msk.f32.mxu0 %vm425_vm1, %v4535_v59 }
 0x437   :  { %17564 = vmatmul.mubr.msk.f32.vlgmr.msra.gmra.mrb[60].mxu0 %vm425_vm1, %v4537_v44  ;;  %v19269_v44 = vunpack.i.h.bf16 %v19267_v30 }
 0x438   :  { %18522 = vmatpush3.bf16.xpose.msk.msra.mxu0 %vm20859_vm2, %v18517_v56  ;;  %17577 = vmatprep.mubr.msk.f32.mxu0 %vm425_vm1, %v4717_v32  ;;  %v19268_v56 = vunpack.i.l.bf16 %v19267_v30 }
 0x439   :  { %v19277_v24 = vpop.permute.xlu1 %19276 }
 0x43a   :  { %v18511_v31 = vpack.c.bf16 %v19269_v44, %v19268_v56  ;;  %v19279_v30 = vunpack.i.h.bf16 %v19277_v24 }
 0x43c   :  { %17529 = vmatmul.mubr.msk.f32.vlgmr.msra.gmra.mrb[42].mxu1 %vm425_vm1, %v21664_v38 }
 0x43d   :  { %18492 = vmatpush3.bf16.xpose.msk.msra.mxu1 %vm20859_vm2, %v18487_v34  ;;  %17542 = vmatprep.mubr.msk.f32.mxu1 %vm425_vm1, %v21648_v25  ;;  %v4628_v35 = vpop.permute.xlu1 %4627 }
 0x43e   :  { %18501 = vmatprep.subr.msk.bf16.mxu1 %vm20859_vm2, %v18499_v2 }
 0x43f   :  { %17578 = vmatmul.mubr.msk.f32.vlgmr.msra.gmra.mrb[62].mxu0 %vm425_vm1, %v4719_v1  ;;  %v19278_v1 = vunpack.i.l.bf16 %v19277_v24  ;;  %v19288_v24 = vunpack.i.l.bf16 %v19287_v45 }
 0x440   :  { %17591 = vmatprep.mubr.msk.f32.mxu0 %vm425_vm1, %v4899_v49 }
 0x441   :  { %v19282_v32 = vpop.permute.xlu1 %19281  ;;  %v18523_v46 = vpack.c.bf16 %v19279_v30, %v19278_v1  ;;  %v18535_v49 = vpack.c.bf16 %v19289_v52, %v19288_v24 }
 0x442   :  { %v19284_v61 = vunpack.i.h.bf16 %v19282_v32  ;;  %v19283_v38 = vunpack.i.l.bf16 %v19282_v32 }
 0x444   :  { %v18529_v47 = vpack.c.bf16 %v19284_v61, %v19283_v38  ;;  %17543 = vmatmul.mubr.msk.f32.vlgmr.msra.gmra.mrb[44].mxu1 %vm425_vm1, %v4264_v21  ;;  %v4990_v21 = vpop.permute.xlu0 %4989 }
 0x445   :  { %18504 = vmatpush3.bf16.xpose.msk.msra.mxu1 %vm20859_vm2, %v18499_v2  ;;  %17556 = vmatprep.mubr.msk.f32.mxu1 %vm425_vm1, %v21660_v37  ;;  %v4808_v25 = vpop.permute.xlu1 %4807 }
 0x446   :  { %18513 = vmatprep.subr.msk.bf16.mxu1 %vm20859_vm2, %v18511_v31  ;;  %18531 = vmatprep.subr.msk.bf16.mxu0 %vm20859_vm2, %v18529_v47 }
 0x447   :  { %18534 = vmatpush3.bf16.xpose.msk.msra.mxu0 %vm20859_vm2, %v18529_v47 }
 0x449   :  { %v4810_v34 = vpop.permute.xlu1 %4809 }
 0x44c   :  { %17557 = vmatmul.mubr.msk.f32.vlgmr.msra.gmra.mrb[46].mxu1 %vm425_vm1, %v4446_v51  ;;  %v19302_v51 = vpop.permute.xlu0 %19301 }
 0x44d   :  { %18516 = vmatpush3.bf16.xpose.msk.msra.mxu1 %vm20859_vm2, %v18511_v31  ;;  %17570 = vmatprep.mubr.msk.f32.mxu1 %vm425_vm1, %v21686_v36  ;;  %v4901_v37 = vpop.permute.xlu1 %4900  ;;  %v21743_v59 = vpop.f32.mrb[34].mxu0  ;;  %v19304_v44 = vunpack.i.h.bf16 %v19302_v51  ;;  %v19303_v56 = vunpack.i.l.bf16 %v19302_v51 }
 0x44e   :  { %25687 = vst [vmem:[#allocation40_spill] sm:$0xff] %v21743_v59  ;;  %18525 = vmatprep.subr.msk.bf16.mxu1 %vm20859_vm2, %v18523_v46  ;;  %17592 = vmatmul.mubr.msk.f32.vlgmr.msra.gmra.mrb[64].mxu0 %vm425_vm1, %v4901_v37  ;;  %v21748_v6 = vpop.f32.mrb[35].mxu0 }
 0x44f   :  { %25688 = vst [vmem:[#allocation39_spill] sm:$0xff] %v21748_v6 }
 0x451   :  { %v4992_v2 = vpop.permute.xlu1 %4991 }
 0x454   :  { %17571 = vmatmul.mubr.msk.f32.vlgmr.msra.gmra.mrb[48].mxu1 %vm425_vm1, %v4628_v35  ;;  %v21760_v35 = vpack.c.bf16 %v19304_v44, %v19303_v56 }
 0x455   :  { %18528 = vmatpush3.bf16.xpose.msk.msra.mxu1 %vm20859_vm2, %v18523_v46  ;;  %17584 = vmatprep.mubr.msk.f32.mxu1 %vm425_vm1, %v4808_v25  ;;  %v19292_v36 = vpop.permute.xlu1 %19291 }
 0x456   :  { %v19294_v32 = vunpack.i.h.bf16 %v19292_v36  ;;  %v19293_v61 = vunpack.i.l.bf16 %v19292_v36  ;;  %18537 = vmatprep.subr.msk.bf16.mxu1 %vm20859_vm2, %v18535_v49 }
 0x458   :  { %v18541_v38 = vpack.c.bf16 %v19294_v32, %v19293_v61  ;;  %v21756_v45 = vpop.f32.mrb[22].mxu1 }
 0x459   :  { %25689 = vst [vmem:[#allocation46_spill] sm:$0xff] %v21756_v45  ;;  %v19297_v31 = vpop.permute.xlu1 %19296  ;;  %v21758_v47 = vpop.f32.mrb[23].mxu1 }
 0x45a   :  { %25690 = vst [vmem:[#allocation41_spill] sm:$0xff] %v21758_v47  ;;  %v19299_v30 = vunpack.i.h.bf16 %v19297_v31  ;;  %v19298_v1 = vunpack.i.l.bf16 %v19297_v31  ;;  %18543 = vmatprep.subr.msk.bf16.mxu0 %vm20941_vm5, %v18541_v38 }
 0x45b   :  { %18546 = vmatpush3.bf16.msk.msra.mxu0 %vm20941_vm5, %v18541_v38 }
 0x45c   :  { %v18547_v25 = vpack.c.bf16 %v19299_v30, %v19298_v1  ;;  %17585 = vmatmul.mubr.msk.f32.vlgmr.msra.gmra.mrb[50].mxu1 %vm425_vm1, %v4810_v34  ;;  %18555 = vmatprep.subr.msk.bf16.mxu0 %vm20941_vm5, %v21760_v35 }
 0x45d   :  { %18540 = vmatpush3.bf16.xpose.msk.msra.mxu1 %vm20859_vm2, %v18535_v49  ;;  %17598 = vmatprep.mubr.msk.f32.mxu1 %vm425_vm1, %v4990_v21  ;;  %v19307_v46 = vpop.permute.xlu1 %19306 }
 0x45e   :  { %18549 = vmatprep.subr.msk.bf16.mxu1 %vm20941_vm5, %v18547_v25  ;;  %v19309_v37 = vunpack.i.h.bf16 %v19307_v46  ;;  %v19308_v52 = vunpack.i.l.bf16 %v19307_v46 }
 0x460   :  { %v21775_v24 = vpack.c.bf16 %v19309_v37, %v19308_v52 }
 0x461   :  { %v21859_v47 = vpop.permute.xlu1 %19326 }
 0x462   :  { %25717 = vst [vmem:[#allocation69_spill] sm:$0xff] %v21859_v47 }
 0x464   :  { %17599 = vmatmul.mubr.msk.f32.vlgmr.msra.gmra.mrb[52].mxu1 %vm425_vm1, %v4992_v2  ;;  %v21778_v34 = vpop.f32.mrb[36].mxu0 }
 0x465   :  { %25691 = vst [vmem:[#allocation42_spill] sm:$0xff] %v21778_v34  ;;  %18552 = vmatpush3.bf16.msk.msra.mxu1 %vm20941_vm5, %v18547_v25  ;;  %v21782_v51 = vpop.f32.mrb[37].mxu0 }
 0x466   :  { %25692 = vst [vmem:[#allocation44_spill] sm:$0xff] %v21782_v51  ;;  %18561 = vmatprep.subr.msk.bf16.mxu1 %vm20941_vm5, %v21775_v24 }
 0x469   :  { %v21787_v21 = vpop.f32.mrb[24].mxu1 }
 0x46a   :  { %25693 = vst [vmem:[#allocation43_spill] sm:$0xff] %v21787_v21  ;;  %v21789_v49 = vpop.f32.mrb[25].mxu1 }
 0x46b   :  { %25694 = vst [vmem:[#allocation48_spill] sm:$0xff] %v21789_v49 }
 0x47a   :  { %v21791_v36 = vpop.f32.mrb[26].mxu1 }
 0x47b   :  { %25695 = vst [vmem:[#allocation59_spill] sm:$0xff] %v21791_v36  ;;  %v21793_v44 = vpop.f32.mrb[27].mxu1 }
 0x47c   :  { %25696 = vst [vmem:[#allocation50_spill] sm:$0xff] %v21793_v44 }
 0x47d   :  { %v21795_v2 = vpop.f32.mrb[38].mxu0 }
 0x47e   :  { %25697 = vst [vmem:[#allocation47_spill] sm:$0xff] %v21795_v2  ;;  %v21797_v56 = vpop.f32.mrb[39].mxu0 }
 0x47f   :  { %25698 = vst [vmem:[#allocation56_spill] sm:$0xff] %v21797_v56 }
 0x481   :  { %v21799_v32 = vpop.f32.mrb[40].mxu0 }
 0x482   :  { %25699 = vst [vmem:[#allocation52_spill] sm:$0xff] %v21799_v32  ;;  %v21801_v61 = vpop.f32.mrb[28].mxu1  ;;  %v21803_v38 = vpop.f32.mrb[41].mxu0 }
 0x483   :  { %25700 = vst [vmem:[#allocation53_spill] sm:$0xff] %v21801_v61  ;;  %25701 = vst [vmem:[#allocation58_spill] sm:$0xff] %v21803_v38  ;;  %v21805_v31 = vpop.f32.mrb[29].mxu1 }
 0x484   :  { %25702 = vst [vmem:[#allocation45_spill] sm:$0xff] %v21805_v31 }
 0x486   :  { %v21807_v30 = vpop.f32.mrb[42].mxu0 }
 0x487   :  { %25703 = vst [vmem:[#allocation49_spill] sm:$0xff] %v21807_v30  ;;  %v21809_v1 = vpop.f32.mrb[43].mxu0 }
 0x488   :  { %25704 = vst [vmem:[#allocation54_spill] sm:$0xff] %v21809_v1 }
 0x48a   :  { %v21811_v25 = vpop.f32.mrb[44].mxu0 }
 0x48b   :  { %25705 = vst [vmem:[#allocation55_spill] sm:$0xff] %v21811_v25  ;;  %v21813_v46 = vpop.f32.mrb[45].mxu0 }
 0x48c   :  { %25706 = vst [vmem:[#allocation51_spill] sm:$0xff] %v21813_v46 }
 0x48e   :  { %v21815_v37 = vpop.f32.mrb[30].mxu1  ;;  %v21817_v52 = vpop.f32.mrb[46].mxu0 }
 0x48f   :  { %25707 = vst [vmem:[#allocation60_spill] sm:$0xff] %v21815_v37  ;;  %25708 = vst [vmem:[#allocation57_spill] sm:$0xff] %v21817_v52  ;;  %v21819_v36 = vpop.f32.mrb[31].mxu1  ;;  %v21821_v32 = vpop.f32.mrb[47].mxu0 }
 0x490   :  { %25709 = vst [vmem:[#allocation61_spill] sm:$0xff] %v21819_v36  ;;  %25710 = vst [vmem:[#allocation62_spill] sm:$0xff] %v21821_v32 }
 0x492   :  { %v21823_v61 = vpop.f32.mrb[48].mxu0 }
 0x493   :  { %25711 = vst [vmem:[#allocation63_spill] sm:$0xff] %v21823_v61  ;;  %v21825_v2 = vpop.f32.mrb[49].mxu0 }
 0x494   :  { %25712 = vst [vmem:[#allocation64_spill] sm:$0xff] %v21825_v2 }
 0x495   :  { %v21827_v31 = vpop.f32.mrb[32].mxu1 }
 0x496   :  { %25713 = vst [vmem:[#allocation65_spill] sm:$0xff] %v21827_v31  ;;  %v21829_v30 = vpop.f32.mrb[33].mxu1 }
 0x497   :  { %25714 = vst [vmem:[#allocation66_spill] sm:$0xff] %v21829_v30 }
 0x49f   :  { %v17495_v1 = vpop.f32.mrb[50].mxu0 }
 0x4a0   :  { %v21831_v44 = vmul.f32 0.35355338, %v17495_v1  ;;  %v3706_v46 = vpop.f32.mrb[51].mxu0 }
 0x4a1   :  { %v21833_v38 = vmul.f32 0.35355338, %v3706_v46 }
 0x4a2   :  { %v5115_v37 = vsel %vm1865_vm6, %v21831_v44, -inf }
 0x4a3   :  { %5116 = vmax.xlane.f32.xlu1 %v5115_v37  ;;  %v5112_v36 = vsel %vm1861_vm7, %v21833_v38, -inf }
 0x4a4   :  { %5113 = vmax.xlane.f32.xlu0 %v5112_v36 }
 0x4a7   :  { %v17509_v61 = vpop.f32.mrb[52].mxu0 }
 0x4a8   :  { %v21839_v21 = vmul.f32 0.35355338, %v17509_v61  ;;  %v3888_v49 = vpop.f32.mrb[53].mxu0 }
 0x4a9   :  { %v21841_v34 = vmul.f32 0.35355338, %v3888_v49 }
 0x4aa   :  { %v5127_v1 = vsel %vm1865_vm6, %v21839_v21, -inf }
 0x4ab   :  { %5128 = vmax.xlane.f32.xlu0 %v5127_v1  ;;  %v5124_v46 = vsel %vm1861_vm7, %v21841_v34, -inf }
 0x4af   :  { %5125 = vmax.xlane.f32.xlu0 %v5124_v46  ;;  %v21861_v46 = vpop.permute.xlu1 %19331 }
 0x4b3   :  { %v21863_v51 = vpop.permute.xlu1 %19336 }
 0x4b4   :  { %25718 = vst [vmem:[#allocation70_spill] sm:$0xff] %v21863_v51 }
 0x4b7   :  { %v21865_v6 = vpop.permute.xlu1 %19346 }
 0x4b8   :  { %25719 = vst [vmem:[#allocation71_spill] sm:$0xff] %v21865_v6 }
 0x4c2   :  { %v21847_v30 = vpop.f32.mrb[34].mxu1 }
 0x4c3   :  { %25715 = vst [vmem:[#allocation67_spill] sm:$0xff] %v21847_v30  ;;  %v21849_v37 = vpop.f32.mrb[35].mxu1 }
 0x4c4   :  { %25716 = vst [vmem:[#allocation68_spill] sm:$0xff] %v21849_v37  ;;  %v17523_v56 = vpop.f32.mrb[54].mxu0 }
 0x4c5   :  { %v21851_v36 = vmul.f32 0.35355338, %v17523_v56  ;;  %v4070_v61 = vpop.f32.mrb[55].mxu0  ;;  %v21867_v56 = vpop.permute.xlu1 %19351 }
 0x4c6   :  { %v21853_v45 = vmul.f32 0.35355338, %v4070_v61  ;;  %25720 = vst [vmem:[#allocation72_spill] sm:$0xff] %v21867_v56  ;;  %v21869_v61 = vpop.permute.xlu0 %19311 }
 0x4c7   :  { %v5139_v49 = vsel %vm1865_vm6, %v21851_v36, -inf }
 0x4c8   :  { %5140 = vmax.xlane.f32.xlu0 %v5139_v49  ;;  %v5136_v1 = vsel %vm1861_vm7, %v21853_v45, -inf }
 0x4ca   :  { %v21877_v32 = vpop.permute.xlu0 %19316 }
 0x4cc   :  { %5137 = vmax.xlane.f32.xlu0 %v5136_v1  ;;  %v21875_v1 = vpop.permute.xlu1 %19356 }
 0x4cd   :  { %25721 = vst [vmem:[#allocation73_spill] sm:$0xff] %v21875_v1 }
 0x4ce   :  { %v21885_v31 = vpop.permute.xlu0 %19321 }
 0x4d0   :  { %v21883_v37 = vpop.permute.xlu1 %19361 }
 0x4d1   :  { %25724 = vst [vmem:[#allocation76_spill] sm:$0xff] %v21883_v37 }
 0x4d4   :  { %v21891_v29 = vpop.permute.xlu1 %19366 }
 0x4d5   :  { %25725 = vst [vmem:[#allocation77_spill] sm:$0xff] %v21891_v29 }
 0x4d8   :  { %v21905_v57 = vpop.permute.xlu1 %19376 }
 0x4d9   :  { %25726 = vst [vmem:[#allocation78_spill] sm:$0xff] %v21905_v57 }
 0x4f2   :  { %v17537_v59 = vpop.f32.mrb[56].mxu0 }
 0x4f3   :  { %v21871_v2 = vmul.f32 0.35355338, %v17537_v59  ;;  %v4252_v49 = vpop.f32.mrb[57].mxu0 }
 0x4f5   :  { %v5151_v52 = vsel %vm1865_vm6, %v21871_v2, -inf }
 0x4f6   :  { %5152 = vmax.xlane.f32.xlu0 %v5151_v52 }
 0x4f7   :  { %v21879_v30 = vpop.f32.mrb[36].mxu1 }
 0x4f8   :  { %25722 = vst [vmem:[#allocation74_spill] sm:$0xff] %v21879_v30  ;;  %v21881_v25 = vpop.f32.mrb[37].mxu1  ;;  %v21895_v30 = vpop.permute.xlu0 %19341 }
 0x4f9   :  { %25723 = vst [vmem:[#allocation75_spill] sm:$0xff] %v21881_v25  ;;  %v21897_v25 = vmul.f32 0.35355338, %v4252_v49 }
 0x4fc   :  { %v21909_v12 = vpop.permute.xlu0 %19371 }
 0x4fd   :  { %25727 = vst [vmem:[#allocation79_spill] sm:$0xff] %v21909_v12 }
 0x4fe   :  { %v17551_v43 = vpop.f32.mrb[58].mxu0 }
 0x4ff   :  { %v17502_v59 = vpop.f32.mrb[38].mxu1  ;;  %v4434_v26 = vpop.f32.mrb[59].mxu0  ;;  %v21901_v28 = vmul.f32 0.35355338, %v17551_v43 }
 0x500   :  { %v21887_v13 = vmul.f32 0.35355338, %v17502_v59  ;;  %v3797_v40 = vpop.f32.mrb[39].mxu1  ;;  %v21915_v43 = vmul.f32 0.35355338, %v4434_v26  ;;  %v21923_v57 = vpop.permute.xlu0 %19381 }
 0x501   :  { %v21889_v48 = vmul.f32 0.35355338, %v3797_v40  ;;  %v5148_v40 = vsel %vm1861_vm7, %v21897_v25, -inf  ;;  %v5163_v15 = vsel %vm1865_vm6, %v21901_v28, -inf  ;;  %25729 = vst [vmem:[#allocation81_spill] sm:$0xff] %v21923_v57 }
 0x502   :  { %v5121_v52 = vsel %vm1865_vm6, %v21887_v13, -inf  ;;  %v5160_v26 = vsel %vm1861_vm7, %v21915_v43, -inf }
 0x503   :  { %5122 = vmax.xlane.f32.xlu1 %v5121_v52  ;;  %v5118_v27 = vsel %vm1861_vm7, %v21889_v48, -inf }
 0x504   :  { %5119 = vmax.xlane.f32.xlu0 %v5118_v27 }
 0x507   :  { %v17516_v59 = vpop.f32.mrb[40].mxu1 }
 0x508   :  { %v21907_v29 = vmul.f32 0.35355338, %v17516_v59  ;;  %v3979_v17 = vpop.f32.mrb[41].mxu1  ;;  %5149 = vmax.xlane.f32.xlu0 %v5148_v40  ;;  %v21919_v59 = vpop.permute.xlu1 %6872 }
 0x509   :  { %v21911_v49 = vmul.f32 0.35355338, %v3979_v17  ;;  %25728 = vst [vmem:[#allocation80_spill] sm:$0xff] %v21919_v59 }
 0x50a   :  { %v5133_v52 = vsel %vm1865_vm6, %v21907_v29, -inf  ;;  %v17565_v27 = vpop.f32.mrb[60].mxu0 }
 0x50b   :  { %5134 = vmax.xlane.f32.xlu1 %v5133_v52  ;;  %v4616_v22 = vpop.f32.mrb[61].mxu0  ;;  %v5130_v40 = vsel %vm1861_vm7, %v21911_v49, -inf  ;;  %v21925_v17 = vmul.f32 0.35355338, %v17565_v27 }
 0x50c   :  { %5164 = vmax.xlane.f32.xlu0 %v5163_v15  ;;  %v21935_v1 = vmul.f32 0.35355338, %v4616_v22  ;;  %v21939_v57 = vpop.permute.xlu1 %19386 }
 0x50d   :  { %25730 = vst [vmem:[#allocation82_spill] sm:$0xff] %v21939_v57 }
 0x50e   :  { %v5172_v22 = vsel %vm1861_vm7, %v21935_v1, -inf }
 0x50f   :  { %5131 = vmax.xlane.f32.xlu1 %v5130_v40  ;;  %v17530_v39 = vpop.f32.mrb[42].mxu1  ;;  %v5175_v40 = vsel %vm1865_vm6, %v21925_v17, -inf }
 0x510   :  { %v21929_v52 = vmul.f32 0.35355338, %v17530_v39  ;;  %v4161_v14 = vpop.f32.mrb[43].mxu1  ;;  %5161 = vmax.xlane.f32.xlu0 %v5160_v26  ;;  %v21941_v39 = vpop.permute.xlu0 %6874 }
 0x511   :  { %v21931_v55 = vmul.f32 0.35355338, %v4161_v14  ;;  %25731 = vst [vmem:[#allocation83_spill] sm:$0xff] %v21941_v39  ;;  %v21951_v63 = vpop.permute.xlu1 %6965 }
 0x512   :  { %v17579_v15 = vpop.f32.mrb[62].mxu0  ;;  %v5145_v59 = vsel %vm1865_vm6, %v21929_v52, -inf  ;;  %25732 = vst [vmem:[#allocation84_spill] sm:$0xff] %v21951_v63 }
 0x513   :  { %5146 = vmax.xlane.f32.xlu1 %v5145_v59  ;;  %v4798_v27 = vpop.f32.mrb[63].mxu0  ;;  %v5142_v14 = vsel %vm1861_vm7, %v21931_v55, -inf  ;;  %v21945_v26 = vmul.f32 0.35355338, %v17579_v15 }
 0x514   :  { %5176 = vmax.xlane.f32.xlu0 %v5175_v40  ;;  %v21957_v39 = vpop.permute.xlu0 %6963  ;;  %v21959_v15 = vmul.f32 0.35355338, %v4798_v27 }
 0x515   :  { %25733 = vst [vmem:[#allocation85_spill] sm:$0xff] %v21957_v39  ;;  %v21967_v63 = vpop.permute.xlu1 %7054 }
 0x516   :  { %25734 = vst [vmem:[#allocation86_spill] sm:$0xff] %v21967_v63 }
 0x517   :  { %5143 = vmax.xlane.f32.xlu1 %v5142_v14  ;;  %v17544_v53 = vpop.f32.mrb[44].mxu1  ;;  %v5187_v14 = vsel %vm1865_vm6, %v21945_v26, -inf }
 0x518   :  { %v21949_v59 = vmul.f32 0.35355338, %v17544_v53  ;;  %5173 = vmax.xlane.f32.xlu0 %v5172_v22  ;;  %v4343_v9 = vpop.f32.mrb[45].mxu1  ;;  %v21971_v39 = vpop.permute.xlu0 %19391 }
 0x519   :  { %v21953_v57 = vmul.f32 0.35355338, %v4343_v9  ;;  %v5184_v9 = vsel %vm1861_vm7, %v21959_v15, -inf  ;;  %25735 = vst [vmem:[#allocation87_spill] sm:$0xff] %v21971_v39 }
 0x51a   :  { %v5157_v40 = vsel %vm1865_vm6, %v21949_v59, -inf }
 0x51b   :  { %5158 = vmax.xlane.f32.xlu1 %v5157_v40  ;;  %v5154_v53 = vsel %vm1861_vm7, %v21953_v57, -inf }
 0x51c   :  { %5188 = vmax.xlane.f32.xlu0 %v5187_v14 }
 0x51f   :  { %5155 = vmax.xlane.f32.xlu1 %v5154_v53  ;;  %v17558_v22 = vpop.f32.mrb[46].mxu1 }
 0x520   :  { %v21969_v12 = vmul.f32 0.35355338, %v17558_v22  ;;  %5185 = vmax.xlane.f32.xlu0 %v5184_v9  ;;  %v4525_v27 = vpop.f32.mrb[47].mxu1  ;;  %v21981_v22 = vpop.permute.xlu1 %19396 }
 0x521   :  { %v17593_v40 = vpop.f32.mrb[64].mxu0  ;;  %v21973_v11 = vmul.f32 0.35355338, %v4525_v27  ;;  %25736 = vst [vmem:[#allocation88_spill] sm:$0xff] %v21981_v22  ;;  %v21987_v27 = vpop.permute.xlu0 %7056 }
 0x522   :  { %v21975_v14 = vmul.f32 0.35355338, %v17593_v40  ;;  %v4980_v6 = vpop.f32.mrb[65].mxu0  ;;  %v5169_v53 = vsel %vm1865_vm6, %v21969_v12, -inf  ;;  %25737 = vst [vmem:[#allocation89_spill] sm:$0xff] %v21987_v27 }
 0x523   :  { %5170 = vmax.xlane.f32.xlu1 %v5169_v53  ;;  %v21983_v9 = vmul.f32 0.35355338, %v4980_v6  ;;  %v5166_v63 = vsel %vm1861_vm7, %v21973_v11, -inf }
 0x524   :  { %v5199_v16 = vsel %vm1865_vm6, %v21975_v14, -inf  ;;  %v21993_v62 = vpop.permute.xlu1 %7147 }
 0x525   :  { %5200 = vmax.xlane.f32.xlu0 %v5199_v16  ;;  %v5196_v53 = vsel %vm1861_vm7, %v21983_v9, -inf  ;;  %25738 = vst [vmem:[#allocation90_spill] sm:$0xff] %v21993_v62  ;;  %v21995_v16 = vpop.permute.xlu0 %7145 }
 0x526   :  { %25739 = vst [vmem:[#allocation91_spill] sm:$0xff] %v21995_v16 }
 0x527   :  { %5167 = vmax.xlane.f32.xlu1 %v5166_v63  ;;  %v17572_v40 = vpop.f32.mrb[48].mxu1 }
 0x528   :  { %v4707_v39 = vpop.f32.mrb[49].mxu1  ;;  %v21989_v37 = vmul.f32 0.35355338, %v17572_v40 }
 0x529   :  { %v21997_v6 = vmul.f32 0.35355338, %v4707_v39 }
 0x52a   :  { %v5181_v22 = vsel %vm1865_vm6, %v21989_v37, -inf }
 0x52b   :  { %5197 = vmax.xlane.f32.xlu1 %v5196_v53  ;;  %v5178_v39 = vsel %vm1861_vm7, %v21997_v6, -inf }
 0x52f   :  { %5182 = vmax.xlane.f32.xlu1 %v5181_v22  ;;  %v17586_v27 = vpop.f32.mrb[50].mxu1 }
 0x530   :  { %v5117_v63 = vpop.xlane.xlu1 %5116  ;;  %v22001_v51 = vmul.f32 0.35355338, %v17586_v27  ;;  %v4889_v40 = vpop.f32.mrb[51].mxu1 }
 0x531   :  { %v5209_v10 = vsub.f32 %v21831_v44, %v5117_v63  ;;  %v5114_v19 = vpop.xlane.xlu0 %5113  ;;  %v22005_v58 = vmul.f32 0.35355338, %v4889_v40 }
 0x532   :  { %v5208_v53 = vsub.f32 %v21833_v38, %v5114_v19  ;;  %v5193_v62 = vsel %vm1865_vm6, %v22001_v51, -inf }
 0x533   :  { %v5242_v16 = vmul.f32 1.442695, %v5209_v10  ;;  %5179 = vmax.xlane.f32.xlu1 %v5178_v39  ;;  %5194 = vmax.xlane.f32.xlu0 %v5193_v62  ;;  %v5190_v44 = vsel %vm1861_vm7, %v22005_v58, -inf }
 0x534   :  { %v5240_v22 = vmul.f32 1.442695, %v5208_v53 }
 0x535   :  { %19844 = vpow2.f32 %v5242_v16 }
 0x536   :  { %19846 = vpow2.f32 %v5240_v22 }
 0x537   :  { %5191 = vmax.xlane.f32.xlu1 %v5190_v44  ;;  %v17600_v27 = vpop.f32.mrb[52].mxu1 }
 0x538   :  { %v5129_v19 = vpop.xlane.xlu0 %5128  ;;  %v22013_v38 = vmul.f32 0.35355338, %v17600_v27  ;;  %v5071_v63 = vpop.f32.mrb[53].mxu1 }
 0x539   :  { %v5213_v40 = vsub.f32 %v21839_v21, %v5129_v19  ;;  %v22016_v56 = vmul.f32 0.35355338, %v5071_v63 }
 0x53a   :  { %v5205_v10 = vsel %vm1865_vm6, %v22013_v38, -inf }
 0x53b   :  { %v5250_v62 = vmul.f32 1.442695, %v5213_v40  ;;  %5206 = vmax.xlane.f32.xlu0 %v5205_v10  ;;  %v5202_v16 = vsel %vm1861_vm7, %v22016_v56, -inf }
 0x53c   :  { %v5126_v53 = vpop.xlane.xlu0 %5125  ;;  %5203 = vmax.xlane.f32.xlu1 %v5202_v16 }
 0x53d   :  { %19848 = vpow2.f32 %v5250_v62  ;;  %v5212_v39 = vsub.f32 %v21841_v34, %v5126_v53 }
 0x53f   :  { %v22023_v22 = vpop.eup %19844  ;;  %v5248_v44 = vmul.f32 1.442695, %v5212_v39 }
 0x540   :  { %v22025_v27 = vpop.eup %19846  ;;  %v5307_v21 = vsel %vm1865_vm6, %v22023_v22, 0.0 }
 0x541   :  { %19850 = vpow2.f32 %v5248_v44  ;;  %5308 = vadd.xlane.f32.xlu0 %v5307_v21  ;;  %v5304_v19 = vsel %vm1861_vm7, %v22025_v27, 0.0 }
 0x542   :  { %5305 = vadd.xlane.f32.xlu1 %v5304_v19 }
 0x547   :  { %v22031_v63 = vpop.eup %19848 }
 0x548   :  { %v5319_v40 = vsel %vm1865_vm6, %v22031_v63, 0.0 }
 0x549   :  { %5320 = vadd.xlane.f32.xlu0 %v5319_v40 }
 0x54b   :  { %v22035_v34 = vpop.eup %19850 }
 0x54c   :  { %v5316_v10 = vsel %vm1861_vm7, %v22035_v34, 0.0 }
 0x54d   :  { %5317 = vadd.xlane.f32.xlu0 %v5316_v10 }
 0x555   :  { %v5141_v62 = vpop.xlane.xlu0 %5140 }
 0x556   :  { %v5217_v16 = vsub.f32 %v21851_v36, %v5141_v62 }
 0x558   :  { %v5258_v53 = vmul.f32 1.442695, %v5217_v16 }
 0x559   :  { %v5138_v39 = vpop.xlane.xlu0 %5137 }
 0x55a   :  { %19852 = vpow2.f32 %v5258_v53  ;;  %v5216_v44 = vsub.f32 %v21853_v45, %v5138_v39 }
 0x55c   :  { %v5256_v21 = vmul.f32 1.442695, %v5216_v44 }
 0x55e   :  { %19854 = vpow2.f32 %v5256_v21 }
 0x564   :  { %v22041_v19 = vpop.eup %19852 }
 0x565   :  { %v5331_v40 = vsel %vm1865_vm6, %v22041_v19, 0.0 }
 0x566   :  { %5332 = vadd.xlane.f32.xlu0 %v5331_v40 }
 0x568   :  { %v22045_v42 = vpop.eup %19854 }
 0x569   :  { %v5328_v10 = vsel %vm1861_vm7, %v22045_v42, 0.0 }
 0x56a   :  { %5329 = vadd.xlane.f32.xlu0 %v5328_v10 }
 0x583   :  { %v5153_v36 = vpop.xlane.xlu0 %5152 }
 0x584   :  { %v5221_v62 = vsub.f32 %v21871_v2, %v5153_v36 }
 0x586   :  { %v5266_v16 = vmul.f32 1.442695, %v5221_v62 }
 0x588   :  { %19856 = vpow2.f32 %v5266_v16 }
 0x590   :  { %v5123_v45 = vpop.xlane.xlu1 %5122 }
 0x591   :  { %v5211_v53 = vsub.f32 %v21887_v13, %v5123_v45  ;;  %v5120_v39 = vpop.xlane.xlu0 %5119 }
 0x592   :  { %v22051_v44 = vpop.eup %19856  ;;  %v5210_v21 = vsub.f32 %v21889_v48, %v5120_v39 }
 0x593   :  { %v5246_v40 = vmul.f32 1.442695, %v5211_v53  ;;  %v5343_v47 = vsel %vm1865_vm6, %v22051_v44, 0.0 }
 0x594   :  { %v5244_v23 = vmul.f32 1.442695, %v5210_v21  ;;  %5344 = vadd.xlane.f32.xlu0 %v5343_v47 }
 0x595   :  { %19858 = vpow2.f32 %v5246_v40  ;;  %v5150_v10 = vpop.xlane.xlu0 %5149 }
 0x596   :  { %v5220_v2 = vsub.f32 %v21897_v25, %v5150_v10  ;;  %19860 = vpow2.f32 %v5244_v23 }
 0x598   :  { %v5264_v36 = vmul.f32 1.442695, %v5220_v2  ;;  %v5135_v62 = vpop.xlane.xlu1 %5134 }
 0x599   :  { %v5215_v13 = vsub.f32 %v21907_v29, %v5135_v62  ;;  %v5165_v16 = vpop.xlane.xlu0 %5164 }
 0x59a   :  { %19862 = vpow2.f32 %v5264_v36  ;;  %v5225_v45 = vsub.f32 %v21901_v28, %v5165_v16 }
 0x59b   :  { %v5254_v48 = vmul.f32 1.442695, %v5215_v13 }
 0x59c   :  { %v5274_v53 = vmul.f32 1.442695, %v5225_v45  ;;  %v5132_v39 = vpop.xlane.xlu1 %5131 }
 0x59d   :  { %19864 = vpow2.f32 %v5254_v48  ;;  %v5214_v21 = vsub.f32 %v21911_v49, %v5132_v39  ;;  %v5162_v47 = vpop.xlane.xlu0 %5161 }
 0x59e   :  { %19866 = vpow2.f32 %v5274_v53  ;;  %v5224_v40 = vsub.f32 %v21915_v43, %v5162_v47 }
 0x59f   :  { %v22061_v25 = vpop.eup %19858  ;;  %v5252_v23 = vmul.f32 1.442695, %v5214_v21 }
 0x5a0   :  { %v5272_v10 = vmul.f32 1.442695, %v5224_v40  ;;  %v5147_v2 = vpop.xlane.xlu1 %5146  ;;  %v5313_v29 = vsel %vm1865_vm6, %v22061_v25, 0.0  ;;  %v22065_v36 = vpop.eup %19860 }
 0x5a1   :  { %19868 = vpow2.f32 %v5252_v23  ;;  %v5219_v28 = vsub.f32 %v21929_v52, %v5147_v2  ;;  %v5177_v62 = vpop.xlane.xlu0 %5176  ;;  %5314 = vadd.xlane.f32.xlu1 %v5313_v29  ;;  %v5310_v48 = vsel %vm1861_vm7, %v22065_v36, 0.0 }
 0x5a2   :  { %19870 = vpow2.f32 %v5272_v10  ;;  %v5229_v49 = vsub.f32 %v21925_v17, %v5177_v62 }
 0x5a3   :  { %v5262_v13 = vmul.f32 1.442695, %v5219_v28 }
 0x5a4   :  { %v22069_v43 = vpop.eup %19862  ;;  %v5282_v16 = vmul.f32 1.442695, %v5229_v49  ;;  %v5144_v45 = vpop.xlane.xlu1 %5143 }
 0x5a5   :  { %19872 = vpow2.f32 %v5262_v13  ;;  %v5218_v53 = vsub.f32 %v21931_v55, %v5144_v45  ;;  %v5174_v39 = vpop.xlane.xlu0 %5173  ;;  %5311 = vadd.xlane.f32.xlu1 %v5310_v48  ;;  %v5340_v52 = vsel %vm1861_vm7, %v22069_v43, 0.0 }
 0x5a6   :  { %19874 = vpow2.f32 %v5282_v16  ;;  %v5228_v21 = vsub.f32 %v21935_v1, %v5174_v39  ;;  %5341 = vadd.xlane.f32.xlu0 %v5340_v52 }
 0x5a7   :  { %v22077_v17 = vpop.eup %19864  ;;  %v5260_v47 = vmul.f32 1.442695, %v5218_v53 }
 0x5a8   :  { %v22079_v40 = vpop.eup %19866  ;;  %v5280_v23 = vmul.f32 1.442695, %v5228_v21  ;;  %v5159_v10 = vpop.xlane.xlu1 %5158  ;;  %v5325_v2 = vsel %vm1865_vm6, %v22077_v17, 0.0 }
 0x5a9   :  { %19876 = vpow2.f32 %v5260_v47  ;;  %v5223_v55 = vsub.f32 %v21949_v59, %v5159_v10  ;;  %v5189_v29 = vpop.xlane.xlu0 %5188  ;;  %5326 = vadd.xlane.f32.xlu1 %v5325_v2  ;;  %v5355_v28 = vsel %vm1865_vm6, %v22079_v40, 0.0 }
 0x5aa   :  { %19878 = vpow2.f32 %v5280_v23  ;;  %v5233_v1 = vsub.f32 %v21945_v26, %v5189_v29  ;;  %5356 = vadd.xlane.f32.xlu0 %v5355_v28 }
 0x5ab   :  { %v22087_v62 = vpop.eup %19868  ;;  %v5270_v49 = vmul.f32 1.442695, %v5223_v55 }
 0x5ac   :  { %v22089_v13 = vpop.eup %19870  ;;  %v5290_v16 = vmul.f32 1.442695, %v5233_v1  ;;  %v5156_v45 = vpop.xlane.xlu1 %5155  ;;  %v5322_v48 = vsel %vm1861_vm7, %v22087_v62, 0.0 }
 0x5ad   :  { %19880 = vpow2.f32 %v5270_v49  ;;  %v5222_v59 = vsub.f32 %v21953_v57, %v5156_v45  ;;  %v5186_v53 = vpop.xlane.xlu0 %5185  ;;  %5323 = vadd.xlane.f32.xlu1 %v5322_v48  ;;  %v5352_v39 = vsel %vm1861_vm7, %v22089_v13, 0.0 }
 0x5ae   :  { %19882 = vpow2.f32 %v5290_v16  ;;  %v5232_v26 = vsub.f32 %v21959_v15, %v5186_v53  ;;  %5353 = vadd.xlane.f32.xlu0 %v5352_v39 }
 0x5af   :  { %v22097_v52 = vpop.eup %19872  ;;  %v5268_v21 = vmul.f32 1.442695, %v5222_v59 }
 0x5b0   :  { %v22099_v47 = vpop.eup %19874  ;;  %v5288_v23 = vmul.f32 1.442695, %v5232_v26  ;;  %v5171_v10 = vpop.xlane.xlu1 %5170  ;;  %v5337_v2 = vsel %vm1865_vm6, %v22097_v52, 0.0 }
 0x5b1   :  { %19884 = vpow2.f32 %v5268_v21  ;;  %v5227_v57 = vsub.f32 %v21969_v12, %v5171_v10  ;;  %5338 = vadd.xlane.f32.xlu1 %v5337_v2  ;;  %v5367_v55 = vsel %vm1865_vm6, %v22099_v47, 0.0 }
 0x5b2   :  { %19886 = vpow2.f32 %v5288_v23  ;;  %5368 = vadd.xlane.f32.xlu0 %v5367_v55  ;;  %v5201_v15 = vpop.xlane.xlu0 %5200 }
 0x5b3   :  { %v22106_v29 = vpop.eup %19876  ;;  %v5278_v28 = vmul.f32 1.442695, %v5227_v57  ;;  %v5237_v1 = vsub.f32 %v21975_v14, %v5201_v15 }
 0x5b4   :  { %v22109_v49 = vpop.eup %19878  ;;  %v5168_v16 = vpop.xlane.xlu1 %5167  ;;  %v5334_v45 = vsel %vm1861_vm7, %v22106_v29, 0.0 }
 0x5b5   :  { %19888 = vpow2.f32 %v5278_v28  ;;  %v5298_v12 = vmul.f32 1.442695, %v5237_v1  ;;  %v5226_v48 = vsub.f32 %v21973_v11, %v5168_v16  ;;  %5335 = vadd.xlane.f32.xlu1 %v5334_v45  ;;  %v5364_v59 = vsel %vm1861_vm7, %v22109_v49, 0.0 }
 0x5b6   :  { %5365 = vadd.xlane.f32.xlu0 %v5364_v59 }
 0x5b7   :  { %v22116_v53 = vpop.eup %19880  ;;  %19890 = vpow2.f32 %v5298_v12  ;;  %v5276_v39 = vmul.f32 1.442695, %v5226_v48 }
 0x5b8   :  { %v22118_v14 = vpop.eup %19882  ;;  %v5198_v26 = vpop.xlane.xlu1 %5197  ;;  %v5349_v21 = vsel %vm1865_vm6, %v22116_v53, 0.0 }
 0x5b9   :  { %19892 = vpow2.f32 %v5276_v39  ;;  %v5236_v23 = vsub.f32 %v21983_v9, %v5198_v26  ;;  %5350 = vadd.xlane.f32.xlu1 %v5349_v21  ;;  %v5379_v11 = vsel %vm1865_vm6, %v22118_v14, 0.0 }
 0x5ba   :  { %5380 = vadd.xlane.f32.xlu0 %v5379_v11 }
 0x5bb   :  { %v22125_v10 = vpop.eup %19884  ;;  %v5296_v2 = vmul.f32 1.442695, %v5236_v23 }
 0x5bc   :  { %v22127_v57 = vpop.eup %19886  ;;  %v5183_v55 = vpop.xlane.xlu1 %5182  ;;  %v5346_v15 = vsel %vm1861_vm7, %v22125_v10, 0.0 }
 0x5bd   :  { %19894 = vpow2.f32 %v5296_v2  ;;  %v5231_v28 = vsub.f32 %v21989_v37, %v5183_v55  ;;  %5347 = vadd.xlane.f32.xlu1 %v5346_v15  ;;  %v5376_v9 = vsel %vm1861_vm7, %v22127_v57, 0.0 }
 0x5be   :  { %5377 = vadd.xlane.f32.xlu0 %v5376_v9 }
 0x5bf   :  { %v22134_v1 = vpop.eup %19888  ;;  %v5286_v16 = vmul.f32 1.442695, %v5231_v28 }
 0x5c0   :  { %v5180_v45 = vpop.xlane.xlu1 %5179  ;;  %v5195_v12 = vpop.xlane.xlu0 %5194  ;;  %v5361_v48 = vsel %vm1865_vm6, %v22134_v1, 0.0 }
 0x5c1   :  { %v22138_v59 = vpop.eup %19890  ;;  %19896 = vpow2.f32 %v5286_v16  ;;  %v5230_v39 = vsub.f32 %v21997_v6, %v5180_v45  ;;  %v5235_v37 = vsub.f32 %v22001_v51, %v5195_v12  ;;  %5362 = vadd.xlane.f32.xlu1 %v5361_v48 }
 0x5c2   :  { %v5391_v26 = vsel %vm1865_vm6, %v22138_v59, 0.0 }
 0x5c3   :  { %v22144_v21 = vpop.eup %19892  ;;  %v5284_v23 = vmul.f32 1.442695, %v5230_v39  ;;  %v5294_v11 = vmul.f32 1.442695, %v5235_v37  ;;  %5392 = vadd.xlane.f32.xlu0 %v5391_v26 }
 0x5c4   :  { %v5192_v2 = vpop.xlane.xlu1 %5191  ;;  %v5358_v55 = vsel %vm1861_vm7, %v22144_v21, 0.0 }
 0x5c5   :  { %19898 = vpow2.f32 %v5284_v23  ;;  %5359 = vadd.xlane.f32.xlu1 %v5358_v55 }
 0x5c6   :  { %19900 = vpow2.f32 %v5294_v11 }
 0x5c7   :  { %v22148_v15 = vpop.eup %19894 }
 0x5c8   :  { %v5207_v6 = vpop.xlane.xlu0 %5206  ;;  %v5388_v51 = vsel %vm1861_vm7, %v22148_v15, 0.0 }
 0x5c9   :  { %5389 = vadd.xlane.f32.xlu1 %v5388_v51  ;;  %v22152_v28 = vpop.xlane.xlu1 %5203  ;;  %v19314_v51 = vunpack.i.h.bf16 %v21869_v61 }
 0x5cb   :  { %v22154_v9 = vpop.eup %19896 }
 0x5cc   :  { %v5373_v16 = vsel %vm1865_vm6, %v22154_v9, 0.0 }
 0x5cd   :  { %5374 = vadd.xlane.f32.xlu0 %v5373_v16  ;;  %v19313_v16 = vunpack.i.l.bf16 %v21869_v61 }
 0x5ce   :  { %v5309_v45 = vpop.xlane.xlu0 %5308 }
 0x5cf   :  { %v22158_v12 = vpop.eup %19898  ;;  %19902 = vrcp.f32 %v5309_v45  ;;  %v5306_v48 = vpop.xlane.xlu1 %5305 }
 0x5d0   :  { %19904 = vrcp.f32 %v5306_v48  ;;  %v5370_v39 = vsel %vm1861_vm7, %v22158_v12, 0.0  ;;  %v22162_v37 = vpop.eup %19900 }
 0x5d1   :  { %5371 = vadd.xlane.f32.xlu0 %v5370_v39  ;;  %v5385_v26 = vsel %vm1865_vm6, %v22162_v37, 0.0 }
 0x5d5   :  { %5386 = vadd.xlane.f32.xlu0 %v5385_v26  ;;  %v18565_v26 = vpack.c.bf16 %v19314_v51, %v19313_v16 }
 0x5d6   :  { %v5321_v23 = vpop.xlane.xlu0 %5320 }
 0x5d7   :  { %19906 = vrcp.f32 %v5321_v23 }
 0x5d9   :  { %v19903_v11 = vpop.eup %19902 }
 0x5da   :  { %v19905_v55 = vpop.eup %19904  ;;  %v5318_v45 = vpop.xlane.xlu0 %5317  ;;  %7236 = vrot.lane.b32.xlu1 %v20650_v50, %s20411_s24  ;;  %v5433_v39 = vmul.f32 %v19903_v11, %v22023_v22 }
 0x5db   :  { %19908 = vrcp.f32 %v5318_v45  ;;  %v5432_v48 = vmul.f32 %v19905_v55, %v22025_v27  ;;  %v19324_v45 = vunpack.i.h.bf16 %v21885_v31  ;;  %v19323_v27 = vunpack.i.l.bf16 %v21885_v31 }
 0x5dc   :  { %v5234_v55 = vsub.f32 %v22005_v58, %v5192_v2 }
 0x5dd   :  { %17605 = vmatprep.mubr.msk.f32.mxu0 %vm1861_vm7, %v5432_v48  ;;  %v18577_v51 = vpack.c.bf16 %v19324_v45, %v19323_v27 }
 0x5de   :  { %17606 = vmatmul.mubr.msk.f32.vlgmr.msra.gmra.mrb[66].mxu0 %vm1861_vm7, %v5433_v39 }
 0x5df   :  { %18558 = vmatpush3.bf16.msk.msra.mxu0 %vm20941_vm5, %v21760_v35  ;;  %v5292_v35 = vmul.f32 1.442695, %v5234_v55 }
 0x5e0   :  { %18567 = vmatprep.subr.msk.bf16.mxu0 %vm20941_vm5, %v18565_v26 }
 0x5e1   :  { %v19907_v61 = vpop.eup %19906  ;;  %19910 = vpow2.f32 %v5292_v35 }
 0x5e2   :  { %v5437_v11 = vmul.f32 %v19907_v61, %v22031_v63  ;;  %v5239_v63 = vsub.f32 %v22013_v38, %v5207_v6  ;;  %v19333_v61 = vunpack.i.l.bf16 %v21861_v46 }
 0x5e5   :  { %v19909_v23 = vpop.eup %19908 }
 0x5e6   :  { %v5436_v22 = vmul.f32 %v19909_v23, %v22035_v34  ;;  %v5302_v34 = vmul.f32 1.442695, %v5239_v63 }
 0x5e8   :  { %17619 = vmatprep.mubr.msk.f32.mxu0 %vm1861_vm7, %v5436_v22 }
 0x5e9   :  { %17620 = vmatmul.mubr.msk.f32.vlgmr.msra.gmra.mrb[68].mxu0 %vm1861_vm7, %v5437_v11 }
 0x5ea   :  { %18570 = vmatpush3.bf16.msk.msra.mxu0 %vm20941_vm5, %v18565_v26  ;;  %v19334_v26 = vunpack.i.h.bf16 %v21861_v46  ;;  %v5238_v46 = vsub.f32 %v22016_v56, %v22152_v28 }
 0x5eb   :  { %18579 = vmatprep.subr.msk.bf16.mxu0 %vm20941_vm5, %v18577_v51  ;;  %19401 = vrot.lane.b32.xlu0 %v20683_v0, %s20410_s23  ;;  %v22193_v2 = vpop.eup %19910 }
 0x5ec   :  { %v5382_v16 = vsel %vm1861_vm7, %v22193_v2, 0.0  ;;  %v22202_v6 = vpack.c.bf16 %v19334_v26, %v19333_v61  ;;  %v19344_v61 = vunpack.i.h.bf16 %v21895_v30 }
 0x5f3   :  { %v5333_v31 = vpop.xlane.xlu0 %5332 }
 0x5f4   :  { %19912 = vrcp.f32 %v5333_v31 }
 0x5f7   :  { %v5330_v58 = vpop.xlane.xlu0 %5329 }
 0x5f8   :  { %19914 = vrcp.f32 %v5330_v58 }
 0x5f9   :  { %19916 = vpow2.f32 %v5302_v34 }
 0x5fe   :  { %5383 = vadd.xlane.f32.xlu1 %v5382_v16  ;;  %v19913_v48 = vpop.eup %19912 }
 0x5ff   :  { %v5441_v38 = vmul.f32 %v19913_v48, %v22041_v19  ;;  %v5300_v19 = vmul.f32 1.442695, %v5238_v46  ;;  %v19319_v48 = vunpack.i.h.bf16 %v21877_v32 }
 0x601   :  { %19918 = vpow2.f32 %v5300_v19 }
 0x602   :  { %v19915_v39 = vpop.eup %19914 }
 0x603   :  { %v5440_v23 = vmul.f32 %v19915_v39, %v22045_v42  ;;  %v22205_v45 = vpop.eup %19916  ;;  %v19318_v39 = vunpack.i.l.bf16 %v21877_v32 }
 0x604   :  { %v5397_v42 = vsel %vm1865_vm6, %v22205_v45, 0.0 }
 0x605   :  { %17633 = vmatprep.mubr.msk.f32.mxu0 %vm1861_vm7, %v5440_v23  ;;  %v19343_v23 = vunpack.i.l.bf16 %v21895_v30 }
 0x606   :  { %17634 = vmatmul.mubr.msk.f32.vlgmr.msra.gmra.mrb[70].mxu0 %vm1861_vm7, %v5441_v38 }
 0x607   :  { %18582 = vmatpush3.bf16.msk.msra.mxu0 %vm20941_vm5, %v18577_v51  ;;  %v18601_v30 = vpack.c.bf16 %v19344_v61, %v19343_v23  ;;  %v25744_v61 = vld [vmem:[#allocation26_spill] sm:$0xff] }
 0x608   :  { %18591 = vmatprep.subr.msk.bf16.mxu0 %vm20941_vm5, %v22202_v6 }
 0x60a   :  { %5398 = vadd.xlane.f32.xlu0 %v5397_v42 }
 0x60b   :  { %v22226_v11 = vpop.eup %19918 }
 0x60c   :  { %v5394_v28 = vsel %vm1861_vm7, %v22226_v11, 0.0 }
 0x60f   :  { %19406 = vrot.lane.b32.xlu1 %v20697_v7, %s20410_s23 }
 0x620   :  { %7238 = vrot.lane.b32.xlu0 %v20634_v41, %s20411_s24 }
 0x621   :  { %v5345_v27 = vpop.xlane.xlu0 %5344 }
 0x622   :  { %19920 = vrcp.f32 %v5345_v27 }
 0x624   :  { %7327 = vrot.lane.b32.xlu0 %v20657_v54, %s20411_s24 }
 0x628   :  { %19411 = vrot.lane.b32.xlu0 %v20713_v20, %s20410_s23 }
 0x62c   :  { %7420 = vrot.lane.b32.xlu0 %v20667_v60, %s20411_s24  ;;  %v19921_v63 = vpop.eup %19920 }
 0x62d   :  { %v5445_v32 = vmul.f32 %v19921_v63, %v22051_v44 }
 0x62e   :  { %v5315_v22 = vpop.xlane.xlu1 %5314 }
 0x62f   :  { %19922 = vrcp.f32 %v5315_v22  ;;  %v18571_v22 = vpack.c.bf16 %v19319_v48, %v19318_v39 }
 0x630   :  { %7509 = vrot.lane.b32.xlu0 %v20693_v5, %s20411_s24 }
 0x632   :  { %v5312_v56 = vpop.xlane.xlu1 %5311 }
 0x633   :  { %19924 = vrcp.f32 %v5312_v56  ;;  %v5342_v55 = vpop.xlane.xlu0 %5341  ;;  %5395 = vadd.xlane.f32.xlu1 %v5394_v28  ;;  %v25741_v28 = vld [vmem:[#allocation69_spill] sm:$0xff] }
 0x634   :  { %19926 = vrcp.f32 %v5342_v55  ;;  %19421 = vrot.lane.b32.xlu0 %v20733_v33, %s20410_s23  ;;  %v19329_v55 = vunpack.i.h.bf16 %v25741_v28 }
 0x636   :  { %v5327_v51 = vpop.xlane.xlu1 %5326 }
 0x637   :  { %v5357_v35 = vpop.xlane.xlu0 %5356  ;;  %19928 = vrcp.f32 %v5327_v51  ;;  %v19328_v51 = vunpack.i.l.bf16 %v25741_v28 }
 0x638   :  { %7602 = vrot.lane.b32.xlu0 %v20688_v3, %s20411_s24  ;;  %19930 = vrcp.f32 %v5357_v35  ;;  %v25742_v35 = vld [vmem:[#allocation14_spill] sm:$0xff] }
 0x639   :  { %v19923_v34 = vpop.eup %19922  ;;  %v18583_v23 = vpack.c.bf16 %v19329_v55, %v19328_v51 }
 0x63a   :  { %v5324_v31 = vpop.xlane.xlu1 %5323  ;;  %v5435_v19 = vmul.f32 %v19923_v34, %v22061_v25 }
 0x63b   :  { %19932 = vrcp.f32 %v5324_v31  ;;  %v5354_v58 = vpop.xlane.xlu0 %5353 }
 0x63c   :  { %19934 = vrcp.f32 %v5354_v58  ;;  %7691 = vrot.lane.b32.xlu0 %v20709_v18, %s20411_s24  ;;  %v25743_v58 = vld [vmem:[#allocation72_spill] sm:$0xff] }
 0x63d   :  { %v19925_v16 = vpop.eup %19924  ;;  %v19354_v34 = vunpack.i.h.bf16 %v25743_v58 }
 0x63e   :  { %v19927_v26 = vpop.eup %19926  ;;  %v5339_v38 = vpop.xlane.xlu1 %5338  ;;  %v5434_v42 = vmul.f32 %v19925_v16, %v22065_v36  ;;  %v19353_v16 = vunpack.i.l.bf16 %v25743_v58  ;;  %v25751_v58 = vld [vmem:[#allocation18_spill] sm:$0xff] }
 0x63f   :  { %v5369_v46 = vpop.xlane.xlu0 %5368  ;;  %v5444_v27 = vmul.f32 %v19927_v26, %v22069_v43  ;;  %19936 = vrcp.f32 %v5339_v38  ;;  %v25745_v38 = vld [vmem:[#allocation16_spill] sm:$0xff] }
 0x640   :  { %19431 = vrot.lane.b32.xlu0 %v20763_v4, %s20410_s23  ;;  %17612 = vmatprep.mubr.msk.f32.mxu1 %vm1861_vm7, %v5434_v42  ;;  %19938 = vrcp.f32 %v5369_v46  ;;  %v18613_v42 = vpack.c.bf16 %v19354_v34, %v19353_v16 }
 0x641   :  { %17613 = vmatmul.mubr.msk.f32.vlgmr.msra.gmra.mrb[54].mxu1 %vm1861_vm7, %v5435_v19  ;;  %17647 = vmatprep.mubr.msk.f32.mxu0 %vm1861_vm7, %v5444_v27  ;;  %v19929_v36 = vpop.eup %19928 }
 0x642   :  { %18564 = vmatpush3.bf16.msk.msra.mxu1 %vm20941_vm5, %v21775_v24  ;;  %17648 = vmatmul.mubr.msk.f32.vlgmr.msra.gmra.mrb[72].mxu0 %vm1861_vm7, %v5445_v32  ;;  %v5336_v25 = vpop.xlane.xlu1 %5335  ;;  %v19931_v43 = vpop.eup %19930  ;;  %v25740_v24 = vld [vmem:[#allocation22_spill] sm:$0xff]  ;;  %v5439_v39 = vmul.f32 %v19929_v36, %v22077_v17  ;;  %v25748_v36 = vld [vmem:[#allocation23_spill] sm:$0xff] }
 0x643   :  { %18573 = vmatprep.subr.msk.bf16.mxu1 %vm20941_vm5, %v18571_v22  ;;  %18594 = vmatpush3.bf16.msk.msra.mxu0 %vm20941_vm5, %v22202_v6  ;;  %19940 = vrcp.f32 %v5336_v25  ;;  %v5366_v44 = vpop.xlane.xlu0 %5365  ;;  %v25747_v32 = vld [vmem:[#allocation70_spill] sm:$0xff] }
 0x644   :  { %19942 = vrcp.f32 %v5366_v44  ;;  %18603 = vmatprep.subr.msk.bf16.mxu0 %vm20941_vm5, %v18601_v30  ;;  %7784 = vrot.lane.b32.xlu0 %v25740_v24, %s20411_s24  ;;  %v19338_v25 = vunpack.i.l.bf16 %v25747_v32 }
 0x645   :  { %v19933_v56 = vpop.eup %19932  ;;  %7329 = vrot.lane.b32.xlu1 %v25742_v35, %s20411_s24 }
 0x646   :  { %v19935_v31 = vpop.eup %19934  ;;  %v5351_v6 = vpop.xlane.xlu1 %5350  ;;  %v5438_v63 = vmul.f32 %v19933_v56, %v22087_v62  ;;  %v5449_v62 = vmul.f32 %v19931_v43, %v22079_v40  ;;  %v25746_v40 = vld [vmem:[#allocation28_spill] sm:$0xff] }
 0x647   :  { %v5381_v48 = vpop.xlane.xlu0 %5380  ;;  %v5448_v26 = vmul.f32 %v19935_v31, %v22089_v13  ;;  %19944 = vrcp.f32 %v5351_v6  ;;  %v25750_v6 = vld [vmem:[#allocation25_spill] sm:$0xff] }
 0x648   :  { %7873 = vrot.lane.b32.xlu0 %v25744_v61, %s20411_s24  ;;  %17626 = vmatprep.mubr.msk.f32.mxu1 %vm1861_vm7, %v5438_v63  ;;  %19946 = vrcp.f32 %v5381_v48 }
 0x649   :  { %7418 = vrot.lane.b32.xlu1 %v25745_v38, %s20411_s24  ;;  %17627 = vmatmul.mubr.msk.f32.vlgmr.msra.gmra.mrb[56].mxu1 %vm1861_vm7, %v5439_v39  ;;  %v19937_v13 = vpop.eup %19936 }
 0x64a   :  { %18576 = vmatpush3.bf16.msk.msra.mxu1 %vm20941_vm5, %v18571_v22  ;;  %17661 = vmatprep.mubr.msk.f32.mxu0 %vm1861_vm7, %v5448_v26  ;;  %v5348_v17 = vpop.xlane.xlu1 %5347  ;;  %v19939_v19 = vpop.eup %19938  ;;  %v19339_v22 = vunpack.i.h.bf16 %v25747_v32  ;;  %v5443_v51 = vmul.f32 %v19937_v13, %v22097_v52  ;;  %v25753_v26 = vld [vmem:[#allocation71_spill] sm:$0xff] }
 0x64b   :  { %18585 = vmatprep.subr.msk.bf16.mxu1 %vm20941_vm5, %v18583_v23  ;;  %17662 = vmatmul.mubr.msk.f32.vlgmr.msra.gmra.mrb[74].mxu0 %vm1861_vm7, %v5449_v62  ;;  %19948 = vrcp.f32 %v5348_v17  ;;  %v5378_v46 = vpop.xlane.xlu0 %5377  ;;  %v19348_v62 = vunpack.i.l.bf16 %v25753_v26  ;;  %v25754_v17 = vld [vmem:[#allocation19_spill] sm:$0xff] }
 0x64c   :  { %18606 = vmatpush3.bf16.msk.msra.mxu0 %vm20941_vm5, %v18601_v30  ;;  %19950 = vrcp.f32 %v5378_v46  ;;  %7964 = vrot.lane.b32.xlu0 %v25746_v40, %s20411_s24  ;;  %v25749_v30 = vld [vmem:[#allocation76_spill] sm:$0xff]  ;;  %v18595_v63 = vpack.c.bf16 %v19339_v22, %v19338_v25  ;;  %v25755_v46 = vld [vmem:[#allocation79_spill] sm:$0xff] }
 0x64d   :  { %v19941_v27 = vpop.eup %19940  ;;  %18615 = vmatprep.subr.msk.bf16.mxu0 %vm20941_vm5, %v18613_v42  ;;  %19416 = vrot.lane.b32.xlu1 %v25748_v36, %s20410_s23  ;;  %v19364_v28 = vunpack.i.h.bf16 %v25749_v30  ;;  %v19363_v55 = vunpack.i.l.bf16 %v25749_v30  ;;  %v19373_v32 = vunpack.i.l.bf16 %v25755_v46 }
 0x64e   :  { %v19943_v44 = vpop.eup %19942  ;;  %v5363_v43 = vpop.xlane.xlu1 %5362  ;;  %v5442_v56 = vmul.f32 %v19941_v27, %v22106_v29  ;;  %v5453_v29 = vmul.f32 %v19939_v19, %v22099_v47  ;;  %v25752_v47 = vld [vmem:[#allocation37_spill] sm:$0xff]  ;;  %v19374_v19 = vunpack.i.h.bf16 %v25755_v46 }
 0x64f   :  { %v5452_v31 = vmul.f32 %v19943_v44, %v22109_v49  ;;  %19952 = vrcp.f32 %v5363_v43  ;;  %v18625_v34 = vpack.c.bf16 %v19364_v28, %v19363_v55  ;;  %v25756_v44 = vld [vmem:[#allocation31_spill] sm:$0xff]  ;;  %v25758_v28 = vld [vmem:[#allocation36_spill] sm:$0xff]  ;;  %v25759_v55 = vld [vmem:[#allocation73_spill] sm:$0xff] }
 0x650   :  { %7966 = vrot.lane.b32.xlu0 %v25750_v6, %s20411_s24  ;;  %17640 = vmatprep.mubr.msk.f32.mxu1 %vm1861_vm7, %v5442_v56  ;;  %v5393_v16 = vpop.xlane.xlu0 %5392  ;;  %v25757_v56 = vld [vmem:[#allocation27_spill] sm:$0xff]  ;;  %v25764_v46 = vld [vmem:[#allocation21_spill] sm:$0xff] }
 0x651   :  { %7511 = vrot.lane.b32.xlu1 %v25751_v58, %s20411_s24  ;;  %17641 = vmatmul.mubr.msk.f32.vlgmr.msra.gmra.mrb[58].mxu1 %vm1861_vm7, %v5443_v51  ;;  %v19945_v49 = vpop.eup %19944  ;;  %v19359_v51 = vunpack.i.h.bf16 %v25759_v55 }
 0x652   :  { %18588 = vmatpush3.bf16.msk.msra.mxu1 %vm20941_vm5, %v18583_v23  ;;  %17675 = vmatprep.mubr.msk.f32.mxu0 %vm1861_vm7, %v5452_v31  ;;  %v5360_v52 = vpop.xlane.xlu1 %5359  ;;  %v19947_v48 = vpop.eup %19946  ;;  %v19349_v23 = vunpack.i.h.bf16 %v25753_v26  ;;  %v5447_v22 = vmul.f32 %v19945_v49, %v22116_v53  ;;  %v19358_v31 = vunpack.i.l.bf16 %v25759_v55  ;;  %v25763_v26 = vld [vmem:[#allocation81_spill] sm:$0xff] }
 0x653   :  { %18597 = vmatprep.subr.msk.bf16.mxu1 %vm20941_vm5, %v18595_v63  ;;  %17676 = vmatmul.mubr.msk.f32.vlgmr.msra.gmra.mrb[76].mxu0 %vm1861_vm7, %v5453_v29  ;;  %19954 = vrcp.f32 %v5360_v52  ;;  %v25761_v29 = vld [vmem:[#allocation20_spill] sm:$0xff] }
 0x654   :  { %18618 = vmatpush3.bf16.msk.msra.mxu0 %vm20941_vm5, %v18613_v42  ;;  %19446 = vrot.lane.b32.xlu0 %v25752_v47, %s20410_s23  ;;  %19956 = vrcp.f32 %v5393_v16  ;;  %v18607_v43 = vpack.c.bf16 %v19349_v23, %v19348_v62  ;;  %v19384_v23 = vunpack.i.h.bf16 %v25763_v26  ;;  %v19383_v62 = vunpack.i.l.bf16 %v25763_v26 }
 0x655   :  { %v19949_v39 = vpop.eup %19948  ;;  %18627 = vmatprep.subr.msk.bf16.mxu0 %vm20941_vm5, %v18625_v34  ;;  %7600 = vrot.lane.b32.xlu1 %v25754_v17, %s20411_s24 }
 0x656   :  { %v19951_v13 = vpop.eup %19950  ;;  %v5390_v27 = vpop.xlane.xlu1 %5389  ;;  %v5446_v42 = vmul.f32 %v19949_v39, %v22125_v10  ;;  %v5457_v10 = vmul.f32 %v19947_v48, %v22118_v14  ;;  %v25762_v48 = vld [vmem:[#allocation10_spill] sm:$0xff] }
 0x657   :  { %19958 = vrcp.f32 %v5390_v27  ;;  %v5456_v25 = vmul.f32 %v19951_v13, %v22127_v57  ;;  %v18637_v57 = vpack.c.bf16 %v19374_v19, %v19373_v32  ;;  %v18619_v13 = vpack.c.bf16 %v19359_v51, %v19358_v31  ;;  %v25765_v19 = vld [vmem:[#allocation15_spill] sm:$0xff]  ;;  %v25768_v32 = vld [vmem:[#allocation17_spill] sm:$0xff] }
 0x658   :  { %8146 = vrot.lane.b32.xlu0 %v25756_v44, %s20411_s24  ;;  %17654 = vmatprep.mubr.msk.f32.mxu1 %vm1861_vm7, %v5446_v42  ;;  %v18649_v27 = vpack.c.bf16 %v19384_v23, %v19383_v62  ;;  %v25766_v42 = vld [vmem:[#allocation33_spill] sm:$0xff]  ;;  %v25776_v62 = vld [vmem:[#allocation6_spill] sm:$0xff] }
 0x659   :  { %19426 = vrot.lane.b32.xlu1 %v25757_v56, %s20410_s23  ;;  %17655 = vmatmul.mubr.msk.f32.vlgmr.msra.gmra.mrb[60].mxu1 %vm1861_vm7, %v5447_v22  ;;  %v19953_v30 = vpop.eup %19952 }
 0x65a   :  { %18600 = vmatpush3.bf16.msk.msra.mxu1 %vm20941_vm5, %v18595_v63  ;;  %17689 = vmatprep.mubr.msk.f32.mxu0 %vm1861_vm7, %v5456_v25  ;;  %v5375_v53 = vpop.xlane.xlu0 %5374  ;;  %v25769_v25 = vld [vmem:[#allocation87_spill] sm:$0xff] }
 0x65b   :  { %18609 = vmatprep.subr.msk.bf16.mxu1 %vm20941_vm5, %v18607_v43  ;;  %17690 = vmatmul.mubr.msk.f32.vlgmr.msra.gmra.mrb[78].mxu0 %vm1861_vm7, %v5457_v10  ;;  %19960 = vrcp.f32 %v5375_v53  ;;  %v25770_v53 = vld [vmem:[#allocation24_spill] sm:$0xff] }
 0x65c   :  { %18630 = vmatpush3.bf16.msk.msra.mxu0 %vm20941_vm5, %v18625_v34  ;;  %8237 = vrot.lane.b32.xlu0 %v25758_v28, %s20411_s24  ;;  %v5451_v34 = vmul.f32 %v19953_v30, %v22134_v1  ;;  %v19393_v30 = vunpack.i.l.bf16 %v25769_v25 }
 0x65d   :  { %v19955_v14 = vpop.eup %19954  ;;  %18639 = vmatprep.subr.msk.bf16.mxu0 %vm20859_vm2, %v18637_v57  ;;  %7693 = vrot.lane.b32.xlu1 %v25761_v29, %s20411_s24 }
 0x65e   :  { %v5372_v52 = vpop.xlane.xlu0 %5371  ;;  %v5450_v49 = vmul.f32 %v19955_v14, %v22144_v21  ;;  %v19957_v16 = vpop.eup %19956 }
 0x65f   :  { %19962 = vrcp.f32 %v5372_v52  ;;  %v5461_v21 = vmul.f32 %v19957_v16, %v22138_v59  ;;  %v25772_v52 = vld [vmem:[#allocation35_spill] sm:$0xff] }
 0x660   :  { %19461 = vrot.lane.b32.xlu0 %v25762_v48, %s20412_s25  ;;  %17668 = vmatprep.mubr.msk.f32.mxu1 %vm1861_vm7, %v5450_v49  ;;  %v25773_v49 = vld [vmem:[#allocation83_spill] sm:$0xff] }
 0x661   :  { %v19959_v39 = vpop.eup %19958  ;;  %7782 = vrot.lane.b32.xlu1 %v25764_v46, %s20411_s24  ;;  %17669 = vmatmul.mubr.msk.f32.vlgmr.msra.gmra.mrb[62].mxu1 %vm1861_vm7, %v5451_v34 }
 0x662   :  { %18612 = vmatpush3.bf16.msk.msra.mxu1 %vm20941_vm5, %v18607_v43  ;;  %v5460_v1 = vmul.f32 %v19959_v39, %v22148_v15  ;;  %v25767_v15 = vld [vmem:[#allocation80_spill] sm:$0xff]  ;;  %v19394_v43 = vunpack.i.h.bf16 %v25769_v25  ;;  %v5387_v10 = vpop.xlane.xlu0 %5386  ;;  %v25774_v39 = vld [vmem:[#allocation86_spill] sm:$0xff]  ;;  %v25782_v25 = vld [vmem:[#allocation5_spill] sm:$0xff] }
 0x663   :  { %18621 = vmatprep.subr.msk.bf16.mxu1 %vm20941_vm5, %v18619_v13  ;;  %19964 = vrcp.f32 %v5387_v10 }
 0x664   :  { %19471 = vrot.lane.b32.xlu0 %v25765_v19, %s20412_s25  ;;  %17703 = vmatprep.mubr.msk.f32.mxu0 %vm1861_vm7, %v5460_v1  ;;  %v18661_v34 = vpack.c.bf16 %v19394_v43, %v19393_v30  ;;  %v7237_v1 = vpop.permute.xlu1 %7236  ;;  %v25783_v43 = vld [vmem:[#allocation11_spill] sm:$0xff]  ;;  %v25784_v30 = vld [vmem:[#allocation8_spill] sm:$0xff] }
 0x665   :  { %19436 = vrot.lane.b32.xlu1 %v25766_v42, %s20410_s23  ;;  %17704 = vmatmul.mubr.msk.f32.vlgmr.msra.gmra.mrb[80].mxu0 %vm1861_vm7, %v5461_v21  ;;  %v19961_v59 = vpop.eup %19960 }
 0x666   :  { %18642 = vmatpush3.bf16.xpose.msk.msra.mxu0 %vm20859_vm2, %v18637_v57  ;;  %17717 = vmatprep.mubr.msk.f32.mxu0 %vm425_vm1, %v25767_v15  ;;  %v25771_v57 = vld [vmem:[#allocation77_spill] sm:$0xff]  ;;  %v5455_v31 = vmul.f32 %v19961_v59, %v22154_v9  ;;  %v25775_v9 = vld [vmem:[#allocation30_spill] sm:$0xff]  ;;  %v25779_v15 = vld [vmem:[#allocation32_spill] sm:$0xff] }
 0x667   :  { %18651 = vmatprep.subr.msk.bf16.mxu0 %vm20859_vm2, %v18649_v27  ;;  %v19369_v14 = vunpack.i.h.bf16 %v25771_v57  ;;  %v19368_v55 = vunpack.i.l.bf16 %v25771_v57  ;;  %v25780_v59 = vld [vmem:[#allocation2_spill] sm:$0xff]  ;;  %v25785_v57 = vld [vmem:[#allocation13_spill] sm:$0xff] }
 0x668   :  { %19476 = vrot.lane.b32.xlu0 %v25768_v32, %s20412_s25 }
 0x669   :  { %v19963_v22 = vpop.eup %19962  ;;  %7875 = vrot.lane.b32.xlu1 %v25770_v53, %s20411_s24  ;;  %v18631_v16 = vpack.c.bf16 %v19369_v14, %v19368_v55  ;;  %v25786_v55 = vld [vmem:[#allocation12_spill] sm:$0xff] }
 0x66a   :  { %v5454_v51 = vmul.f32 %v19963_v22, %v22158_v12  ;;  %v19402_v12 = vpop.permute.xlu0 %19401  ;;  %v25781_v22 = vld [vmem:[#allocation34_spill] sm:$0xff] }
 0x66b   :  { %v19404_v26 = vunpack.i.h.bf16 %v19402_v12  ;;  %v19403_v23 = vunpack.i.l.bf16 %v19402_v12 }
 0x66c   :  { %19481 = vrot.lane.b32.xlu0 %v20683_v0, %s20412_s25  ;;  %17682 = vmatprep.mubr.msk.f32.mxu1 %vm1861_vm7, %v5454_v51 }
 0x66d   :  { %19441 = vrot.lane.b32.xlu1 %v25772_v52, %s20410_s23  ;;  %17718 = vmatmul.mubr.msk.f32.vlgmr.msra.gmra.mrb[82].mxu0 %vm425_vm1, %v25773_v49  ;;  %v18673_v21 = vpack.c.bf16 %v19404_v26, %v19403_v23  ;;  %v19965_v51 = vpop.eup %19964  ;;  %v25787_v49 = vld [vmem:[#allocation78_spill] sm:$0xff] }
 0x66e   :  { %17683 = vmatmul.mubr.msk.f32.vlgmr.msra.gmra.mrb[64].mxu1 %vm1861_vm7, %v5455_v31  ;;  %18654 = vmatpush3.bf16.xpose.msk.msra.mxu0 %vm20859_vm2, %v18649_v27  ;;  %v25778_v27 = vld [vmem:[#allocation89_spill] sm:$0xff]  ;;  %v19378_v10 = vunpack.i.l.bf16 %v25787_v49  ;;  %v5459_v26 = vmul.f32 %v19965_v51, %v22162_v37 }
 0x66f   :  { %18624 = vmatpush3.bf16.msk.msra.mxu1 %vm20941_vm5, %v18619_v13  ;;  %17731 = vmatprep.mubr.msk.f32.mxu0 %vm425_vm1, %v25774_v39  ;;  %v25777_v13 = vld [vmem:[#allocation29_spill] sm:$0xff] }
 0x670   :  { %18633 = vmatprep.subr.msk.bf16.mxu1 %vm20941_vm5, %v18631_v16  ;;  %18663 = vmatprep.subr.msk.bf16.mxu0 %vm20859_vm2, %v18661_v34 }
 0x671   :  { %19501 = vrot.lane.b32.xlu0 %v20733_v33, %s20412_s25  ;;  %8055 = vrot.lane.b32.xlu1 %v25775_v9, %s20411_s24 }
 0x675   :  { %19531 = vrot.lane.b32.xlu0 %v25776_v62, %s20413_s26  ;;  %8057 = vrot.lane.b32.xlu1 %v25777_v13, %s20411_s24 }
 0x676   :  { %17732 = vmatmul.mubr.msk.f32.vlgmr.msra.gmra.mrb[84].mxu0 %vm425_vm1, %v25778_v27 }
 0x677   :  { %18666 = vmatpush3.bf16.xpose.msk.msra.mxu0 %vm20859_vm2, %v18661_v34  ;;  %17745 = vmatprep.mubr.msk.f32.mxu0 %vm425_vm1, %v7237_v1  ;;  %v19379_v34 = vunpack.i.h.bf16 %v25787_v49  ;;  %v25791_v49 = vld [vmem:[#allocation4_spill] sm:$0xff] }
 0x678   :  { %18675 = vmatprep.subr.msk.bf16.mxu0 %vm20859_vm2, %v18673_v21 }
 0x679   :  { %19541 = vrot.lane.b32.xlu0 %v25762_v48, %s20413_s26  ;;  %8148 = vrot.lane.b32.xlu1 %v25779_v15, %s20411_s24  ;;  %v18643_v23 = vpack.c.bf16 %v19379_v34, %v19378_v10 }
 0x67d   :  { %10122 = vrot.lane.b32.xlu0 %v25780_v59, %s20414_s27  ;;  %8239 = vrot.lane.b32.xlu1 %v25781_v22, %s20411_s24 }
 0x681   :  { %10211 = vrot.lane.b32.xlu0 %v25782_v25, %s20414_s27  ;;  %19451 = vrot.lane.b32.xlu1 %v25776_v62, %s20412_s25 }
 0x685   :  { %19551 = vrot.lane.b32.xlu0 %v25765_v19, %s20413_s26  ;;  %19456 = vrot.lane.b32.xlu1 %v25783_v43, %s20412_s25 }
 0x689   :  { %10304 = vrot.lane.b32.xlu0 %v25784_v30, %s20414_s27  ;;  %19466 = vrot.lane.b32.xlu1 %v25785_v57, %s20412_s25  ;;  %v25788_v30 = vld [vmem:[#allocation3_spill] sm:$0xff] }
 0x68b   :  { %v5384_v14 = vpop.xlane.xlu1 %5383 }
 0x68c   :  { %19966 = vrcp.f32 %v5384_v14 }
 0x68d   :  { %10393 = vrot.lane.b32.xlu0 %v25786_v55, %s20414_s27  ;;  %19486 = vrot.lane.b32.xlu1 %v20697_v7, %s20412_s25 }
 0x68f   :  { %v19407_v34 = vpop.permute.xlu1 %19406 }
 0x691   :  { %19491 = vrot.lane.b32.xlu1 %v20713_v20, %s20412_s25 }
 0x695   :  { %19496 = vrot.lane.b32.xlu1 %v25748_v36, %s20412_s25 }
 0x696   :  { %v19967_v31 = vpop.eup %19966 }
 0x697   :  { %v5399_v12 = vpop.xlane.xlu0 %5398  ;;  %v5458_v39 = vmul.f32 %v19967_v31, %v22193_v2 }
 0x698   :  { %19968 = vrcp.f32 %v5399_v12 }
 0x699   :  { %19506 = vrot.lane.b32.xlu1 %v25757_v56, %s20412_s25  ;;  %17696 = vmatprep.mubr.msk.f32.mxu1 %vm1861_vm7, %v5458_v39  ;;  %v25793_v39 = vld [vmem:[#allocation7_spill] sm:$0xff] }
 0x69a   :  { %17697 = vmatmul.mubr.msk.f32.vlgmr.msra.gmra.mrb[66].mxu1 %vm1861_vm7, %v5459_v26 }
 0x69b   :  { %18636 = vmatpush3.bf16.msk.msra.mxu1 %vm20941_vm5, %v18631_v16  ;;  %v7239_v1 = vpop.permute.xlu0 %7238 }
 0x69c   :  { %18645 = vmatprep.subr.msk.bf16.mxu1 %vm20859_vm2, %v18643_v23  ;;  %17746 = vmatmul.mubr.msk.f32.vlgmr.msra.gmra.mrb[86].mxu0 %vm425_vm1, %v7239_v1 }
 0x69d   :  { %19511 = vrot.lane.b32.xlu1 %v20763_v4, %s20412_s25  ;;  %18678 = vmatpush3.bf16.xpose.msk.msra.mxu0 %vm20859_vm2, %v18673_v21 }
 0x69f   :  { %v22468_v37 = vpop.permute.xlu0 %7327 }
 0x6a1   :  { %19516 = vrot.lane.b32.xlu1 %v25766_v42, %s20412_s25 }
 0x6a3   :  { %v19412_v2 = vpop.permute.xlu0 %19411 }
 0x6a4   :  { %v19414_v27 = vunpack.i.h.bf16 %v19412_v2  ;;  %v19413_v16 = vunpack.i.l.bf16 %v19412_v2 }
 0x6a5   :  { %19521 = vrot.lane.b32.xlu1 %v25772_v52, %s20412_s25 }
 0x6a6   :  { %v18685_v59 = vpack.c.bf16 %v19414_v27, %v19413_v16 }
 0x6a7   :  { %v7421_v25 = vpop.permute.xlu0 %7420 }
 0x6a8   :  { %18687 = vmatprep.subr.msk.bf16.mxu0 %vm20859_vm2, %v18685_v59 }
 0x6a9   :  { %19526 = vrot.lane.b32.xlu1 %v25752_v47, %s20412_s25 }
 0x6ab   :  { %v22478_v21 = vpop.permute.xlu0 %7509 }
 0x6ad   :  { %19536 = vrot.lane.b32.xlu1 %v25783_v43, %s20413_s26 }
 0x6af   :  { %v19422_v51 = vpop.permute.xlu0 %19421 }
 0x6b1   :  { %10120 = vrot.lane.b32.xlu1 %v25788_v30, %s20414_s27  ;;  %v22484_v14 = vpop.f32.mrb[66].mxu0  ;;  %v25795_v30 = vld [vmem:[#allocation9_spill] sm:$0xff] }
 0x6b2   :  { %25789 = vst [vmem:[#allocation69_spill] sm:$0xff] %v22484_v14  ;;  %v22486_v55 = vpop.f32.mrb[67].mxu0 }
 0x6b3   :  { %25790 = vst [vmem:[#allocation72_spill] sm:$0xff] %v22486_v55  ;;  %v7603_v31 = vpop.permute.xlu0 %7602  ;;  %v25796_v55 = vld [vmem:[#allocation82_spill] sm:$0xff] }
 0x6b5   :  { %19546 = vrot.lane.b32.xlu1 %v25785_v57, %s20413_s26  ;;  %v19389_v57 = vunpack.i.h.bf16 %v25796_v55 }
 0x6b7   :  { %v22498_v1 = vpop.permute.xlu0 %7691 }
 0x6b9   :  { %10213 = vrot.lane.b32.xlu1 %v25791_v49, %s20414_s27  ;;  %v19424_v49 = vunpack.i.h.bf16 %v19422_v51 }
 0x6bb   :  { %v19432_v16 = vpop.permute.xlu0 %19431 }
 0x6bc   :  { %v22492_v10 = vpop.f32.mrb[68].mxu0 }
 0x6bd   :  { %25792 = vst [vmem:[#allocation70_spill] sm:$0xff] %v22492_v10  ;;  %10302 = vrot.lane.b32.xlu1 %v25793_v39, %s20414_s27  ;;  %v22496_v26 = vpop.f32.mrb[69].mxu0  ;;  %v19423_v10 = vunpack.i.l.bf16 %v19422_v51  ;;  %v19969_v39 = vpop.eup %19968 }
 0x6be   :  { %25794 = vst [vmem:[#allocation76_spill] sm:$0xff] %v22496_v26 }
 0x6bf   :  { %v18697_v26 = vpack.c.bf16 %v19424_v49, %v19423_v10 }
 0x6c0   :  { %v5396_v2 = vpop.xlane.xlu1 %5395 }
 0x6c1   :  { %19556 = vrot.lane.b32.xlu1 %v25768_v32, %s20413_s26  ;;  %19970 = vrcp.f32 %v5396_v2  ;;  %v19388_v2 = vunpack.i.l.bf16 %v25796_v55  ;;  %v7785_v32 = vpop.permute.xlu0 %7784  ;;  %v25797_v55 = vld [vmem:[#allocation85_spill] sm:$0xff] }
 0x6c4   :  { %v22502_v27 = vpop.permute.xlu1 %7329 }
 0x6c5   :  { %10395 = vrot.lane.b32.xlu1 %v25795_v30, %s20414_s27  ;;  %v22522_v10 = vpop.permute.xlu0 %7873 }
 0x6c8   :  { %v7419_v14 = vpop.permute.xlu1 %7418 }
 0x6c9   :  { %17759 = vmatprep.mubr.msk.f32.mxu0 %vm425_vm1, %v7419_v14  ;;  %v5463_v14 = vmul.f32 %v19969_v39, %v22205_v45  ;;  %v19434_v39 = vunpack.i.h.bf16 %v19432_v16 }
 0x6ca   :  { %17760 = vmatmul.mubr.msk.f32.vlgmr.msra.gmra.mrb[88].mxu0 %vm425_vm1, %v7421_v25  ;;  %v18655_v25 = vpack.c.bf16 %v19389_v57, %v19388_v2  ;;  %v19433_v57 = vunpack.i.l.bf16 %v19432_v16 }
 0x6cb   :  { %v19971_v12 = vpop.eup %19970  ;;  %18690 = vmatpush3.bf16.xpose.msk.msra.mxu0 %vm20859_vm2, %v18685_v59 }
 0x6cc   :  { %18699 = vmatprep.subr.msk.bf16.mxu0 %vm20859_vm2, %v18697_v26  ;;  %v19417_v51 = vpop.permute.xlu1 %19416  ;;  %v5462_v30 = vmul.f32 %v19971_v12, %v22226_v11  ;;  %v25798_v11 = vld [vmem:[#allocation88_spill] sm:$0xff]  ;;  %v18709_v2 = vpack.c.bf16 %v19434_v39, %v19433_v57 }
 0x6cd   :  { %v19399_v49 = vunpack.i.h.bf16 %v25798_v11  ;;  %v19398_v45 = vunpack.i.l.bf16 %v25798_v11 }
 0x6ce   :  { %17710 = vmatprep.mubr.msk.f32.mxu1 %vm1861_vm7, %v5462_v30  ;;  %v7965_v30 = vpop.permute.xlu0 %7964 }
 0x6cf   :  { %17711 = vmatmul.mubr.msk.f32.vlgmr.msra.gmra.mrb[68].mxu1 %vm1861_vm7, %v5463_v14  ;;  %v25799_v14 = vld [vmem:[#allocation84_spill] sm:$0xff] }
 0x6d0   :  { %18648 = vmatpush3.bf16.xpose.msk.msra.mxu1 %vm20859_vm2, %v18643_v23  ;;  %17724 = vmatprep.mubr.msk.f32.mxu1 %vm425_vm1, %v25797_v55  ;;  %v7512_v59 = vpop.permute.xlu1 %7511  ;;  %v18667_v23 = vpack.c.bf16 %v19399_v49, %v19398_v45  ;;  %v25800_v55 = vld [vmem:[#allocation91_spill] sm:$0xff]  ;;  %v19409_v49 = vunpack.i.h.bf16 %v19407_v34  ;;  %v19408_v45 = vunpack.i.l.bf16 %v19407_v34  ;;  %v19419_v34 = vunpack.i.h.bf16 %v19417_v51 }
 0x6d1   :  { %18657 = vmatprep.subr.msk.bf16.mxu1 %vm20859_vm2, %v18655_v25 }
 0x6d2   :  { %v7967_v39 = vpop.permute.xlu0 %7966  ;;  %v18679_v57 = vpack.c.bf16 %v19409_v49, %v19408_v45 }
 0x6d4   :  { %v7601_v12 = vpop.permute.xlu1 %7600 }
 0x6d5   :  { %17773 = vmatprep.mubr.msk.f32.mxu0 %vm425_vm1, %v7601_v12 }
 0x6d6   :  { %17774 = vmatmul.mubr.msk.f32.vlgmr.msra.gmra.mrb[90].mxu0 %vm425_vm1, %v7603_v31 }
 0x6d7   :  { %17725 = vmatmul.mubr.msk.f32.vlgmr.msra.gmra.mrb[70].mxu1 %vm425_vm1, %v25799_v14  ;;  %18702 = vmatpush3.bf16.xpose.msk.msra.mxu0 %vm20859_vm2, %v18697_v26  ;;  %v19418_v14 = vunpack.i.l.bf16 %v19417_v51 }
 0x6d8   :  { %18660 = vmatpush3.bf16.xpose.msk.msra.mxu1 %vm20859_vm2, %v18655_v25  ;;  %17738 = vmatprep.mubr.msk.f32.mxu1 %vm425_vm1, %v25800_v55  ;;  %v19427_v16 = vpop.permute.xlu1 %19426  ;;  %v25803_v25 = vld [vmem:[#allocation90_spill] sm:$0xff]  ;;  %v19447_v55 = vpop.permute.xlu0 %19446 }
 0x6d9   :  { %v22538_v11 = vpop.f32.mrb[70].mxu0  ;;  %18711 = vmatprep.subr.msk.bf16.mxu0 %vm20859_vm2, %v18709_v2  ;;  %18669 = vmatprep.subr.msk.bf16.mxu1 %vm20859_vm2, %v18667_v23  ;;  %v18691_v49 = vpack.c.bf16 %v19419_v34, %v19418_v14  ;;  %v19429_v51 = vunpack.i.h.bf16 %v19427_v16  ;;  %v19449_v14 = vunpack.i.h.bf16 %v19447_v55 }
 0x6da   :  { %25801 = vst [vmem:[#allocation71_spill] sm:$0xff] %v22538_v11  ;;  %v22544_v31 = vpop.f32.mrb[71].mxu0 }
 0x6db   :  { %25802 = vst [vmem:[#allocation79_spill] sm:$0xff] %v22544_v31 }
 0x6dc   :  { %v7694_v26 = vpop.permute.xlu1 %7693 }
 0x6df   :  { %17739 = vmatmul.mubr.msk.f32.vlgmr.msra.gmra.mrb[72].mxu1 %vm425_vm1, %v25803_v25 }
 0x6e0   :  { %18672 = vmatpush3.bf16.xpose.msk.msra.mxu1 %vm20859_vm2, %v18667_v23  ;;  %17752 = vmatprep.mubr.msk.f32.mxu1 %vm425_vm1, %v22468_v37  ;;  %v7783_v12 = vpop.permute.xlu1 %7782  ;;  %v8147_v37 = vpop.permute.xlu0 %8146 }
 0x6e1   :  { %18681 = vmatprep.subr.msk.bf16.mxu1 %vm20859_vm2, %v18679_v57  ;;  %17787 = vmatprep.mubr.msk.f32.mxu0 %vm425_vm1, %v7783_v12 }
 0x6e2   :  { %17788 = vmatmul.mubr.msk.f32.vlgmr.msra.gmra.mrb[92].mxu0 %vm425_vm1, %v7785_v32 }
 0x6e3   :  { %18714 = vmatpush3.bf16.xpose.msk.msra.mxu0 %vm20859_vm2, %v18709_v2  ;;  %17801 = vmatprep.mubr.msk.f32.mxu0 %vm425_vm1, %v7965_v30  ;;  %v19428_v2 = vunpack.i.l.bf16 %v19427_v16 }
 0x6e4   :  { %v19437_v23 = vpop.permute.xlu1 %19436  ;;  %v8238_v34 = vpop.permute.xlu0 %8237 }
 0x6e5   :  { %v18703_v25 = vpack.c.bf16 %v19429_v51, %v19428_v2  ;;  %v19439_v16 = vunpack.i.h.bf16 %v19437_v23 }
 0x6e7   :  { %17753 = vmatmul.mubr.msk.f32.vlgmr.msra.gmra.mrb[74].mxu1 %vm425_vm1, %v22502_v27 }
 0x6e8   :  { %18684 = vmatpush3.bf16.xpose.msk.msra.mxu1 %vm20859_vm2, %v18679_v57  ;;  %17766 = vmatprep.mubr.msk.f32.mxu1 %vm425_vm1, %v22478_v21  ;;  %v7876_v32 = vpop.permute.xlu1 %7875 }
 0x6e9   :  { %18693 = vmatprep.subr.msk.bf16.mxu1 %vm20859_vm2, %v18691_v49 }
 0x6ea   :  { %17802 = vmatmul.mubr.msk.f32.vlgmr.msra.gmra.mrb[94].mxu0 %vm425_vm1, %v7967_v39  ;;  %v19438_v39 = vunpack.i.l.bf16 %v19437_v23 }
 0x6eb   :  { %17815 = vmatprep.mubr.msk.f32.mxu0 %vm425_vm1, %v8147_v37  ;;  %v19462_v37 = vpop.permute.xlu0 %19461 }
 0x6ec   :  { %v19442_v30 = vpop.permute.xlu1 %19441  ;;  %v19463_v2 = vunpack.i.l.bf16 %v19462_v37 }
 0x6ed   :  { %v19444_v45 = vunpack.i.h.bf16 %v19442_v30  ;;  %v19443_v27 = vunpack.i.l.bf16 %v19442_v30 }
 0x6ef   :  { %v18721_v12 = vpack.c.bf16 %v19444_v45, %v19443_v27  ;;  %17767 = vmatmul.mubr.msk.f32.vlgmr.msra.gmra.mrb[76].mxu1 %vm425_vm1, %v7512_v59  ;;  %v18715_v59 = vpack.c.bf16 %v19439_v16, %v19438_v39 }
 0x6f0   :  { %18696 = vmatpush3.bf16.xpose.msk.msra.mxu1 %vm20859_vm2, %v18691_v49  ;;  %17780 = vmatprep.mubr.msk.f32.mxu1 %vm425_vm1, %v22498_v1  ;;  %v8056_v21 = vpop.permute.xlu1 %8055  ;;  %v19448_v49 = vunpack.i.l.bf16 %v19447_v55 }
 0x6f1   :  { %18705 = vmatprep.subr.msk.bf16.mxu1 %vm20859_vm2, %v18703_v25  ;;  %18723 = vmatprep.subr.msk.bf16.mxu0 %vm20859_vm2, %v18721_v12 }
 0x6f2   :  { %18726 = vmatpush3.bf16.xpose.msk.msra.mxu0 %vm20859_vm2, %v18721_v12  ;;  %v18727_v51 = vpack.c.bf16 %v19449_v14, %v19448_v49 }
 0x6f4   :  { %v8058_v57 = vpop.permute.xlu1 %8057 }
 0x6f7   :  { %17781 = vmatmul.mubr.msk.f32.vlgmr.msra.gmra.mrb[78].mxu1 %vm425_vm1, %v7694_v26 }
 0x6f8   :  { %18708 = vmatpush3.bf16.xpose.msk.msra.mxu1 %vm20859_vm2, %v18703_v25  ;;  %17794 = vmatprep.mubr.msk.f32.mxu1 %vm425_vm1, %v22522_v10  ;;  %v8149_v1 = vpop.permute.xlu1 %8148  ;;  %v19464_v10 = vunpack.i.h.bf16 %v19462_v37 }
 0x6f9   :  { %18717 = vmatprep.subr.msk.bf16.mxu1 %vm20859_vm2, %v18715_v59  ;;  %17816 = vmatmul.mubr.msk.f32.vlgmr.msra.gmra.mrb[96].mxu0 %vm425_vm1, %v8149_v1 }
 0x6fa   :  { %v22594_v25 = vpack.c.bf16 %v19464_v10, %v19463_v2 }
 0x6fc   :  { %v8240_v23 = vpop.permute.xlu1 %8239 }
 0x6ff   :  { %17795 = vmatmul.mubr.msk.f32.vlgmr.msra.gmra.mrb[80].mxu1 %vm425_vm1, %v7876_v32 }
 0x700   :  { %18720 = vmatpush3.bf16.xpose.msk.msra.mxu1 %vm20859_vm2, %v18715_v59  ;;  %17808 = vmatprep.mubr.msk.f32.mxu1 %vm425_vm1, %v8056_v21  ;;  %v19452_v26 = vpop.permute.xlu1 %19451 }
 0x701   :  { %v19454_v30 = vunpack.i.h.bf16 %v19452_v26  ;;  %v19453_v45 = vunpack.i.l.bf16 %v19452_v26  ;;  %18729 = vmatprep.subr.msk.bf16.mxu1 %vm20859_vm2, %v18727_v51 }
 0x703   :  { %v18733_v27 = vpack.c.bf16 %v19454_v30, %v19453_v45 }
 0x704   :  { %v19457_v55 = vpop.permute.xlu1 %19456 }
 0x705   :  { %v19459_v12 = vunpack.i.h.bf16 %v19457_v55  ;;  %v19458_v16 = vunpack.i.l.bf16 %v19457_v55  ;;  %18735 = vmatprep.subr.msk.bf16.mxu0 %vm20941_vm5, %v18733_v27 }
 0x706   :  { %18738 = vmatpush3.bf16.msk.msra.mxu0 %vm20941_vm5, %v18733_v27 }
 0x707   :  { %v18739_v32 = vpack.c.bf16 %v19459_v12, %v19458_v16  ;;  %17809 = vmatmul.mubr.msk.f32.vlgmr.msra.gmra.mrb[82].mxu1 %vm425_vm1, %v8058_v57  ;;  %18747 = vmatprep.subr.msk.bf16.mxu0 %vm20941_vm5, %v22594_v25 }
 0x708   :  { %18732 = vmatpush3.bf16.xpose.msk.msra.mxu1 %vm20859_vm2, %v18727_v51  ;;  %17822 = vmatprep.mubr.msk.f32.mxu1 %vm425_vm1, %v8238_v34  ;;  %v19467_v21 = vpop.permute.xlu1 %19466 }
 0x709   :  { %18741 = vmatprep.subr.msk.bf16.mxu1 %vm20941_vm5, %v18739_v32  ;;  %v19469_v39 = vunpack.i.h.bf16 %v19467_v21  ;;  %v19468_v59 = vunpack.i.l.bf16 %v19467_v21 }
 0x70b   :  { %v22609_v1 = vpack.c.bf16 %v19469_v39, %v19468_v59 }
 0x70f   :  { %17823 = vmatmul.mubr.msk.f32.vlgmr.msra.gmra.mrb[84].mxu1 %vm425_vm1, %v8240_v23 }
 0x710   :  { %18744 = vmatpush3.bf16.msk.msra.mxu1 %vm20941_vm5, %v18739_v32 }
 0x711   :  { %18753 = vmatprep.subr.msk.bf16.mxu1 %vm20941_vm5, %v22609_v1 }
 0x714   :  { %v22617_v57 = vpop.f32.mrb[54].mxu1 }
 0x715   :  { %25804 = vst [vmem:[#allocation73_spill] sm:$0xff] %v22617_v57  ;;  %v22619_v34 = vpop.f32.mrb[55].mxu1  ;;  %v22621_v14 = vpop.f32.mrb[72].mxu0 }
 0x716   :  { %25805 = vst [vmem:[#allocation81_spill] sm:$0xff] %v22619_v34  ;;  %25806 = vst [vmem:[#allocation80_spill] sm:$0xff] %v22621_v14  ;;  %v22623_v49 = vpop.f32.mrb[73].mxu0 }
 0x717   :  { %25807 = vst [vmem:[#allocation87_spill] sm:$0xff] %v22623_v49  ;;  %v22689_v49 = vpop.permute.xlu1 %19486 }
 0x718   :  { %25828 = vst [vmem:[#allocation93_spill] sm:$0xff] %v22689_v49 }
 0x71c   :  { %v22625_v37 = vpop.f32.mrb[56].mxu1 }
 0x71d   :  { %25808 = vst [vmem:[#allocation77_spill] sm:$0xff] %v22625_v37  ;;  %v22627_v51 = vpop.f32.mrb[57].mxu1 }
 0x71e   :  { %25809 = vst [vmem:[#allocation83_spill] sm:$0xff] %v22627_v51  ;;  %v22629_v23 = vpop.f32.mrb[74].mxu0 }
 0x71f   :  { %25810 = vst [vmem:[#allocation86_spill] sm:$0xff] %v22629_v23  ;;  %v22631_v26 = vpop.f32.mrb[75].mxu0 }
 0x720   :  { %25811 = vst [vmem:[#allocation89_spill] sm:$0xff] %v22631_v26 }
 0x724   :  { %v22633_v10 = vpop.f32.mrb[58].mxu1 }
 0x725   :  { %25812 = vst [vmem:[#allocation2_spill] sm:$0xff] %v22633_v10  ;;  %v22635_v2 = vpop.f32.mrb[59].mxu1 }
 0x726   :  { %25813 = vst [vmem:[#allocation5_spill] sm:$0xff] %v22635_v2  ;;  %v22637_v30 = vpop.f32.mrb[76].mxu0 }
 0x727   :  { %25814 = vst [vmem:[#allocation8_spill] sm:$0xff] %v22637_v30  ;;  %v22639_v45 = vpop.f32.mrb[77].mxu0 }
 0x728   :  { %25815 = vst [vmem:[#allocation12_spill] sm:$0xff] %v22639_v45 }
 0x72c   :  { %v22641_v27 = vpop.f32.mrb[60].mxu1 }
 0x72d   :  { %25816 = vst [vmem:[#allocation78_spill] sm:$0xff] %v22641_v27  ;;  %v22643_v55 = vpop.f32.mrb[61].mxu1 }
 0x72e   :  { %25817 = vst [vmem:[#allocation3_spill] sm:$0xff] %v22643_v55  ;;  %v22645_v12 = vpop.f32.mrb[78].mxu0 }
 0x72f   :  { %25818 = vst [vmem:[#allocation4_spill] sm:$0xff] %v22645_v12  ;;  %v22647_v16 = vpop.f32.mrb[79].mxu0 }
 0x730   :  { %25819 = vst [vmem:[#allocation7_spill] sm:$0xff] %v22647_v16 }
 0x734   :  { %v22649_v32 = vpop.f32.mrb[62].mxu1 }
 0x735   :  { %25820 = vst [vmem:[#allocation9_spill] sm:$0xff] %v22649_v32  ;;  %v22651_v21 = vpop.f32.mrb[63].mxu1 }
 0x736   :  { %25821 = vst [vmem:[#allocation82_spill] sm:$0xff] %v22651_v21 }
 0x738   :  { %v22653_v39 = vpop.f32.mrb[80].mxu0 }
 0x739   :  { %25822 = vst [vmem:[#allocation85_spill] sm:$0xff] %v22653_v39  ;;  %v22655_v59 = vpop.f32.mrb[81].mxu0 }
 0x73a   :  { %25823 = vst [vmem:[#allocation88_spill] sm:$0xff] %v22655_v59 }
 0x740   :  { %v17719_v23 = vpop.f32.mrb[82].mxu0 }
 0x741   :  { %v22657_v30 = vmul.f32 0.35355338, %v17719_v23  ;;  %v22659_v45 = vpop.f32.mrb[64].mxu1  ;;  %v6954_v26 = vpop.f32.mrb[83].mxu0 }
 0x742   :  { %25824 = vst [vmem:[#allocation84_spill] sm:$0xff] %v22659_v45  ;;  %v22661_v27 = vmul.f32 0.35355338, %v6954_v26  ;;  %v22663_v55 = vpop.f32.mrb[65].mxu1 }
 0x743   :  { %25825 = vst [vmem:[#allocation91_spill] sm:$0xff] %v22663_v55  ;;  %v8363_v12 = vsel %vm1865_vm6, %v22657_v30, -inf }
 0x744   :  { %8364 = vmax.xlane.f32.xlu1 %v8363_v12  ;;  %v8360_v16 = vsel %vm1861_vm7, %v22661_v27, -inf }
 0x745   :  { %8361 = vmax.xlane.f32.xlu0 %v8360_v16 }
 0x749   :  { %v17733_v39 = vpop.f32.mrb[84].mxu0 }
 0x74a   :  { %v22669_v59 = vmul.f32 0.35355338, %v17733_v39  ;;  %v7136_v23 = vpop.f32.mrb[85].mxu0 }
 0x74b   :  { %v22671_v32 = vmul.f32 0.35355338, %v7136_v23 }
 0x74c   :  { %v8375_v26 = vsel %vm1865_vm6, %v22669_v59, -inf }
 0x74d   :  { %8376 = vmax.xlane.f32.xlu0 %v8375_v26  ;;  %v8372_v55 = vsel %vm1861_vm7, %v22671_v32, -inf }
 0x751   :  { %8373 = vmax.xlane.f32.xlu0 %v8372_v55  ;;  %v22691_v55 = vpop.permute.xlu1 %19491 }
 0x76d   :  { %v22677_v45 = vpop.f32.mrb[66].mxu1 }
 0x76e   :  { %25826 = vst [vmem:[#allocation90_spill] sm:$0xff] %v22677_v45  ;;  %v22679_v12 = vpop.f32.mrb[67].mxu1  ;;  %v22693_v45 = vpop.permute.xlu1 %19496 }
 0x76f   :  { %25827 = vst [vmem:[#allocation92_spill] sm:$0xff] %v22679_v12  ;;  %v17747_v21 = vpop.f32.mrb[86].mxu0  ;;  %25829 = vst [vmem:[#allocation94_spill] sm:$0xff] %v22693_v45 }
 0x770   :  { %v22681_v16 = vmul.f32 0.35355338, %v17747_v21  ;;  %v7318_v39 = vpop.f32.mrb[87].mxu0  ;;  %v22697_v21 = vpop.permute.xlu0 %19471 }
 0x771   :  { %v22683_v14 = vmul.f32 0.35355338, %v7318_v39 }
 0x772   :  { %v8387_v23 = vsel %vm1865_vm6, %v22681_v16, -inf  ;;  %v22695_v12 = vpop.permute.xlu1 %19506 }
 0x773   :  { %8388 = vmax.xlane.f32.xlu0 %v8387_v23  ;;  %v8384_v26 = vsel %vm1861_vm7, %v22683_v14, -inf  ;;  %25830 = vst [vmem:[#allocation95_spill] sm:$0xff] %v22695_v12 }
 0x774   :  { %v22701_v10 = vpop.permute.xlu0 %19476 }
 0x776   :  { %v22699_v39 = vpop.permute.xlu1 %19511 }
 0x777   :  { %8385 = vmax.xlane.f32.xlu0 %v8384_v26  ;;  %25831 = vst [vmem:[#allocation96_spill] sm:$0xff] %v22699_v39 }
 0x778   :  { %v22705_v23 = vpop.permute.xlu0 %19481 }
 0x77a   :  { %v22703_v11 = vpop.permute.xlu1 %19516 }
 0x77b   :  { %25832 = vst [vmem:[#allocation97_spill] sm:$0xff] %v22703_v11 }
 0x77c   :  { %v22713_v57 = vpop.permute.xlu0 %19501 }
 0x77e   :  { %v22707_v31 = vpop.permute.xlu1 %19521 }
 0x77f   :  { %25833 = vst [vmem:[#allocation98_spill] sm:$0xff] %v22707_v31 }
 0x780   :  { %v22721_v15 = vpop.permute.xlu0 %19531 }
 0x781   :  { %25837 = vst [vmem:[#allocation102_spill] sm:$0xff] %v22721_v15 }
 0x782   :  { %v22717_v62 = vpop.permute.xlu1 %19526 }
 0x783   :  { %25835 = vst [vmem:[#allocation100_spill] sm:$0xff] %v22717_v62 }
 0x786   :  { %v22723_v13 = vpop.permute.xlu1 %19536 }
 0x787   :  { %25838 = vst [vmem:[#allocation103_spill] sm:$0xff] %v22723_v13  ;;  %v22737_v13 = vpop.permute.xlu0 %19541 }
 0x788   :  { %25840 = vst [vmem:[#allocation105_spill] sm:$0xff] %v22737_v13 }
 0x78a   :  { %v22735_v62 = vpop.permute.xlu1 %10120 }
 0x78b   :  { %25839 = vst [vmem:[#allocation104_spill] sm:$0xff] %v22735_v62  ;;  %v22751_v29 = vpop.permute.xlu0 %10122 }
 0x78c   :  { %25842 = vst [vmem:[#allocation107_spill] sm:$0xff] %v22751_v29 }
 0x78f   :  { %v22767_v29 = vpop.permute.xlu0 %10211 }
 0x790   :  { %25844 = vst [vmem:[#allocation109_spill] sm:$0xff] %v22767_v29 }
 0x79d   :  { %v17761_v26 = vpop.f32.mrb[88].mxu0 }
 0x79e   :  { %v22709_v2 = vmul.f32 0.35355338, %v17761_v26  ;;  %v7500_v51 = vpop.f32.mrb[89].mxu0 }
 0x7a0   :  { %v8399_v37 = vsel %vm1865_vm6, %v22709_v2, -inf }
 0x7a1   :  { %8400 = vmax.xlane.f32.xlu0 %v8399_v37 }
 0x7a2   :  { %v22715_v34 = vpop.f32.mrb[68].mxu1 }
 0x7a3   :  { %25834 = vst [vmem:[#allocation99_spill] sm:$0xff] %v22715_v34  ;;  %v22719_v22 = vpop.f32.mrb[69].mxu1  ;;  %v22731_v34 = vmul.f32 0.35355338, %v7500_v51  ;;  %v22745_v51 = vpop.permute.xlu1 %19546 }
 0x7a4   :  { %25836 = vst [vmem:[#allocation101_spill] sm:$0xff] %v22719_v22  ;;  %25841 = vst [vmem:[#allocation106_spill] sm:$0xff] %v22745_v51 }
 0x7a7   :  { %v22763_v11 = vpop.permute.xlu1 %10213 }
 0x7a8   :  { %25843 = vst [vmem:[#allocation108_spill] sm:$0xff] %v22763_v11  ;;  %v22781_v11 = vpop.permute.xlu0 %19551 }
 0x7a9   :  { %v17775_v47 = vpop.f32.mrb[90].mxu0  ;;  %25846 = vst [vmem:[#allocation111_spill] sm:$0xff] %v22781_v11 }
 0x7aa   :  { %v17726_v26 = vpop.f32.mrb[70].mxu1  ;;  %v7682_v40 = vpop.f32.mrb[91].mxu0  ;;  %v22739_v48 = vmul.f32 0.35355338, %v17775_v47 }
 0x7ab   :  { %v22725_v53 = vmul.f32 0.35355338, %v17726_v26  ;;  %v7045_v19 = vpop.f32.mrb[71].mxu1  ;;  %v22753_v47 = vmul.f32 0.35355338, %v7682_v40 }
 0x7ac   :  { %v22727_v42 = vmul.f32 0.35355338, %v7045_v19  ;;  %v8396_v19 = vsel %vm1861_vm7, %v22731_v34, -inf  ;;  %v8411_v13 = vsel %vm1865_vm6, %v22739_v48, -inf  ;;  %v22799_v11 = vpop.permute.xlu0 %10304 }
 0x7ad   :  { %v8369_v37 = vsel %vm1865_vm6, %v22725_v53, -inf  ;;  %v8408_v63 = vsel %vm1861_vm7, %v22753_v47, -inf  ;;  %25848 = vst [vmem:[#allocation113_spill] sm:$0xff] %v22799_v11 }
 0x7ae   :  { %8370 = vmax.xlane.f32.xlu1 %v8369_v37  ;;  %v8366_v22 = vsel %vm1861_vm7, %v22727_v42, -inf }
 0x7af   :  { %8367 = vmax.xlane.f32.xlu0 %v8366_v22 }
 0x7b2   :  { %v17740_v26 = vpop.f32.mrb[72].mxu1 }
 0x7b3   :  { %v22743_v46 = vmul.f32 0.35355338, %v17740_v26  ;;  %v7227_v43 = vpop.f32.mrb[73].mxu1  ;;  %8397 = vmax.xlane.f32.xlu0 %v8396_v19 }
 0x7b4   :  { %v22747_v37 = vmul.f32 0.35355338, %v7227_v43 }
 0x7b5   :  { %v8381_v62 = vsel %vm1865_vm6, %v22743_v46, -inf  ;;  %v17789_v22 = vpop.f32.mrb[92].mxu0 }
 0x7b6   :  { %8382 = vmax.xlane.f32.xlu1 %v8381_v62  ;;  %v7864_v26 = vpop.f32.mrb[93].mxu0  ;;  %v8378_v19 = vsel %vm1861_vm7, %v22747_v37, -inf  ;;  %v22759_v51 = vmul.f32 0.35355338, %v17789_v22 }
 0x7b7   :  { %8412 = vmax.xlane.f32.xlu0 %v8411_v13  ;;  %v22773_v56 = vmul.f32 0.35355338, %v7864_v26 }
 0x7b8   :  { %v8423_v44 = vsel %vm1865_vm6, %v22759_v51, -inf }
 0x7b9   :  { %v8420_v26 = vsel %vm1861_vm7, %v22773_v56, -inf }
 0x7ba   :  { %8379 = vmax.xlane.f32.xlu1 %v8378_v19  ;;  %v17754_v43 = vpop.f32.mrb[74].mxu1 }
 0x7bb   :  { %v22765_v40 = vmul.f32 0.35355338, %v17754_v43  ;;  %v7409_v62 = vpop.f32.mrb[75].mxu1  ;;  %8409 = vmax.xlane.f32.xlu0 %v8408_v63  ;;  %v22777_v43 = vpop.permute.xlu1 %10302 }
 0x7bc   :  { %v22769_v28 = vmul.f32 0.35355338, %v7409_v62  ;;  %25845 = vst [vmem:[#allocation110_spill] sm:$0xff] %v22777_v43 }
 0x7bd   :  { %v17803_v13 = vpop.f32.mrb[94].mxu0  ;;  %v8393_v22 = vsel %vm1865_vm6, %v22765_v40, -inf }
 0x7be   :  { %8394 = vmax.xlane.f32.xlu1 %v8393_v22  ;;  %v8046_v19 = vpop.f32.mrb[95].mxu0  ;;  %v8390_v63 = vsel %vm1861_vm7, %v22769_v28, -inf  ;;  %v22783_v62 = vmul.f32 0.35355338, %v17803_v13 }
 0x7bf   :  { %8424 = vmax.xlane.f32.xlu0 %v8423_v44  ;;  %v22793_v43 = vmul.f32 0.35355338, %v8046_v19 }
 0x7c0   :  { %v8435_v13 = vsel %vm1865_vm6, %v22783_v62, -inf }
 0x7c2   :  { %8391 = vmax.xlane.f32.xlu1 %v8390_v63  ;;  %v17768_v29 = vpop.f32.mrb[76].mxu1  ;;  %v22797_v63 = vpop.permute.xlu1 %19556 }
 0x7c3   :  { %v22787_v22 = vmul.f32 0.35355338, %v17768_v29  ;;  %8421 = vmax.xlane.f32.xlu0 %v8420_v26  ;;  %v7591_v15 = vpop.f32.mrb[77].mxu1  ;;  %25847 = vst [vmem:[#allocation112_spill] sm:$0xff] %v22797_v63  ;;  %v8432_v26 = vsel %vm1861_vm7, %v22793_v43, -inf }
 0x7c4   :  { %v22789_v17 = vmul.f32 0.35355338, %v7591_v15 }
 0x7c5   :  { %v8405_v44 = vsel %vm1865_vm6, %v22787_v22, -inf }
 0x7c6   :  { %8406 = vmax.xlane.f32.xlu1 %v8405_v44  ;;  %v8402_v29 = vsel %vm1861_vm7, %v22789_v17, -inf  ;;  %v22807_v9 = vpop.permute.xlu1 %10395 }
 0x7c7   :  { %8436 = vmax.xlane.f32.xlu0 %v8435_v13  ;;  %25849 = vst [vmem:[#allocation114_spill] sm:$0xff] %v22807_v9 }
 0x7ca   :  { %8403 = vmax.xlane.f32.xlu1 %v8402_v29  ;;  %v17782_v15 = vpop.f32.mrb[78].mxu1  ;;  %v22815_v29 = vpop.permute.xlu0 %10393 }
 0x7cb   :  { %v22805_v12 = vmul.f32 0.35355338, %v17782_v15  ;;  %8433 = vmax.xlane.f32.xlu0 %v8432_v26  ;;  %v7773_v19 = vpop.f32.mrb[79].mxu1  ;;  %25850 = vst [vmem:[#allocation115_spill] sm:$0xff] %v22815_v29 }
 0x7cc   :  { %v17817_v44 = vpop.f32.mrb[96].mxu0  ;;  %v22809_v58 = vmul.f32 0.35355338, %v7773_v19 }
 0x7cd   :  { %v22811_v13 = vmul.f32 0.35355338, %v17817_v44  ;;  %v8228_v63 = vpop.f32.mrb[97].mxu0  ;;  %v8417_v11 = vsel %vm1865_vm6, %v22805_v12, -inf }
 0x7ce   :  { %8418 = vmax.xlane.f32.xlu1 %v8417_v11  ;;  %v22819_v26 = vmul.f32 0.35355338, %v8228_v63  ;;  %v8414_v19 = vsel %vm1861_vm7, %v22809_v58, -inf }
 0x7cf   :  { %v8447_v15 = vsel %vm1865_vm6, %v22811_v13, -inf }
 0x7d0   :  { %8448 = vmax.xlane.f32.xlu0 %v8447_v15  ;;  %v8444_v11 = vsel %vm1861_vm7, %v22819_v26, -inf }
 0x7d1   :  { %v8365_v6 = vpop.xlane.xlu1 %8364 }
 0x7d2   :  { %v8362_v9 = vpop.xlane.xlu0 %8361  ;;  %8415 = vmax.xlane.f32.xlu1 %v8414_v19  ;;  %v17796_v44 = vpop.f32.mrb[80].mxu1  ;;  %v8457_v36 = vsub.f32 %v22657_v30, %v8365_v6 }
 0x7d3   :  { %v7955_v31 = vpop.f32.mrb[81].mxu1  ;;  %v8456_v45 = vsub.f32 %v22661_v27, %v8362_v9  ;;  %v22825_v29 = vmul.f32 0.35355338, %v17796_v44 }
 0x7d4   :  { %v8490_v63 = vmul.f32 1.442695, %v8457_v36  ;;  %v22829_v15 = vmul.f32 0.35355338, %v7955_v31 }
 0x7d5   :  { %v8488_v52 = vmul.f32 1.442695, %v8456_v45  ;;  %v8429_v38 = vsel %vm1865_vm6, %v22825_v29, -inf }
 0x7d6   :  { %8445 = vmax.xlane.f32.xlu1 %v8444_v11  ;;  %19972 = vpow2.f32 %v8490_v63  ;;  %v8426_v27 = vsel %vm1861_vm7, %v22829_v15, -inf }
 0x7d7   :  { %19974 = vpow2.f32 %v8488_v52 }
 0x7da   :  { %v8377_v19 = vpop.xlane.xlu0 %8376  ;;  %8430 = vmax.xlane.f32.xlu1 %v8429_v38  ;;  %v17810_v61 = vpop.f32.mrb[82].mxu1 }
 0x7db   :  { %v8461_v6 = vsub.f32 %v22669_v59, %v8377_v19  ;;  %v22834_v30 = vmul.f32 0.35355338, %v17810_v61  ;;  %v8137_v9 = vpop.f32.mrb[83].mxu1 }
 0x7dc   :  { %v22838_v31 = vmul.f32 0.35355338, %v8137_v9 }
 0x7dd   :  { %v8498_v36 = vmul.f32 1.442695, %v8461_v6  ;;  %v8441_v45 = vsel %vm1865_vm6, %v22834_v30, -inf }
 0x7de   :  { %v8374_v44 = vpop.xlane.xlu0 %8373  ;;  %8427 = vmax.xlane.f32.xlu1 %v8426_v27  ;;  %8442 = vmax.xlane.f32.xlu0 %v8441_v45  ;;  %v8438_v59 = vsel %vm1861_vm7, %v22838_v31, -inf }
 0x7df   :  { %v8460_v38 = vsub.f32 %v22671_v32, %v8374_v44  ;;  %19976 = vpow2.f32 %v8498_v36 }
 0x7e0   :  { %v22851_v9 = vpop.eup %19972 }
 0x7e1   :  { %v8496_v61 = vmul.f32 1.442695, %v8460_v38  ;;  %v22855_v27 = vpop.eup %19974  ;;  %v8555_v36 = vsel %vm1865_vm6, %v22851_v9, 0.0 }
 0x7e2   :  { %8439 = vmax.xlane.f32.xlu1 %v8438_v59  ;;  %v17824_v11 = vpop.f32.mrb[84].mxu1  ;;  %v8552_v44 = vsel %vm1861_vm7, %v22855_v27, 0.0 }
 0x7e3   :  { %v22845_v63 = vmul.f32 0.35355338, %v17824_v11  ;;  %v8319_v52 = vpop.f32.mrb[85].mxu1  ;;  %19978 = vpow2.f32 %v8496_v61 }
 0x7e4   :  { %v22847_v19 = vmul.f32 0.35355338, %v8319_v52 }
 0x7e5   :  { %v8453_v6 = vsel %vm1865_vm6, %v22845_v63, -inf }
 0x7e6   :  { %8454 = vmax.xlane.f32.xlu0 %v8453_v6  ;;  %v8450_v32 = vsel %vm1861_vm7, %v22847_v19, -inf }
 0x7e7   :  { %8451 = vmax.xlane.f32.xlu1 %v8450_v32 }
 0x7e9   :  { %v22859_v45 = vpop.eup %19976 }
 0x7ea   :  { %8556 = vadd.xlane.f32.xlu0 %v8555_v36  ;;  %v8567_v38 = vsel %vm1865_vm6, %v22859_v45, 0.0 }
 0x7eb   :  { %8553 = vadd.xlane.f32.xlu1 %v8552_v44 }
 0x7ed   :  { %v22865_v61 = vpop.eup %19978 }
 0x7ee   :  { %8568 = vadd.xlane.f32.xlu0 %v8567_v38  ;;  %v8564_v59 = vsel %vm1861_vm7, %v22865_v61, 0.0 }
 0x7f2   :  { %8565 = vadd.xlane.f32.xlu0 %v8564_v59 }
 0x800   :  { %v8389_v11 = vpop.xlane.xlu0 %8388 }
 0x801   :  { %v8465_v52 = vsub.f32 %v22681_v16, %v8389_v11 }
 0x803   :  { %v8506_v6 = vmul.f32 1.442695, %v8465_v52 }
 0x804   :  { %v8386_v32 = vpop.xlane.xlu0 %8385 }
 0x805   :  { %19980 = vpow2.f32 %v8506_v6  ;;  %v8464_v36 = vsub.f32 %v22683_v14, %v8386_v32 }
 0x807   :  { %v8504_v39 = vmul.f32 1.442695, %v8464_v36 }
 0x809   :  { %19982 = vpow2.f32 %v8504_v39 }
 0x80f   :  { %v22871_v44 = vpop.eup %19980 }
 0x810   :  { %v8579_v35 = vsel %vm1865_vm6, %v22871_v44, 0.0 }
 0x811   :  { %8580 = vadd.xlane.f32.xlu0 %v8579_v35 }
 0x813   :  { %v22875_v38 = vpop.eup %19982 }
 0x814   :  { %v8576_v59 = vsel %vm1861_vm7, %v22875_v38, 0.0 }
 0x815   :  { %8577 = vadd.xlane.f32.xlu0 %v8576_v59 }
 0x82e   :  { %v8401_v16 = vpop.xlane.xlu0 %8400 }
 0x82f   :  { %v8469_v11 = vsub.f32 %v22709_v2, %v8401_v16 }
 0x831   :  { %v8514_v52 = vmul.f32 1.442695, %v8469_v11 }
 0x833   :  { %19984 = vpow2.f32 %v8514_v52 }
 0x83b   :  { %v8371_v14 = vpop.xlane.xlu1 %8370 }
 0x83c   :  { %v8459_v39 = vsub.f32 %v22725_v53, %v8371_v14  ;;  %v8368_v6 = vpop.xlane.xlu0 %8367 }
 0x83d   :  { %v22881_v32 = vpop.eup %19984  ;;  %v8458_v36 = vsub.f32 %v22727_v42, %v8368_v6 }
 0x83e   :  { %v8494_v35 = vmul.f32 1.442695, %v8459_v39  ;;  %v8591_v49 = vsel %vm1865_vm6, %v22881_v32, 0.0 }
 0x83f   :  { %v8492_v24 = vmul.f32 1.442695, %v8458_v36  ;;  %8592 = vadd.xlane.f32.xlu0 %v8591_v49 }
 0x840   :  { %19986 = vpow2.f32 %v8494_v35  ;;  %v8398_v59 = vpop.xlane.xlu0 %8397 }
 0x841   :  { %v8468_v2 = vsub.f32 %v22731_v34, %v8398_v59  ;;  %19988 = vpow2.f32 %v8492_v24 }
 0x843   :  { %v8512_v16 = vmul.f32 1.442695, %v8468_v2  ;;  %v8383_v11 = vpop.xlane.xlu1 %8382 }
 0x844   :  { %v8463_v53 = vsub.f32 %v22743_v46, %v8383_v11  ;;  %v8413_v52 = vpop.xlane.xlu0 %8412 }
 0x845   :  { %19990 = vpow2.f32 %v8512_v16  ;;  %v8473_v14 = vsub.f32 %v22739_v48, %v8413_v52 }
 0x846   :  { %v8502_v42 = vmul.f32 1.442695, %v8463_v53 }
 0x847   :  { %v8522_v39 = vmul.f32 1.442695, %v8473_v14  ;;  %v8380_v6 = vpop.xlane.xlu1 %8379 }
 0x848   :  { %19992 = vpow2.f32 %v8502_v42  ;;  %v8462_v36 = vsub.f32 %v22747_v37, %v8380_v6  ;;  %v8410_v49 = vpop.xlane.xlu0 %8409 }
 0x849   :  { %19994 = vpow2.f32 %v8522_v39  ;;  %v8472_v35 = vsub.f32 %v22753_v47, %v8410_v49 }
 0x84a   :  { %v22891_v34 = vpop.eup %19986  ;;  %v8500_v24 = vmul.f32 1.442695, %v8462_v36 }
 0x84b   :  { %v8520_v59 = vmul.f32 1.442695, %v8472_v35  ;;  %v8395_v2 = vpop.xlane.xlu1 %8394  ;;  %v8561_v46 = vsel %vm1865_vm6, %v22891_v34, 0.0  ;;  %v22895_v16 = vpop.eup %19988 }
 0x84c   :  { %19996 = vpow2.f32 %v8500_v24  ;;  %v8467_v48 = vsub.f32 %v22765_v40, %v8395_v2  ;;  %v8425_v11 = vpop.xlane.xlu0 %8424  ;;  %8562 = vadd.xlane.f32.xlu1 %v8561_v46  ;;  %v8558_v42 = vsel %vm1861_vm7, %v22895_v16, 0.0 }
 0x84d   :  { %19998 = vpow2.f32 %v8520_v59  ;;  %v8477_v37 = vsub.f32 %v22759_v51, %v8425_v11 }
 0x84e   :  { %v8510_v53 = vmul.f32 1.442695, %v8467_v48 }
 0x84f   :  { %v22899_v47 = vpop.eup %19990  ;;  %v8530_v52 = vmul.f32 1.442695, %v8477_v37  ;;  %v8392_v14 = vpop.xlane.xlu1 %8391 }
 0x850   :  { %20000 = vpow2.f32 %v8510_v53  ;;  %v8466_v39 = vsub.f32 %v22769_v28, %v8392_v14  ;;  %v8422_v6 = vpop.xlane.xlu0 %8421  ;;  %8559 = vadd.xlane.f32.xlu1 %v8558_v42  ;;  %v8588_v40 = vsel %vm1861_vm7, %v22899_v47, 0.0 }
 0x851   :  { %20002 = vpow2.f32 %v8530_v52  ;;  %v8476_v36 = vsub.f32 %v22773_v56, %v8422_v6  ;;  %8589 = vadd.xlane.f32.xlu0 %v8588_v40 }
 0x852   :  { %v22907_v51 = vpop.eup %19992  ;;  %v8508_v49 = vmul.f32 1.442695, %v8466_v39 }
 0x853   :  { %v22909_v35 = vpop.eup %19994  ;;  %v8528_v24 = vmul.f32 1.442695, %v8476_v36  ;;  %v8407_v59 = vpop.xlane.xlu1 %8406  ;;  %v8573_v2 = vsel %vm1865_vm6, %v22907_v51, 0.0 }
 0x854   :  { %20004 = vpow2.f32 %v8508_v49  ;;  %v8471_v28 = vsub.f32 %v22787_v22, %v8407_v59  ;;  %v8437_v46 = vpop.xlane.xlu0 %8436  ;;  %8574 = vadd.xlane.f32.xlu1 %v8573_v2  ;;  %v8603_v48 = vsel %vm1865_vm6, %v22909_v35, 0.0 }
 0x855   :  { %20006 = vpow2.f32 %v8528_v24  ;;  %v8481_v56 = vsub.f32 %v22783_v62, %v8437_v46  ;;  %8604 = vadd.xlane.f32.xlu0 %v8603_v48 }
 0x856   :  { %v22917_v11 = vpop.eup %19996  ;;  %v8518_v37 = vmul.f32 1.442695, %v8471_v28 }
 0x857   :  { %v22919_v53 = vpop.eup %19998  ;;  %v8538_v52 = vmul.f32 1.442695, %v8481_v56  ;;  %v8404_v14 = vpop.xlane.xlu1 %8403  ;;  %v8570_v42 = vsel %vm1861_vm7, %v22917_v11, 0.0 }
 0x858   :  { %20008 = vpow2.f32 %v8518_v37  ;;  %v8470_v22 = vsub.f32 %v22789_v17, %v8404_v14  ;;  %v8434_v39 = vpop.xlane.xlu0 %8433  ;;  %8571 = vadd.xlane.f32.xlu1 %v8570_v42  ;;  %v8600_v6 = vsel %vm1861_vm7, %v22919_v53, 0.0 }
 0x859   :  { %20010 = vpow2.f32 %v8538_v52  ;;  %v8480_v62 = vsub.f32 %v22793_v43, %v8434_v39  ;;  %8601 = vadd.xlane.f32.xlu0 %v8600_v6 }
 0x85a   :  { %v22927_v40 = vpop.eup %20000  ;;  %v8516_v36 = vmul.f32 1.442695, %v8470_v22 }
 0x85b   :  { %v22929_v49 = vpop.eup %20002  ;;  %v8536_v24 = vmul.f32 1.442695, %v8480_v62  ;;  %v8419_v59 = vpop.xlane.xlu1 %8418  ;;  %v8585_v2 = vsel %vm1865_vm6, %v22927_v40, 0.0 }
 0x85c   :  { %20012 = vpow2.f32 %v8516_v36  ;;  %v8475_v17 = vsub.f32 %v22805_v12, %v8419_v59  ;;  %8586 = vadd.xlane.f32.xlu1 %v8585_v2  ;;  %v8615_v28 = vsel %vm1865_vm6, %v22929_v49, 0.0 }
 0x85d   :  { %20014 = vpow2.f32 %v8536_v24  ;;  %8616 = vadd.xlane.f32.xlu0 %v8615_v28  ;;  %v8449_v43 = vpop.xlane.xlu0 %8448 }
 0x85e   :  { %v22936_v46 = vpop.eup %20004  ;;  %v8526_v48 = vmul.f32 1.442695, %v8475_v17  ;;  %v8485_v56 = vsub.f32 %v22811_v13, %v8449_v43 }
 0x85f   :  { %v22939_v37 = vpop.eup %20006  ;;  %v8416_v52 = vpop.xlane.xlu1 %8415  ;;  %v8582_v14 = vsel %vm1861_vm7, %v22936_v46, 0.0 }
 0x860   :  { %20016 = vpow2.f32 %v8526_v48  ;;  %v8546_v12 = vmul.f32 1.442695, %v8485_v56  ;;  %v8474_v42 = vsub.f32 %v22809_v58, %v8416_v52  ;;  %8583 = vadd.xlane.f32.xlu1 %v8582_v14  ;;  %v8612_v22 = vsel %vm1861_vm7, %v22939_v37, 0.0 }
 0x861   :  { %8613 = vadd.xlane.f32.xlu0 %v8612_v22 }
 0x862   :  { %v22946_v39 = vpop.eup %20008  ;;  %20018 = vpow2.f32 %v8546_v12  ;;  %v8524_v6 = vmul.f32 1.442695, %v8474_v42 }
 0x863   :  { %v22948_v13 = vpop.eup %20010  ;;  %v8446_v62 = vpop.xlane.xlu1 %8445  ;;  %v8597_v36 = vsel %vm1865_vm6, %v22946_v39, 0.0 }
 0x864   :  { %20020 = vpow2.f32 %v8524_v6  ;;  %v8484_v24 = vsub.f32 %v22819_v26, %v8446_v62  ;;  %8598 = vadd.xlane.f32.xlu1 %v8597_v36  ;;  %v8627_v58 = vsel %vm1865_vm6, %v22948_v13, 0.0 }
 0x865   :  { %8628 = vadd.xlane.f32.xlu0 %v8627_v58 }
 0x866   :  { %v22955_v59 = vpop.eup %20012  ;;  %v8544_v2 = vmul.f32 1.442695, %v8484_v24 }
 0x867   :  { %v22957_v17 = vpop.eup %20014  ;;  %v8431_v28 = vpop.xlane.xlu1 %8430  ;;  %v8594_v43 = vsel %vm1861_vm7, %v22955_v59, 0.0 }
 0x868   :  { %20022 = vpow2.f32 %v8544_v2  ;;  %v8479_v48 = vsub.f32 %v22825_v29, %v8431_v28  ;;  %8595 = vadd.xlane.f32.xlu1 %v8594_v43  ;;  %v8624_v26 = vsel %vm1861_vm7, %v22957_v17, 0.0 }
 0x869   :  { %8625 = vadd.xlane.f32.xlu0 %v8624_v26 }
 0x86a   :  { %v22964_v56 = vpop.eup %20016  ;;  %v8534_v52 = vmul.f32 1.442695, %v8479_v48 }
 0x86b   :  { %v8428_v14 = vpop.xlane.xlu1 %8427  ;;  %v8443_v12 = vpop.xlane.xlu0 %8442  ;;  %v8609_v42 = vsel %vm1865_vm6, %v22964_v56, 0.0 }
 0x86c   :  { %v22968_v22 = vpop.eup %20018  ;;  %20024 = vpow2.f32 %v8534_v52  ;;  %v8478_v6 = vsub.f32 %v22829_v15, %v8428_v14  ;;  %v8483_v29 = vsub.f32 %v22834_v30, %v8443_v12  ;;  %8610 = vadd.xlane.f32.xlu1 %v8609_v42 }
 0x86d   :  { %v8639_v62 = vsel %vm1865_vm6, %v22968_v22, 0.0 }
 0x86e   :  { %v22974_v36 = vpop.eup %20020  ;;  %v8532_v24 = vmul.f32 1.442695, %v8478_v6  ;;  %v8542_v58 = vmul.f32 1.442695, %v8483_v29  ;;  %8640 = vadd.xlane.f32.xlu0 %v8639_v62 }
 0x86f   :  { %v8440_v2 = vpop.xlane.xlu1 %8439  ;;  %v8606_v28 = vsel %vm1861_vm7, %v22974_v36, 0.0 }
 0x870   :  { %20026 = vpow2.f32 %v8532_v24  ;;  %8607 = vadd.xlane.f32.xlu1 %v8606_v28 }
 0x871   :  { %20028 = vpow2.f32 %v8542_v58 }
 0x872   :  { %v22978_v43 = vpop.eup %20022 }
 0x873   :  { %v8455_v15 = vpop.xlane.xlu0 %8454  ;;  %v8636_v30 = vsel %vm1861_vm7, %v22978_v43, 0.0 }
 0x874   :  { %8637 = vadd.xlane.f32.xlu1 %v8636_v30  ;;  %v22982_v48 = vpop.xlane.xlu1 %8451 }
 0x876   :  { %v22984_v26 = vpop.eup %20024 }
 0x877   :  { %25851 = vst [vmem:[#allocation116_spill] sm:$0xff] %v22984_v26  ;;  %v8557_v52 = vpop.xlane.xlu0 %8556  ;;  %v8621_v14 = vsel %vm1865_vm6, %v22984_v26, 0.0 }
 0x878   :  { %8622 = vadd.xlane.f32.xlu0 %v8621_v14  ;;  %v8554_v12 = vpop.xlane.xlu1 %8553  ;;  %20030 = vrcp.f32 %v8557_v52  ;;  %v19474_v14 = vunpack.i.h.bf16 %v22697_v21  ;;  %v19473_v52 = vunpack.i.l.bf16 %v22697_v21 }
 0x879   :  { %20032 = vrcp.f32 %v8554_v12 }
 0x87a   :  { %v22988_v42 = vpop.eup %20026  ;;  %v18757_v26 = vpack.c.bf16 %v19474_v14, %v19473_v52  ;;  %v19493_v14 = vunpack.i.l.bf16 %v22691_v55 }
 0x87b   :  { %v8569_v6 = vpop.xlane.xlu0 %8568  ;;  %v8618_v29 = vsel %vm1861_vm7, %v22988_v42, 0.0  ;;  %v22992_v62 = vpop.eup %20028 }
 0x87c   :  { %25852 = vst [vmem:[#allocation117_spill] sm:$0xff] %v22992_v62  ;;  %8619 = vadd.xlane.f32.xlu0 %v8618_v29  ;;  %20034 = vrcp.f32 %v8569_v6  ;;  %v8633_v58 = vsel %vm1865_vm6, %v22992_v62, 0.0  ;;  %v19483_v62 = vunpack.i.l.bf16 %v22705_v23 }
 0x87f   :  { %v8566_v24 = vpop.xlane.xlu0 %8565 }
 0x880   :  { %20036 = vrcp.f32 %v8566_v24  ;;  %8634 = vadd.xlane.f32.xlu0 %v8633_v58  ;;  %v19484_v58 = vunpack.i.h.bf16 %v22705_v23 }
 0x882   :  { %v20031_v28 = vpop.eup %20030 }
 0x883   :  { %v20033_v30 = vpop.eup %20032  ;;  %v8681_v29 = vmul.f32 %v20031_v28, %v22851_v9  ;;  %v18769_v9 = vpack.c.bf16 %v19484_v58, %v19483_v62 }
 0x884   :  { %v8680_v12 = vmul.f32 %v20033_v30, %v22855_v27  ;;  %v19494_v30 = vunpack.i.h.bf16 %v22691_v55 }
 0x885   :  { %10484 = vrot.lane.b32.xlu1 %v20650_v50, %s20414_s27 }
 0x886   :  { %17829 = vmatprep.mubr.msk.f32.mxu0 %vm1861_vm7, %v8680_v12  ;;  %v20035_v6 = vpop.eup %20034  ;;  %v23034_v12 = vpack.c.bf16 %v19494_v30, %v19493_v14  ;;  %v25854_v14 = vld [vmem:[#allocation93_spill] sm:$0xff] }
 0x887   :  { %17830 = vmatmul.mubr.msk.f32.vlgmr.msra.gmra.mrb[98].mxu0 %vm1861_vm7, %v8681_v29  ;;  %v8685_v21 = vmul.f32 %v20035_v6, %v22859_v45  ;;  %v8487_v45 = vsub.f32 %v22845_v63, %v8455_v15 }
 0x888   :  { %18750 = vmatpush3.bf16.msk.msra.mxu0 %vm20941_vm5, %v22594_v25  ;;  %v8482_v25 = vsub.f32 %v22838_v31, %v8440_v2 }
 0x889   :  { %18759 = vmatprep.subr.msk.bf16.mxu0 %vm20941_vm5, %v18757_v26  ;;  %v8550_v62 = vmul.f32 1.442695, %v8487_v45  ;;  %v19504_v45 = vunpack.i.h.bf16 %v22713_v57 }
 0x88a   :  { %v20037_v24 = vpop.eup %20036  ;;  %v8540_v23 = vmul.f32 1.442695, %v8482_v25  ;;  %v19479_v25 = vunpack.i.h.bf16 %v22701_v10 }
 0x88b   :  { %v8684_v50 = vmul.f32 %v20037_v24, %v22865_v61 }
 0x88c   :  { %20038 = vpow2.f32 %v8540_v23  ;;  %v19478_v23 = vunpack.i.l.bf16 %v22701_v10 }
 0x88d   :  { %17843 = vmatprep.mubr.msk.f32.mxu0 %vm1861_vm7, %v8684_v50 }
 0x88e   :  { %17844 = vmatmul.mubr.msk.f32.vlgmr.msra.gmra.mrb[100].mxu0 %vm1861_vm7, %v8685_v21  ;;  %v18763_v10 = vpack.c.bf16 %v19479_v25, %v19478_v23  ;;  %v25860_v23 = vld [vmem:[#allocation94_spill] sm:$0xff] }
 0x88f   :  { %18762 = vmatpush3.bf16.msk.msra.mxu0 %vm20941_vm5, %v18757_v26 }
 0x890   :  { %18771 = vmatprep.subr.msk.bf16.mxu0 %vm20941_vm5, %v18769_v9 }
 0x896   :  { %19561 = vrot.lane.b32.xlu0 %v20683_v0, %s20413_s26  ;;  %v23023_v28 = vpop.eup %20038 }
 0x897   :  { %v8630_v26 = vsel %vm1861_vm7, %v23023_v28, 0.0 }
 0x89e   :  { %v8581_v27 = vpop.xlane.xlu0 %8580 }
 0x89f   :  { %20040 = vrcp.f32 %v8581_v27 }
 0x8a2   :  { %v8578_v61 = vpop.xlane.xlu0 %8577 }
 0x8a3   :  { %20042 = vrcp.f32 %v8578_v61 }
 0x8a4   :  { %20044 = vpow2.f32 %v8550_v62 }
 0x8a9   :  { %8631 = vadd.xlane.f32.xlu1 %v8630_v26  ;;  %v20041_v31 = vpop.eup %20040 }
 0x8aa   :  { %v8689_v63 = vmul.f32 %v20041_v31, %v22871_v44  ;;  %v8486_v44 = vsub.f32 %v22847_v19, %v22982_v48 }
 0x8ad   :  { %v20043_v2 = vpop.eup %20042 }
 0x8ae   :  { %v8688_v52 = vmul.f32 %v20043_v2, %v22875_v38  ;;  %v23032_v15 = vpop.eup %20044  ;;  %v8548_v38 = vmul.f32 1.442695, %v8486_v44 }
 0x8af   :  { %v8645_v55 = vsel %vm1865_vm6, %v23032_v15, 0.0 }
 0x8b0   :  { %17857 = vmatprep.mubr.msk.f32.mxu0 %vm1861_vm7, %v8688_v52  ;;  %20046 = vpow2.f32 %v8548_v38  ;;  %v19489_v52 = vunpack.i.h.bf16 %v25854_v14 }
 0x8b1   :  { %17858 = vmatmul.mubr.msk.f32.vlgmr.msra.gmra.mrb[102].mxu0 %vm1861_vm7, %v8689_v63  ;;  %v19488_v63 = vunpack.i.l.bf16 %v25854_v14 }
 0x8b2   :  { %18774 = vmatpush3.bf16.msk.msra.mxu0 %vm20941_vm5, %v18769_v9 }
 0x8b3   :  { %18783 = vmatprep.subr.msk.bf16.mxu0 %vm20941_vm5, %v23034_v12 }
 0x8b5   :  { %8646 = vadd.xlane.f32.xlu0 %v8645_v55  ;;  %v25855_v55 = vld [vmem:[#allocation14_spill] sm:$0xff] }
 0x8ba   :  { %19566 = vrot.lane.b32.xlu1 %v20697_v7, %s20413_s26  ;;  %v23056_v24 = vpop.eup %20046 }
 0x8cb   :  { %10486 = vrot.lane.b32.xlu0 %v20634_v41, %s20414_s27 }
 0x8cc   :  { %v8593_v29 = vpop.xlane.xlu0 %8592 }
 0x8cd   :  { %20048 = vrcp.f32 %v8593_v29  ;;  %v25856_v29 = vld [vmem:[#allocation96_spill] sm:$0xff] }
 0x8cf   :  { %10575 = vrot.lane.b32.xlu0 %v20657_v54, %s20414_s27  ;;  %v8642_v54 = vsel %vm1861_vm7, %v23056_v24, 0.0 }
 0x8d3   :  { %19571 = vrot.lane.b32.xlu0 %v20713_v20, %s20413_s26 }
 0x8d7   :  { %10668 = vrot.lane.b32.xlu0 %v20667_v60, %s20414_s27  ;;  %v20049_v58 = vpop.eup %20048 }
 0x8d9   :  { %v8563_v6 = vpop.xlane.xlu1 %8562 }
 0x8da   :  { %20050 = vrcp.f32 %v8563_v6  ;;  %v19514_v6 = vunpack.i.h.bf16 %v25856_v29 }
 0x8db   :  { %10757 = vrot.lane.b32.xlu0 %v20693_v5, %s20414_s27 }
 0x8dd   :  { %v8560_v41 = vpop.xlane.xlu1 %8559 }
 0x8de   :  { %20052 = vrcp.f32 %v8560_v41  ;;  %v8590_v19 = vpop.xlane.xlu0 %8589  ;;  %8643 = vadd.xlane.f32.xlu1 %v8642_v54  ;;  %v19513_v41 = vunpack.i.l.bf16 %v25856_v29 }
 0x8df   :  { %20054 = vrcp.f32 %v8590_v19  ;;  %19581 = vrot.lane.b32.xlu0 %v20733_v33, %s20413_s26 }
 0x8e1   :  { %v8575_v60 = vpop.xlane.xlu1 %8574 }
 0x8e2   :  { %v8605_v48 = vpop.xlane.xlu0 %8604  ;;  %20056 = vrcp.f32 %v8575_v60 }
 0x8e3   :  { %10850 = vrot.lane.b32.xlu0 %v20688_v3, %s20414_s27  ;;  %20058 = vrcp.f32 %v8605_v48  ;;  %v19503_v3 = vunpack.i.l.bf16 %v22713_v57  ;;  %v25857_v48 = vld [vmem:[#allocation26_spill] sm:$0xff] }
 0x8e4   :  { %v20051_v21 = vpop.eup %20050 }
 0x8e5   :  { %v8572_v5 = vpop.xlane.xlu1 %8571  ;;  %v8683_v31 = vmul.f32 %v20051_v21, %v22891_v34  ;;  %v18793_v57 = vpack.c.bf16 %v19504_v45, %v19503_v3  ;;  %v19498_v45 = vunpack.i.l.bf16 %v25860_v23  ;;  %v25861_v3 = vld [vmem:[#allocation23_spill] sm:$0xff] }
 0x8e6   :  { %20060 = vrcp.f32 %v8572_v5  ;;  %v8602_v50 = vpop.xlane.xlu0 %8601  ;;  %v18775_v5 = vpack.c.bf16 %v19489_v52, %v19488_v63  ;;  %v25866_v52 = vld [vmem:[#allocation95_spill] sm:$0xff] }
 0x8e7   :  { %20062 = vrcp.f32 %v8602_v50  ;;  %10939 = vrot.lane.b32.xlu0 %v20709_v18, %s20414_s27  ;;  %v8693_v18 = vmul.f32 %v20049_v58, %v22881_v32  ;;  %v25858_v58 = vld [vmem:[#allocation16_spill] sm:$0xff]  ;;  %v18805_v50 = vpack.c.bf16 %v19514_v6, %v19513_v41  ;;  %v19509_v63 = vunpack.i.h.bf16 %v25866_v52 }
 0x8e8   :  { %v20053_v9 = vpop.eup %20052 }
 0x8e9   :  { %v20055_v27 = vpop.eup %20054  ;;  %v8587_v61 = vpop.xlane.xlu1 %8586  ;;  %v8682_v62 = vmul.f32 %v20053_v9, %v22895_v16 }
 0x8ea   :  { %v8617_v26 = vpop.xlane.xlu0 %8616  ;;  %v8692_v2 = vmul.f32 %v20055_v27, %v22899_v47  ;;  %20064 = vrcp.f32 %v8587_v61  ;;  %v19499_v27 = vunpack.i.h.bf16 %v25860_v23 }
 0x8eb   :  { %19591 = vrot.lane.b32.xlu0 %v20763_v4, %s20413_s26  ;;  %17836 = vmatprep.mubr.msk.f32.mxu1 %vm1861_vm7, %v8682_v62  ;;  %20066 = vrcp.f32 %v8617_v26 }
 0x8ec   :  { %17837 = vmatmul.mubr.msk.f32.vlgmr.msra.gmra.mrb[86].mxu1 %vm1861_vm7, %v8683_v31  ;;  %17871 = vmatprep.mubr.msk.f32.mxu0 %vm1861_vm7, %v8692_v2  ;;  %v20057_v16 = vpop.eup %20056  ;;  %v25862_v31 = vld [vmem:[#allocation98_spill] sm:$0xff] }
 0x8ed   :  { %18756 = vmatpush3.bf16.msk.msra.mxu1 %vm20941_vm5, %v22609_v1  ;;  %17872 = vmatmul.mubr.msk.f32.vlgmr.msra.gmra.mrb[104].mxu0 %vm1861_vm7, %v8693_v18  ;;  %v8584_v34 = vpop.xlane.xlu1 %8583  ;;  %v20059_v47 = vpop.eup %20058  ;;  %v25853_v1 = vld [vmem:[#allocation22_spill] sm:$0xff]  ;;  %v8687_v19 = vmul.f32 %v20057_v16, %v22907_v51  ;;  %v19524_v2 = vunpack.i.h.bf16 %v25862_v31  ;;  %v19523_v18 = vunpack.i.l.bf16 %v25862_v31  ;;  %v18787_v16 = vpack.c.bf16 %v19499_v27, %v19498_v45  ;;  %v25876_v31 = vld [vmem:[#allocation105_spill] sm:$0xff] }
 0x8ee   :  { %18765 = vmatprep.subr.msk.bf16.mxu1 %vm20941_vm5, %v18763_v10  ;;  %18786 = vmatpush3.bf16.msk.msra.mxu0 %vm20941_vm5, %v23034_v12  ;;  %20068 = vrcp.f32 %v8584_v34  ;;  %v8614_v32 = vpop.xlane.xlu0 %8613  ;;  %v25863_v34 = vld [vmem:[#allocation25_spill] sm:$0xff] }
 0x8ef   :  { %20070 = vrcp.f32 %v8614_v32  ;;  %18795 = vmatprep.subr.msk.bf16.mxu0 %vm20941_vm5, %v18793_v57  ;;  %11032 = vrot.lane.b32.xlu0 %v25853_v1, %s20414_s27  ;;  %v25864_v32 = vld [vmem:[#allocation18_spill] sm:$0xff] }
 0x8f0   :  { %v20061_v30 = vpop.eup %20060  ;;  %10577 = vrot.lane.b32.xlu1 %v25855_v55, %s20414_s27  ;;  %v19508_v55 = vunpack.i.l.bf16 %v25866_v52 }
 0x8f1   :  { %v20063_v44 = vpop.eup %20062  ;;  %v8599_v12 = vpop.xlane.xlu1 %8598  ;;  %v8686_v38 = vmul.f32 %v20061_v30, %v22917_v11  ;;  %v8697_v11 = vmul.f32 %v20059_v47, %v22909_v35  ;;  %v25859_v35 = vld [vmem:[#allocation35_spill] sm:$0xff]  ;;  %v18817_v47 = vpack.c.bf16 %v19524_v2, %v19523_v18  ;;  %v19544_v2 = vunpack.i.h.bf16 %v25876_v31 }
 0x8f2   :  { %v8629_v54 = vpop.xlane.xlu0 %8628  ;;  %v8696_v60 = vmul.f32 %v20063_v44, %v22919_v53  ;;  %20072 = vrcp.f32 %v8599_v12  ;;  %v25867_v44 = vld [vmem:[#allocation19_spill] sm:$0xff]  ;;  %v19543_v18 = vunpack.i.l.bf16 %v25876_v31 }
 0x8f3   :  { %11121 = vrot.lane.b32.xlu0 %v25857_v48, %s20414_s27  ;;  %17850 = vmatprep.mubr.msk.f32.mxu1 %vm1861_vm7, %v8686_v38  ;;  %20074 = vrcp.f32 %v8629_v54  ;;  %v25868_v38 = vld [vmem:[#allocation102_spill] sm:$0xff]  ;;  %v25869_v48 = vld [vmem:[#allocation31_spill] sm:$0xff] }
 0x8f4   :  { %10666 = vrot.lane.b32.xlu1 %v25858_v58, %s20414_s27  ;;  %17851 = vmatmul.mubr.msk.f32.vlgmr.msra.gmra.mrb[88].mxu1 %vm1861_vm7, %v8687_v19  ;;  %v20065_v53 = vpop.eup %20064  ;;  %v19534_v29 = vunpack.i.h.bf16 %v25868_v38  ;;  %v19533_v54 = vunpack.i.l.bf16 %v25868_v38  ;;  %v25870_v58 = vld [vmem:[#allocation27_spill] sm:$0xff]  ;;  %v25886_v38 = vld [vmem:[#allocation28_spill] sm:$0xff] }
 0x8f5   :  { %18768 = vmatpush3.bf16.msk.msra.mxu1 %vm20941_vm5, %v18763_v10  ;;  %17885 = vmatprep.mubr.msk.f32.mxu0 %vm1861_vm7, %v8696_v60  ;;  %v8596_v51 = vpop.xlane.xlu1 %8595  ;;  %v20067_v9 = vpop.eup %20066  ;;  %v8691_v10 = vmul.f32 %v20065_v53, %v22927_v40  ;;  %v25872_v53 = vld [vmem:[#allocation97_spill] sm:$0xff] }
 0x8f6   :  { %18777 = vmatprep.subr.msk.bf16.mxu1 %vm20941_vm5, %v18775_v5  ;;  %17886 = vmatmul.mubr.msk.f32.vlgmr.msra.gmra.mrb[106].mxu0 %vm1861_vm7, %v8697_v11  ;;  %20076 = vrcp.f32 %v8596_v51  ;;  %v8626_v21 = vpop.xlane.xlu0 %8625  ;;  %v25871_v51 = vld [vmem:[#allocation36_spill] sm:$0xff] }
 0x8f7   :  { %18798 = vmatpush3.bf16.msk.msra.mxu0 %vm20941_vm5, %v18793_v57  ;;  %20078 = vrcp.f32 %v8626_v21  ;;  %19601 = vrot.lane.b32.xlu0 %v25859_v35, %s20413_s26  ;;  %v19518_v21 = vunpack.i.l.bf16 %v25872_v53 }
 0x8f8   :  { %v20069_v25 = vpop.eup %20068  ;;  %18807 = vmatprep.subr.msk.bf16.mxu0 %vm20941_vm5, %v18805_v50  ;;  %19576 = vrot.lane.b32.xlu1 %v25861_v3, %s20413_s26 }
 0x8f9   :  { %v20071_v61 = vpop.eup %20070  ;;  %v8611_v62 = vpop.xlane.xlu1 %8610  ;;  %v8690_v26 = vmul.f32 %v20069_v25, %v22936_v46  ;;  %v8701_v46 = vmul.f32 %v20067_v9, %v22929_v49  ;;  %v25865_v49 = vld [vmem:[#allocation30_spill] sm:$0xff]  ;;  %v25874_v25 = vld [vmem:[#allocation20_spill] sm:$0xff] }
 0x8fa   :  { %v8700_v57 = vmul.f32 %v20071_v61, %v22939_v37  ;;  %20080 = vrcp.f32 %v8611_v62  ;;  %v25875_v62 = vld [vmem:[#allocation11_spill] sm:$0xff] }
 0x8fb   :  { %11214 = vrot.lane.b32.xlu0 %v25863_v34, %s20414_s27  ;;  %17864 = vmatprep.mubr.msk.f32.mxu1 %vm1861_vm7, %v8690_v26  ;;  %v8641_v1 = vpop.xlane.xlu0 %8640  ;;  %v25878_v34 = vld [vmem:[#allocation10_spill] sm:$0xff] }
 0x8fc   :  { %10759 = vrot.lane.b32.xlu1 %v25864_v32, %s20414_s27  ;;  %17865 = vmatmul.mubr.msk.f32.vlgmr.msra.gmra.mrb[90].mxu1 %vm1861_vm7, %v8691_v10  ;;  %v20073_v37 = vpop.eup %20072  ;;  %v25879_v32 = vld [vmem:[#allocation33_spill] sm:$0xff] }
 0x8fd   :  { %18780 = vmatpush3.bf16.msk.msra.mxu1 %vm20941_vm5, %v18775_v5  ;;  %17899 = vmatprep.mubr.msk.f32.mxu0 %vm1861_vm7, %v8700_v57  ;;  %v8608_v40 = vpop.xlane.xlu1 %8607  ;;  %v20075_v30 = vpop.eup %20074  ;;  %v8695_v19 = vmul.f32 %v20073_v37, %v22946_v39  ;;  %v18799_v5 = vpack.c.bf16 %v19509_v63, %v19508_v55  ;;  %v25877_v57 = vld [vmem:[#allocation21_spill] sm:$0xff] }
 0x8fe   :  { %18789 = vmatprep.subr.msk.bf16.mxu1 %vm20941_vm5, %v18787_v16  ;;  %17900 = vmatmul.mubr.msk.f32.vlgmr.msra.gmra.mrb[108].mxu0 %vm1861_vm7, %v8701_v46  ;;  %20082 = vrcp.f32 %v8608_v40  ;;  %v25881_v40 = vld [vmem:[#allocation15_spill] sm:$0xff] }
 0x8ff   :  { %18810 = vmatpush3.bf16.msk.msra.mxu0 %vm20941_vm5, %v18805_v50  ;;  %11303 = vrot.lane.b32.xlu0 %v25865_v49, %s20414_s27  ;;  %20084 = vrcp.f32 %v8641_v1  ;;  %v19519_v50 = vunpack.i.h.bf16 %v25872_v53  ;;  %v25896_v53 = vld [vmem:[#allocation17_spill] sm:$0xff] }
 0x900   :  { %v20077_v14 = vpop.eup %20076  ;;  %18819 = vmatprep.subr.msk.bf16.mxu0 %vm20941_vm5, %v18817_v47  ;;  %10848 = vrot.lane.b32.xlu1 %v25867_v44, %s20414_s27  ;;  %v25885_v44 = vld [vmem:[#allocation116_spill] sm:$0xff] }
 0x901   :  { %v20079_v12 = vpop.eup %20078  ;;  %v8638_v6 = vpop.xlane.xlu1 %8637  ;;  %v8694_v41 = vmul.f32 %v20077_v14, %v22955_v59  ;;  %v8705_v59 = vmul.f32 %v20075_v30, %v22948_v13  ;;  %v18811_v10 = vpack.c.bf16 %v19519_v50, %v19518_v21  ;;  %v25883_v30 = vld [vmem:[#allocation24_spill] sm:$0xff] }
 0x902   :  { %20086 = vrcp.f32 %v8638_v6  ;;  %v8704_v60 = vmul.f32 %v20079_v12, %v22957_v17  ;;  %v18829_v17 = vpack.c.bf16 %v19534_v29, %v19533_v54  ;;  %v25884_v14 = vld [vmem:[#allocation100_spill] sm:$0xff]  ;;  %v25887_v29 = vld [vmem:[#allocation107_spill] sm:$0xff] }
 0x903   :  { %11394 = vrot.lane.b32.xlu0 %v25869_v48, %s20414_s27  ;;  %17878 = vmatprep.mubr.msk.f32.mxu1 %vm1861_vm7, %v8694_v41  ;;  %v19529_v52 = vunpack.i.h.bf16 %v25884_v14  ;;  %v19528_v63 = vunpack.i.l.bf16 %v25884_v14 }
 0x904   :  { %19586 = vrot.lane.b32.xlu1 %v25870_v58, %s20413_s26  ;;  %17879 = vmatmul.mubr.msk.f32.vlgmr.msra.gmra.mrb[92].mxu1 %vm1861_vm7, %v8695_v19  ;;  %v20081_v11 = vpop.eup %20080 }
 0x905   :  { %18792 = vmatpush3.bf16.msk.msra.mxu1 %vm20941_vm5, %v18787_v16  ;;  %17913 = vmatprep.mubr.msk.f32.mxu0 %vm1861_vm7, %v8704_v60  ;;  %v8623_v39 = vpop.xlane.xlu0 %8622  ;;  %v8699_v45 = vmul.f32 %v20081_v11, %v22964_v56  ;;  %v18841_v16 = vpack.c.bf16 %v19544_v2, %v19543_v18  ;;  %v18823_v41 = vpack.c.bf16 %v19529_v52, %v19528_v63  ;;  %v25889_v60 = vld [vmem:[#allocation37_spill] sm:$0xff]  ;;  %v10485_v48 = vpop.permute.xlu1 %10484  ;;  %v25893_v11 = vld [vmem:[#allocation34_spill] sm:$0xff] }
 0x906   :  { %18801 = vmatprep.subr.msk.bf16.mxu1 %vm20941_vm5, %v18799_v5  ;;  %17914 = vmatmul.mubr.msk.f32.vlgmr.msra.gmra.mrb[110].mxu0 %vm1861_vm7, %v8705_v59  ;;  %20088 = vrcp.f32 %v8623_v39  ;;  %v25890_v59 = vld [vmem:[#allocation29_spill] sm:$0xff] }
 0x907   :  { %18822 = vmatpush3.bf16.msk.msra.mxu0 %vm20941_vm5, %v18817_v47  ;;  %11485 = vrot.lane.b32.xlu0 %v25871_v51, %s20414_s27  ;;  %v25882_v47 = vld [vmem:[#allocation111_spill] sm:$0xff]  ;;  %v25891_v39 = vld [vmem:[#allocation113_spill] sm:$0xff]  ;;  %v25894_v51 = vld [vmem:[#allocation6_spill] sm:$0xff] }
 0x908   :  { %v20083_v13 = vpop.eup %20082  ;;  %18831 = vmatprep.subr.msk.bf16.mxu0 %vm20859_vm2, %v18829_v17  ;;  %10941 = vrot.lane.b32.xlu1 %v25874_v25, %s20414_s27  ;;  %v19554_v1 = vunpack.i.h.bf16 %v25882_v47  ;;  %v19553_v49 = vunpack.i.l.bf16 %v25882_v47 }
 0x909   :  { %v8620_v23 = vpop.xlane.xlu0 %8619  ;;  %v8698_v27 = vmul.f32 %v20083_v13, %v22974_v36  ;;  %v20085_v61 = vpop.eup %20084  ;;  %v25895_v13 = vld [vmem:[#allocation13_spill] sm:$0xff] }
 0x90a   :  { %20090 = vrcp.f32 %v8620_v23  ;;  %v8709_v36 = vmul.f32 %v20085_v61, %v22968_v22  ;;  %v18853_v6 = vpack.c.bf16 %v19554_v1, %v19553_v49  ;;  %v25897_v23 = vld [vmem:[#allocation103_spill] sm:$0xff] }
 0x90b   :  { %19616 = vrot.lane.b32.xlu0 %v25875_v62, %s20415_s28  ;;  %17892 = vmatprep.mubr.msk.f32.mxu1 %vm1861_vm7, %v8698_v27  ;;  %v19539_v27 = vunpack.i.h.bf16 %v25897_v23 }
 0x90c   :  { %v20087_v26 = vpop.eup %20086  ;;  %11030 = vrot.lane.b32.xlu1 %v25877_v57, %s20414_s27  ;;  %17893 = vmatmul.mubr.msk.f32.vlgmr.msra.gmra.mrb[94].mxu1 %vm1861_vm7, %v8699_v45  ;;  %v19538_v45 = vunpack.i.l.bf16 %v25897_v23 }
 0x90d   :  { %18804 = vmatpush3.bf16.msk.msra.mxu1 %vm20941_vm5, %v18799_v5  ;;  %v8708_v56 = vmul.f32 %v20087_v26, %v22978_v43  ;;  %v25880_v43 = vld [vmem:[#allocation104_spill] sm:$0xff]  ;;  %v8635_v46 = vpop.xlane.xlu0 %8634  ;;  %v25898_v26 = vld [vmem:[#allocation117_spill] sm:$0xff] }
 0x90e   :  { %18813 = vmatprep.subr.msk.bf16.mxu1 %vm20941_vm5, %v18811_v10  ;;  %20092 = vrcp.f32 %v8635_v46  ;;  %v18835_v2 = vpack.c.bf16 %v19539_v27, %v19538_v45 }
 0x90f   :  { %19621 = vrot.lane.b32.xlu0 %v25878_v34, %s20415_s28  ;;  %17927 = vmatprep.mubr.msk.f32.mxu0 %vm1861_vm7, %v8708_v56 }
 0x910   :  { %19596 = vrot.lane.b32.xlu1 %v25879_v32, %s20413_s26  ;;  %17928 = vmatmul.mubr.msk.f32.vlgmr.msra.gmra.mrb[112].mxu0 %vm1861_vm7, %v8709_v36  ;;  %v20089_v22 = vpop.eup %20088 }
 0x911   :  { %18834 = vmatpush3.bf16.xpose.msk.msra.mxu0 %vm20859_vm2, %v18829_v17  ;;  %17941 = vmatprep.mubr.msk.f32.mxu0 %vm425_vm1, %v25880_v43  ;;  %v8703_v12 = vmul.f32 %v20089_v22, %v25885_v44  ;;  %v19562_v54 = vpop.permute.xlu0 %19561  ;;  %v25892_v17 = vld [vmem:[#allocation32_spill] sm:$0xff] }
 0x912   :  { %18843 = vmatprep.subr.msk.bf16.mxu0 %vm20859_vm2, %v18841_v16  ;;  %v19563_v19 = vunpack.i.l.bf16 %v19562_v54 }
 0x913   :  { %19631 = vrot.lane.b32.xlu0 %v25881_v40, %s20415_s28 }
 0x914   :  { %v20091_v37 = vpop.eup %20090  ;;  %11123 = vrot.lane.b32.xlu1 %v25883_v30, %s20414_s27 }
 0x915   :  { %v8702_v55 = vmul.f32 %v20091_v37, %v22988_v42  ;;  %v19564_v42 = vunpack.i.h.bf16 %v19562_v54 }
 0x917   :  { %19646 = vrot.lane.b32.xlu0 %v20697_v7, %s20415_s28  ;;  %17906 = vmatprep.mubr.msk.f32.mxu1 %vm1861_vm7, %v8702_v55  ;;  %v25888_v7 = vld [vmem:[#allocation110_spill] sm:$0xff]  ;;  %v18865_v5 = vpack.c.bf16 %v19564_v42, %v19563_v19 }
 0x918   :  { %11212 = vrot.lane.b32.xlu1 %v25886_v38, %s20414_s27  ;;  %17942 = vmatmul.mubr.msk.f32.vlgmr.msra.gmra.mrb[114].mxu0 %vm425_vm1, %v25887_v29  ;;  %v20093_v21 = vpop.eup %20092  ;;  %v25900_v38 = vld [vmem:[#allocation106_spill] sm:$0xff] }
 0x919   :  { %17907 = vmatmul.mubr.msk.f32.vlgmr.msra.gmra.mrb[96].mxu1 %vm1861_vm7, %v8703_v12  ;;  %18846 = vmatpush3.bf16.xpose.msk.msra.mxu0 %vm20859_vm2, %v18841_v16  ;;  %v8707_v31 = vmul.f32 %v20093_v21, %v25898_v26  ;;  %v19549_v29 = vunpack.i.h.bf16 %v25900_v38  ;;  %v25904_v21 = vld [vmem:[#allocation115_spill] sm:$0xff] }
 0x91a   :  { %18816 = vmatpush3.bf16.msk.msra.mxu1 %vm20941_vm5, %v18811_v10  ;;  %17955 = vmatprep.mubr.msk.f32.mxu0 %vm425_vm1, %v25888_v7 }
 0x91b   :  { %18825 = vmatprep.subr.msk.bf16.mxu1 %vm20941_vm5, %v18823_v41  ;;  %18855 = vmatprep.subr.msk.bf16.mxu0 %vm20859_vm2, %v18853_v6 }
 0x91c   :  { %19606 = vrot.lane.b32.xlu1 %v25889_v60, %s20413_s26 }
 0x920   :  { %11305 = vrot.lane.b32.xlu1 %v25890_v59, %s20414_s27  ;;  %17956 = vmatmul.mubr.msk.f32.vlgmr.msra.gmra.mrb[116].mxu0 %vm425_vm1, %v25891_v39  ;;  %v25902_v59 = vld [vmem:[#allocation112_spill] sm:$0xff] }
 0x921   :  { %18858 = vmatpush3.bf16.xpose.msk.msra.mxu0 %vm20859_vm2, %v18853_v6  ;;  %17969 = vmatprep.mubr.msk.f32.mxu0 %vm425_vm1, %v10485_v48  ;;  %v19548_v6 = vunpack.i.l.bf16 %v25900_v38  ;;  %v25901_v48 = vld [vmem:[#allocation109_spill] sm:$0xff] }
 0x922   :  { %18867 = vmatprep.subr.msk.bf16.mxu0 %vm20859_vm2, %v18865_v5 }
 0x923   :  { %v18847_v19 = vpack.c.bf16 %v19549_v29, %v19548_v6 }
 0x924   :  { %11396 = vrot.lane.b32.xlu1 %v25892_v17, %s20414_s27 }
 0x928   :  { %11487 = vrot.lane.b32.xlu1 %v25893_v11, %s20414_s27 }
 0x92c   :  { %19611 = vrot.lane.b32.xlu1 %v25894_v51, %s20415_s28 }
 0x930   :  { %19626 = vrot.lane.b32.xlu1 %v25895_v13, %s20415_s28 }
 0x934   :  { %19636 = vrot.lane.b32.xlu1 %v25896_v53, %s20415_s28 }
 0x936   :  { %v8632_v50 = vpop.xlane.xlu1 %8631 }
 0x937   :  { %20094 = vrcp.f32 %v8632_v50  ;;  %v25903_v50 = vld [vmem:[#allocation108_spill] sm:$0xff] }
 0x938   :  { %19641 = vrot.lane.b32.xlu1 %v20683_v0, %s20415_s28 }
 0x93a   :  { %v19567_v40 = vpop.permute.xlu1 %19566 }
 0x93c   :  { %19651 = vrot.lane.b32.xlu1 %v20713_v20, %s20415_s28 }
 0x941   :  { %v20095_v25 = vpop.eup %20094 }
 0x942   :  { %v8647_v61 = vpop.xlane.xlu0 %8646  ;;  %v8706_v62 = vmul.f32 %v20095_v25, %v23023_v28 }
 0x943   :  { %20096 = vrcp.f32 %v8647_v61  ;;  %v19569_v61 = vunpack.i.h.bf16 %v19567_v40 }
 0x944   :  { %17920 = vmatprep.mubr.msk.f32.mxu1 %vm1861_vm7, %v8706_v62  ;;  %v19568_v62 = vunpack.i.l.bf16 %v19567_v40 }
 0x945   :  { %17921 = vmatmul.mubr.msk.f32.vlgmr.msra.gmra.mrb[98].mxu1 %vm1861_vm7, %v8707_v31 }
 0x946   :  { %18828 = vmatpush3.bf16.msk.msra.mxu1 %vm20941_vm5, %v18823_v41  ;;  %v10487_v0 = vpop.permute.xlu0 %10486 }
 0x947   :  { %18837 = vmatprep.subr.msk.bf16.mxu1 %vm20859_vm2, %v18835_v2  ;;  %17970 = vmatmul.mubr.msk.f32.vlgmr.msra.gmra.mrb[118].mxu0 %vm425_vm1, %v10487_v0  ;;  %v18871_v0 = vpack.c.bf16 %v19569_v61, %v19568_v62 }
 0x948   :  { %18870 = vmatpush3.bf16.xpose.msk.msra.mxu0 %vm20859_vm2, %v18865_v5 }
 0x94a   :  { %v23276_v20 = vpop.permute.xlu0 %10575 }
 0x94d   :  { %v20097_v55 = vpop.eup %20096 }
 0x94e   :  { %v19572_v28 = vpop.permute.xlu0 %19571  ;;  %v8711_v7 = vmul.f32 %v20097_v55, %v23032_v15  ;;  %v19558_v15 = vunpack.i.l.bf16 %v25902_v59 }
 0x94f   :  { %v19574_v18 = vunpack.i.h.bf16 %v19572_v28  ;;  %v19573_v10 = vunpack.i.l.bf16 %v19572_v28  ;;  %v25907_v28 = vld [vmem:[#allocation114_spill] sm:$0xff] }
 0x951   :  { %v18877_v57 = vpack.c.bf16 %v19574_v18, %v19573_v10 }
 0x952   :  { %v10669_v56 = vpop.permute.xlu0 %10668 }
 0x953   :  { %18879 = vmatprep.subr.msk.bf16.mxu0 %vm20859_vm2, %v18877_v57 }
 0x956   :  { %v23280_v36 = vpop.permute.xlu0 %10757 }
 0x95a   :  { %v23282_v34 = vpop.f32.mrb[98].mxu0  ;;  %v19582_v43 = vpop.permute.xlu0 %19581 }
 0x95b   :  { %v23284_v16 = vpop.f32.mrb[99].mxu0  ;;  %v19584_v49 = vunpack.i.h.bf16 %v19582_v43  ;;  %v19583_v14 = vunpack.i.l.bf16 %v19582_v43 }
 0x95d   :  { %v18889_v44 = vpack.c.bf16 %v19584_v49, %v19583_v14 }
 0x95e   :  { %v10851_v37 = vpop.permute.xlu0 %10850 }
 0x961   :  { %v23286_v22 = vpop.f32.mrb[100].mxu0 }
 0x962   :  { %25899 = vst [vmem:[#allocation22_spill] sm:$0xff] %v23286_v22  ;;  %v23288_v46 = vpop.f32.mrb[101].mxu0  ;;  %v23290_v1 = vpop.permute.xlu0 %10939 }
 0x966   :  { %v19592_v52 = vpop.permute.xlu0 %19591 }
 0x967   :  { %v19594_v39 = vunpack.i.h.bf16 %v19592_v52  ;;  %v19593_v17 = vunpack.i.l.bf16 %v19592_v52 }
 0x969   :  { %v18901_v53 = vpack.c.bf16 %v19594_v39, %v19593_v17 }
 0x96a   :  { %v11033_v42 = vpop.permute.xlu0 %11032 }
 0x96b   :  { %v8644_v47 = vpop.xlane.xlu1 %8643 }
 0x96c   :  { %20098 = vrcp.f32 %v8644_v47 }
 0x96e   :  { %v23314_v11 = vpop.permute.xlu0 %11121 }
 0x96f   :  { %v23292_v30 = vpop.permute.xlu1 %10577 }
 0x972   :  { %v19602_v27 = vpop.permute.xlu0 %19601 }
 0x973   :  { %v10667_v63 = vpop.permute.xlu1 %10666  ;;  %v19604_v31 = vunpack.i.h.bf16 %v19602_v27 }
 0x974   :  { %17983 = vmatprep.mubr.msk.f32.mxu0 %vm425_vm1, %v10667_v63 }
 0x975   :  { %17984 = vmatmul.mubr.msk.f32.vlgmr.msra.gmra.mrb[120].mxu0 %vm425_vm1, %v10669_v56 }
 0x976   :  { %v20099_v12 = vpop.eup %20098  ;;  %18882 = vmatpush3.bf16.xpose.msk.msra.mxu0 %vm20859_vm2, %v18877_v57  ;;  %v11215_v18 = vpop.permute.xlu0 %11214 }
 0x977   :  { %18891 = vmatprep.subr.msk.bf16.mxu0 %vm20859_vm2, %v18889_v44  ;;  %v19577_v41 = vpop.permute.xlu1 %19576  ;;  %v8710_v54 = vmul.f32 %v20099_v12, %v23056_v24  ;;  %v19559_v24 = vunpack.i.h.bf16 %v25902_v59 }
 0x978   :  { %v19579_v56 = vunpack.i.h.bf16 %v19577_v41  ;;  %v19578_v43 = vunpack.i.l.bf16 %v19577_v41 }
 0x979   :  { %17934 = vmatprep.mubr.msk.f32.mxu1 %vm1861_vm7, %v8710_v54  ;;  %v18859_v13 = vpack.c.bf16 %v19559_v24, %v19558_v15 }
 0x97a   :  { %17935 = vmatmul.mubr.msk.f32.vlgmr.msra.gmra.mrb[100].mxu1 %vm1861_vm7, %v8711_v7 }
 0x97b   :  { %18840 = vmatpush3.bf16.xpose.msk.msra.mxu1 %vm20859_vm2, %v18835_v2  ;;  %17948 = vmatprep.mubr.msk.f32.mxu1 %vm425_vm1, %v25901_v48  ;;  %v10760_v5 = vpop.permute.xlu1 %10759  ;;  %v19603_v2 = vunpack.i.l.bf16 %v19602_v27 }
 0x97c   :  { %18849 = vmatprep.subr.msk.bf16.mxu1 %vm20859_vm2, %v18847_v19 }
 0x97d   :  { %v18913_v57 = vpack.c.bf16 %v19604_v31, %v19603_v2 }
 0x97f   :  { %v10849_v51 = vpop.permute.xlu1 %10848 }
 0x980   :  { %17997 = vmatprep.mubr.msk.f32.mxu0 %vm425_vm1, %v10849_v51 }
 0x981   :  { %17998 = vmatmul.mubr.msk.f32.vlgmr.msra.gmra.mrb[122].mxu0 %vm425_vm1, %v10851_v37  ;;  %v11304_v37 = vpop.permute.xlu0 %11303 }
 0x982   :  { %17949 = vmatmul.mubr.msk.f32.vlgmr.msra.gmra.mrb[102].mxu1 %vm425_vm1, %v25903_v50  ;;  %18894 = vmatpush3.bf16.xpose.msk.msra.mxu0 %vm20859_vm2, %v18889_v44 }
 0x983   :  { %18852 = vmatpush3.bf16.xpose.msk.msra.mxu1 %vm20859_vm2, %v18847_v19  ;;  %17962 = vmatprep.mubr.msk.f32.mxu1 %vm425_vm1, %v25904_v21  ;;  %v19587_v25 = vpop.permute.xlu1 %19586 }
 0x984   :  { %18903 = vmatprep.subr.msk.bf16.mxu0 %vm20859_vm2, %v18901_v53  ;;  %18861 = vmatprep.subr.msk.bf16.mxu1 %vm20859_vm2, %v18859_v13  ;;  %v23330_v23 = vpop.f32.mrb[102].mxu0  ;;  %v19589_v49 = vunpack.i.h.bf16 %v19587_v25  ;;  %v19588_v14 = vunpack.i.l.bf16 %v19587_v25 }
 0x985   :  { %25905 = vst [vmem:[#allocation93_spill] sm:$0xff] %v23330_v23  ;;  %v23332_v45 = vpop.f32.mrb[103].mxu0  ;;  %v11395_v52 = vpop.permute.xlu0 %11394 }
 0x986   :  { %25906 = vst [vmem:[#allocation14_spill] sm:$0xff] %v23332_v45  ;;  %v18895_v55 = vpack.c.bf16 %v19589_v49, %v19588_v14 }
 0x987   :  { %v10942_v26 = vpop.permute.xlu1 %10941 }
 0x98a   :  { %17963 = vmatmul.mubr.msk.f32.vlgmr.msra.gmra.mrb[104].mxu1 %vm425_vm1, %v25907_v28 }
 0x98b   :  { %18864 = vmatpush3.bf16.xpose.msk.msra.mxu1 %vm20859_vm2, %v18859_v13  ;;  %17976 = vmatprep.mubr.msk.f32.mxu1 %vm425_vm1, %v23276_v20  ;;  %v11031_v10 = vpop.permute.xlu1 %11030  ;;  %v18883_v20 = vpack.c.bf16 %v19579_v56, %v19578_v43 }
 0x98c   :  { %18873 = vmatprep.subr.msk.bf16.mxu1 %vm20859_vm2, %v18871_v0  ;;  %18011 = vmatprep.mubr.msk.f32.mxu0 %vm425_vm1, %v11031_v10 }
 0x98d   :  { %18012 = vmatmul.mubr.msk.f32.vlgmr.msra.gmra.mrb[124].mxu0 %vm425_vm1, %v11033_v42 }
 0x98e   :  { %18906 = vmatpush3.bf16.xpose.msk.msra.mxu0 %vm20859_vm2, %v18901_v53 }
 0x98f   :  { %18915 = vmatprep.subr.msk.bf16.mxu0 %vm20859_vm2, %v18913_v57  ;;  %v19597_v40 = vpop.permute.xlu1 %19596 }
 0x990   :  { %v19599_v44 = vunpack.i.h.bf16 %v19597_v40  ;;  %v19598_v12 = vunpack.i.l.bf16 %v19597_v40 }
 0x992   :  { %17977 = vmatmul.mubr.msk.f32.vlgmr.msra.gmra.mrb[106].mxu1 %vm425_vm1, %v23292_v30  ;;  %v11486_v30 = vpop.permute.xlu0 %11485  ;;  %v18907_v29 = vpack.c.bf16 %v19599_v44, %v19598_v12 }
 0x993   :  { %18876 = vmatpush3.bf16.xpose.msk.msra.mxu1 %vm20859_vm2, %v18871_v0  ;;  %17990 = vmatprep.mubr.msk.f32.mxu1 %vm425_vm1, %v23280_v36  ;;  %v11124_v47 = vpop.permute.xlu1 %11123 }
 0x994   :  { %18885 = vmatprep.subr.msk.bf16.mxu1 %vm20859_vm2, %v18883_v20 }
 0x996   :  { %v19617_v6 = vpop.permute.xlu0 %19616 }
 0x997   :  { %v11213_v63 = vpop.permute.xlu1 %11212  ;;  %v19619_v39 = vunpack.i.h.bf16 %v19617_v6  ;;  %v19618_v17 = vunpack.i.l.bf16 %v19617_v6 }
 0x998   :  { %18025 = vmatprep.mubr.msk.f32.mxu0 %vm425_vm1, %v11213_v63 }
 0x999   :  { %18026 = vmatmul.mubr.msk.f32.vlgmr.msra.gmra.mrb[126].mxu0 %vm425_vm1, %v11215_v18  ;;  %v18931_v13 = vpack.c.bf16 %v19619_v39, %v19618_v17 }
 0x99a   :  { %17991 = vmatmul.mubr.msk.f32.vlgmr.msra.gmra.mrb[108].mxu1 %vm425_vm1, %v10760_v5  ;;  %18918 = vmatpush3.bf16.xpose.msk.msra.mxu0 %vm20859_vm2, %v18913_v57  ;;  %v19622_v42 = vpop.permute.xlu0 %19621 }
 0x99b   :  { %18888 = vmatpush3.bf16.xpose.msk.msra.mxu1 %vm20859_vm2, %v18883_v20  ;;  %18004 = vmatprep.mubr.msk.f32.mxu1 %vm425_vm1, %v23290_v1  ;;  %v19607_v36 = vpop.permute.xlu1 %19606  ;;  %v19624_v5 = vunpack.i.h.bf16 %v19622_v42  ;;  %v19623_v59 = vunpack.i.l.bf16 %v19622_v42 }
 0x99c   :  { %18039 = vmatprep.mubr.msk.f32.mxu0 %vm425_vm1, %v11395_v52  ;;  %18897 = vmatprep.subr.msk.bf16.mxu1 %vm20859_vm2, %v18895_v55  ;;  %v19609_v41 = vunpack.i.h.bf16 %v19607_v36  ;;  %v19608_v54 = vunpack.i.l.bf16 %v19607_v36 }
 0x99d   :  { %v23382_v51 = vpack.c.bf16 %v19624_v5, %v19623_v59 }
 0x99e   :  { %v18919_v19 = vpack.c.bf16 %v19609_v41, %v19608_v54 }
 0x99f   :  { %v11306_v38 = vpop.permute.xlu1 %11305 }
 0x9a2   :  { %18005 = vmatmul.mubr.msk.f32.vlgmr.msra.gmra.mrb[110].mxu1 %vm425_vm1, %v10942_v26 }
 0x9a3   :  { %18900 = vmatpush3.bf16.xpose.msk.msra.mxu1 %vm20859_vm2, %v18895_v55  ;;  %18018 = vmatprep.mubr.msk.f32.mxu1 %vm425_vm1, %v23314_v11  ;;  %v11397_v1 = vpop.permute.xlu1 %11396 }
 0x9a4   :  { %18909 = vmatprep.subr.msk.bf16.mxu1 %vm20859_vm2, %v18907_v29  ;;  %18040 = vmatmul.mubr.msk.f32.vlgmr.msra.gmra.mrb[128].mxu0 %vm425_vm1, %v11397_v1 }
 0x9a7   :  { %v11488_v7 = vpop.permute.xlu1 %11487 }
 0x9aa   :  { %18019 = vmatmul.mubr.msk.f32.vlgmr.msra.gmra.mrb[112].mxu1 %vm425_vm1, %v11124_v47 }
 0x9ab   :  { %18912 = vmatpush3.bf16.xpose.msk.msra.mxu1 %vm20859_vm2, %v18907_v29  ;;  %18032 = vmatprep.mubr.msk.f32.mxu1 %vm425_vm1, %v11304_v37  ;;  %v19612_v48 = vpop.permute.xlu1 %19611 }
 0x9ac   :  { %v19614_v24 = vunpack.i.h.bf16 %v19612_v48  ;;  %v19613_v15 = vunpack.i.l.bf16 %v19612_v48  ;;  %18921 = vmatprep.subr.msk.bf16.mxu1 %vm20859_vm2, %v18919_v19 }
 0x9ae   :  { %v18925_v11 = vpack.c.bf16 %v19614_v24, %v19613_v15 }
 0x9af   :  { %v19627_v53 = vpop.permute.xlu1 %19626 }
 0x9b0   :  { %18927 = vmatprep.subr.msk.bf16.mxu0 %vm20941_vm5, %v18925_v11  ;;  %v19629_v50 = vunpack.i.h.bf16 %v19627_v53  ;;  %v19628_v21 = vunpack.i.l.bf16 %v19627_v53 }
 0x9b1   :  { %18930 = vmatpush3.bf16.msk.msra.mxu0 %vm20941_vm5, %v18925_v11 }
 0x9b2   :  { %18033 = vmatmul.mubr.msk.f32.vlgmr.msra.gmra.mrb[114].mxu1 %vm425_vm1, %v11306_v38  ;;  %18939 = vmatprep.subr.msk.bf16.mxu0 %vm20941_vm5, %v23382_v51  ;;  %v23397_v25 = vpack.c.bf16 %v19629_v50, %v19628_v21 }
 0x9b3   :  { %18924 = vmatpush3.bf16.xpose.msk.msra.mxu1 %vm20859_vm2, %v18919_v19  ;;  %18046 = vmatprep.mubr.msk.f32.mxu1 %vm425_vm1, %v11486_v30  ;;  %vm16084_vm2 = vcmask 1045509  }
 0x9b4   :  { %18933 = vmatprep.subr.msk.bf16.mxu1 %vm20941_vm5, %v18931_v13  ;;  %25908 = vst [vmem:[#allocation96_spill] sm:$0xff] %v23397_v25 }
 0x9ba   :  { %18047 = vmatmul.mubr.msk.f32.vlgmr.msra.gmra.mrb[116].mxu1 %vm425_vm1, %v11488_v7 }
 0x9bb   :  { %18936 = vmatpush3.bf16.msk.msra.mxu1 %vm20941_vm5, %v18931_v13 }
 0x9bc   :  { %18945 = vmatprep.subr.msk.bf16.mxu1 %vm20941_vm5, %v23397_v25 }
 0x9bf   :  { %v23405_v9 = vpop.f32.mrb[86].mxu1 }
 0x9c0   :  { %v23407_v27 = vpop.f32.mrb[87].mxu1  ;;  %v23409_v61 = vpop.f32.mrb[104].mxu0 }
 0x9c1   :  { %25909 = vst [vmem:[#allocation26_spill] sm:$0xff] %v23409_v61  ;;  %v23411_v62 = vpop.f32.mrb[105].mxu0 }
 0x9c2   :  { %25910 = vst [vmem:[#allocation16_spill] sm:$0xff] %v23411_v62 }
 0x9c7   :  { %v23413_v26 = vpop.f32.mrb[88].mxu1 }
 0x9c8   :  { %v23415_v31 = vpop.f32.mrb[89].mxu1 }
 0x9c9   :  { %25911 = vst [vmem:[#allocation35_spill] sm:$0xff] %v23415_v31  ;;  %v23417_v2 = vpop.f32.mrb[106].mxu0 }
 0x9ca   :  { %25912 = vst [vmem:[#allocation94_spill] sm:$0xff] %v23417_v2  ;;  %v23419_v0 = vpop.f32.mrb[107].mxu0 }
 0x9cb   :  { %25913 = vst [vmem:[#allocation23_spill] sm:$0xff] %v23419_v0 }
 0x9cf   :  { %v23421_v28 = vpop.f32.mrb[90].mxu1 }
 0x9d0   :  { %25914 = vst [vmem:[#allocation98_spill] sm:$0xff] %v23421_v28  ;;  %v23423_v18 = vpop.f32.mrb[91].mxu1 }
 0x9d1   :  { %25915 = vst [vmem:[#allocation25_spill] sm:$0xff] %v23423_v18  ;;  %v23425_v10 = vpop.f32.mrb[108].mxu0 }
 0x9d2   :  { %25916 = vst [vmem:[#allocation18_spill] sm:$0xff] %v23425_v10  ;;  %v23427_v57 = vpop.f32.mrb[109].mxu0 }
 0x9d3   :  { %25917 = vst [vmem:[#allocation30_spill] sm:$0xff] %v23427_v57 }
 0x9d7   :  { %v23429_v56 = vpop.f32.mrb[92].mxu1 }
 0x9d8   :  { %25918 = vst [vmem:[#allocation95_spill] sm:$0xff] %v23429_v56  ;;  %v23431_v43 = vpop.f32.mrb[93].mxu1 }
 0x9d9   :  { %25919 = vst [vmem:[#allocation19_spill] sm:$0xff] %v23431_v43  ;;  %v23433_v40 = vpop.f32.mrb[110].mxu0 }
 0x9da   :  { %25920 = vst [vmem:[#allocation102_spill] sm:$0xff] %v23433_v40  ;;  %v23435_v37 = vpop.f32.mrb[111].mxu0 }
 0x9db   :  { %25921 = vst [vmem:[#allocation31_spill] sm:$0xff] %v23435_v37 }
 0x9df   :  { %v23437_v20 = vpop.f32.mrb[94].mxu1 }
 0x9e0   :  { %25922 = vst [vmem:[#allocation27_spill] sm:$0xff] %v23437_v20  ;;  %v23439_v47 = vpop.f32.mrb[95].mxu1 }
 0x9e1   :  { %25923 = vst [vmem:[#allocation36_spill] sm:$0xff] %v23439_v47 }
 0x9e3   :  { %v23441_v49 = vpop.f32.mrb[112].mxu0 }
 0x9e4   :  { %25924 = vst [vmem:[#allocation97_spill] sm:$0xff] %v23441_v49  ;;  %v23443_v14 = vpop.f32.mrb[113].mxu0 }
 0x9e5   :  { %25925 = vst [vmem:[#allocation38_spill] sm:$0xff] %v23443_v14 }
 0x9eb   :  { %v17943_v52 = vpop.f32.mrb[114].mxu0 }
 0x9ec   :  { %v23445_v63 = vmul.f32 0.35355338, %v17943_v52  ;;  %v23447_v55 = vpop.f32.mrb[96].mxu1  ;;  %v10202_v36 = vpop.f32.mrb[115].mxu0 }
 0x9ed   :  { %25926 = vst [vmem:[#allocation20_spill] sm:$0xff] %v23447_v55  ;;  %v23449_v30 = vmul.f32 0.35355338, %v10202_v36  ;;  %v23451_v44 = vpop.f32.mrb[97].mxu1 }
 0x9ee   :  { %25927 = vst [vmem:[#allocation11_spill] sm:$0xff] %v23451_v44  ;;  %v11611_v12 = vsel %vm1865_vm6, %v23445_v63, -inf  ;;  %v23547_v44 = vpop.permute.xlu0 %19631 }
 0x9ef   :  { %11612 = vmax.xlane.f32.xlu1 %v11611_v12  ;;  %v11608_v38 = vsel %vm1861_vm7, %v23449_v30, -inf }
 0x9f0   :  { %11609 = vmax.xlane.f32.xlu0 %v11608_v38 }
 0x9f3   :  { %v17957_v29 = vpop.f32.mrb[116].mxu0 }
 0x9f4   :  { %v23457_v6 = vmul.f32 0.35355338, %v17957_v29  ;;  %v10384_v1 = vpop.f32.mrb[117].mxu0 }
 0x9f5   :  { %v23459_v41 = vmul.f32 0.35355338, %v10384_v1 }
 0x9f6   :  { %v11623_v54 = vsel %vm1865_vm6, %v23457_v6, -inf }
 0x9f7   :  { %11624 = vmax.xlane.f32.xlu0 %v11623_v54  ;;  %v11620_v7 = vsel %vm1861_vm7, %v23459_v41, -inf }
 0x9f8   :  { %11621 = vmax.xlane.f32.xlu1 %v11620_v7 }
 0xa18   :  { %v23465_v42 = vpop.f32.mrb[98].mxu1 }
 0xa19   :  { %25928 = vst [vmem:[#allocation105_spill] sm:$0xff] %v23465_v42  ;;  %v23467_v19 = vpop.f32.mrb[99].mxu1 }
 0xa1a   :  { %25929 = vst [vmem:[#allocation21_spill] sm:$0xff] %v23467_v19  ;;  %v17971_v48 = vpop.f32.mrb[118].mxu0 }
 0xa1b   :  { %v23469_v5 = vmul.f32 0.35355338, %v17971_v48  ;;  %v10566_v59 = vpop.f32.mrb[119].mxu0 }
 0xa1c   :  { %v23471_v24 = vmul.f32 0.35355338, %v10566_v59 }
 0xa1d   :  { %v11635_v15 = vsel %vm1865_vm6, %v23469_v5, -inf }
 0xa1e   :  { %11636 = vmax.xlane.f32.xlu0 %v11635_v15  ;;  %v11632_v39 = vsel %vm1861_vm7, %v23471_v24, -inf }
 0xa1f   :  { %11633 = vmax.xlane.f32.xlu1 %v11632_v39 }
 0xa48   :  { %v17985_v17 = vpop.f32.mrb[120].mxu0 }
 0xa49   :  { %v10748_v11 = vpop.f32.mrb[121].mxu0  ;;  %v23487_v1 = vmul.f32 0.35355338, %v17985_v17 }
 0xa4a   :  { %v23477_v13 = vmul.f32 0.35355338, %v10748_v11 }
 0xa4b   :  { %v11647_v48 = vsel %vm1865_vm6, %v23487_v1, -inf }
 0xa4c   :  { %v11644_v53 = vsel %vm1861_vm7, %v23477_v13, -inf }
 0xa4d   :  { %v23481_v50 = vpop.f32.mrb[100].mxu1  ;;  %11645 = vmax.xlane.f32.xlu1 %v11644_v53 }
 0xa4e   :  { %25930 = vst [vmem:[#allocation10_spill] sm:$0xff] %v23481_v50  ;;  %v23483_v21 = vpop.f32.mrb[101].mxu1 }
 0xa4f   :  { %25931 = vst [vmem:[#allocation33_spill] sm:$0xff] %v23483_v21 }
 0xa54   :  { %v17999_v52 = vpop.f32.mrb[122].mxu0 }
 0xa55   :  { %v17950_v36 = vpop.f32.mrb[102].mxu1  ;;  %v10930_v12 = vpop.f32.mrb[123].mxu0  ;;  %v23505_v50 = vmul.f32 0.35355338, %v17999_v52 }
 0xa56   :  { %v23485_v38 = vmul.f32 0.35355338, %v17950_v36  ;;  %v10293_v29 = vpop.f32.mrb[103].mxu1  ;;  %v23501_v36 = vmul.f32 0.35355338, %v10930_v12 }
 0xa57   :  { %v23491_v7 = vmul.f32 0.35355338, %v10293_v29  ;;  %v11659_v21 = vsel %vm1865_vm6, %v23505_v50, -inf }
 0xa58   :  { %v11617_v54 = vsel %vm1865_vm6, %v23485_v38, -inf }
 0xa59   :  { %11618 = vmax.xlane.f32.xlu0 %v11617_v54  ;;  %v11614_v17 = vsel %vm1861_vm7, %v23491_v7, -inf }
 0xa5d   :  { %v17964_v59 = vpop.f32.mrb[104].mxu1  ;;  %11648 = vmax.xlane.f32.xlu0 %v11647_v48 }
 0xa5e   :  { %v10475_v15 = vpop.f32.mrb[105].mxu1  ;;  %v23497_v11 = vmul.f32 0.35355338, %v17964_v59  ;;  %v11656_v59 = vsel %vm1861_vm7, %v23501_v36, -inf }
 0xa5f   :  { %v23495_v39 = vmul.f32 0.35355338, %v10475_v15 }
 0xa60   :  { %v18013_v53 = vpop.f32.mrb[124].mxu0  ;;  %v11629_v48 = vsel %vm1865_vm6, %v23497_v11, -inf }
 0xa61   :  { %11615 = vmax.xlane.f32.xlu0 %v11614_v17  ;;  %v11626_v29 = vsel %vm1861_vm7, %v23495_v39, -inf  ;;  %v11112_v54 = vpop.f32.mrb[125].mxu0  ;;  %v23523_v14 = vmul.f32 0.35355338, %v18013_v53 }
 0xa62   :  { %11627 = vmax.xlane.f32.xlu1 %v11626_v29  ;;  %v23517_v29 = vmul.f32 0.35355338, %v11112_v54 }
 0xa63   :  { %v11671_v53 = vsel %vm1865_vm6, %v23523_v14, -inf }
 0xa64   :  { %v11668_v42 = vsel %vm1861_vm7, %v23517_v29, -inf }
 0xa65   :  { %v17978_v15 = vpop.f32.mrb[106].mxu1  ;;  %11630 = vmax.xlane.f32.xlu0 %v11629_v48  ;;  %v23521_v48 = vpop.permute.xlu1 %19636 }
 0xa66   :  { %v10657_v49 = vpop.f32.mrb[107].mxu1  ;;  %11657 = vmax.xlane.f32.xlu1 %v11656_v59  ;;  %v23513_v17 = vmul.f32 0.35355338, %v17978_v15  ;;  %25932 = vst [vmem:[#allocation104_spill] sm:$0xff] %v23521_v48 }
 0xa67   :  { %v23511_v12 = vmul.f32 0.35355338, %v10657_v49 }
 0xa68   :  { %v11641_v49 = vsel %vm1865_vm6, %v23513_v17, -inf }
 0xa69   :  { %11660 = vmax.xlane.f32.xlu0 %v11659_v21  ;;  %v11638_v52 = vsel %vm1861_vm7, %v23511_v12, -inf  ;;  %v23539_v10 = vpop.permute.xlu1 %19641 }
 0xa6a   :  { %11639 = vmax.xlane.f32.xlu1 %v11638_v52 }
 0xa6c   :  { %v18027_v59 = vpop.f32.mrb[126].mxu0 }
 0xa6d   :  { %11642 = vmax.xlane.f32.xlu0 %v11641_v49  ;;  %v17992_v15 = vpop.f32.mrb[108].mxu1  ;;  %v11294_v54 = vpop.f32.mrb[127].mxu0  ;;  %v23541_v37 = vmul.f32 0.35355338, %v18027_v59 }
 0xa6e   :  { %11669 = vmax.xlane.f32.xlu1 %v11668_v42  ;;  %v10839_v21 = vpop.f32.mrb[109].mxu1  ;;  %v23531_v19 = vmul.f32 0.35355338, %v17992_v15  ;;  %v23535_v52 = vmul.f32 0.35355338, %v11294_v54  ;;  %v23551_v57 = vpop.permute.xlu1 %19651 }
 0xa6f   :  { %v23529_v40 = vmul.f32 0.35355338, %v10839_v21  ;;  %v11683_v20 = vsel %vm1865_vm6, %v23541_v37, -inf }
 0xa70   :  { %v11653_v42 = vsel %vm1865_vm6, %v23531_v19, -inf  ;;  %v11680_v21 = vsel %vm1861_vm7, %v23535_v52, -inf }
 0xa71   :  { %11672 = vmax.xlane.f32.xlu0 %v11671_v53  ;;  %v11650_v49 = vsel %vm1861_vm7, %v23529_v40, -inf }
 0xa72   :  { %11651 = vmax.xlane.f32.xlu1 %v11650_v49 }
 0xa75   :  { %11654 = vmax.xlane.f32.xlu0 %v11653_v42  ;;  %v18006_v15 = vpop.f32.mrb[110].mxu1 }
 0xa76   :  { %11681 = vmax.xlane.f32.xlu1 %v11680_v21  ;;  %v11021_v54 = vpop.f32.mrb[111].mxu1  ;;  %v23553_v49 = vmul.f32 0.35355338, %v18006_v15 }
 0xa77   :  { %v23549_v53 = vmul.f32 0.35355338, %v11021_v54  ;;  %v18041_v55 = vpop.f32.mrb[128].mxu0  ;;  %v23563_v54 = vpop.permute.xlu0 %19646 }
 0xa78   :  { %v11476_v59 = vpop.f32.mrb[129].mxu0  ;;  %25933 = vst [vmem:[#allocation15_spill] sm:$0xff] %v23563_v54  ;;  %v23565_v25 = vmul.f32 0.35355338, %v18041_v55  ;;  %v11665_v48 = vsel %vm1865_vm6, %v23553_v49, -inf }
 0xa79   :  { %v23557_v42 = vmul.f32 0.35355338, %v11476_v59  ;;  %11684 = vmax.xlane.f32.xlu0 %v11683_v20  ;;  %v11662_v2 = vsel %vm1861_vm7, %v23549_v53, -inf }
 0xa7a   :  { %11663 = vmax.xlane.f32.xlu1 %v11662_v2  ;;  %v11695_v54 = vsel %vm1865_vm6, %v23565_v25, -inf }
 0xa7b   :  { %v11692_v21 = vsel %vm1861_vm7, %v23557_v42, -inf }
 0xa7c   :  { %v11613_v15 = vpop.xlane.xlu1 %11612 }
 0xa7d   :  { %11666 = vmax.xlane.f32.xlu0 %v11665_v48  ;;  %v18020_v47 = vpop.f32.mrb[112].mxu1  ;;  %v11705_v20 = vsub.f32 %v23445_v63, %v11613_v15  ;;  %v11610_v2 = vpop.xlane.xlu0 %11609 }
 0xa7e   :  { %11693 = vmax.xlane.f32.xlu1 %v11692_v21  ;;  %v11203_v59 = vpop.f32.mrb[113].mxu1  ;;  %v23572_v0 = vmul.f32 0.35355338, %v18020_v47 }
 0xa7f   :  { %v23570_v61 = vmul.f32 0.35355338, %v11203_v59  ;;  %v11738_v43 = vmul.f32 1.442695, %v11705_v20 }
 0xa80   :  { %v11677_v21 = vsel %vm1865_vm6, %v23572_v0, -inf }
 0xa81   :  { %11696 = vmax.xlane.f32.xlu0 %v11695_v54  ;;  %v11674_v55 = vsel %vm1861_vm7, %v23570_v61, -inf  ;;  %20100 = vpow2.f32 %v11738_v43 }
 0xa82   :  { %11675 = vmax.xlane.f32.xlu1 %v11674_v55 }
 0xa84   :  { %v11625_v48 = vpop.xlane.xlu0 %11624 }
 0xa85   :  { %v11709_v63 = vsub.f32 %v23457_v6, %v11625_v48  ;;  %11678 = vmax.xlane.f32.xlu0 %v11677_v21  ;;  %v18034_v15 = vpop.f32.mrb[114].mxu1 }
 0xa86   :  { %v23581_v59 = vmul.f32 0.35355338, %v18034_v15  ;;  %v11385_v47 = vpop.f32.mrb[115].mxu1 }
 0xa87   :  { %v11746_v56 = vmul.f32 1.442695, %v11709_v63  ;;  %v23583_v62 = vmul.f32 0.35355338, %v11385_v47 }
 0xa88   :  { %v11689_v54 = vsel %vm1865_vm6, %v23581_v59, -inf }
 0xa89   :  { %11690 = vmax.xlane.f32.xlu0 %v11689_v54  ;;  %v11686_v20 = vsel %vm1861_vm7, %v23583_v62, -inf  ;;  %20102 = vpow2.f32 %v11746_v56 }
 0xa8a   :  { %11687 = vmax.xlane.f32.xlu1 %v11686_v20 }
 0xa8b   :  { %v23595_v63 = vpop.eup %20100 }
 0xa8c   :  { %v11803_v47 = vsel %vm1865_vm6, %v23595_v63, 0.0 }
 0xa8d   :  { %v18048_v55 = vpop.f32.mrb[116].mxu1 }
 0xa8e   :  { %v23589_v6 = vmul.f32 0.35355338, %v18048_v55  ;;  %v11567_v48 = vpop.f32.mrb[117].mxu1 }
 0xa8f   :  { %v23591_v21 = vmul.f32 0.35355338, %v11567_v48 }
 0xa90   :  { %v11701_v43 = vsel %vm1865_vm6, %v23589_v6, -inf }
 0xa91   :  { %11702 = vmax.xlane.f32.xlu0 %v11701_v43  ;;  %v11698_v15 = vsel %vm1861_vm7, %v23591_v21, -inf  ;;  %v11704_v43 = vsub.f32 %v23449_v30, %v11610_v2 }
 0xa92   :  { %11699 = vmax.xlane.f32.xlu1 %v11698_v15  ;;  %v11622_v15 = vpop.xlane.xlu1 %11621 }
 0xa93   :  { %v23601_v56 = vpop.eup %20102  ;;  %v11736_v28 = vmul.f32 1.442695, %v11704_v43  ;;  %v11708_v23 = vsub.f32 %v23459_v41, %v11622_v15 }
 0xa94   :  { %v11815_v54 = vsel %vm1865_vm6, %v23601_v56, 0.0 }
 0xa95   :  { %11804 = vadd.xlane.f32.xlu0 %v11803_v47  ;;  %v11744_v47 = vmul.f32 1.442695, %v11708_v23 }
 0xa99   :  { %11816 = vadd.xlane.f32.xlu0 %v11815_v54 }
 0xaa3   :  { %19656 = vrot.lane.b32.xlu1 %v25861_v3, %s20415_s28 }
 0xaab   :  { %v11637_v20 = vpop.xlane.xlu0 %11636 }
 0xaac   :  { %v11713_v55 = vsub.f32 %v23469_v5, %v11637_v20  ;;  %v11634_v18 = vpop.xlane.xlu1 %11633 }
 0xaad   :  { %v11712_v22 = vsub.f32 %v23471_v24, %v11634_v18 }
 0xaae   :  { %v11754_v48 = vmul.f32 1.442695, %v11713_v55 }
 0xaaf   :  { %v11752_v5 = vmul.f32 1.442695, %v11712_v22 }
 0xab0   :  { %20104 = vpow2.f32 %v11754_v48 }
 0xab1   :  { %20106 = vpow2.f32 %v11736_v28 }
 0xab2   :  { %20108 = vpow2.f32 %v11744_v47 }
 0xab3   :  { %20110 = vpow2.f32 %v11752_v5 }
 0xaba   :  { %v23611_v54 = vpop.eup %20104 }
 0xabb   :  { %v11827_v3 = vsel %vm1865_vm6, %v23611_v54, 0.0  ;;  %v23615_v20 = vpop.eup %20106 }
 0xabc   :  { %11828 = vadd.xlane.f32.xlu0 %v11827_v3  ;;  %v11800_v30 = vsel %vm1861_vm7, %v23615_v20, 0.0  ;;  %v23619_v41 = vpop.eup %20108 }
 0xabd   :  { %v11812_v23 = vsel %vm1861_vm7, %v23619_v41, 0.0  ;;  %v23623_v28 = vpop.eup %20110 }
 0xabe   :  { %v11824_v18 = vsel %vm1861_vm7, %v23623_v28, 0.0 }
 0xac7   :  { %11801 = vadd.xlane.f32.xlu1 %v11800_v30 }
 0xacb   :  { %11813 = vadd.xlane.f32.xlu1 %v11812_v23 }
 0xacf   :  { %11825 = vadd.xlane.f32.xlu1 %v11824_v18 }
 0xada   :  { %v11646_v55 = vpop.xlane.xlu1 %11645 }
 0xadb   :  { %v11716_v15 = vsub.f32 %v23477_v13, %v11646_v55 }
 0xadd   :  { %v11760_v23 = vmul.f32 1.442695, %v11716_v15 }
 0xae6   :  { %v11619_v22 = vpop.xlane.xlu0 %11618 }
 0xae7   :  { %v11707_v24 = vsub.f32 %v23485_v38, %v11619_v22 }
 0xae9   :  { %v11742_v2 = vmul.f32 1.442695, %v11707_v24 }
 0xaea   :  { %v11649_v48 = vpop.xlane.xlu0 %11648 }
 0xaeb   :  { %20112 = vpow2.f32 %v11742_v2  ;;  %v11717_v43 = vsub.f32 %v23487_v1, %v11649_v48 }
 0xaed   :  { %v11762_v47 = vmul.f32 1.442695, %v11717_v43 }
 0xaee   :  { %v11616_v3 = vpop.xlane.xlu0 %11615 }
 0xaef   :  { %20114 = vpow2.f32 %v11762_v47  ;;  %v11706_v5 = vsub.f32 %v23491_v7, %v11616_v3  ;;  %v11628_v30 = vpop.xlane.xlu1 %11627 }
 0xaf0   :  { %v11710_v18 = vsub.f32 %v23495_v39, %v11628_v30 }
 0xaf1   :  { %v11740_v45 = vmul.f32 1.442695, %v11706_v5 }
 0xaf2   :  { %v11631_v31 = vpop.xlane.xlu0 %11630  ;;  %v11748_v1 = vmul.f32 1.442695, %v11710_v18 }
 0xaf3   :  { %20116 = vpow2.f32 %v11740_v45  ;;  %v11711_v38 = vsub.f32 %v23497_v11, %v11631_v31  ;;  %v11658_v22 = vpop.xlane.xlu1 %11657 }
 0xaf4   :  { %20118 = vpow2.f32 %v11760_v23  ;;  %v11720_v2 = vsub.f32 %v23501_v36, %v11658_v22 }
 0xaf5   :  { %v23633_v24 = vpop.eup %20112  ;;  %v11750_v13 = vmul.f32 1.442695, %v11711_v38 }
 0xaf6   :  { %v11661_v55 = vpop.xlane.xlu0 %11660  ;;  %v11809_v7 = vsel %vm1865_vm6, %v23633_v24, 0.0  ;;  %v11768_v31 = vmul.f32 1.442695, %v11720_v2 }
 0xaf7   :  { %20120 = vpow2.f32 %v11750_v13  ;;  %v11721_v48 = vsub.f32 %v23505_v50, %v11661_v55  ;;  %v11640_v39 = vpop.xlane.xlu1 %11639  ;;  %11810 = vadd.xlane.f32.xlu0 %v11809_v7 }
 0xaf8   :  { %20122 = vpow2.f32 %v11748_v1  ;;  %v11714_v50 = vsub.f32 %v23511_v12, %v11640_v39 }
 0xaf9   :  { %v23639_v45 = vpop.eup %20114  ;;  %v11770_v11 = vmul.f32 1.442695, %v11721_v48 }
 0xafa   :  { %v11643_v43 = vpop.xlane.xlu0 %11642  ;;  %v11839_v15 = vsel %vm1865_vm6, %v23639_v45, 0.0 }
 0xafb   :  { %20124 = vpow2.f32 %v11770_v11  ;;  %v11715_v36 = vsub.f32 %v23513_v17, %v11643_v43  ;;  %v11670_v47 = vpop.xlane.xlu1 %11669  ;;  %11840 = vadd.xlane.f32.xlu0 %v11839_v15  ;;  %v11756_v17 = vmul.f32 1.442695, %v11714_v50 }
 0xafc   :  { %20126 = vpow2.f32 %v11768_v31  ;;  %v11724_v13 = vsub.f32 %v23517_v29, %v11670_v47 }
 0xafd   :  { %v23644_v3 = vpop.eup %20116  ;;  %v11758_v5 = vmul.f32 1.442695, %v11715_v36 }
 0xafe   :  { %v11673_v30 = vpop.xlane.xlu0 %11672  ;;  %v11806_v23 = vsel %vm1861_vm7, %v23644_v3, 0.0  ;;  %v23649_v18 = vpop.eup %20118  ;;  %v11776_v29 = vmul.f32 1.442695, %v11724_v13 }
 0xaff   :  { %v11725_v38 = vsub.f32 %v23523_v14, %v11673_v30  ;;  %v11652_v22 = vpop.xlane.xlu1 %11651  ;;  %11807 = vadd.xlane.f32.xlu1 %v11806_v23  ;;  %20128 = vpow2.f32 %v11758_v5  ;;  %v11836_v7 = vsel %vm1861_vm7, %v23649_v18, 0.0 }
 0xb00   :  { %v11718_v11 = vsub.f32 %v23529_v40, %v11652_v22 }
 0xb01   :  { %v23652_v1 = vpop.eup %20120  ;;  %v11778_v2 = vmul.f32 1.442695, %v11725_v38 }
 0xb02   :  { %v11655_v55 = vpop.xlane.xlu0 %11654  ;;  %v11821_v12 = vsel %vm1865_vm6, %v23652_v1, 0.0  ;;  %v23659_v48 = vpop.eup %20122  ;;  %v11764_v30 = vmul.f32 1.442695, %v11718_v11 }
 0xb03   :  { %20130 = vpow2.f32 %v11778_v2  ;;  %v11719_v14 = vsub.f32 %v23531_v19, %v11655_v55  ;;  %v11682_v39 = vpop.xlane.xlu1 %11681  ;;  %11822 = vadd.xlane.f32.xlu0 %v11821_v12  ;;  %11837 = vadd.xlane.f32.xlu1 %v11836_v7  ;;  %v11818_v47 = vsel %vm1861_vm7, %v23659_v48, 0.0 }
 0xb04   :  { %20132 = vpow2.f32 %v11756_v17  ;;  %v11728_v40 = vsub.f32 %v23535_v52, %v11682_v39 }
 0xb05   :  { %v23662_v31 = vpop.eup %20124  ;;  %v11766_v43 = vmul.f32 1.442695, %v11719_v14 }
 0xb06   :  { %v11685_v15 = vpop.xlane.xlu0 %11684  ;;  %v11851_v36 = vsel %vm1865_vm6, %v23662_v31, 0.0  ;;  %v23669_v50 = vpop.eup %20126  ;;  %v11784_v55 = vmul.f32 1.442695, %v11728_v40 }
 0xb07   :  { %20134 = vpow2.f32 %v11766_v43  ;;  %v11729_v19 = vsub.f32 %v23541_v37, %v11685_v15  ;;  %v11664_v5 = vpop.xlane.xlu1 %11663  ;;  %11852 = vadd.xlane.f32.xlu0 %v11851_v36  ;;  %11819 = vadd.xlane.f32.xlu1 %v11818_v47  ;;  %v11848_v22 = vsel %vm1861_vm7, %v23669_v50, 0.0 }
 0xb08   :  { %20136 = vpow2.f32 %v11776_v29  ;;  %v11722_v12 = vsub.f32 %v23549_v53, %v11664_v5 }
 0xb09   :  { %v11786_v23 = vmul.f32 1.442695, %v11729_v19  ;;  %v23675_v17 = vpop.eup %20128 }
 0xb0a   :  { %v11667_v38 = vpop.xlane.xlu0 %11666  ;;  %v11833_v14 = vsel %vm1865_vm6, %v23675_v17, 0.0  ;;  %v11772_v53 = vmul.f32 1.442695, %v11722_v12 }
 0xb0b   :  { %20138 = vpow2.f32 %v11786_v23  ;;  %v11723_v13 = vsub.f32 %v23553_v49, %v11667_v38  ;;  %v11694_v2 = vpop.xlane.xlu1 %11693  ;;  %11849 = vadd.xlane.f32.xlu0 %v11848_v22 }
 0xb0c   :  { %20140 = vpow2.f32 %v11764_v30  ;;  %v11732_v43 = vsub.f32 %v23557_v42, %v11694_v2 }
 0xb0d   :  { %v23678_v37 = vpop.eup %20130  ;;  %v11774_v7 = vmul.f32 1.442695, %v11723_v13 }
 0xb0e   :  { %v11697_v52 = vpop.xlane.xlu0 %11696  ;;  %v11863_v39 = vsel %vm1865_vm6, %v23678_v37, 0.0  ;;  %v23685_v29 = vpop.eup %20132  ;;  %v11792_v42 = vmul.f32 1.442695, %v11732_v43 }
 0xb0f   :  { %20142 = vpow2.f32 %v11774_v7  ;;  %v11733_v49 = vsub.f32 %v23565_v25, %v11697_v52  ;;  %v11676_v11 = vpop.xlane.xlu1 %11675  ;;  %11834 = vadd.xlane.f32.xlu0 %v11833_v14  ;;  %11864 = vadd.xlane.f32.xlu1 %v11863_v39  ;;  %v11830_v30 = vsel %vm1861_vm7, %v23685_v29, 0.0 }
 0xb10   :  { %20144 = vpow2.f32 %v11784_v55  ;;  %v11726_v47 = vsub.f32 %v23570_v61, %v11676_v11 }
 0xb11   :  { %v23689_v15 = vpop.eup %20134  ;;  %v11794_v36 = vmul.f32 1.442695, %v11733_v49 }
 0xb12   :  { %v11679_v19 = vpop.xlane.xlu0 %11678  ;;  %v11845_v5 = vsel %vm1865_vm6, %v23689_v15, 0.0  ;;  %v23696_v25 = vpop.eup %20136  ;;  %v11780_v38 = vmul.f32 1.442695, %v11726_v47 }
 0xb13   :  { %20146 = vpow2.f32 %v11794_v36  ;;  %v11727_v40 = vsub.f32 %v23572_v0, %v11679_v19  ;;  %11846 = vadd.xlane.f32.xlu0 %v11845_v5  ;;  %11831 = vadd.xlane.f32.xlu1 %v11830_v30  ;;  %v11860_v2 = vsel %vm1861_vm7, %v23696_v25, 0.0 }
 0xb14   :  { %20148 = vpow2.f32 %v11772_v53 }
 0xb15   :  { %v23699_v23 = vpop.eup %20138  ;;  %v11782_v61 = vmul.f32 1.442695, %v11727_v40 }
 0xb16   :  { %v11691_v22 = vpop.xlane.xlu0 %11690  ;;  %v11875_v13 = vsel %vm1865_vm6, %v23699_v23, 0.0  ;;  %v23705_v55 = vpop.eup %20140 }
 0xb17   :  { %20150 = vpow2.f32 %v11782_v61  ;;  %v11731_v0 = vsub.f32 %v23581_v59, %v11691_v22  ;;  %v11688_v12 = vpop.xlane.xlu1 %11687  ;;  %11876 = vadd.xlane.f32.xlu0 %v11875_v13  ;;  %11861 = vadd.xlane.f32.xlu1 %v11860_v2  ;;  %v11842_v49 = vsel %vm1861_vm7, %v23705_v55, 0.0 }
 0xb18   :  { %20152 = vpow2.f32 %v11792_v42  ;;  %v11730_v14 = vsub.f32 %v23583_v62, %v11688_v12 }
 0xb19   :  { %v23708_v7 = vpop.eup %20142  ;;  %20154 = vpow2.f32 %v11780_v38  ;;  %v11790_v52 = vmul.f32 1.442695, %v11731_v0 }
 0xb1a   :  { %v11857_v39 = vsel %vm1865_vm6, %v23708_v7, 0.0  ;;  %v23715_v11 = vpop.eup %20144  ;;  %v11788_v43 = vmul.f32 1.442695, %v11730_v14 }
 0xb1b   :  { %11858 = vadd.xlane.f32.xlu0 %v11857_v39  ;;  %11843 = vadd.xlane.f32.xlu1 %v11842_v49  ;;  %20156 = vpow2.f32 %v11790_v52  ;;  %v11872_v62 = vsel %vm1861_vm7, %v23715_v11, 0.0 }
 0xb1c   :  { %20158 = vpow2.f32 %v11788_v43 }
 0xb1d   :  { %v23717_v59 = vpop.eup %20146 }
 0xb1e   :  { %v11703_v53 = vpop.xlane.xlu0 %11702  ;;  %v11887_v36 = vsel %vm1865_vm6, %v23717_v59, 0.0  ;;  %v23723_v47 = vpop.eup %20148 }
 0xb1f   :  { %v11735_v19 = vsub.f32 %v23589_v6, %v11703_v53  ;;  %11888 = vadd.xlane.f32.xlu0 %v11887_v36  ;;  %11873 = vadd.xlane.f32.xlu1 %v11872_v62  ;;  %v11700_v5 = vpop.xlane.xlu1 %11699  ;;  %v11854_v13 = vsel %vm1861_vm7, %v23723_v47, 0.0  ;;  %v25934_v36 = vld [vmem:[#allocation72_spill] sm:$0xff] }
 0xb20   :  { %v11734_v30 = vsub.f32 %v23591_v21, %v11700_v5  ;;  %v25937_v5 = vld [vmem:[#allocation73_spill] sm:$0xff] }
 0xb21   :  { %v23727_v40 = vpop.eup %20150  ;;  %v11798_v42 = vmul.f32 1.442695, %v11735_v19 }
 0xb22   :  { %v23729_v38 = vpop.eup %20152  ;;  %v11796_v61 = vmul.f32 1.442695, %v11734_v30  ;;  %v11869_v22 = vsel %vm1865_vm6, %v23727_v40, 0.0  ;;  %v11805_v62 = vpop.xlane.xlu0 %11804 }
 0xb23   :  { %v23735_v2 = vpop.eup %20154  ;;  %20160 = vpow2.f32 %v11798_v42  ;;  %11870 = vadd.xlane.f32.xlu0 %v11869_v22  ;;  %11855 = vadd.xlane.f32.xlu1 %v11854_v13  ;;  %v11884_v21 = vsel %vm1861_vm7, %v23729_v38, 0.0  ;;  %v23769_v19 = vpop.permute.xlu1 %19656  ;;  %v19634_v42 = vunpack.i.h.bf16 %v23547_v44  ;;  %v25938_v22 = vld [vmem:[#allocation76_spill] sm:$0xff] }
 0xb24   :  { %20162 = vpow2.f32 %v11796_v61  ;;  %v11866_v6 = vsel %vm1861_vm7, %v23735_v2, 0.0  ;;  %v19633_v61 = vunpack.i.l.bf16 %v23547_v44 }
 0xb25   :  { %v23741_v0 = vpop.eup %20156  ;;  %20164 = vrcp.f32 %v11805_v62  ;;  %v19653_v62 = vunpack.i.l.bf16 %v23551_v57 }
 0xb26   :  { %v11881_v12 = vsel %vm1865_vm6, %v23741_v0, 0.0  ;;  %v23745_v52 = vpop.eup %20158 }
 0xb27   :  { %11867 = vadd.xlane.f32.xlu0 %v11866_v6  ;;  %11885 = vadd.xlane.f32.xlu1 %v11884_v21  ;;  %v11878_v39 = vsel %vm1861_vm7, %v23745_v52, 0.0  ;;  %v25939_v6 = vld [vmem:[#allocation70_spill] sm:$0xff] }
 0xb2b   :  { %11882 = vadd.xlane.f32.xlu0 %v11881_v12  ;;  %v18949_v12 = vpack.c.bf16 %v19634_v42, %v19633_v61  ;;  %v25955_v42 = vld [vmem:[#allocation78_spill] sm:$0xff] }
 0xb2d   :  { %v23747_v14 = vpop.eup %20160 }
 0xb2e   :  { %v11893_v49 = vsel %vm1865_vm6, %v23747_v14, 0.0  ;;  %v23753_v43 = vpop.eup %20162 }
 0xb2f   :  { %11879 = vadd.xlane.f32.xlu0 %v11878_v39  ;;  %11894 = vadd.xlane.f32.xlu1 %v11893_v49  ;;  %v11890_v53 = vsel %vm1861_vm7, %v23753_v43, 0.0  ;;  %v19644_v39 = vunpack.i.h.bf16 %v23539_v10  ;;  %v19643_v49 = vunpack.i.l.bf16 %v23539_v10 }
 0xb33   :  { %11891 = vadd.xlane.f32.xlu0 %v11890_v53 }
 0xb40   :  { %19666 = vrot.lane.b32.xlu1 %v25870_v58, %s20415_s28  ;;  %v25936_v58 = vld [vmem:[#allocation69_spill] sm:$0xff] }
 0xb44   :  { %19671 = vrot.lane.b32.xlu1 %v20763_v4, %s20415_s28  ;;  %v25935_v4 = vld [vmem:[#allocation81_spill] sm:$0xff] }
 0xb48   :  { %19676 = vrot.lane.b32.xlu1 %v25879_v32, %s20415_s28 }
 0xb49   :  { %19661 = vrot.lane.b32.xlu0 %v20733_v33, %s20415_s28 }
 0xb4c   :  { %19681 = vrot.lane.b32.xlu1 %v25859_v35, %s20415_s28  ;;  %v11817_v35 = vpop.xlane.xlu0 %11816 }
 0xb4d   :  { %13400 = vrot.lane.b32.xlu0 %v25934_v36, %s20416_s29  ;;  %v18961_v36 = vpack.c.bf16 %v19644_v39, %v19643_v49  ;;  %v25960_v39 = vld [vmem:[#allocation26_spill] sm:$0xff] }
 0xb50   :  { %19686 = vrot.lane.b32.xlu1 %v25889_v60, %s20415_s28  ;;  %v11829_v60 = vpop.xlane.xlu0 %11828 }
 0xb51   :  { %13404 = vrot.lane.b32.xlu0 %v25935_v4, %s20416_s29  ;;  %v25942_v4 = vld [vmem:[#allocation35_spill] sm:$0xff] }
 0xb54   :  { %13528 = vrot.lane.b32.xlu1 %v23284_v16, %s20417_s30  ;;  %v11802_v33 = vpop.xlane.xlu1 %11801 }
 0xb55   :  { %20166 = vrcp.f32 %v11802_v33  ;;  %13532 = vrot.lane.b32.xlu0 %v23407_v27, %s20417_s30  ;;  %v20165_v27 = vpop.eup %20164  ;;  %v25946_v33 = vld [vmem:[#allocation79_spill] sm:$0xff] }
 0xb56   :  { %20168 = vrcp.f32 %v11817_v35  ;;  %v25947_v35 = vld [vmem:[#allocation25_spill] sm:$0xff] }
 0xb58   :  { %13402 = vrot.lane.b32.xlu1 %v25936_v58, %s20416_s29  ;;  %v11814_v32 = vpop.xlane.xlu1 %11813  ;;  %v25948_v58 = vld [vmem:[#allocation71_spill] sm:$0xff] }
 0xb59   :  { %20170 = vrcp.f32 %v11814_v32  ;;  %13406 = vrot.lane.b32.xlu0 %v25937_v5, %s20416_s29  ;;  %v25949_v32 = vld [vmem:[#allocation2_spill] sm:$0xff] }
 0xb5a   :  { %20172 = vrcp.f32 %v11829_v60  ;;  %v25950_v60 = vld [vmem:[#allocation93_spill] sm:$0xff]  ;;  %v25951_v5 = vld [vmem:[#allocation98_spill] sm:$0xff] }
 0xb5c   :  { %13530 = vrot.lane.b32.xlu1 %v23282_v34, %s20417_s30  ;;  %v11826_v16 = vpop.xlane.xlu1 %11825  ;;  %v11929_v34 = vmul.f32 %v20165_v27, %v23595_v63  ;;  %v25940_v63 = vld [vmem:[#allocation77_spill] sm:$0xff]  ;;  %v25953_v27 = vld [vmem:[#allocation80_spill] sm:$0xff] }
 0xb5d   :  { %20174 = vrcp.f32 %v11826_v16  ;;  %13534 = vrot.lane.b32.xlu0 %v23405_v9, %s20417_s30  ;;  %v25952_v16 = vld [vmem:[#allocation87_spill] sm:$0xff] }
 0xb5f   :  { %v20167_v30 = vpop.eup %20166 }
 0xb60   :  { %13408 = vrot.lane.b32.xlu1 %v25938_v22, %s20416_s29  ;;  %v11928_v13 = vmul.f32 %v20167_v30, %v23615_v20  ;;  %v20169_v21 = vpop.eup %20168  ;;  %v25954_v30 = vld [vmem:[#allocation16_spill] sm:$0xff]  ;;  %v25956_v22 = vld [vmem:[#allocation3_spill] sm:$0xff] }
 0xb61   :  { %13410 = vrot.lane.b32.xlu0 %v25939_v6, %s20416_s29  ;;  %v11933_v20 = vmul.f32 %v20169_v21, %v23601_v56 }
 0xb62   :  { %18053 = vmatprep.mubr.msk.f32.mxu0 %vm1861_vm7, %v11928_v13  ;;  %v25957_v13 = vld [vmem:[#allocation95_spill] sm:$0xff] }
 0xb63   :  { %v20171_v9 = vpop.eup %20170  ;;  %18054 = vmatmul.mubr.msk.f32.vlgmr.msra.gmra.mrb[130].mxu0 %vm1861_vm7, %v11929_v34  ;;  %v25958_v34 = vld [vmem:[#allocation19_spill] sm:$0xff] }
 0xb64   :  { %18942 = vmatpush3.bf16.msk.msra.mxu0 %vm20941_vm5, %v23382_v51  ;;  %13536 = vrot.lane.b32.xlu1 %v23288_v46, %s20417_s30  ;;  %v11932_v44 = vmul.f32 %v20171_v9, %v23619_v41  ;;  %v20173_v10 = vpop.eup %20172  ;;  %v19654_v51 = vunpack.i.h.bf16 %v23551_v57  ;;  %v25941_v46 = vld [vmem:[#allocation83_spill] sm:$0xff] }
 0xb65   :  { %18951 = vmatprep.subr.msk.bf16.mxu0 %vm20941_vm5, %v18949_v12  ;;  %13414 = vrot.lane.b32.xlu0 %v25940_v63, %s20416_s29  ;;  %v11937_v56 = vmul.f32 %v20173_v10, %v23611_v54  ;;  %v25944_v54 = vld [vmem:[#allocation22_spill] sm:$0xff]  ;;  %v25959_v9 = vld [vmem:[#allocation23_spill] sm:$0xff] }
 0xb66   :  { %18067 = vmatprep.mubr.msk.f32.mxu0 %vm1861_vm7, %v11932_v44  ;;  %v23825_v57 = vpack.c.bf16 %v19654_v51, %v19653_v62  ;;  %v25961_v44 = vld [vmem:[#allocation82_spill] sm:$0xff]  ;;  %v25964_v62 = vld [vmem:[#allocation104_spill] sm:$0xff] }
 0xb67   :  { %v20175_v53 = vpop.eup %20174  ;;  %18068 = vmatmul.mubr.msk.f32.vlgmr.msra.gmra.mrb[132].mxu0 %vm1861_vm7, %v11933_v20  ;;  %v25962_v20 = vld [vmem:[#allocation89_spill] sm:$0xff] }
 0xb68   :  { %18954 = vmatpush3.bf16.msk.msra.mxu0 %vm20941_vm5, %v18949_v12  ;;  %13412 = vrot.lane.b32.xlu1 %v25941_v46, %s20416_s29  ;;  %v11936_v41 = vmul.f32 %v20175_v53, %v23623_v28  ;;  %v25945_v28 = vld [vmem:[#allocation5_spill] sm:$0xff]  ;;  %v25963_v53 = vld [vmem:[#allocation36_spill] sm:$0xff]  ;;  %v19639_v46 = vunpack.i.h.bf16 %v25964_v62 }
 0xb69   :  { %18963 = vmatprep.subr.msk.bf16.mxu0 %vm20941_vm5, %v18961_v36  ;;  %13542 = vrot.lane.b32.xlu0 %v23413_v26, %s20417_s30  ;;  %v25943_v26 = vld [vmem:[#allocation14_spill] sm:$0xff] }
 0xb6a   :  { %18081 = vmatprep.mubr.msk.f32.mxu0 %vm1861_vm7, %v11936_v41  ;;  %v19638_v41 = vunpack.i.l.bf16 %v25964_v62  ;;  %v19659_v62 = vunpack.i.h.bf16 %v23769_v19 }
 0xb6b   :  { %18082 = vmatmul.mubr.msk.f32.vlgmr.msra.gmra.mrb[134].mxu0 %vm1861_vm7, %v11937_v56 }
 0xb6c   :  { %18966 = vmatpush3.bf16.msk.msra.mxu0 %vm20941_vm5, %v18961_v36  ;;  %13540 = vrot.lane.b32.xlu1 %v25942_v4, %s20417_s30  ;;  %v25965_v4 = vld [vmem:[#allocation86_spill] sm:$0xff] }
 0xb6d   :  { %18975 = vmatprep.subr.msk.bf16.mxu0 %vm20941_vm5, %v23825_v57  ;;  %13544 = vrot.lane.b32.xlu0 %v25943_v26, %s20417_s30 }
 0xb70   :  { %13538 = vrot.lane.b32.xlu1 %v25944_v54, %s20417_s30  ;;  %v25966_v54 = vld [vmem:[#allocation9_spill] sm:$0xff] }
 0xb71   :  { %13420 = vrot.lane.b32.xlu0 %v25945_v28, %s20416_s29 }
 0xb74   :  { %13416 = vrot.lane.b32.xlu1 %v25946_v33, %s20416_s29 }
 0xb75   :  { %13548 = vrot.lane.b32.xlu0 %v25947_v35, %s20417_s30  ;;  %v18955_v35 = vpack.c.bf16 %v19639_v46, %v19638_v41  ;;  %v19658_v46 = vunpack.i.l.bf16 %v23769_v19 }
 0xb78   :  { %13418 = vrot.lane.b32.xlu1 %v25948_v58, %s20416_s29 }
 0xb79   :  { %13422 = vrot.lane.b32.xlu0 %v25949_v32, %s20416_s29  ;;  %v25967_v32 = vld [vmem:[#allocation96_spill] sm:$0xff] }
 0xb7c   :  { %13546 = vrot.lane.b32.xlu1 %v25950_v60, %s20417_s30 }
 0xb7d   :  { %13550 = vrot.lane.b32.xlu0 %v25951_v5, %s20417_s30 }
 0xb80   :  { %13424 = vrot.lane.b32.xlu1 %v25952_v16, %s20416_s29 }
 0xb81   :  { %13426 = vrot.lane.b32.xlu0 %v25953_v27, %s20416_s29 }
 0xb84   :  { %13552 = vrot.lane.b32.xlu1 %v25954_v30, %s20417_s30  ;;  %v11811_v61 = vpop.xlane.xlu0 %11810 }
 0xb85   :  { %13430 = vrot.lane.b32.xlu0 %v25955_v42, %s20416_s29  ;;  %20176 = vrcp.f32 %v11811_v61  ;;  %v25970_v61 = vld [vmem:[#allocation15_spill] sm:$0xff] }
 0xb88   :  { %13428 = vrot.lane.b32.xlu1 %v25956_v22, %s20416_s29  ;;  %v11841_v6 = vpop.xlane.xlu0 %11840  ;;  %v19649_v22 = vunpack.i.h.bf16 %v25970_v61 }
 0xb89   :  { %13558 = vrot.lane.b32.xlu0 %v25957_v13, %s20417_s30  ;;  %v19648_v13 = vunpack.i.l.bf16 %v25970_v61 }
 0xb8c   :  { %13556 = vrot.lane.b32.xlu1 %v25958_v34, %s20417_s30  ;;  %v11808_v21 = vpop.xlane.xlu1 %11807  ;;  %v25971_v34 = vld [vmem:[#allocation12_spill] sm:$0xff] }
 0xb8d   :  { %20178 = vrcp.f32 %v11808_v21  ;;  %13560 = vrot.lane.b32.xlu0 %v25959_v9, %s20417_s30 }
 0xb8e   :  { %20180 = vrcp.f32 %v11841_v6 }
 0xb8f   :  { %v20177_v36 = vpop.eup %20176 }
 0xb90   :  { %v11823_v12 = vpop.xlane.xlu0 %11822  ;;  %13554 = vrot.lane.b32.xlu1 %v25960_v39, %s20417_s30  ;;  %v11838_v49 = vpop.xlane.xlu1 %11837  ;;  %v11931_v28 = vmul.f32 %v20177_v36, %v23633_v24  ;;  %v25969_v24 = vld [vmem:[#allocation27_spill] sm:$0xff]  ;;  %v25976_v36 = vld [vmem:[#allocation20_spill] sm:$0xff] }
 0xb91   :  { %13436 = vrot.lane.b32.xlu0 %v25961_v44, %s20416_s29  ;;  %20182 = vrcp.f32 %v11838_v49  ;;  %v18967_v49 = vpack.c.bf16 %v19649_v22, %v19648_v13  ;;  %v25983_v22 = vld [vmem:[#allocation4_spill] sm:$0xff]  ;;  %v25984_v13 = vld [vmem:[#allocation90_spill] sm:$0xff] }
 0xb92   :  { %20184 = vrcp.f32 %v11823_v12 }
 0xb94   :  { %v11853_v63 = vpop.xlane.xlu0 %11852  ;;  %13432 = vrot.lane.b32.xlu1 %v25962_v20, %s20416_s29  ;;  %v11820_v10 = vpop.xlane.xlu1 %11819 }
 0xb95   :  { %13564 = vrot.lane.b32.xlu0 %v25963_v53, %s20417_s30  ;;  %20186 = vrcp.f32 %v11820_v10  ;;  %v25975_v53 = vld [vmem:[#allocation91_spill] sm:$0xff] }
 0xb96   :  { %20188 = vrcp.f32 %v11853_v63  ;;  %v25973_v63 = vld [vmem:[#allocation30_spill] sm:$0xff] }
 0xb97   :  { %v20179_v51 = vpop.eup %20178 }
 0xb98   :  { %v11850_v56 = vpop.xlane.xlu0 %11849  ;;  %13434 = vrot.lane.b32.xlu1 %v25965_v4, %s20416_s29  ;;  %v11930_v26 = vmul.f32 %v20179_v51, %v23644_v3  ;;  %v20181_v33 = vpop.eup %20180  ;;  %v25968_v3 = vld [vmem:[#allocation94_spill] sm:$0xff] }
 0xb99   :  { %20190 = vrcp.f32 %v11850_v56  ;;  %13438 = vrot.lane.b32.xlu0 %v25966_v54, %s20416_s29  ;;  %v11941_v27 = vmul.f32 %v20181_v33, %v23639_v45  ;;  %v25972_v45 = vld [vmem:[#allocation8_spill] sm:$0xff]  ;;  %v25977_v56 = vld [vmem:[#allocation11_spill] sm:$0xff] }
 0xb9a   :  { %18060 = vmatprep.mubr.msk.f32.mxu1 %vm1861_vm7, %v11930_v26  ;;  %v25978_v26 = vld [vmem:[#allocation31_spill] sm:$0xff] }
 0xb9b   :  { %18061 = vmatmul.mubr.msk.f32.vlgmr.msra.gmra.mrb[118].mxu1 %vm1861_vm7, %v11931_v28  ;;  %v20183_v58 = vpop.eup %20182 }
 0xb9c   :  { %18948 = vmatpush3.bf16.msk.msra.mxu1 %vm20941_vm5, %v25967_v32  ;;  %v11835_v60 = vpop.xlane.xlu0 %11834  ;;  %13562 = vrot.lane.b32.xlu1 %v25968_v3, %s20417_s30  ;;  %v23892_v5 = vpop.xlane.xlu1 %11864  ;;  %v11940_v16 = vmul.f32 %v20183_v58, %v23649_v18  ;;  %v25979_v58 = vld [vmem:[#allocation18_spill] sm:$0xff] }
 0xb9d   :  { %18957 = vmatprep.subr.msk.bf16.mxu1 %vm20941_vm5, %v18955_v35  ;;  %13566 = vrot.lane.b32.xlu0 %v25969_v24, %s20417_s30  ;;  %v20185_v30 = vpop.eup %20184  ;;  %20192 = vrcp.f32 %v11835_v60  ;;  %v25980_v60 = vld [vmem:[#allocation92_spill] sm:$0xff] }
 0xb9e   :  { %18095 = vmatprep.mubr.msk.f32.mxu0 %vm1861_vm7, %v11940_v16  ;;  %v11935_v12 = vmul.f32 %v20185_v30, %v23652_v1  ;;  %v25981_v16 = vld [vmem:[#allocation7_spill] sm:$0xff] }
 0xb9f   :  { %v20187_v42 = vpop.eup %20186  ;;  %18096 = vmatmul.mubr.msk.f32.vlgmr.msra.gmra.mrb[136].mxu0 %vm1861_vm7, %v11941_v27  ;;  %v25982_v27 = vld [vmem:[#allocation21_spill] sm:$0xff] }
 0xba0   :  { %v11847_v6 = vpop.xlane.xlu0 %11846  ;;  %13440 = vrot.lane.b32.xlu1 %v25971_v34, %s20416_s29  ;;  %v11832_v21 = vpop.xlane.xlu1 %11831  ;;  %18978 = vmatpush3.bf16.msk.msra.mxu0 %vm20941_vm5, %v23825_v57  ;;  %v11934_v18 = vmul.f32 %v20187_v42, %v23659_v48  ;;  %v25974_v48 = vld [vmem:[#allocation84_spill] sm:$0xff] }
 0xba1   :  { %13442 = vrot.lane.b32.xlu0 %v25972_v45, %s20416_s29  ;;  %v20189_v9 = vpop.eup %20188  ;;  %20194 = vrcp.f32 %v11832_v21  ;;  %v25986_v45 = vld [vmem:[#allocation105_spill] sm:$0xff] }
 0xba2   :  { %18074 = vmatprep.mubr.msk.f32.mxu1 %vm1861_vm7, %v11934_v18  ;;  %v11945_v1 = vmul.f32 %v20189_v9, %v23662_v31 }
 0xba3   :  { %v20191_v39 = vpop.eup %20190  ;;  %18075 = vmatmul.mubr.msk.f32.vlgmr.msra.gmra.mrb[120].mxu1 %vm1861_vm7, %v11935_v12 }
 0xba4   :  { %v23915_v44 = vpop.xlane.xlu0 %11876  ;;  %13568 = vrot.lane.b32.xlu1 %v25973_v63, %s20417_s30  ;;  %v11862_v57 = vpop.xlane.xlu1 %11861  ;;  %v11944_v20 = vmul.f32 %v20191_v39, %v23669_v50  ;;  %18960 = vmatpush3.bf16.msk.msra.mxu1 %vm20941_vm5, %v18955_v35  ;;  %v18979_v35 = vpack.c.bf16 %v19659_v62, %v19658_v46  ;;  %v25987_v39 = vld [vmem:[#allocation88_spill] sm:$0xff] }
 0xba5   :  { %13446 = vrot.lane.b32.xlu0 %v25974_v48, %s20416_s29  ;;  %18969 = vmatprep.subr.msk.bf16.mxu1 %vm20941_vm5, %v18967_v49  ;;  %20196 = vrcp.f32 %v11862_v57 }
 0xba6   :  { %18109 = vmatprep.mubr.msk.f32.mxu0 %vm1861_vm7, %v11944_v20  ;;  %20198 = vrcp.f32 %v11847_v6 }
 0xba7   :  { %18110 = vmatmul.mubr.msk.f32.vlgmr.msra.gmra.mrb[138].mxu0 %vm1861_vm7, %v11945_v1  ;;  %v20193_v51 = vpop.eup %20192 }
 0xba8   :  { %v11859_v10 = vpop.xlane.xlu0 %11858  ;;  %13444 = vrot.lane.b32.xlu1 %v25975_v53, %s20416_s29  ;;  %v11844_v50 = vpop.xlane.xlu1 %11843  ;;  %v11939_v28 = vmul.f32 %v20193_v51, %v23675_v17 }
 0xba9   :  { %13574 = vrot.lane.b32.xlu0 %v25976_v36, %s20417_s30  ;;  %20200 = vrcp.f32 %v11844_v50 }
 0xbaa   :  { %20202 = vrcp.f32 %v11859_v10  ;;  %v25989_v10 = vld [vmem:[#allocation38_spill] sm:$0xff] }
 0xbab   :  { %v20195_v31 = vpop.eup %20194 }
 0xbac   :  { %v23935_v41 = vpop.xlane.xlu0 %11888  ;;  %13572 = vrot.lane.b32.xlu1 %v25977_v56, %s20417_s30  ;;  %v11874_v4 = vpop.xlane.xlu1 %11873  ;;  %v11938_v54 = vmul.f32 %v20195_v31, %v23685_v29 }
 0xbad   :  { %13576 = vrot.lane.b32.xlu0 %v25978_v26, %s20417_s30 }
 0xbae   :  { %18088 = vmatprep.mubr.msk.f32.mxu1 %vm1861_vm7, %v11938_v54 }
 0xbaf   :  { %v20197_v33 = vpop.eup %20196  ;;  %18089 = vmatmul.mubr.msk.f32.vlgmr.msra.gmra.mrb[122].mxu1 %vm1861_vm7, %v11939_v28 }
 0xbb0   :  { %v11871_v19 = vpop.xlane.xlu0 %11870  ;;  %13570 = vrot.lane.b32.xlu1 %v25979_v58, %s20417_s30  ;;  %v11856_v32 = vpop.xlane.xlu1 %11855  ;;  %18972 = vmatpush3.bf16.msk.msra.mxu1 %vm20941_vm5, %v18967_v49  ;;  %v11948_v17 = vmul.f32 %v20197_v33, %v23696_v25 }
 0xbb1   :  { %13452 = vrot.lane.b32.xlu0 %v25980_v60, %s20416_s29  ;;  %20204 = vrcp.f32 %v11856_v32  ;;  %18981 = vmatprep.subr.msk.bf16.mxu1 %vm20941_vm5, %v18979_v35  ;;  %v20199_v29 = vpop.eup %20198  ;;  %v25991_v60 = vld [vmem:[#allocation33_spill] sm:$0xff] }
 0xbb2   :  { %18123 = vmatprep.mubr.msk.f32.mxu0 %vm1861_vm7, %v11948_v17  ;;  %v11943_v25 = vmul.f32 %v20199_v29, %v23689_v15  ;;  %v25985_v15 = vld [vmem:[#allocation102_spill] sm:$0xff] }
 0xbb3   :  { %v20201_v3 = vpop.eup %20200 }
 0xbb4   :  { %v11868_v24 = vpop.xlane.xlu0 %11867  ;;  %13448 = vrot.lane.b32.xlu1 %v25981_v16, %s20416_s29  ;;  %v11942_v30 = vmul.f32 %v20201_v3, %v23705_v55  ;;  %v11886_v42 = vpop.xlane.xlu1 %11885 }
 0xbb5   :  { %20206 = vrcp.f32 %v11868_v24  ;;  %13580 = vrot.lane.b32.xlu0 %v25982_v27, %s20417_s30  ;;  %v20203_v6 = vpop.eup %20202 }
 0xbb6   :  { %18102 = vmatprep.mubr.msk.f32.mxu1 %vm1861_vm7, %v11942_v30  ;;  %20208 = vrcp.f32 %v11871_v19  ;;  %v11947_v9 = vmul.f32 %v20203_v6, %v23708_v7 }
 0xbb7   :  { %18103 = vmatmul.mubr.msk.f32.vlgmr.msra.gmra.mrb[124].mxu1 %vm1861_vm7, %v11943_v25 }
 0xbb8   :  { %v11883_v61 = vpop.xlane.xlu0 %11882  ;;  %13450 = vrot.lane.b32.xlu1 %v25983_v22, %s20416_s29  ;;  %18984 = vmatpush3.bf16.msk.msra.mxu1 %vm20941_vm5, %v18979_v35 }
 0xbb9   :  { %13454 = vrot.lane.b32.xlu0 %v25984_v13, %s20416_s29 }
 0xbbb   :  { %v20205_v55 = vpop.eup %20204 }
 0xbbc   :  { %v11880_v34 = vpop.xlane.xlu0 %11879  ;;  %13578 = vrot.lane.b32.xlu1 %v25985_v15, %s20417_s30  ;;  %v11895_v21 = vpop.xlane.xlu1 %11894  ;;  %v11946_v18 = vmul.f32 %v20205_v55, %v23723_v47 }
 0xbbd   :  { %20210 = vrcp.f32 %v11880_v34  ;;  %13582 = vrot.lane.b32.xlu0 %v25986_v45, %s20417_s30 }
 0xbbe   :  { %20212 = vrcp.f32 %v23892_v5  ;;  %18116 = vmatprep.mubr.msk.f32.mxu1 %vm1861_vm7, %v11946_v18  ;;  %v25988_v5 = vld [vmem:[#allocation85_spill] sm:$0xff] }
 0xbbf   :  { %v20207_v12 = vpop.eup %20206  ;;  %20214 = vrcp.f32 %v11874_v4  ;;  %18117 = vmatmul.mubr.msk.f32.vlgmr.msra.gmra.mrb[126].mxu1 %vm1861_vm7, %v11947_v9  ;;  %v25990_v4 = vld [vmem:[#allocation101_spill] sm:$0xff] }
 0xbc0   :  { %13456 = vrot.lane.b32.xlu1 %v25987_v39, %s20416_s29  ;;  %v11892_v49 = vpop.xlane.xlu0 %11891  ;;  %v19667_v63 = vpop.permute.xlu1 %19666  ;;  %v11950_v57 = vmul.f32 %v20207_v12, %v23735_v2  ;;  %20216 = vrcp.f32 %v23915_v44 }
 0xbc1   :  { %v19669_v47 = vunpack.i.h.bf16 %v19667_v63  ;;  %v19668_v20 = vunpack.i.l.bf16 %v19667_v63  ;;  %13458 = vrot.lane.b32.xlu0 %v25988_v5, %s20416_s29  ;;  %20218 = vrcp.f32 %v11886_v42  ;;  %v20209_v48 = vpop.eup %20208 }
 0xbc2   :  { %18130 = vmatprep.mubr.msk.f32.mxu1 %vm1861_vm7, %v11950_v57  ;;  %20220 = vrcp.f32 %v11883_v61  ;;  %v11951_v62 = vmul.f32 %v20209_v48, %v23727_v40 }
 0xbc3   :  { %v18991_v7 = vpack.c.bf16 %v19669_v47, %v19668_v20  ;;  %20222 = vrcp.f32 %v11892_v49 }
 0xbc4   :  { %v19662_v1 = vpop.permute.xlu0 %19661  ;;  %13584 = vrot.lane.b32.xlu1 %v25989_v10, %s20417_s30  ;;  %v19672_v53 = vpop.permute.xlu1 %19671  ;;  %20224 = vrcp.f32 %v23935_v41 }
 0xbc5   :  { %v19664_v2 = vunpack.i.h.bf16 %v19662_v1  ;;  %v19663_v50 = vunpack.i.l.bf16 %v19662_v1  ;;  %v19674_v44 = vunpack.i.h.bf16 %v19672_v53  ;;  %v19673_v36 = vunpack.i.l.bf16 %v19672_v53  ;;  %18993 = vmatprep.subr.msk.bf16.mxu1 %vm20941_vm5, %v18991_v7 }
 0xbc6   :  { %18996 = vmatpush3.bf16.msk.msra.mxu1 %vm20941_vm5, %v18991_v7  ;;  %20226 = vrcp.f32 %v11895_v21 }
 0xbc7   :  { %v20211_v51 = vpop.eup %20210  ;;  %v18985_v31 = vpack.c.bf16 %v19664_v2, %v19663_v50  ;;  %v18997_v33 = vpack.c.bf16 %v19674_v44, %v19673_v36 }
 0xbc8   :  { %v20213_v46 = vpop.eup %20212  ;;  %v23993_v56 = vpop.permute.xlu0 %13400  ;;  %13460 = vrot.lane.b32.xlu1 %v25990_v4, %s20416_s29  ;;  %v11954_v54 = vmul.f32 %v20211_v51, %v23745_v52 }
 0xbc9   :  { %v19677_v26 = vpop.permute.xlu1 %19676  ;;  %v20215_v28 = vpop.eup %20214  ;;  %18987 = vmatprep.subr.msk.bf16.mxu0 %vm20941_vm5, %v18985_v31  ;;  %18131 = vmatmul.mubr.msk.f32.vlgmr.msra.gmra.mrb[128].mxu1 %vm1861_vm7, %v11951_v62  ;;  %v11949_v52 = vmul.f32 %v20213_v46, %v23678_v37 }
 0xbca   :  { %v19679_v35 = vunpack.i.h.bf16 %v19677_v26  ;;  %v19678_v41 = vunpack.i.l.bf16 %v19677_v26  ;;  %18990 = vmatpush3.bf16.msk.msra.mxu0 %vm20941_vm5, %v18985_v31  ;;  %18144 = vmatprep.mubr.msk.f32.mxu1 %vm1861_vm7, %v11954_v54  ;;  %v20217_v40 = vpop.eup %20216  ;;  %v11952_v29 = vmul.f32 %v20215_v28, %v23715_v11 }
 0xbcb   :  { %18999 = vmatprep.subr.msk.bf16.mxu0 %vm20941_vm5, %v18997_v33  ;;  %v20219_v58 = vpop.eup %20218  ;;  %v11953_v11 = vmul.f32 %v20217_v40, %v23699_v23 }
 0xbcc   :  { %v19003_v19 = vpack.c.bf16 %v19679_v35, %v19678_v41  ;;  %v24007_v32 = vpop.permute.xlu0 %13404  ;;  %13588 = vrot.lane.b32.xlu1 %v25991_v60, %s20417_s30  ;;  %v20221_v3 = vpop.eup %20220  ;;  %v11956_v6 = vmul.f32 %v20219_v58, %v23729_v38  ;;  %v25992_v58 = vld [vmem:[#allocation65_spill] sm:$0xff] }
 0xbcd   :  { %v19682_v17 = vpop.permute.xlu1 %19681  ;;  %18124 = vmatmul.mubr.msk.f32.vlgmr.msra.gmra.mrb[140].mxu0 %vm1861_vm7, %v11949_v52  ;;  %v20223_v27 = vpop.eup %20222  ;;  %v11955_v61 = vmul.f32 %v20221_v3, %v23741_v0 }
 0xbce   :  { %v19684_v24 = vunpack.i.h.bf16 %v19682_v17  ;;  %v19683_v16 = vunpack.i.l.bf16 %v19682_v17  ;;  %19005 = vmatprep.subr.msk.bf16.mxu1 %vm20941_vm5, %v19003_v19  ;;  %19002 = vmatpush3.bf16.msk.msra.mxu0 %vm20941_vm5, %v18997_v33  ;;  %v20225_v30 = vpop.eup %20224  ;;  %v11958_v55 = vmul.f32 %v20223_v27, %v23753_v43 }
 0xbcf   :  { %18137 = vmatprep.mubr.msk.f32.mxu0 %vm1861_vm7, %v11952_v29  ;;  %19008 = vmatpush3.bf16.msk.msra.mxu1 %vm20941_vm5, %v19003_v19  ;;  %v11957_v0 = vmul.f32 %v20225_v30, %v23717_v59 }
 0xbd0   :  { %v19009_v37 = vpack.c.bf16 %v19684_v24, %v19683_v16  ;;  %v24021_v25 = vpop.permute.xlu0 %13532  ;;  %v20227_v34 = vpop.eup %20226 }
 0xbd1   :  { %v19687_v42 = vpop.permute.xlu1 %19686  ;;  %18138 = vmatmul.mubr.msk.f32.vlgmr.msra.gmra.mrb[142].mxu0 %vm1861_vm7, %v11953_v11  ;;  %v11959_v38 = vmul.f32 %v20227_v34, %v23747_v14  ;;  %v25994_v11 = vld [vmem:[#allocation68_spill] sm:$0xff]  ;;  %v25998_v34 = vld [vmem:[#allocation67_spill] sm:$0xff] }
 0xbd2   :  { %v19689_v22 = vunpack.i.h.bf16 %v19687_v42  ;;  %v19688_v13 = vunpack.i.l.bf16 %v19687_v42  ;;  %19011 = vmatprep.subr.msk.bf16.mxu0 %vm20941_vm5, %v19009_v37  ;;  %18145 = vmatmul.mubr.msk.f32.vlgmr.msra.gmra.mrb[130].mxu1 %vm1861_vm7, %v11955_v61  ;;  %v25995_v42 = vld [vmem:[#allocation55_spill] sm:$0xff] }
 0xbd3   :  { %19014 = vmatpush3.bf16.msk.msra.mxu0 %vm20941_vm5, %v19009_v37  ;;  %18151 = vmatprep.mubr.msk.f32.mxu0 %vm1861_vm7, %v11956_v6 }
 0xbd4   :  { %v19015_v23 = vpack.c.bf16 %v19689_v22, %v19688_v13  ;;  %18158 = vmatprep.mubr.msk.f32.mxu1 %vm1861_vm7, %v11958_v55  ;;  %v24035_v15 = vpop.permute.xlu0 %13406 }
 0xbd5   :  { %v24037_v21 = vpop.permute.xlu1 %13528 }
 0xbd6   :  { %18152 = vmatmul.mubr.msk.f32.vlgmr.msra.gmra.mrb[144].mxu0 %vm1861_vm7, %v11957_v0  ;;  %19017 = vmatprep.subr.msk.bf16.mxu1 %vm20941_vm5, %v19015_v23 }
 0xbd7   :  { %19020 = vmatpush3.bf16.msk.msra.mxu1 %vm20941_vm5, %v19015_v23 }
 0xbd8   :  { %v24045_v43 = vpop.permute.xlu0 %13534 }
 0xbd9   :  { %v24047_v45 = vpop.permute.xlu1 %13402 }
 0xbda   :  { %18159 = vmatmul.mubr.msk.f32.vlgmr.msra.gmra.mrb[132].mxu1 %vm1861_vm7, %v11959_v38 }
 0xbdc   :  { %v24050_v59 = vpop.permute.xlu0 %13410 }
 0xbdd   :  { %v24052_v18 = vpop.permute.xlu1 %13530 }
 0xbe0   :  { %v24054_v9 = vpop.permute.xlu0 %13414 }
 0xbe1   :  { %v24056_v12 = vpop.permute.xlu1 %13408 }
 0xbe4   :  { %v24058_v39 = vpop.permute.xlu0 %13542 }
 0xbe5   :  { %v24060_v8 = vpop.permute.xlu1 %13536 }
 0xbe8   :  { %v24062_v49 = vpop.permute.xlu0 %13544 }
 0xbe9   :  { %v24064_v14 = vpop.permute.xlu1 %13412 }
 0xbec   :  { %v24066_v63 = vpop.permute.xlu0 %13420 }
 0xbed   :  { %v24068_v57 = vpop.permute.xlu1 %13540 }
 0xbf0   :  { %v24070_v47 = vpop.permute.xlu0 %13548 }
 0xbf1   :  { %v24072_v20 = vpop.permute.xlu1 %13538 }
 0xbf4   :  { %v24074_v5 = vpop.permute.xlu0 %13422 }
 0xbf5   :  { %v24076_v7 = vpop.permute.xlu1 %13416 }
 0xbf8   :  { %v24078_v48 = vpop.permute.xlu0 %13550 }
 0xbf9   :  { %v24080_v1 = vpop.permute.xlu1 %13418 }
 0xbfc   :  { %v24082_v10 = vpop.permute.xlu0 %13426 }
 0xbfd   :  { %v24084_v53 = vpop.permute.xlu1 %13546 }
 0xc00   :  { %v24086_v2 = vpop.permute.xlu0 %13430 }
 0xc01   :  { %v24088_v50 = vpop.permute.xlu1 %13424 }
 0xc04   :  { %v24090_v44 = vpop.permute.xlu0 %13558 }
 0xc05   :  { %v24092_v36 = vpop.permute.xlu1 %13552 }
 0xc08   :  { %v24094_v51 = vpop.permute.xlu0 %13560 }
 0xc09   :  { %v24096_v31 = vpop.permute.xlu1 %13428 }
 0xc0c   :  { %v24098_v62 = vpop.permute.xlu0 %13436 }
 0xc0d   :  { %v24100_v46 = vpop.permute.xlu1 %13556 }
 0xc10   :  { %v24102_v4 = vpop.permute.xlu0 %13564 }
 0xc11   :  { %v24104_v26 = vpop.permute.xlu1 %13554 }
 0xc14   :  { %v24106_v54 = vpop.permute.xlu0 %13438 }
 0xc15   :  { %v24108_v28 = vpop.permute.xlu1 %13432 }
 0xc18   :  { %v24110_v33 = vpop.permute.xlu0 %13566 }
 0xc19   :  { %v24112_v35 = vpop.permute.xlu1 %13434 }
 0xc1c   :  { %v13443_v41 = vpop.permute.xlu0 %13442 }
 0xc1d   :  { %v24114_v40 = vpop.permute.xlu1 %13562  ;;  %v13773_v61 = vsel %vm425_vm1, %v25995_v42, %v13443_v41  ;;  %v26002_v42 = vld [vmem:[#allocation57_spill] sm:$0xff] }
 0xc20   :  { %v13447_v19 = vpop.permute.xlu0 %13446 }
 0xc21   :  { %v24116_v52 = vpop.permute.xlu1 %13440  ;;  %v13775_v60 = vsel %vm425_vm1, %v25992_v58, %v13447_v19  ;;  %v25999_v19 = vld [vmem:[#allocation62_spill] sm:$0xff] }
 0xc24   :  { %v13575_v17 = vpop.permute.xlu0 %13574 }
 0xc25   :  { %v24120_v29 = vpop.permute.xlu1 %13568  ;;  %v24123_v3 = vsel %vm13784_vm8, %v13775_v60, %v13575_v17 }
 0xc26   :  { %25993 = vst [vmem:[#allocation111_spill] sm:$0xff] %v24123_v3 }
 0xc28   :  { %v13577_v24 = vpop.permute.xlu0 %13576 }
 0xc29   :  { %v24125_v16 = vpop.permute.xlu1 %13444 }
 0xc2c   :  { %v13453_v27 = vpop.permute.xlu0 %13452 }
 0xc2d   :  { %v24127_v37 = vpop.permute.xlu1 %13572  ;;  %v13778_v30 = vsel %vm425_vm1, %v25994_v11, %v13453_v27 }
 0xc30   :  { %v13581_v22 = vpop.permute.xlu0 %13580 }
 0xc31   :  { %v13571_v13 = vpop.permute.xlu1 %13570  ;;  %v24134_v6 = vsel %vm13784_vm8, %v13778_v30, %v13581_v22 }
 0xc32   :  { %25996 = vst [vmem:[#allocation24_spill] sm:$0xff] %v24134_v6  ;;  %v24137_v55 = vsel %vm13784_vm8, %v13773_v61, %v13571_v13  ;;  %v26009_v6 = vld [vmem:[#allocation40_spill] sm:$0xff] }
 0xc33   :  { %25997 = vst [vmem:[#allocation100_spill] sm:$0xff] %v24137_v55 }
 0xc34   :  { %v13455_v23 = vpop.permute.xlu0 %13454 }
 0xc35   :  { %v13449_v0 = vpop.permute.xlu1 %13448  ;;  %v13779_v38 = vsel %vm425_vm1, %v25998_v34, %v13455_v23 }
 0xc36   :  { %v13776_v58 = vsel %vm425_vm1, %v25999_v19, %v13449_v0  ;;  %v18055_v60 = vpop.f32.mrb[130].mxu0  ;;  %v26004_v19 = vld [vmem:[#allocation64_spill] sm:$0xff] }
 0xc37   :  { %v24144_v17 = vsel %vm13784_vm8, %v13776_v58, %v13577_v24  ;;  %13658 = vrot.lane.b32.xlu0 %v18055_v60, %s20418_s7  ;;  %v12039_v41 = vpop.f32.mrb[131].mxu0 }
 0xc38   :  { %26000 = vst [vmem:[#allocation116_spill] sm:$0xff] %v24144_v17  ;;  %v13583_v27 = vpop.permute.xlu0 %13582 }
 0xc39   :  { %v13451_v11 = vpop.permute.xlu1 %13450  ;;  %v24148_v30 = vsel %vm13784_vm8, %v13779_v38, %v13583_v27 }
 0xc3a   :  { %26001 = vst [vmem:[#allocation28_spill] sm:$0xff] %v24148_v30  ;;  %v13777_v61 = vsel %vm425_vm1, %v26002_v42, %v13451_v11  ;;  %v18069_v22 = vpop.f32.mrb[132].mxu0  ;;  %v26006_v11 = vld [vmem:[#allocation75_spill] sm:$0xff] }
 0xc3b   :  { %13656 = vrot.lane.b32.xlu0 %v12039_v41, %s20418_s7  ;;  %13666 = vrot.lane.b32.xlu1 %v18069_v22, %s20418_s7  ;;  %v12215_v13 = vpop.f32.mrb[133].mxu0  ;;  %v13899_v22 = vld [vmem:[%s25364_s3 + $0x8] sm:$0xff] }
 0xc3c   :  { %v24191_v30 = vpop.permute.xlu0 %13458 }
 0xc3d   :  { %v13579_v24 = vpop.permute.xlu1 %13578  ;;  %26008 = vst [vmem:[#allocation29_spill] sm:$0xff] %v24191_v30 }
 0xc3e   :  { %v24155_v23 = vsel %vm13784_vm8, %v13777_v61, %v13579_v24  ;;  %v18083_v0 = vpop.f32.mrb[134].mxu0  ;;  %v13898_v61 = vld [vmem:[%s25364_s3] sm:$0xff] }
 0xc3f   :  { %26003 = vst [vmem:[#allocation107_spill] sm:$0xff] %v24155_v23  ;;  %13674 = vrot.lane.b32.xlu0 %v18083_v0, %s20418_s7  ;;  %v12391_v34 = vpop.f32.mrb[135].mxu0  ;;  %13664 = vrot.lane.b32.xlu1 %v12215_v13, %s20418_s7  ;;  %v19021_v13 = vpack.c.bf16 %v13899_v22, %v13898_v61  ;;  %v13900_v0 = vld [vmem:[%s25364_s3 + $0x10] sm:$0xff]  ;;  %v13753_v23 = vsel %vm425_vm1, %v26009_v6, %v24047_v45 }
 0xc41   :  { %v13457_v38 = vpop.permute.xlu1 %13456  ;;  %19022 = vmatprep.subr.bf16.mxu0 %v19021_v13 }
 0xc42   :  { %v13780_v58 = vsel %vm425_vm1, %v26004_v19, %v13457_v38  ;;  %19024 = vmatpush3.bf16.msra.mxu0 %v19021_v13 }
 0xc43   :  { %13672 = vrot.lane.b32.xlu0 %v12391_v34, %s20418_s7  ;;  %v13901_v34 = vld [vmem:[%s25364_s3 + $0x18] sm:$0xff] }
 0xc44   :  { %v19025_v19 = vpack.c.bf16 %v13901_v34, %v13900_v0 }
 0xc45   :  { %v13585_v60 = vpop.permute.xlu1 %13584 }
 0xc46   :  { %v24163_v41 = vsel %vm13784_vm8, %v13780_v58, %v13585_v60  ;;  %19026 = vmatprep.subr.bf16.mxu0 %v19025_v19 }
 0xc47   :  { %26005 = vst [vmem:[#allocation110_spill] sm:$0xff] %v24163_v41  ;;  %19028 = vmatpush3.bf16.msra.mxu0 %v19025_v19 }
 0xc49   :  { %v13461_v27 = vpop.permute.xlu1 %13460 }
 0xc4a   :  { %v24167_v42 = vsel %vm425_vm1, %v26006_v11, %v13461_v27 }
 0xc4b   :  { %26007 = vst [vmem:[#allocation37_spill] sm:$0xff] %v24167_v42 }
 0xc6e   :  { %v18062_v24 = vpop.f32.mrb[118].mxu1 }
 0xc6f   :  { %13662 = vrot.lane.b32.xlu0 %v18062_v24, %s20418_s7  ;;  %v12127_v38 = vpop.f32.mrb[119].mxu1 }
 0xc72   :  { %v18097_v58 = vpop.f32.mrb[136].mxu0 }
 0xc73   :  { %13682 = vrot.lane.b32.xlu1 %v18097_v58, %s20418_s7  ;;  %v12567_v60 = vpop.f32.mrb[137].mxu0 }
 0xc76   :  { %v18076_v27 = vpop.f32.mrb[120].mxu1 }
 0xc77   :  { %13660 = vrot.lane.b32.xlu1 %v12127_v38, %s20418_s7  ;;  %v12303_v11 = vpop.f32.mrb[121].mxu1 }
 0xc7a   :  { %v18111_v61 = vpop.f32.mrb[138].mxu0 }
 0xc7b   :  { %13690 = vrot.lane.b32.xlu0 %v18111_v61, %s20418_s7  ;;  %v12743_v22 = vpop.f32.mrb[139].mxu0  ;;  %13680 = vrot.lane.b32.xlu1 %v12567_v60, %s20418_s7 }
 0xc7f   :  { %13668 = vrot.lane.b32.xlu0 %v12303_v11, %s20418_s7  ;;  %13670 = vrot.lane.b32.xlu1 %v18076_v27, %s20418_s7 }
 0xc82   :  { %v18090_v13 = vpop.f32.mrb[122].mxu1 }
 0xc83   :  { %13688 = vrot.lane.b32.xlu0 %v12743_v22, %s20418_s7  ;;  %v12479_v24 = vpop.f32.mrb[123].mxu1 }
 0xc87   :  { %13678 = vrot.lane.b32.xlu0 %v18090_v13, %s20418_s7 }
 0xc8a   :  { %v18104_v0 = vpop.f32.mrb[124].mxu1 }
 0xc8b   :  { %v12655_v34 = vpop.f32.mrb[125].mxu1 }
 0xc92   :  { %v18118_v38 = vpop.f32.mrb[126].mxu1 }
 0xc93   :  { %v12831_v19 = vpop.f32.mrb[127].mxu1 }
 0xc9c   :  { %v18132_v58 = vpop.f32.mrb[128].mxu1 }
 0xc9d   :  { %v13007_v42 = vpop.f32.mrb[129].mxu1 }
 0xca0   :  { %v18125_v61 = vpop.f32.mrb[140].mxu0 }
 0xca1   :  { %13698 = vrot.lane.b32.xlu1 %v18125_v61, %s20418_s7  ;;  %v12919_v60 = vpop.f32.mrb[141].mxu0  ;;  %v13786_v61 = vsel %vm13784_vm8, %v13753_v23, %v24052_v18 }
 0xca4   :  { %v18139_v11 = vpop.f32.mrb[142].mxu0 }
 0xca5   :  { %v18146_v27 = vpop.f32.mrb[130].mxu1  ;;  %13676 = vrot.lane.b32.xlu1 %v12479_v24, %s20418_s7  ;;  %13706 = vrot.lane.b32.xlu0 %v18139_v11, %s20418_s7  ;;  %v13095_v22 = vpop.f32.mrb[143].mxu0  ;;  %v26011_v11 = vld [vmem:[#allocation39_spill] sm:$0xff] }
 0xca6   :  { %v13183_v13 = vpop.f32.mrb[131].mxu1  ;;  %v13752_v55 = vsel %vm425_vm1, %v26011_v11, %v23993_v56 }
 0xca7   :  { %v13785_v45 = vsel %vm13784_vm8, %v13752_v55, %v24037_v21  ;;  %v26014_v21 = vld [vmem:[#allocation99_spill] sm:$0xff]  ;;  %v26015_v55 = vld [vmem:[#allocation97_spill] sm:$0xff] }
 0xca9   :  { %v18153_v41 = vpop.f32.mrb[144].mxu0  ;;  %v13659_v3 = vpop.permute.xlu0 %13658  ;;  %13696 = vrot.lane.b32.xlu1 %v12919_v60, %s20418_s7  ;;  %13684 = vrot.lane.b32.xlu0 %v12655_v34, %s20418_s7  ;;  %v26017_v60 = vld [vmem:[#allocation44_spill] sm:$0xff] }
 0xcaa   :  { %v13271_v30 = vpop.f32.mrb[145].mxu0  ;;  %v24203_v24 = vsel %vm13817_vm9, %v13786_v61, %v13659_v3 }
 0xcab   :  { %26010 = vst [vmem:[#allocation113_spill] sm:$0xff] %v24203_v24 }
 0xcad   :  { %v18160_v17 = vpop.f32.mrb[132].mxu1  ;;  %v13657_v6 = vpop.permute.xlu0 %13656  ;;  %13686 = vrot.lane.b32.xlu1 %v18104_v0, %s20418_s7  ;;  %13704 = vrot.lane.b32.xlu0 %v13095_v22, %s20418_s7  ;;  %v26016_v0 = vld [vmem:[#allocation10_spill] sm:$0xff] }
 0xcae   :  { %v24213_v18 = vsel %vm13817_vm9, %v13785_v45, %v13657_v6  ;;  %v13359_v23 = vpop.f32.mrb[133].mxu1  ;;  %v26020_v6 = vld [vmem:[#allocation46_spill] sm:$0xff] }
 0xcaf   :  { %26012 = vst [vmem:[#allocation32_spill] sm:$0xff] %v24213_v18  ;;  %v24217_v3 = vcombine.high %v24213_v18, %v24213_v18 }
 0xcb1   :  { %26013 = vst [vmem:[#allocation34_spill] sm:$0xff] %v24217_v3  ;;  %v13909_v56 = vcombine.low %v24213_v18, %v24217_v3  ;;  %13694 = vrot.lane.b32.xlu0 %v18118_v38, %s20418_s7  ;;  %13692 = vrot.lane.b32.xlu1 %v12831_v19, %s20418_s7  ;;  %v13675_v34 = vpop.permute.xlu0 %13674 }
 0xcb3   :  { %18169 = vmatprep.mubr.msk.f32.mxu0 %vm138_vm0, %v13909_v56 }
 0xcb5   :  { %13712 = vrot.lane.b32.xlu1 %v13271_v30, %s20418_s7  ;;  %13700 = vrot.lane.b32.xlu0 %v13007_v42, %s20418_s7  ;;  %v24238_v30 = vpop.permute.xlu1 %13588  ;;  %v13673_v19 = vpop.permute.xlu0 %13672 }
 0xcb9   :  { %13702 = vrot.lane.b32.xlu1 %v18132_v58, %s20418_s7  ;;  %13462 = vrot.lane.b32.xlu0 %v26014_v21, %s20416_s29  ;;  %v13667_v42 = vpop.permute.xlu1 %13666 }
 0xcbd   :  { %13586 = vrot.lane.b32.xlu1 %v26015_v55, %s20417_s30  ;;  %13710 = vrot.lane.b32.xlu0 %v18146_v27, %s20418_s7  ;;  %v13665_v38 = vpop.permute.xlu1 %13664  ;;  %v13756_v27 = vsel %vm425_vm1, %v26017_v60, %v24056_v12  ;;  %v26021_v12 = vld [vmem:[#allocation56_spill] sm:$0xff] }
 0xcbe   :  { %v13789_v22 = vsel %vm13784_vm8, %v13756_v27, %v24060_v8  ;;  %v13760_v8 = vsel %vm425_vm1, %v26021_v12, %v24076_v7  ;;  %v26027_v27 = vld [vmem:[#allocation42_spill] sm:$0xff] }
 0xcc1   :  { %13708 = vrot.lane.b32.xlu1 %v13183_v13, %s20418_s7  ;;  %13716 = vrot.lane.b32.xlu0 %v13359_v23, %s20418_s7  ;;  %v26018_v13 = vld [vmem:[#allocation41_spill] sm:$0xff]  ;;  %v13755_v23 = vsel %vm425_vm1, %v26020_v6, %v24035_v15 }
 0xcc5   :  { %13590 = vrot.lane.b32.xlu1 %v26016_v0, %s20417_s30  ;;  %13714 = vrot.lane.b32.xlu0 %v18153_v41, %s20418_s7  ;;  %v13754_v41 = vsel %vm425_vm1, %v26018_v13, %v24007_v32  ;;  %v13788_v32 = vsel %vm13784_vm8, %v13755_v23, %v24045_v43  ;;  %v13793_v0 = vsel %vm13784_vm8, %v13760_v8, %v24062_v49  ;;  %v26028_v13 = vld [vmem:[#allocation48_spill] sm:$0xff] }
 0xcc6   :  { %v13787_v11 = vsel %vm13784_vm8, %v13754_v41, %v24021_v25  ;;  %v24287_v60 = vsel %vm13817_vm9, %v13793_v0, %v13673_v19  ;;  %v13758_v41 = vsel %vm425_vm1, %v26028_v13, %v24064_v14  ;;  %v26036_v13 = vld [vmem:[#allocation50_spill] sm:$0xff] }
 0xcc7   :  { %26026 = vst [vmem:[#allocation106_spill] sm:$0xff] %v24287_v60  ;;  %v24310_v14 = vcombine.high %v24287_v60, %v24287_v60 }
 0xcc9   :  { %13718 = vrot.lane.b32.xlu1 %v18160_v17, %s20418_s7  ;;  %v24251_v17 = vsel %vm13817_vm9, %v13789_v22, %v13665_v38  ;;  %v13757_v22 = vsel %vm425_vm1, %v26027_v27, %v24050_v59  ;;  %26031 = vst [vmem:[#allocation112_spill] sm:$0xff] %v24310_v14 }
 0xcca   :  { %26019 = vst [vmem:[#allocation6_spill] sm:$0xff] %v24251_v17  ;;  %v24268_v21 = vcombine.high %v24251_v17, %v24251_v17  ;;  %v13790_v19 = vsel %vm13784_vm8, %v13757_v22, %v24072_v20 }
 0xccb   :  { %v24306_v6 = vsel %vm13817_vm9, %v13790_v19, %v13667_v42 }
 0xccc   :  { %26023 = vst [vmem:[#allocation17_spill] sm:$0xff] %v24268_v21  ;;  %v13912_v49 = vcombine.low %v24251_v17, %v24268_v21  ;;  %26030 = vst [vmem:[#allocation109_spill] sm:$0xff] %v24306_v6 }
 0xce1   :  { %v13663_v61 = vpop.permute.xlu0 %13662 }
 0xce2   :  { %v24277_v55 = vsel %vm13817_vm9, %v13788_v32, %v13663_v61  ;;  %v13791_v61 = vsel %vm13784_vm8, %v13758_v41, %v24068_v57  ;;  %v13915_v32 = vcombine.low %v24287_v60, %v24310_v14  ;;  %v13762_v41 = vsel %vm425_vm1, %v26036_v13, %v24066_v63  ;;  %v26040_v63 = vld [vmem:[#allocation59_spill] sm:$0xff] }
 0xce3   :  { %26025 = vst [vmem:[#allocation117_spill] sm:$0xff] %v24277_v55 }
 0xce5   :  { %v24240_v58 = vpop.permute.xlu1 %13682 }
 0xce9   :  { %v13661_v45 = vpop.permute.xlu1 %13660 }
 0xcea   :  { %v24262_v56 = vsel %vm13817_vm9, %v13787_v11, %v13661_v45  ;;  %v26029_v45 = vld [vmem:[#allocation43_spill] sm:$0xff] }
 0xceb   :  { %26022 = vst [vmem:[#allocation13_spill] sm:$0xff] %v24262_v56  ;;  %v24272_v25 = vcombine.high %v24262_v56, %v24262_v56  ;;  %v13910_v15 = vcombine.low %v24203_v24, %v24262_v56  ;;  %v13759_v59 = vsel %vm425_vm1, %v26029_v45, %v24054_v9  ;;  %v26039_v45 = vld [vmem:[#allocation54_spill] sm:$0xff] }
 0xcec   :  { %v13792_v57 = vsel %vm13784_vm8, %v13759_v59, %v24058_v39 }
 0xced   :  { %26024 = vst [vmem:[#allocation103_spill] sm:$0xff] %v24272_v25  ;;  %v24279_v7 = vpop.permute.xlu0 %13690  ;;  %v13911_v43 = vcombine.low %v24272_v25, %v24277_v55  ;;  %v13681_v38 = vpop.permute.xlu1 %13680  ;;  %18170 = vmatmul.mubr.msk.f32.vlgmr.msra.gmra.mrb[146].mxu0 %vm138_vm0, %v13910_v15 }
 0xcef   :  { %18172 = vmatprep.mubr.msk.f32.mxu0 %vm138_vm0, %v13911_v43  ;;  %v26035_v43 = vld [vmem:[#allocation58_spill] sm:$0xff] }
 0xcf0   :  { %v13764_v27 = vsel %vm425_vm1, %v26035_v43, %v24088_v50 }
 0xcf1   :  { %v13669_v11 = vpop.permute.xlu0 %13668  ;;  %v13671_v12 = vpop.permute.xlu1 %13670  ;;  %18173 = vmatmul.mubr.msk.f32.gmra.mrb[148].mxu0 %vm138_vm0, %v13912_v49  ;;  %v13797_v22 = vsel %vm13784_vm8, %v13764_v27, %v24092_v36  ;;  %v26037_v49 = vld [vmem:[#allocation47_spill] sm:$0xff]  ;;  %v13768_v36 = vsel %vm425_vm1, %v26039_v45, %v24108_v28 }
 0xcf2   :  { %v24313_v23 = vsel %vm13817_vm9, %v13791_v61, %v13669_v11  ;;  %v24325_v42 = vsel %vm13817_vm9, %v13792_v57, %v13671_v12  ;;  %v13761_v61 = vsel %vm425_vm1, %v26037_v49, %v24080_v1  ;;  %v24348_v19 = vsel %vm13817_vm9, %v13797_v22, %v13681_v38 }
 0xcf3   :  { %26032 = vst [vmem:[#allocation108_spill] sm:$0xff] %v24313_v23  ;;  %v24320_v20 = vcombine.high %v24313_v23, %v24313_v23  ;;  %v13913_v9 = vcombine.low %v24306_v6, %v24313_v23  ;;  %26034 = vst [vmem:[#allocation114_spill] sm:$0xff] %v24325_v42  ;;  %v13795_v11 = vsel %vm13784_vm8, %v13762_v41, %v24070_v47 }
 0xcf4   :  { %26038 = vst [vmem:[#allocation72_spill] sm:$0xff] %v24348_v19  ;;  %v13794_v50 = vsel %vm13784_vm8, %v13761_v61, %v24084_v53  ;;  %v13763_v1 = vsel %vm425_vm1, %v26040_v63, %v24074_v5  ;;  %v24372_v53 = vcombine.high %v24348_v19, %v24348_v19 }
 0xcf5   :  { %26033 = vst [vmem:[#allocation115_spill] sm:$0xff] %v24320_v20  ;;  %v13914_v8 = vcombine.low %v24320_v20, %v24325_v42  ;;  %18175 = vmatprep.mubr.msk.f32.mxu0 %vm138_vm0, %v13913_v9  ;;  %v13689_v39 = vpop.permute.xlu0 %13688  ;;  %v24363_v38 = vsel %vm13817_vm9, %v13794_v50, %v13675_v34  ;;  %v13796_v47 = vsel %vm13784_vm8, %v13763_v1, %v24078_v48  ;;  %v26045_v34 = vld [vmem:[#allocation52_spill] sm:$0xff]  ;;  %v26056_v1 = vld [vmem:[#allocation61_spill] sm:$0xff] }
 0xcf6   :  { %26041 = vst [vmem:[#allocation81_spill] sm:$0xff] %v24363_v38  ;;  %26043 = vst [vmem:[#allocation73_spill] sm:$0xff] %v24372_v53  ;;  %v13765_v9 = vsel %vm425_vm1, %v26045_v34, %v24082_v10  ;;  %v13801_v48 = vsel %vm13784_vm8, %v13768_v36, %v24094_v51  ;;  %v26054_v36 = vld [vmem:[#allocation51_spill] sm:$0xff] }
 0xcf7   :  { %18176 = vmatmul.mubr.msk.f32.gmra.mrb[150].mxu0 %vm138_vm0, %v13914_v8  ;;  %v26046_v8 = vld [vmem:[#allocation45_spill] sm:$0xff]  ;;  %v13798_v22 = vsel %vm13784_vm8, %v13765_v9, %v24104_v26  ;;  %v24396_v13 = vsel %vm13817_vm9, %v13801_v48, %v13689_v39  ;;  %v26059_v48 = vld [vmem:[#allocation60_spill] sm:$0xff] }
 0xcf8   :  { %18178 = vmatprep.mubr.msk.f32.mxu0 %vm138_vm0, %v13915_v32  ;;  %v13766_v32 = vsel %vm425_vm1, %v26046_v8, %v24096_v31  ;;  %26048 = vst [vmem:[#allocation77_spill] sm:$0xff] %v24396_v13  ;;  %v24403_v51 = vsel %vm13817_vm9, %v13798_v22, %v24240_v58  ;;  %v26051_v39 = vld [vmem:[#allocation53_spill] sm:$0xff]  ;;  %v24418_v61 = vcombine.high %v24396_v13, %v24396_v13 }
 0xcf9   :  { %v13679_v15 = vpop.permute.xlu0 %13678  ;;  %v13799_v27 = vsel %vm13784_vm8, %v13766_v32, %v24100_v46  ;;  %26049 = vst [vmem:[#allocation83_spill] sm:$0xff] %v24403_v51  ;;  %v13918_v46 = vcombine.low %v24348_v19, %v24372_v53  ;;  %v13767_v49 = vsel %vm425_vm1, %v26051_v39, %v24086_v2 }
 0xcfa   :  { %v24389_v43 = vsel %vm13817_vm9, %v13796_v47, %v13679_v15  ;;  %26052 = vst [vmem:[#allocation14_spill] sm:$0xff] %v24418_v61  ;;  %v13800_v58 = vsel %vm13784_vm8, %v13767_v49, %v24090_v44  ;;  %v13770_v47 = vsel %vm425_vm1, %v26056_v1, %v24098_v62  ;;  %v26073_v1 = vld [vmem:[#allocation111_spill] sm:$0xff] }
 0xcfb   :  { %26047 = vst [vmem:[#allocation70_spill] sm:$0xff] %v24389_v43 }
 0xd13   :  { %v24334_v0 = vpop.permute.xlu1 %13698 }
 0xd17   :  { %v13677_v59 = vpop.permute.xlu1 %13676  ;;  %v24357_v12 = vpop.permute.xlu0 %13706 }
 0xd18   :  { %v24366_v57 = vsel %vm13817_vm9, %v13795_v11, %v13677_v59  ;;  %v13772_v59 = vsel %vm425_vm1, %v26054_v36, %v24116_v52  ;;  %v13921_v52 = vcombine.low %v24396_v13, %v24418_v61 }
 0xd19   :  { %26042 = vst [vmem:[#allocation69_spill] sm:$0xff] %v24366_v57  ;;  %v24376_v28 = vcombine.high %v24366_v57, %v24366_v57  ;;  %v13916_v5 = vcombine.low %v24363_v38, %v24366_v57  ;;  %v13805_v44 = vsel %vm13784_vm8, %v13772_v59, %v24120_v29  ;;  %v13803_v29 = vsel %vm13784_vm8, %v13770_v47, %v24102_v4 }
 0xd1b   :  { %26044 = vst [vmem:[#allocation76_spill] sm:$0xff] %v24376_v28  ;;  %v13917_v10 = vcombine.low %v24376_v28, %v24389_v43  ;;  %v13697_v41 = vpop.permute.xlu1 %13696  ;;  %18179 = vmatmul.mubr.msk.f32.gmra.mrb[152].mxu0 %vm138_vm0, %v13916_v5  ;;  %v13685_v31 = vpop.permute.xlu0 %13684  ;;  %v26057_v5 = vld [vmem:[#allocation49_spill] sm:$0xff] }
 0xd1c   :  { %v24406_v15 = vsel %vm13817_vm9, %v13799_v27, %v13685_v31  ;;  %v13769_v34 = vsel %vm425_vm1, %v26057_v5, %v24112_v35  ;;  %v24447_v9 = vsel %vm13817_vm9, %v13805_v44, %v13697_v41  ;;  %v13771_v35 = vsel %vm425_vm1, %v26059_v48, %v24106_v54 }
 0xd1d   :  { %26050 = vst [vmem:[#allocation35_spill] sm:$0xff] %v24406_v15  ;;  %v13919_v26 = vcombine.low %v24403_v51, %v24406_v15  ;;  %18181 = vmatprep.mubr.msk.f32.mxu0 %vm138_vm0, %v13917_v10  ;;  %v24424_v11 = vcombine.high %v24406_v15, %v24406_v15  ;;  %26058 = vst [vmem:[#allocation79_spill] sm:$0xff] %v24447_v9  ;;  %v13802_v8 = vsel %vm13784_vm8, %v13769_v34, %v24114_v40 }
 0xd1e   :  { %v24459_v27 = vsel %vm13817_vm9, %v13802_v8, %v24279_v7  ;;  %v13804_v4 = vsel %vm13784_vm8, %v13771_v35, %v24110_v33  ;;  %v24469_v40 = vcombine.high %v24447_v9, %v24447_v9  ;;  %v26064_v7 = vld [vmem:[#allocation66_spill] sm:$0xff]  ;;  %v26077_v35 = vld [vmem:[#allocation107_spill] sm:$0xff] }
 0xd1f   :  { %26053 = vst [vmem:[#allocation22_spill] sm:$0xff] %v24424_v11  ;;  %v13687_v50 = vpop.permute.xlu1 %13686  ;;  %18182 = vmatmul.mubr.msk.f32.gmra.mrb[154].mxu0 %vm138_vm0, %v13918_v46  ;;  %v13705_v45 = vpop.permute.xlu0 %13704  ;;  %26060 = vst [vmem:[#allocation25_spill] sm:$0xff] %v24459_v27  ;;  %v13774_v41 = vsel %vm425_vm1, %v26064_v7, %v24125_v16  ;;  %v26066_v46 = vld [vmem:[#allocation116_spill] sm:$0xff]  ;;  %v26075_v8 = vld [vmem:[#allocation110_spill] sm:$0xff] }
 0xd20   :  { %v24431_v2 = vsel %vm13817_vm9, %v13800_v58, %v13687_v50  ;;  %18184 = vmatprep.mubr.msk.f32.mxu0 %vm138_vm0, %v13919_v26  ;;  %26062 = vst [vmem:[#allocation2_spill] sm:$0xff] %v24469_v40  ;;  %v13807_v33 = vsel %vm13784_vm8, %v13774_v41, %v24127_v37  ;;  %v24487_v26 = vsel %vm13817_vm9, %v26066_v46, %v13705_v45  ;;  %v26068_v50 = vld [vmem:[#allocation100_spill] sm:$0xff] }
 0xd21   :  { %26055 = vst [vmem:[#allocation5_spill] sm:$0xff] %v24431_v2  ;;  %v13920_v63 = vcombine.low %v24424_v11, %v24431_v2  ;;  %26067 = vst [vmem:[#allocation87_spill] sm:$0xff] %v24487_v26  ;;  %v24495_v16 = vsel %vm13817_vm9, %v26068_v50, %v24334_v0  ;;  %v13924_v37 = vcombine.low %v24447_v9, %v24469_v40 }
 0xd22   :  { %26069 = vst [vmem:[#allocation80_spill] sm:$0xff] %v24495_v16  ;;  %v24507_v59 = vcombine.high %v24487_v26, %v24487_v26 }
 0xd23   :  { %18185 = vmatmul.mubr.msk.f32.gmra.mrb[156].mxu0 %vm138_vm0, %v13920_v63  ;;  %v13695_v32 = vpop.permute.xlu0 %13694  ;;  %v13693_v62 = vpop.permute.xlu1 %13692 }
 0xd24   :  { %v24462_v22 = vsel %vm13817_vm9, %v13803_v29, %v13693_v62  ;;  %18187 = vmatprep.mubr.msk.f32.mxu0 %vm138_vm0, %v13921_v52  ;;  %v24481_v31 = vsel %vm13817_vm9, %v13804_v4, %v13695_v32  ;;  %26071 = vst [vmem:[#allocation78_spill] sm:$0xff] %v24507_v59  ;;  %v13927_v34 = vcombine.low %v24487_v26, %v24507_v59 }
 0xd25   :  { %26061 = vst [vmem:[#allocation71_spill] sm:$0xff] %v24462_v22  ;;  %v24473_v10 = vcombine.high %v24462_v22, %v24462_v22  ;;  %v13922_v54 = vcombine.low %v24459_v27, %v24462_v22  ;;  %26065 = vst [vmem:[#allocation98_spill] sm:$0xff] %v24481_v31  ;;  %v24532_v4 = vsel %vm13817_vm9, %v26077_v35, %v24357_v12 }
 0xd26   :  { %26078 = vst [vmem:[#allocation23_spill] sm:$0xff] %v24532_v4 }
 0xd27   :  { %26063 = vst [vmem:[#allocation93_spill] sm:$0xff] %v24473_v10  ;;  %v13923_v39 = vcombine.low %v24473_v10, %v24481_v31  ;;  %18188 = vmatmul.mubr.msk.f32.gmra.mrb[158].mxu0 %vm138_vm0, %v13922_v54  ;;  %v13713_v49 = vpop.permute.xlu1 %13712  ;;  %v13701_v58 = vpop.permute.xlu0 %13700  ;;  %v26079_v54 = vld [vmem:[#allocation24_spill] sm:$0xff] }
 0xd28   :  { %v24498_v36 = vsel %vm13817_vm9, %v13807_v33, %v13701_v58  ;;  %v24527_v32 = vsel %vm13817_vm9, %v26075_v8, %v13713_v49  ;;  %v26084_v49 = vld [vmem:[#allocation63_spill] sm:$0xff]  ;;  %v26085_v58 = vld [vmem:[#allocation28_spill] sm:$0xff] }
 0xd29   :  { %26070 = vst [vmem:[#allocation16_spill] sm:$0xff] %v24498_v36  ;;  %v13925_v45 = vcombine.low %v24495_v16, %v24498_v36  ;;  %18190 = vmatprep.mubr.msk.f32.mxu0 %vm138_vm0, %v13923_v39  ;;  %v24511_v44 = vcombine.high %v24498_v36, %v24498_v36  ;;  %26076 = vst [vmem:[#allocation19_spill] sm:$0xff] %v24527_v32  ;;  %v24540_v41 = vcombine.high %v24527_v32, %v24527_v32  ;;  %v26083_v39 = vld [vmem:[#allocation29_spill] sm:$0xff] }
 0xd2a   :  { %v13781_v12 = vsel %vm425_vm1, %v26084_v49, %v26083_v39 }
 0xd2b   :  { %26072 = vst [vmem:[#allocation3_spill] sm:$0xff] %v24511_v44  ;;  %18191 = vmatmul.mubr.msk.f32.gmra.mrb[160].mxu0 %vm138_vm0, %v13924_v37  ;;  %v13703_v0 = vpop.permute.xlu1 %13702  ;;  %v13463_v63 = vpop.permute.xlu0 %13462  ;;  %26081 = vst [vmem:[#allocation82_spill] sm:$0xff] %v24540_v41  ;;  %v26087_v37 = vld [vmem:[#allocation37_spill] sm:$0xff] }
 0xd2c   :  { %v24516_v47 = vsel %vm13817_vm9, %v26073_v1, %v13703_v0  ;;  %18193 = vmatprep.mubr.msk.f32.mxu0 %vm138_vm0, %v13925_v45  ;;  %v13815_v45 = vsel %vm13784_vm8, %v26087_v37, %v24238_v30  ;;  %v24597_v37 = vld [vmem:[%s25366_s4] ss:$0 sm:$0xff] }
 0xd2d   :  { %26074 = vst [vmem:[#allocation95_spill] sm:$0xff] %v24516_v47  ;;  %v13926_v5 = vcombine.low %v24511_v44, %v24516_v47 }
 0xd2f   :  { %v13587_v52 = vpop.permute.xlu1 %13586  ;;  %18194 = vmatmul.mubr.msk.f32.gmra.mrb[162].mxu0 %vm138_vm0, %v13926_v5  ;;  %v13711_v29 = vpop.permute.xlu0 %13710 }
 0xd30   :  { %18196 = vmatprep.mubr.msk.f32.mxu0 %vm138_vm0, %v13927_v34  ;;  %v24553_v50 = vsel %vm13817_vm9, %v26085_v58, %v13711_v29  ;;  %v13814_v0 = vsel %vm13784_vm8, %v13781_v12, %v13587_v52  ;;  %v13930_v29 = vcombine.low %v24527_v32, %v24540_v41  ;;  %v26090_v52 = vld [vmem:[#allocation74_spill] sm:$0xff]  ;;  %v14191_v12 = vld [vmem:[%s25365_s5 + $0x8] sm:$0xff] }
 0xd31   :  { %26086 = vst [vmem:[#allocation36_spill] sm:$0xff] %v24553_v50  ;;  %v13783_v35 = vsel %vm425_vm1, %v26090_v52, %v13463_v63  ;;  %v14190_v63 = vld [vmem:[%s25365_s5] sm:$0xff]  ;;  %vm16082_vm1 = vcmask 1044484  }
 0xd32   :  { %v19029_v58 = vpack.c.bf16 %v14191_v12, %v14190_v63 }
 0xd33   :  { %v13709_v62 = vpop.permute.xlu1 %13708  ;;  %v13717_v48 = vpop.permute.xlu0 %13716 }
 0xd34   :  { %v24536_v7 = vsel %vm13817_vm9, %v26079_v54, %v13709_v62  ;;  %v24563_v8 = vsel %vm13817_vm9, %v13815_v45, %v13717_v48  ;;  %19030 = vmatprep.subr.bf16.mxu1 %v19029_v58 }
 0xd35   :  { %26080 = vst [vmem:[#allocation26_spill] sm:$0xff] %v24536_v7  ;;  %v24544_v33 = vcombine.high %v24536_v7, %v24536_v7  ;;  %v13928_v46 = vcombine.low %v24532_v4, %v24536_v7  ;;  %26088 = vst [vmem:[#allocation104_spill] sm:$0xff] %v24563_v8  ;;  %v24577_v54 = vcombine.high %v24563_v8, %v24563_v8  ;;  %19032 = vmatpush3.bf16.msra.mxu1 %v19029_v58 }
 0xd37   :  { %26082 = vst [vmem:[#allocation89_spill] sm:$0xff] %v24544_v33  ;;  %v13929_v1 = vcombine.low %v24544_v33, %v24553_v50  ;;  %18197 = vmatmul.mubr.msk.f32.gmra.mrb[164].mxu0 %vm138_vm0, %v13928_v46  ;;  %v13591_v5 = vpop.permute.xlu1 %13590  ;;  %v13715_v34 = vpop.permute.xlu0 %13714  ;;  %26091 = vst [vmem:[#allocation9_spill] sm:$0xff] %v24577_v54 }
 0xd38   :  { %v24566_v62 = vsel %vm13817_vm9, %v13814_v0, %v13715_v34  ;;  %v13816_v48 = vsel %vm13784_vm8, %v13783_v35, %v13591_v5 }
 0xd39   :  { %26089 = vst [vmem:[#allocation86_spill] sm:$0xff] %v24566_v62  ;;  %v13931_v30 = vcombine.low %v24566_v62, %v24563_v8  ;;  %18199 = vmatprep.mubr.msk.f32.mxu0 %vm138_vm0, %v13929_v1 }
 0xd3b   :  { %18200 = vmatmul.mubr.msk.f32.gmra.mrb[166].mxu0 %vm138_vm0, %v13930_v29  ;;  %v13719_v46 = vpop.permute.xlu1 %13718 }
 0xd3c   :  { %v24582_v39 = vsel %vm13817_vm9, %v13816_v48, %v13719_v46  ;;  %18202 = vmatprep.mubr.msk.f32.mxu0 %vm138_vm0, %v13931_v30 }
 0xd3d   :  { %26092 = vst [vmem:[#allocation96_spill] sm:$0xff] %v24582_v39  ;;  %v13932_v49 = vcombine.low %v24577_v54, %v24582_v39 }
 0xd3f   :  { %18203 = vmatmul.mubr.msk.f32.gmra.mrb[168].mxu0 %vm138_vm0, %v13932_v49 }
 0xdc0   :  { %v18171_v45 = vpop.f32.mrb[146].mxu0 }
 0xdc1   :  { %v14053_v0 = vadd.f32 %v18171_v45, %v24597_v37  ;;  %v14047_v1 = vpop.f32.mrb[147].mxu0 }
 0xdc2   :  { %v14048_v5 = vadd.f32 %v24597_v37, %v14047_v1 }
 0xdc4   :  { %20228 = vtanh.f32 %v14048_v5  ;;  %v18174_v34 = vpop.f32.mrb[148].mxu0 }
 0xdc5   :  { %20230 = vtanh.f32 %v14053_v0  ;;  %v14063_v29 = vadd.f32 %v18174_v34, %v24597_v37  ;;  %v14057_v30 = vpop.f32.mrb[149].mxu0 }
 0xdc6   :  { %v14058_v52 = vadd.f32 %v24597_v37, %v14057_v30 }
 0xdc8   :  { %20232 = vtanh.f32 %v14058_v52 }
 0xdc9   :  { %20234 = vtanh.f32 %v14063_v29 }
 0xdca   :  { %v18177_v35 = vpop.f32.mrb[150].mxu0 }
 0xdcb   :  { %v14073_v48 = vadd.f32 %v18177_v35, %v24597_v37  ;;  %v14067_v46 = vpop.f32.mrb[151].mxu0 }
 0xdcc   :  { %v14068_v49 = vadd.f32 %v24597_v37, %v14067_v46 }
 0xdce   :  { %20236 = vtanh.f32 %v14068_v49  ;;  %v20229_v63 = vpop.eup %20228 }
 0xdcf   :  { %20238 = vtanh.f32 %v14073_v48  ;;  %v20231_v12 = vpop.eup %20230  ;;  %18209 = vmatprep.mubr.msk.f32.mxu1 %vm13784_vm8, %v20229_v63 }
 0xdd0   :  { %18210 = vmatmul.mubr.msk.f32.vlgmr.msra.gmra.mrb[134].mxu1 %vm13784_vm8, %v20231_v12 }
 0xdd2   :  { %v20233_v58 = vpop.eup %20232 }
 0xdd3   :  { %v20235_v45 = vpop.eup %20234  ;;  %18212 = vmatprep.mubr.msk.f32.mxu1 %vm13784_vm8, %v20233_v58 }
 0xdd4   :  { %18213 = vmatmul.mubr.msk.f32.gmra.mrb[136].mxu1 %vm13784_vm8, %v20235_v45 }
 0xdd8   :  { %v20237_v0 = vpop.eup %20236 }
 0xdd9   :  { %v20239_v1 = vpop.eup %20238  ;;  %18215 = vmatprep.mubr.msk.f32.mxu1 %vm13784_vm8, %v20237_v0 }
 0xdda   :  { %18216 = vmatmul.mubr.msk.f32.gmra.mrb[138].mxu1 %vm13784_vm8, %v20239_v1 }
 0xdee   :  { %v18180_v5 = vpop.f32.mrb[152].mxu0 }
 0xdef   :  { %v14083_v34 = vadd.f32 %v18180_v5, %v24597_v37  ;;  %v14077_v29 = vpop.f32.mrb[153].mxu0 }
 0xdf0   :  { %v14078_v30 = vadd.f32 %v24597_v37, %v14077_v29 }
 0xdf2   :  { %20240 = vtanh.f32 %v14078_v30  ;;  %v18183_v52 = vpop.f32.mrb[154].mxu0 }
 0xdf3   :  { %20242 = vtanh.f32 %v14083_v34  ;;  %v14093_v35 = vadd.f32 %v18183_v52, %v24597_v37  ;;  %v14087_v48 = vpop.f32.mrb[155].mxu0 }
 0xdf4   :  { %v14088_v46 = vadd.f32 %v24597_v37, %v14087_v48 }
 0xdf6   :  { %20244 = vtanh.f32 %v14088_v46  ;;  %v18186_v49 = vpop.f32.mrb[156].mxu0 }
 0xdf7   :  { %20246 = vtanh.f32 %v14093_v35  ;;  %v14103_v63 = vadd.f32 %v18186_v49, %v24597_v37  ;;  %v14097_v12 = vpop.f32.mrb[157].mxu0 }
 0xdf8   :  { %v14098_v58 = vadd.f32 %v24597_v37, %v14097_v12 }
 0xdfa   :  { %20248 = vtanh.f32 %v14098_v58  ;;  %v18189_v45 = vpop.f32.mrb[158].mxu0 }
 0xdfb   :  { %20250 = vtanh.f32 %v14103_v63  ;;  %v14113_v0 = vadd.f32 %v18189_v45, %v24597_v37  ;;  %v14107_v1 = vpop.f32.mrb[159].mxu0 }
 0xdfc   :  { %v20241_v5 = vpop.eup %20240  ;;  %v14108_v34 = vadd.f32 %v24597_v37, %v14107_v1 }
 0xdfd   :  { %v20243_v29 = vpop.eup %20242  ;;  %18218 = vmatprep.mubr.msk.f32.mxu1 %vm13784_vm8, %v20241_v5 }
 0xdfe   :  { %20252 = vtanh.f32 %v14108_v34  ;;  %v18192_v30 = vpop.f32.mrb[160].mxu0  ;;  %18219 = vmatmul.mubr.msk.f32.gmra.mrb[140].mxu1 %vm13784_vm8, %v20243_v29 }
 0xdff   :  { %20254 = vtanh.f32 %v14113_v0  ;;  %v14123_v52 = vadd.f32 %v18192_v30, %v24597_v37  ;;  %v14117_v35 = vpop.f32.mrb[161].mxu0 }
 0xe00   :  { %v20245_v48 = vpop.eup %20244  ;;  %v14118_v46 = vadd.f32 %v24597_v37, %v14117_v35 }
 0xe01   :  { %v20247_v49 = vpop.eup %20246  ;;  %18221 = vmatprep.mubr.msk.f32.mxu1 %vm13784_vm8, %v20245_v48 }
 0xe02   :  { %20256 = vtanh.f32 %v14118_v46  ;;  %v18195_v63 = vpop.f32.mrb[162].mxu0  ;;  %18222 = vmatmul.mubr.msk.f32.gmra.mrb[142].mxu1 %vm13784_vm8, %v20247_v49 }
 0xe03   :  { %20258 = vtanh.f32 %v14123_v52  ;;  %v14133_v12 = vadd.f32 %v18195_v63, %v24597_v37  ;;  %v14127_v58 = vpop.f32.mrb[163].mxu0 }
 0xe04   :  { %v20249_v45 = vpop.eup %20248  ;;  %v14128_v0 = vadd.f32 %v24597_v37, %v14127_v58 }
 0xe05   :  { %v20251_v1 = vpop.eup %20250  ;;  %18224 = vmatprep.mubr.msk.f32.mxu1 %vm13784_vm8, %v20249_v45 }
 0xe06   :  { %20260 = vtanh.f32 %v14128_v0  ;;  %18225 = vmatmul.mubr.msk.f32.gmra.mrb[144].mxu1 %vm13784_vm8, %v20251_v1 }
 0xe07   :  { %20262 = vtanh.f32 %v14133_v12 }
 0xe08   :  { %v20253_v5 = vpop.eup %20252 }
 0xe09   :  { %v20255_v34 = vpop.eup %20254  ;;  %18227 = vmatprep.mubr.msk.f32.mxu1 %vm13784_vm8, %v20253_v5 }
 0xe0a   :  { %v18198_v29 = vpop.f32.mrb[164].mxu0  ;;  %18228 = vmatmul.mubr.msk.f32.gmra.mrb[146].mxu1 %vm13784_vm8, %v20255_v34 }
 0xe0b   :  { %v14143_v30 = vadd.f32 %v18198_v29, %v24597_v37  ;;  %v14137_v52 = vpop.f32.mrb[165].mxu0 }
 0xe0c   :  { %v20257_v35 = vpop.eup %20256  ;;  %v14138_v48 = vadd.f32 %v24597_v37, %v14137_v52 }
 0xe0d   :  { %v20259_v46 = vpop.eup %20258  ;;  %18230 = vmatprep.mubr.msk.f32.mxu1 %vm13784_vm8, %v20257_v35 }
 0xe0e   :  { %20264 = vtanh.f32 %v14138_v48  ;;  %v18201_v49 = vpop.f32.mrb[166].mxu0  ;;  %18231 = vmatmul.mubr.msk.f32.gmra.mrb[148].mxu1 %vm13784_vm8, %v20259_v46 }
 0xe0f   :  { %20266 = vtanh.f32 %v14143_v30  ;;  %v14153_v63 = vadd.f32 %v18201_v49, %v24597_v37  ;;  %v14147_v12 = vpop.f32.mrb[167].mxu0 }
 0xe10   :  { %v20261_v58 = vpop.eup %20260  ;;  %v14148_v45 = vadd.f32 %v24597_v37, %v14147_v12 }
 0xe11   :  { %v20263_v0 = vpop.eup %20262  ;;  %18233 = vmatprep.mubr.msk.f32.mxu1 %vm13784_vm8, %v20261_v58 }
 0xe12   :  { %20268 = vtanh.f32 %v14148_v45  ;;  %v18204_v1 = vpop.f32.mrb[168].mxu0  ;;  %18234 = vmatmul.mubr.msk.f32.gmra.mrb[150].mxu1 %vm13784_vm8, %v20263_v0 }
 0xe13   :  { %20270 = vtanh.f32 %v14153_v63  ;;  %v14163_v5 = vadd.f32 %v18204_v1, %v24597_v37  ;;  %v14157_v34 = vpop.f32.mrb[169].mxu0 }
 0xe14   :  { %v14158_v29 = vadd.f32 %v24597_v37, %v14157_v34  ;;  %v20419_v37 = vmov 0  }
 0xe15   :  { %19691 = vset.pattern.permute.xlu1 %v20419_v37  ;;  %19690 = vset.pattern.permute.xlu0 %v20419_v37 }
 0xe16   :  { %20272 = vtanh.f32 %v14158_v29 }
 0xe17   :  { %20274 = vtanh.f32 %v14163_v5 }
 0xe18   :  { %v20265_v30 = vpop.eup %20264 }
 0xe19   :  { %v20267_v52 = vpop.eup %20266  ;;  %18236 = vmatprep.mubr.msk.f32.mxu1 %vm13784_vm8, %v20265_v30 }
 0xe1a   :  { %18237 = vmatmul.mubr.msk.f32.gmra.mrb[152].mxu1 %vm13784_vm8, %v20267_v52 }
 0xe1c   :  { %v20269_v35 = vpop.eup %20268 }
 0xe1d   :  { %v20271_v48 = vpop.eup %20270  ;;  %18239 = vmatprep.mubr.msk.f32.mxu1 %vm13784_vm8, %v20269_v35 }
 0xe1e   :  { %18240 = vmatmul.mubr.msk.f32.gmra.mrb[154].mxu1 %vm13784_vm8, %v20271_v48 }
 0xe20   :  { %v20273_v46 = vpop.eup %20272 }
 0xe21   :  { %v20275_v49 = vpop.eup %20274  ;;  %18242 = vmatprep.mubr.msk.f32.mxu1 %vm13784_vm8, %v20273_v46 }
 0xe22   :  { %18243 = vmatmul.mubr.msk.f32.gmra.mrb[156].mxu1 %vm13784_vm8, %v20275_v49 }
 0xea3   :  { %v18211_v63 = vpop.f32.mrb[134].mxu1 }
 0xea4   :  { %v14330_v12 = vpop.f32.mrb[135].mxu1  ;;  %v14474_v45 = vcombine.high %v18211_v63, %v18211_v63  ;;  %v14556_v29 = vsel %vm14555_vm10, %v18211_v63, -inf }
 0xea5   :  { %v14473_v58 = vcombine.high %v14330_v12, %v14330_v12 }
 0xea7   :  { %v14521_v0 = vcombine.low %v14330_v12, %v14473_v58  ;;  %v24647_v1 = vpop.f32.mrb[136].mxu1 }
 0xea8   :  { %v24651_v5 = vcombine.high %v24647_v1, %v24647_v1  ;;  %v14340_v34 = vpop.f32.mrb[137].mxu1 }
 0xea9   :  { %v14554_v30 = vsel %vm14553_vm11, %v14521_v0, -inf  ;;  %v14475_v52 = vcombine.high %v14340_v34, %v14340_v34  ;;  %v14522_v35 = vcombine.low %v14474_v45, %v14340_v34 }
 0xeaa   :  { %v14557_v48 = vmax.f32 %v14554_v30, %v14556_v29  ;;  %v14523_v46 = vcombine.low %v24647_v1, %v24651_v5 }
 0xeab   :  { %v14564_v49 = vsel %vm14553_vm11, %v14522_v35, -inf  ;;  %v14565_v37 = vsel %vm14555_vm10, %v14475_v52, -inf }
 0xeac   :  { %v14558_v39 = vrot.slane %v14557_v48, 4  ;;  %v14566_v8 = vmax.f32 %v14564_v49, %v14565_v37  ;;  %v14573_v0 = vsel %vm14553_vm11, %v14523_v46, -inf }
 0xead   :  { %v24659_v54 = vpop.f32.mrb[138].mxu1 }
 0xeae   :  { %v24663_v2 = vcombine.high %v24659_v54, %v24659_v54  ;;  %v14350_v41 = vpop.f32.mrb[139].mxu1  ;;  %v14559_v62 = vmax.f32 %v14557_v48, %v14558_v39  ;;  %v14567_v29 = vrot.slane %v14566_v8, 4 }
 0xeaf   :  { %v14477_v30 = vcombine.high %v14350_v41, %v14350_v41  ;;  %v14574_v32 = vsel %vm14555_vm10, %v14350_v41, -inf }
 0xeb0   :  { %v14575_v15 = vmax.f32 %v14573_v0, %v14574_v32  ;;  %v14560_v35 = vrot.slane %v14559_v62, 2  ;;  %v14568_v11 = vmax.f32 %v14566_v8, %v14567_v29  ;;  %v14583_v50 = vsel %vm14555_vm10, %v24663_v2, -inf }
 0xeb1   :  { %v14524_v33 = vcombine.low %v14477_v30, %v24659_v54 }
 0xeb2   :  { %v14576_v49 = vrot.slane %v14575_v15, 4  ;;  %v14561_v37 = vmax.f32 %v14559_v62, %v14560_v35  ;;  %v14569_v7 = vrot.slane %v14568_v11, 2 }
 0xeb3   :  { %v14582_v4 = vsel %vm14553_vm11, %v14524_v33, -inf }
 0xeb4   :  { %v14577_v47 = vmax.f32 %v14575_v15, %v14576_v49  ;;  %v14584_v46 = vmax.f32 %v14582_v4, %v14583_v50  ;;  %v14562_v39 = vrot.slane %v14561_v37, 1  ;;  %v14570_v48 = vmax.f32 %v14568_v11, %v14569_v7 }
 0xeb6   :  { %v14578_v16 = vrot.slane %v14577_v47, 2  ;;  %v14585_v59 = vrot.slane %v14584_v46, 4  ;;  %v14563_v26 = vmax.f32 %v14561_v37, %v14562_v39  ;;  %v14571_v32 = vrot.slane %v14570_v48, 1 }
 0xeb8   :  { %v14579_v0 = vmax.f32 %v14577_v47, %v14578_v16  ;;  %v14586_v8 = vmax.f32 %v14584_v46, %v14585_v59  ;;  %v14715_v29 = vcombine.high %v14563_v26, %v14563_v26  ;;  %v14747_v44 = vsub.f32 %v14330_v12, %v14563_v26 }
 0xeb9   :  { %v14749_v27 = vsub.f32 %v18211_v63, %v14563_v26  ;;  %v14572_v62 = vmax.f32 %v14570_v48, %v14571_v32 }
 0xeba   :  { %v14580_v35 = vrot.slane %v14579_v0, 1  ;;  %v14587_v31 = vrot.slane %v14586_v8, 2  ;;  %v14748_v36 = vsub.f32 %v14473_v58, %v14715_v29  ;;  %v14795_v40 = vmul.f32 1.442695, %v14747_v44 }
 0xebb   :  { %v14799_v13 = vmul.f32 1.442695, %v14749_v27  ;;  %v14716_v33 = vcombine.high %v14572_v62, %v14572_v62  ;;  %v14750_v15 = vsub.f32 %v14474_v45, %v14572_v62  ;;  %v14752_v4 = vsub.f32 %v14475_v52, %v14572_v62 }
 0xebc   :  { %v14581_v50 = vmax.f32 %v14579_v0, %v14580_v35  ;;  %v14588_v11 = vmax.f32 %v14586_v8, %v14587_v31  ;;  %20276 = vpow2.f32 %v14795_v40  ;;  %v14797_v7 = vmul.f32 1.442695, %v14748_v36 }
 0xebd   :  { %v14751_v49 = vsub.f32 %v14340_v34, %v14716_v33  ;;  %20278 = vpow2.f32 %v14799_v13  ;;  %v14801_v16 = vmul.f32 1.442695, %v14750_v15  ;;  %v14805_v59 = vmul.f32 1.442695, %v14752_v4 }
 0xebe   :  { %v14589_v47 = vrot.slane %v14588_v11, 1  ;;  %20280 = vpow2.f32 %v14797_v7  ;;  %v14717_v63 = vcombine.high %v14581_v50, %v14581_v50  ;;  %v14753_v12 = vsub.f32 %v24647_v1, %v14581_v50 }
 0xebf   :  { %v14803_v26 = vmul.f32 1.442695, %v14751_v49  ;;  %20282 = vpow2.f32 %v14801_v16  ;;  %v14755_v27 = vsub.f32 %v14350_v41, %v14581_v50 }
 0xec0   :  { %v14590_v44 = vmax.f32 %v14588_v11, %v14589_v47  ;;  %v14754_v58 = vsub.f32 %v24651_v5, %v14717_v63  ;;  %v14807_v45 = vmul.f32 1.442695, %v14753_v12 }
 0xec1   :  { %20284 = vpow2.f32 %v14803_v26  ;;  %v14811_v34 = vmul.f32 1.442695, %v14755_v27 }
 0xec2   :  { %20286 = vpow2.f32 %v14805_v59  ;;  %v14718_v40 = vcombine.high %v14590_v44, %v14590_v44  ;;  %v14756_v31 = vsub.f32 %v14477_v30, %v14590_v44  ;;  %v14758_v13 = vsub.f32 %v24663_v2, %v14590_v44 }
 0xec3   :  { %v14809_v36 = vmul.f32 1.442695, %v14754_v58  ;;  %20288 = vpow2.f32 %v14807_v45 }
 0xec4   :  { %v14757_v52 = vsub.f32 %v24659_v54, %v14718_v40  ;;  %v14813_v37 = vmul.f32 1.442695, %v14756_v31  ;;  %v14817_v1 = vmul.f32 1.442695, %v14758_v13 }
 0xec5   :  { %20290 = vpow2.f32 %v14809_v36 }
 0xec6   :  { %20292 = vpow2.f32 %v14811_v34  ;;  %v14815_v46 = vmul.f32 1.442695, %v14757_v52  ;;  %v24675_v41 = vpop.eup %20276 }
 0xec7   :  { %20294 = vpow2.f32 %v14813_v37  ;;  %v24677_v5 = vpop.eup %20278 }
 0xec8   :  { %20296 = vpow2.f32 %v14815_v46  ;;  %v24679_v39 = vpop.eup %20280  ;;  %v14956_v0 = vsel %vm14555_vm10, %v24677_v5, 0.0 }
 0xec9   :  { %20298 = vpow2.f32 %v14817_v1  ;;  %v24681_v2 = vpop.eup %20282  ;;  %v14923_v54 = vcombine.low %v24675_v41, %v24679_v39 }
 0xecb   :  { %v24685_v30 = vpop.eup %20284  ;;  %v14955_v32 = vsel %vm14553_vm11, %v14923_v54, 0.0 }
 0xecc   :  { %v24687_v48 = vpop.eup %20286  ;;  %v14924_v8 = vcombine.low %v24681_v2, %v24685_v30  ;;  %v14957_v29 = vadd.f32 %v14956_v0, %v14955_v32 }
 0xecd   :  { %v24694_v62 = vpop.eup %20288  ;;  %v14965_v33 = vsel %vm14555_vm10, %v24687_v48, 0.0 }
 0xece   :  { %v14964_v35 = vsel %vm14553_vm11, %v14924_v8, 0.0  ;;  %v14958_v4 = vrot.slane %v14957_v29, 4 }
 0xecf   :  { %v24699_v15 = vpop.eup %20290  ;;  %v14966_v50 = vadd.f32 %v14965_v33, %v14964_v35 }
 0xed0   :  { %v24701_v11 = vpop.eup %20292  ;;  %v14925_v7 = vcombine.low %v24694_v62, %v24699_v15  ;;  %v14959_v16 = vadd.f32 %v14958_v4, %v14957_v29 }
 0xed1   :  { %v24705_v49 = vpop.eup %20294  ;;  %v14967_v59 = vrot.slane %v14966_v50, 4  ;;  %v24707_v47 = vpop.f32.mrb[140].mxu1  ;;  %v14974_v12 = vsel %vm14555_vm10, %v24701_v11, 0.0 }
 0xed2   :  { %v24709_v26 = vpop.eup %20296  ;;  %v14973_v63 = vsel %vm14553_vm11, %v14925_v7, 0.0  ;;  %v24714_v44 = vpop.f32.mrb[141].mxu1  ;;  %v14960_v58 = vrot.slane %v14959_v16, 2  ;;  %v24724_v36 = vcombine.high %v24707_v47, %v24707_v47  ;;  %v14592_v0 = vsel %vm14555_vm10, %v24707_v47, -inf }
 0xed3   :  { %v24716_v27 = vpop.eup %20298  ;;  %v14968_v45 = vadd.f32 %v14967_v59, %v14966_v50  ;;  %v14926_v40 = vcombine.low %v24705_v49, %v24709_v26  ;;  %v14975_v31 = vadd.f32 %v14974_v12, %v14973_v63  ;;  %v24728_v34 = vcombine.high %v24714_v44, %v24714_v44 }
 0xed4   :  { %v14983_v13 = vsel %vm14555_vm10, %v24716_v27, 0.0  ;;  %v14961_v52 = vadd.f32 %v14960_v58, %v14959_v16 }
 0xed5   :  { %v14969_v37 = vrot.slane %v14968_v45, 2  ;;  %v14976_v1 = vrot.slane %v14975_v31, 4  ;;  %v14982_v46 = vsel %vm14553_vm11, %v14926_v40, 0.0  ;;  %v24731_v54 = vpop.f32.mrb[142].mxu1  ;;  %v14525_v8 = vcombine.low %v24714_v44, %v24728_v34 }
 0xed6   :  { %v14984_v32 = vadd.f32 %v14983_v13, %v14982_v46  ;;  %v24739_v29 = vcombine.high %v24731_v54, %v24731_v54  ;;  %v24741_v35 = vpop.f32.mrb[143].mxu1  ;;  %v14962_v33 = vrot.slane %v14961_v52, 1 }
 0xed7   :  { %v14970_v4 = vadd.f32 %v14969_v37, %v14968_v45  ;;  %v14977_v50 = vadd.f32 %v14976_v1, %v14975_v31  ;;  %v24745_v7 = vcombine.high %v24741_v35, %v24741_v35  ;;  %v14591_v59 = vsel %vm14553_vm11, %v14525_v8, -inf }
 0xed8   :  { %v14985_v16 = vrot.slane %v14984_v32, 4  ;;  %v14527_v63 = vcombine.low %v24731_v54, %v24739_v29  ;;  %v14526_v12 = vcombine.low %v24724_v36, %v24741_v35  ;;  %v14963_v58 = vadd.f32 %v14962_v33, %v14961_v52 }
 0xed9   :  { %v14971_v40 = vrot.slane %v14970_v4, 1  ;;  %v14978_v13 = vrot.slane %v14977_v50, 2  ;;  %v14593_v46 = vmax.f32 %v14591_v59, %v14592_v0  ;;  %v24752_v10 = vpop.f32.mrb[144].mxu1  ;;  %v14601_v37 = vsel %vm14555_vm10, %v24745_v7, -inf }
 0xeda   :  { %v14986_v45 = vadd.f32 %v14985_v16, %v14984_v32  ;;  %v14600_v31 = vsel %vm14553_vm11, %v14526_v12, -inf  ;;  %v24759_v1 = vcombine.high %v24752_v10, %v24752_v10  ;;  %v24761_v8 = vpop.f32.mrb[145].mxu1  ;;  %20300 = vrcp.f32 %v14963_v58 }
 0xedb   :  { %v14972_v9 = vadd.f32 %v14971_v40, %v14970_v4  ;;  %v14979_v52 = vadd.f32 %v14978_v13, %v14977_v50  ;;  %v14594_v33 = vrot.slane %v14593_v46, 4  ;;  %v14602_v0 = vmax.f32 %v14600_v31, %v14601_v37 }
 0xedc   :  { %v14987_v22 = vrot.slane %v14986_v45, 2  ;;  %v14619_v32 = vsel %vm14555_vm10, %v24759_v1, -inf  ;;  %v24767_v16 = vcombine.high %v24761_v8, %v24761_v8  ;;  %v14609_v61 = vsel %vm14553_vm11, %v14527_v63, -inf }
 0xedd   :  { %20302 = vrcp.f32 %v14972_v9  ;;  %v14980_v59 = vrot.slane %v14979_v52, 1  ;;  %v14595_v12 = vmax.f32 %v14593_v46, %v14594_v33  ;;  %v24770_v51 = vpop.f32.mrb[146].mxu1  ;;  %v14603_v4 = vrot.slane %v14602_v0, 4 }
 0xede   :  { %v14988_v58 = vadd.f32 %v14987_v22, %v14986_v45  ;;  %v14528_v50 = vcombine.low %v24767_v16, %v24752_v10  ;;  %v14610_v40 = vsel %vm14555_vm10, %v24761_v8, -inf  ;;  %v24776_v13 = vpop.f32.mrb[147].mxu1  ;;  %v24780_v9 = vcombine.high %v24770_v51, %v24770_v51 }
 0xedf   :  { %v14981_v31 = vadd.f32 %v14980_v59, %v14979_v52  ;;  %v14596_v37 = vrot.slane %v14595_v12, 2  ;;  %v14611_v19 = vmax.f32 %v14609_v61, %v14610_v40  ;;  %v14604_v46 = vmax.f32 %v14602_v0, %v14603_v4 }
 0xee0   :  { %v14989_v63 = vrot.slane %v14988_v58, 1  ;;  %v14618_v22 = vsel %vm14553_vm11, %v14528_v50, -inf  ;;  %v14628_v45 = vsel %vm14555_vm10, %v24770_v51, -inf  ;;  %v24789_v61 = vcombine.high %v24776_v13, %v24776_v13 }
 0xee1   :  { %20304 = vrcp.f32 %v14981_v31  ;;  %v14597_v33 = vmax.f32 %v14595_v12, %v14596_v37  ;;  %v14612_v53 = vrot.slane %v14611_v19, 4  ;;  %v14620_v43 = vmax.f32 %v14618_v22, %v14619_v32  ;;  %v24785_v57 = vpop.f32.mrb[148].mxu1 }
 0xee2   :  { %v14990_v52 = vadd.f32 %v14989_v63, %v14988_v58  ;;  %v14605_v59 = vrot.slane %v14604_v46, 2  ;;  %v24793_v0 = vcombine.high %v24785_v57, %v24785_v57  ;;  %v24795_v4 = vpop.f32.mrb[149].mxu1  ;;  %v14529_v58 = vcombine.low %v24776_v13, %v24789_v61 }
 0xee3   :  { %v14598_v50 = vrot.slane %v14597_v33, 1  ;;  %v14613_v40 = vmax.f32 %v14611_v19, %v14612_v53  ;;  %v14621_v31 = vrot.slane %v14620_v43, 4  ;;  %v24799_v32 = vcombine.high %v24795_v4, %v24795_v4 }
 0xee4   :  { %20306 = vrcp.f32 %v14990_v52  ;;  %v14606_v12 = vmax.f32 %v14604_v46, %v14605_v59  ;;  %v24805_v63 = vpop.eup %20300  ;;  %v14530_v19 = vcombine.low %v24780_v9, %v24795_v4  ;;  %v14627_v52 = vsel %vm14553_vm11, %v14529_v58, -inf }
 0xee5   :  { %v14599_v22 = vmax.f32 %v14597_v33, %v14598_v50  ;;  %v14614_v28 = vrot.slane %v14613_v40, 2  ;;  %v14622_v38 = vmax.f32 %v14620_v43, %v14621_v31  ;;  %v24809_v53 = vpop.f32.mrb[150].mxu1  ;;  %v14637_v46 = vsel %vm14555_vm10, %v24799_v32, -inf }
 0xee6   :  { %v14607_v60 = vrot.slane %v14606_v12, 1  ;;  %v24816_v59 = vcombine.high %v24809_v53, %v24809_v53  ;;  %v24818_v37 = vpop.f32.mrb[151].mxu1  ;;  %v14629_v58 = vmax.f32 %v14627_v52, %v14628_v45  ;;  %v14636_v20 = vsel %vm14553_vm11, %v14530_v19, -inf }
 0xee7   :  { %v24820_v33 = vpop.eup %20302  ;;  %v14719_v43 = vcombine.high %v14599_v22, %v14599_v22  ;;  %v14759_v50 = vsub.f32 %v24714_v44, %v14599_v22  ;;  %v14761_v31 = vsub.f32 %v24707_v47, %v14599_v22  ;;  %v14615_v14 = vmax.f32 %v14613_v40, %v14614_v28 }
 0xee8   :  { %v14608_v42 = vmax.f32 %v14606_v12, %v14607_v60  ;;  %v14623_v23 = vrot.slane %v14622_v38, 2  ;;  %v14630_v47 = vrot.slane %v14629_v58, 4 }
 0xee9   :  { %v14760_v6 = vsub.f32 %v24728_v34, %v14719_v43  ;;  %v14819_v21 = vmul.f32 1.442695, %v14759_v50  ;;  %v14823_v17 = vmul.f32 1.442695, %v14761_v31  ;;  %v14616_v25 = vrot.slane %v14615_v14, 1 }
 0xeea   :  { %v14720_v55 = vcombine.high %v14608_v42, %v14608_v42  ;;  %v14762_v56 = vsub.f32 %v24724_v36, %v14608_v42  ;;  %v14764_v3 = vsub.f32 %v24745_v7, %v14608_v42  ;;  %v14624_v18 = vmax.f32 %v14622_v38, %v14623_v23 }
 0xeeb   :  { %v24828_v44 = vpop.eup %20304  ;;  %20308 = vpow2.f32 %v14819_v21  ;;  %v14821_v28 = vmul.f32 1.442695, %v14760_v6  ;;  %v14617_v60 = vmax.f32 %v14615_v14, %v14616_v25  ;;  %v14631_v25 = vmax.f32 %v14629_v58, %v14630_v47 }
 0xeec   :  { %20310 = vpow2.f32 %v14823_v17  ;;  %v14763_v45 = vsub.f32 %v24741_v35, %v14720_v55  ;;  %v14825_v40 = vmul.f32 1.442695, %v14762_v56  ;;  %v14829_v34 = vmul.f32 1.442695, %v14764_v3 }
 0xeed   :  { %20312 = vpow2.f32 %v14821_v28  ;;  %v14625_v12 = vrot.slane %v14624_v18, 1  ;;  %v14721_v22 = vcombine.high %v14617_v60, %v14617_v60  ;;  %v14765_v19 = vsub.f32 %v24731_v54, %v14617_v60  ;;  %v24832_v36 = vpop.f32.mrb[152].mxu1 }
 0xeee   :  { %v24834_v42 = vpop.eup %20306  ;;  %20314 = vpow2.f32 %v14825_v40  ;;  %v14827_v23 = vmul.f32 1.442695, %v14763_v45  ;;  %v14767_v21 = vsub.f32 %v24761_v8, %v14617_v60  ;;  %v24837_v6 = vpop.f32.mrb[153].mxu1  ;;  %v14632_v14 = vrot.slane %v14631_v25, 2 }
 0xeef   :  { %20316 = vpow2.f32 %v14829_v34  ;;  %v14626_v17 = vmax.f32 %v14624_v18, %v14625_v12  ;;  %v14766_v3 = vsub.f32 %v24739_v29, %v14721_v22  ;;  %v14831_v56 = vmul.f32 1.442695, %v14765_v19 }
 0xef0   :  { %20318 = vpow2.f32 %v14827_v23  ;;  %v14835_v55 = vmul.f32 1.442695, %v14767_v21  ;;  %v14638_v38 = vmax.f32 %v14636_v20, %v14637_v46  ;;  %v14633_v43 = vmax.f32 %v14631_v25, %v14632_v14 }
 0xef1   :  { %v14722_v54 = vcombine.high %v14626_v17, %v14626_v17  ;;  %v14768_v35 = vsub.f32 %v24767_v16, %v14626_v17  ;;  %v14770_v7 = vsub.f32 %v24759_v1, %v14626_v17  ;;  %20320 = vpow2.f32 %v14831_v56  ;;  %v24842_v52 = vpop.f32.mrb[154].mxu1 }
 0xef2   :  { %v14833_v8 = vmul.f32 1.442695, %v14766_v3  ;;  %20322 = vpow2.f32 %v14835_v55  ;;  %v14639_v50 = vrot.slane %v14638_v38, 4  ;;  %v24844_v18 = vpop.f32.mrb[155].mxu1  ;;  %v14655_v20 = vsel %vm14555_vm10, %v24816_v59, -inf }
 0xef3   :  { %v14769_v29 = vsub.f32 %v24752_v10, %v14722_v54  ;;  %v14837_v31 = vmul.f32 1.442695, %v14768_v35  ;;  %v14841_v58 = vmul.f32 1.442695, %v14770_v7  ;;  %v14634_v16 = vrot.slane %v14633_v43, 1 }
 0xef4   :  { %20324 = vpow2.f32 %v14833_v8  ;;  %v14640_v46 = vmax.f32 %v14638_v38, %v14639_v50  ;;  %v24851_v1 = vcombine.high %v24818_v37, %v24818_v37  ;;  %v26093_v47 = vcombine.low %v24785_v57, %v24793_v0 }
 0xef5   :  { %v24853_v28 = vpop.eup %20308  ;;  %20326 = vpow2.f32 %v14837_v31  ;;  %v14839_v60 = vmul.f32 1.442695, %v14769_v29  ;;  %v14646_v45 = vsel %vm14555_vm10, %v24818_v37, -inf  ;;  %v24861_v40 = vpop.f32.mrb[156].mxu1  ;;  %v14635_v12 = vmax.f32 %v14633_v43, %v14634_v16 }
 0xef6   :  { %v14645_v10 = vsel %vm14553_vm11, %v26093_v47, -inf  ;;  %v24863_v34 = vpop.eup %20310  ;;  %20328 = vpow2.f32 %v14841_v58  ;;  %v14641_v22 = vrot.slane %v14640_v46, 2  ;;  %v14532_v19 = vcombine.low %v24851_v1, %v24809_v53  ;;  %v24867_v23 = vpop.f32.mrb[157].mxu1 }
 0xef7   :  { %v24869_v21 = vpop.eup %20312  ;;  %v14992_v25 = vsel %vm14555_vm10, %v24863_v34, 0.0  ;;  %20330 = vpow2.f32 %v14839_v60  ;;  %v14647_v17 = vmax.f32 %v14645_v10, %v14646_v45  ;;  %v15165_v3 = vmul.f32 %v24805_v63, %v24677_v5 }
 0xef8   :  { %v24875_v56 = vpop.eup %20314  ;;  %v14927_v55 = vcombine.low %v24853_v28, %v24869_v21  ;;  %v14723_v14 = vcombine.high %v14635_v12, %v14635_v12  ;;  %v14771_v38 = vsub.f32 %v24776_v13, %v14635_v12  ;;  %v14773_v54 = vsub.f32 %v24770_v51, %v14635_v12 }
 0xef9   :  { %v24881_v35 = vpop.eup %20316  ;;  %v14642_v7 = vmax.f32 %v14640_v46, %v14641_v22  ;;  %v14648_v8 = vrot.slane %v14647_v17, 4  ;;  %v14654_v43 = vsel %vm14553_vm11, %v14532_v19, -inf  ;;  %15237 = vperm.xlu1 %19691, %v15165_v3   ;;  %v15163_v5 = vmul.f32 %v24805_v63, %v24675_v41 }
 0xefa   :  { %v24886_v50 = vpop.eup %20318  ;;  %v14991_v29 = vsel %vm14553_vm11, %v14927_v55, 0.0  ;;  %v15001_v31 = vsel %vm14555_vm10, %v24881_v35, 0.0  ;;  %v14772_v13 = vsub.f32 %v24789_v61, %v14723_v14  ;;  %v14843_v51 = vmul.f32 1.442695, %v14771_v38 }
 0xefb   :  { %26094 = vst [vmem:[#allocation94_spill] sm:$0xff] %v24886_v50  ;;  %v24892_v58 = vpop.eup %20320  ;;  %v14993_v16 = vadd.f32 %v14992_v25, %v14991_v29  ;;  %v14928_v46 = vcombine.low %v24875_v56, %v24886_v50  ;;  %v14847_v60 = vmul.f32 1.442695, %v14773_v54  ;;  %v14643_v47 = vrot.slane %v14642_v7, 1  ;;  %15213 = vperm.xlu0 %19690, %v15163_v5  }
 0xefc   :  { %26095 = vst [vmem:[#allocation27_spill] sm:$0xff] %v24892_v58  ;;  %v24896_v41 = vpop.eup %20322  ;;  %20332 = vpow2.f32 %v14843_v51  ;;  %v14845_v10 = vmul.f32 1.442695, %v14772_v13  ;;  %v14649_v45 = vmax.f32 %v14647_v17, %v14648_v8  ;;  %v14656_v12 = vmax.f32 %v14654_v43, %v14655_v20 }
 0xefd   :  { %26096 = vst [vmem:[#allocation15_spill] sm:$0xff] %v24896_v41  ;;  %v14994_v22 = vrot.slane %v14993_v16, 4  ;;  %v15000_v19 = vsel %vm14553_vm11, %v14928_v46, 0.0  ;;  %v15010_v61 = vsel %vm14555_vm10, %v24896_v41, 0.0  ;;  %20334 = vpow2.f32 %v14847_v60 }
 0xefe   :  { %v24901_v25 = vpop.eup %20324  ;;  %v15002_v3 = vadd.f32 %v15001_v31, %v15000_v19  ;;  %20336 = vpow2.f32 %v14845_v10  ;;  %v14644_v55 = vmax.f32 %v14642_v7, %v14643_v47  ;;  %v14650_v14 = vrot.slane %v14649_v45, 2 }
 0xeff   :  { %26097 = vst [vmem:[#allocation12_spill] sm:$0xff] %v24901_v25  ;;  %v24903_v38 = vpop.eup %20326  ;;  %v14995_v54 = vadd.f32 %v14994_v22, %v14993_v16  ;;  %v14929_v17 = vcombine.low %v24892_v58, %v24901_v25  ;;  %v14657_v20 = vrot.slane %v14656_v12, 4 }
 0xf00   :  { %v24909_v43 = vpop.eup %20328  ;;  %v15003_v5 = vrot.slane %v15002_v3, 4  ;;  %v14724_v29 = vcombine.high %v14644_v55, %v14644_v55  ;;  %v14774_v13 = vsub.f32 %v24780_v9, %v14644_v55  ;;  %v14776_v31 = vsub.f32 %v24799_v32, %v14644_v55 }
 0xf01   :  { %26098 = vst [vmem:[#allocation8_spill] sm:$0xff] %v24909_v43  ;;  %v24913_v7 = vpop.eup %20330  ;;  %v14996_v51 = vrot.slane %v14995_v54, 2  ;;  %v15009_v16 = vsel %vm14553_vm11, %v14929_v17, 0.0  ;;  %v15019_v46 = vsel %vm14555_vm10, %v24909_v43, 0.0  ;;  %v14651_v60 = vmax.f32 %v14649_v45, %v14650_v14 }
 0xf02   :  { %v15004_v47 = vadd.f32 %v15003_v5, %v15002_v3  ;;  %v14930_v10 = vcombine.low %v24903_v38, %v24913_v7  ;;  %v15011_v22 = vadd.f32 %v15010_v61, %v15009_v16  ;;  %v14775_v19 = vsub.f32 %v24795_v4, %v14724_v29 }
 0xf03   :  { %v14997_v8 = vadd.f32 %v14996_v51, %v14995_v54  ;;  %v14849_v9 = vmul.f32 1.442695, %v14774_v13  ;;  %v14853_v24 = vmul.f32 1.442695, %v14776_v31  ;;  %v14652_v32 = vrot.slane %v14651_v60, 1 }
 0xf04   :  { %v15005_v55 = vrot.slane %v15004_v47, 2  ;;  %v15012_v25 = vrot.slane %v15011_v22, 4  ;;  %v15018_v41 = vsel %vm14553_vm11, %v14930_v10, 0.0  ;;  %v14851_v17 = vmul.f32 1.442695, %v14775_v19 }
 0xf05   :  { %v14998_v50 = vrot.slane %v14997_v8, 1  ;;  %v15020_v58 = vadd.f32 %v15019_v46, %v15018_v41  ;;  %20338 = vpow2.f32 %v14849_v9  ;;  %v14653_v45 = vmax.f32 %v14651_v60, %v14652_v32 }
 0xf06   :  { %v24922_v3 = vpop.eup %20332  ;;  %v15006_v14 = vadd.f32 %v15005_v55, %v15004_v47  ;;  %v15013_v5 = vadd.f32 %v15012_v25, %v15011_v22  ;;  %20340 = vpow2.f32 %v14851_v17  ;;  %v14658_v61 = vmax.f32 %v14656_v12, %v14657_v20 }
 0xf07   :  { %v24924_v4 = vpop.eup %20334  ;;  %v14999_v54 = vadd.f32 %v14998_v50, %v14997_v8  ;;  %v15021_v29 = vrot.slane %v15020_v58, 4  ;;  %20342 = vpow2.f32 %v14853_v24  ;;  %v14725_v13 = vcombine.high %v14653_v45, %v14653_v45 }
 0xf08   :  { %v24926_v31 = vpop.eup %20336  ;;  %v15007_v51 = vrot.slane %v15006_v14, 1  ;;  %v15014_v16 = vrot.slane %v15013_v5, 2  ;;  %v15028_v41 = vsel %vm14555_vm10, %v24924_v4, 0.0  ;;  %v14659_v46 = vrot.slane %v14658_v61, 2 }
 0xf09   :  { %20344 = vrcp.f32 %v14999_v54  ;;  %v15022_v60 = vadd.f32 %v15021_v29, %v15020_v58  ;;  %v14931_v25 = vcombine.low %v24922_v3, %v24926_v31  ;;  %v14777_v12 = vsub.f32 %v24785_v57, %v14653_v45 }
 0xf0a   :  { %v15008_v20 = vadd.f32 %v15007_v51, %v15006_v14  ;;  %v15015_v50 = vadd.f32 %v15014_v16, %v15013_v5  ;;  %v14660_v8 = vmax.f32 %v14658_v61, %v14659_v46  ;;  %v14778_v24 = vsub.f32 %v24793_v0, %v14725_v13 }
 0xf0b   :  { %v15023_v47 = vrot.slane %v15022_v60, 2  ;;  %v15027_v10 = vsel %vm14553_vm11, %v14931_v25, 0.0  ;;  %v14779_v22 = vsub.f32 %v24818_v37, %v14653_v45  ;;  %v14855_v19 = vmul.f32 1.442695, %v14777_v12 }
 0xf0c   :  { %20346 = vrcp.f32 %v15008_v20  ;;  %v15016_v9 = vrot.slane %v15015_v50, 1  ;;  %v15029_v32 = vadd.f32 %v15028_v41, %v15027_v10  ;;  %v14661_v58 = vrot.slane %v14660_v8, 1 }
 0xf0d   :  { %v15024_v55 = vadd.f32 %v15023_v47, %v15022_v60  ;;  %20348 = vpow2.f32 %v14855_v19  ;;  %v14857_v17 = vmul.f32 1.442695, %v14778_v24  ;;  %v14859_v54 = vmul.f32 1.442695, %v14779_v22 }
 0xf0e   :  { %v15017_v57 = vadd.f32 %v15016_v9, %v15015_v50  ;;  %v15030_v14 = vrot.slane %v15029_v32, 4  ;;  %v14662_v5 = vmax.f32 %v14660_v8, %v14661_v58  ;;  %v26099_v0 = vcombine.high %v24805_v63, %v24805_v63 }
 0xf0f   :  { %v24940_v29 = vpop.eup %20338  ;;  %v15025_v37 = vrot.slane %v15024_v55, 1  ;;  %20350 = vpow2.f32 %v14857_v17  ;;  %v15168_v45 = vmul.f32 %v24820_v33, %v24687_v48  ;;  %v24946_v13 = vcombine.high %v24832_v36, %v24832_v36 }
 0xf10   :  { %v15164_v61 = vmul.f32 %v24679_v39, %v26099_v0  ;;  %v24948_v51 = vpop.eup %20340  ;;  %20352 = vrcp.f32 %v15017_v57  ;;  %v15031_v16 = vadd.f32 %v15030_v14, %v15029_v32  ;;  %v14726_v41 = vcombine.high %v14662_v5, %v14662_v5 }
 0xf11   :  { %v14780_v63 = vsub.f32 %v24851_v1, %v14662_v5  ;;  %v24951_v39 = vpop.eup %20342  ;;  %v15026_v46 = vadd.f32 %v15025_v37, %v15024_v55  ;;  %v14932_v60 = vcombine.low %v24940_v29, %v24948_v51  ;;  %v14782_v48 = vsub.f32 %v24816_v59, %v14662_v5  ;;  %15273 = vperm.xlu0 %19690, %v15168_v45  }
 0xf12   :  { %15225 = vperm.xlu1 %19691, %v15164_v61   ;;  %20354 = vpow2.f32 %v14859_v54  ;;  %v15032_v25 = vrot.slane %v15031_v16, 2  ;;  %v15037_v12 = vsel %vm14555_vm10, %v24951_v39, 0.0  ;;  %v14781_v20 = vsub.f32 %v24809_v53, %v14726_v41 }
 0xf13   :  { %v14861_v50 = vmul.f32 1.442695, %v14780_v63  ;;  %v24959_v8 = vpop.eup %20344  ;;  %20356 = vrcp.f32 %v15026_v46  ;;  %v15036_v1 = vsel %vm14553_vm11, %v14932_v60, 0.0  ;;  %v14865_v24 = vmul.f32 1.442695, %v14782_v48 }
 0xf14   :  { %v14664_v47 = vsel %vm14555_vm10, %v24832_v36, -inf  ;;  %v15033_v10 = vadd.f32 %v15032_v25, %v15031_v16  ;;  %v15038_v59 = vadd.f32 %v15037_v12, %v15036_v1  ;;  %v14863_v22 = vmul.f32 1.442695, %v14781_v20 }
 0xf15   :  { %20358 = vpow2.f32 %v14861_v50  ;;  %v24966_v19 = vcombine.high %v24837_v6, %v24837_v6  ;;  %v15166_v53 = vmul.f32 %v24820_v33, %v24681_v2  ;;  %v15132_v9 = vcombine.high %v24820_v33, %v24820_v33 }
 0xf16   :  { %20360 = vpow2.f32 %v14865_v24  ;;  %v24972_v32 = vpop.eup %20346  ;;  %v15034_v58 = vrot.slane %v15033_v10, 1  ;;  %v15039_v55 = vrot.slane %v15038_v59, 4  ;;  %v24976_v17 = vcombine.high %v24842_v52, %v24842_v52 }
 0xf17   :  { %20362 = vpow2.f32 %v14863_v22  ;;  %v24978_v54 = vpop.eup %20348  ;;  %v14533_v57 = vcombine.low %v24837_v6, %v24966_v19  ;;  %15249 = vperm.xlu1 %19691, %v15166_v53   ;;  %v15167_v2 = vmul.f32 %v24685_v30, %v15132_v9  ;;  %v24985_v33 = vcombine.high %v24844_v18, %v24844_v18 }
 0xf18   :  { %26100 = vst [vmem:[#allocation30_spill] sm:$0xff] %v24978_v54  ;;  %v14534_v14 = vcombine.low %v24946_v13, %v24844_v18  ;;  %v15035_v5 = vadd.f32 %v15034_v58, %v15033_v10  ;;  %v15040_v0 = vadd.f32 %v15039_v55, %v15038_v59  ;;  %v14535_v61 = vcombine.low %v24842_v52, %v24976_v17 }
 0xf19   :  { %v15169_v37 = vmul.f32 %v24828_v44, %v24694_v62  ;;  %v24993_v45 = vpop.eup %20350  ;;  %v14663_v16 = vsel %vm14553_vm11, %v14533_v57, -inf  ;;  %15261 = vperm.xlu0 %19690, %v15167_v2   ;;  %v14673_v41 = vsel %vm14555_vm10, %v24985_v33, -inf  ;;  %v15133_v63 = vcombine.high %v24828_v44, %v24828_v44 }
 0xf1a   :  { %v14672_v30 = vsel %vm14553_vm11, %v14534_v14, -inf  ;;  %v25001_v46 = vpop.eup %20352  ;;  %20364 = vrcp.f32 %v15035_v5  ;;  %v15041_v60 = vrot.slane %v15040_v0, 2  ;;  %v14933_v62 = vcombine.low %v24978_v54, %v24993_v45 }
 0xf1b   :  { %v14665_v48 = vmax.f32 %v14663_v16, %v14664_v47  ;;  %v14674_v12 = vmax.f32 %v14672_v30, %v14673_v41  ;;  %15285 = vperm.xlu1 %19691, %v15169_v37   ;;  %v15170_v20 = vmul.f32 %v24699_v15, %v15133_v63  ;;  %v25010_v50 = vcombine.high %v24861_v40, %v24861_v40 }
 0xf1c   :  { %v25005_v25 = vpop.eup %20354  ;;  %v25014_v1 = vcombine.high %v24867_v23, %v24867_v23  ;;  %v15042_v24 = vadd.f32 %v15041_v60, %v15040_v0  ;;  %v15045_v10 = vsel %vm14553_vm11, %v14933_v62, 0.0  ;;  %v14681_v14 = vsel %vm14553_vm11, %v14535_v61, -inf }
 0xf1d   :  { %v15046_v47 = vsel %vm14555_vm10, %v25005_v25, 0.0  ;;  %v14666_v59 = vrot.slane %v14665_v48, 4  ;;  %v25019_v22 = vpop.eup %20356  ;;  %v14675_v9 = vrot.slane %v14674_v12, 4  ;;  %15297 = vperm.xlu0 %19690, %v15170_v20   ;;  %v14691_v15 = vsel %vm14555_vm10, %v25010_v50, -inf }
 0xf1e   :  { %v15047_v53 = vadd.f32 %v15046_v47, %v15045_v10  ;;  %v14536_v58 = vcombine.low %v25014_v1, %v24861_v40  ;;  %v15043_v57 = vrot.slane %v15042_v24, 1  ;;  %v14682_v5 = vsel %vm14555_vm10, %v24867_v23, -inf }
 0xf1f   :  { %v25025_v55 = vpop.eup %20358  ;;  %v14667_v2 = vmax.f32 %v14665_v48, %v14666_v59  ;;  %v14676_v16 = vmax.f32 %v14674_v12, %v14675_v9  ;;  %v14683_v30 = vmax.f32 %v14681_v14, %v14682_v5  ;;  %v15171_v9 = vmul.f32 %v24828_v44, %v24701_v11 }
 0xf20   :  { %v25030_v0 = vpop.eup %20360  ;;  %v15048_v37 = vrot.slane %v15047_v53, 4  ;;  %v14690_v41 = vsel %vm14553_vm11, %v14536_v58, -inf  ;;  %v15044_v60 = vadd.f32 %v15043_v57, %v15042_v24  ;;  %v15172_v11 = vmul.f32 %v24834_v42, %v24705_v49 }
 0xf21   :  { %v25033_v63 = vpop.eup %20362  ;;  %v15055_v62 = vsel %vm14555_vm10, %v25030_v0, 0.0  ;;  %v14668_v20 = vrot.slane %v14667_v2, 2  ;;  %v14692_v48 = vmax.f32 %v14690_v41, %v14691_v15  ;;  %v14677_v47 = vrot.slane %v14676_v16, 2  ;;  %15309 = vperm.xlu1 %19691, %v15171_v9  }
 0xf22   :  { %v14934_v61 = vcombine.low %v25025_v55, %v25033_v63  ;;  %v15049_v10 = vadd.f32 %v15048_v37, %v15047_v53  ;;  %v14684_v59 = vrot.slane %v14683_v30, 4  ;;  %20366 = vrcp.f32 %v15044_v60 }
 0xf23   :  { %v14669_v43 = vmax.f32 %v14667_v2, %v14668_v20  ;;  %v14693_v12 = vrot.slane %v14692_v48, 4  ;;  %v14678_v57 = vmax.f32 %v14676_v16, %v14677_v47  ;;  %v15134_v53 = vcombine.high %v24834_v42, %v24834_v42 }
 0xf24   :  { %v15050_v58 = vrot.slane %v15049_v10, 2  ;;  %v15054_v24 = vsel %vm14553_vm11, %v14934_v61, 0.0  ;;  %v14685_v14 = vmax.f32 %v14683_v30, %v14684_v59  ;;  %v25042_v5 = vpop.eup %20364 }
 0xf25   :  { %v15056_v15 = vadd.f32 %v15055_v62, %v15054_v24  ;;  %v14670_v41 = vrot.slane %v14669_v43, 1  ;;  %v14694_v54 = vmax.f32 %v14692_v48, %v14693_v12  ;;  %v14679_v2 = vrot.slane %v14678_v57, 1  ;;  %15321 = vperm.xlu1 %19691, %v15172_v11  }
 0xf26   :  { %v15051_v37 = vadd.f32 %v15050_v58, %v15049_v10  ;;  %v14686_v60 = vrot.slane %v14685_v14, 2  ;;  %v15173_v16 = vmul.f32 %v24709_v26, %v15134_v53  ;;  %v15174_v48 = vmul.f32 %v24834_v42, %v24716_v27 }
 0xf27   :  { %v15057_v44 = vrot.slane %v15056_v15, 4  ;;  %v14671_v20 = vmax.f32 %v14669_v43, %v14670_v41  ;;  %v14695_v61 = vrot.slane %v14694_v54, 2  ;;  %v14680_v47 = vmax.f32 %v14678_v57, %v14679_v2 }
 0xf28   :  { %v15052_v30 = vrot.slane %v15051_v37, 1  ;;  %v14687_v62 = vmax.f32 %v14685_v14, %v14686_v60  ;;  %15333 = vperm.xlu0 %19690, %v15173_v16  }
 0xf29   :  { %v15058_v59 = vadd.f32 %v15057_v44, %v15056_v15  ;;  %v14727_v12 = vcombine.high %v14671_v20, %v14671_v20  ;;  %v14783_v10 = vsub.f32 %v24837_v6, %v14671_v20  ;;  %v14785_v9 = vsub.f32 %v24832_v36, %v14671_v20  ;;  %15345 = vperm.xlu1 %19691, %v15174_v48  }
 0xf2a   :  { %v15053_v58 = vadd.f32 %v15052_v30, %v15051_v37  ;;  %v14728_v49 = vcombine.high %v14680_v47, %v14680_v47  ;;  %v14786_v43 = vsub.f32 %v24946_v13, %v14680_v47  ;;  %v14788_v24 = vsub.f32 %v24985_v33, %v14680_v47 }
 0xf2b   :  { %v15059_v26 = vrot.slane %v15058_v59, 2  ;;  %v14784_v57 = vsub.f32 %v24966_v19, %v14727_v12  ;;  %v14867_v14 = vmul.f32 1.442695, %v14783_v10  ;;  %v14871_v41 = vmul.f32 1.442695, %v14785_v9 }
 0xf2c   :  { %20368 = vrcp.f32 %v15053_v58  ;;  %v14787_v27 = vsub.f32 %v24844_v18, %v14728_v49  ;;  %v14873_v42 = vmul.f32 1.442695, %v14786_v43  ;;  %v14877_v6 = vmul.f32 1.442695, %v14788_v24  ;;  %v25057_v15 = vpop.eup %20366  ;;  %v26103_v24 = vld [vmem:[#allocation15_spill] sm:$0xff] }
 0xf2d   :  { %v15060_v36 = vadd.f32 %v15059_v26, %v15058_v59  ;;  %20370 = vpow2.f32 %v14867_v14  ;;  %v14869_v53 = vmul.f32 1.442695, %v14784_v57  ;;  %v14688_v37 = vrot.slane %v14687_v62, 1 }
 0xf2e   :  { %20372 = vpow2.f32 %v14871_v41  ;;  %v14875_v13 = vmul.f32 1.442695, %v14787_v27  ;;  %v14696_v33 = vmax.f32 %v14694_v54, %v14695_v61  ;;  %v15177_v19 = vmul.f32 %v24959_v8, %v24863_v34 }
 0xf2f   :  { %v15061_v2 = vrot.slane %v15060_v36, 1  ;;  %20374 = vpow2.f32 %v14869_v53  ;;  %v14689_v60 = vmax.f32 %v14687_v62, %v14688_v37  ;;  %v15175_v18 = vmul.f32 %v24959_v8, %v24853_v28  ;;  %v26104_v53 = vld [vmem:[#allocation12_spill] sm:$0xff] }
 0xf30   :  { %20376 = vpow2.f32 %v14873_v42  ;;  %v14697_v11 = vrot.slane %v14696_v33, 1  ;;  %v15135_v44 = vcombine.high %v24959_v8, %v24959_v8  ;;  %v15178_v20 = vmul.f32 %v24972_v32, %v24875_v56  ;;  %15381 = vperm.xlu1 %19691, %v15177_v19  }
 0xf31   :  { %v15062_v16 = vadd.f32 %v15061_v2, %v15060_v36  ;;  %20378 = vpow2.f32 %v14875_v13  ;;  %v14729_v54 = vcombine.high %v14689_v60, %v14689_v60  ;;  %v14789_v61 = vsub.f32 %v24842_v52, %v14689_v60  ;;  %15357 = vperm.xlu0 %19690, %v15175_v18  }
 0xf32   :  { %20380 = vpow2.f32 %v14877_v6  ;;  %v14698_v34 = vmax.f32 %v14696_v33, %v14697_v11  ;;  %v14791_v30 = vsub.f32 %v24867_v23, %v14689_v60  ;;  %v15176_v28 = vmul.f32 %v24869_v21, %v15135_v44  ;;  %v26101_v23 = vld [vmem:[#allocation27_spill] sm:$0xff] }
 0xf33   :  { %20382 = vrcp.f32 %v15062_v16  ;;  %v14790_v47 = vsub.f32 %v24976_v17, %v14729_v54  ;;  %v14879_v8 = vmul.f32 1.442695, %v14789_v61  ;;  %v15180_v56 = vmul.f32 %v24972_v32, %v24881_v35 }
 0xf34   :  { %v14730_v62 = vcombine.high %v14698_v34, %v14698_v34  ;;  %v14792_v48 = vsub.f32 %v25014_v1, %v14698_v34  ;;  %v14794_v52 = vsub.f32 %v25010_v50, %v14698_v34  ;;  %v14883_v59 = vmul.f32 1.442695, %v14791_v30  ;;  %15369 = vperm.xlu1 %19691, %v15176_v28   ;;  %v26102_v50 = vld [vmem:[#allocation94_spill] sm:$0xff] }
 0xf35   :  { %20384 = vpow2.f32 %v14879_v8  ;;  %v14881_v12 = vmul.f32 1.442695, %v14790_v47  ;;  %15393 = vperm.xlu0 %19690, %v15178_v20   ;;  %v15181_v10 = vmul.f32 %v25001_v46, %v26101_v23  ;;  %v15136_v21 = vcombine.high %v24972_v32, %v24972_v32 }
 0xf36   :  { %v20369_v17 = vpop.eup %20368  ;;  %v14793_v9 = vsub.f32 %v24861_v40, %v14730_v62  ;;  %20386 = vpow2.f32 %v14883_v59  ;;  %v14885_v35 = vmul.f32 1.442695, %v14792_v48  ;;  %v14889_v58 = vmul.f32 1.442695, %v14794_v52 }
 0xf37   :  { %v25080_v1 = vpop.eup %20370  ;;  %20388 = vpow2.f32 %v14881_v12  ;;  %v15179_v49 = vmul.f32 %v26102_v50, %v15136_v21  ;;  %v15184_v43 = vmul.f32 %v25019_v22, %v24903_v38  ;;  %v15183_v26 = vmul.f32 %v25001_v46, %v26103_v24 }
 0xf38   :  { %v25087_v57 = vpop.eup %20372  ;;  %20390 = vpow2.f32 %v14885_v35  ;;  %v14887_v32 = vmul.f32 1.442695, %v14793_v9  ;;  %v15139_v40 = vcombine.high %v25042_v5, %v25042_v5  ;;  %v15137_v14 = vcombine.high %v25001_v46, %v25001_v46  ;;  %15417 = vperm.xlu1 %19691, %v15180_v56  }
 0xf39   :  { %v25093_v41 = vpop.eup %20374  ;;  %v15064_v27 = vsel %vm14555_vm10, %v25087_v57, 0.0  ;;  %20392 = vpow2.f32 %v14889_v58  ;;  %15429 = vperm.xlu0 %19690, %v15181_v10   ;;  %v15192_v38 = vmul.f32 %v25057_v15, %v24951_v39  ;;  %v15138_v42 = vcombine.high %v25019_v22, %v25019_v22 }
 0xf3a   :  { %v25101_v6 = vpop.eup %20376  ;;  %v14935_v36 = vcombine.low %v25080_v1, %v25093_v41  ;;  %20394 = vpow2.f32 %v14887_v32  ;;  %v15188_v46 = vmul.f32 %v24926_v31, %v15139_v40  ;;  %v15182_v37 = vmul.f32 %v26104_v53, %v15137_v14 }
 0xf3b   :  { %v25107_v13 = vpop.eup %20378  ;;  %v15185_v33 = vmul.f32 %v24913_v7, %v15138_v42  ;;  %v15140_v39 = vcombine.high %v25057_v15, %v25057_v15  ;;  %v25114_v19 = vmul.f32 %v25042_v5, %v24922_v3  ;;  %v15195_v2 = vmul.f32 %v20369_v17, %v25005_v25 }
 0xf3c   :  { %v25117_v60 = vpop.eup %20380  ;;  %v15063_v18 = vsel %vm14553_vm11, %v14935_v36, 0.0  ;;  %v14936_v31 = vcombine.low %v25101_v6, %v25107_v13  ;;  %v25124_v11 = vmul.f32 %v25042_v5, %v24924_v4  ;;  %v15141_v7 = vcombine.high %v20369_v17, %v20369_v17  ;;  %15405 = vperm.xlu1 %19691, %v15179_v49   ;;  %v26105_v5 = vld [vmem:[#allocation30_spill] sm:$0xff] }
 0xf3d   :  { %v20383_v44 = vpop.eup %20382  ;;  %v15065_v20 = vadd.f32 %v15064_v27, %v15063_v18  ;;  %v15073_v3 = vsel %vm14555_vm10, %v25117_v60, 0.0  ;;  %15465 = vperm.xlu0 %19690, %v15184_v43   ;;  %v15191_v25 = vmul.f32 %v24948_v51, %v15140_v39  ;;  %v25131_v16 = vmul.f32 %v25057_v15, %v24940_v29  ;;  %v26106_v15 = vld [vmem:[#allocation8_spill] sm:$0xff] }
 0xf3e   :  { %v15072_v54 = vsel %vm14553_vm11, %v14936_v31, 0.0  ;;  %v15194_v61 = vmul.f32 %v24993_v45, %v15141_v7  ;;  %v15198_v4 = vmul.f32 %v20383_v44, %v25030_v0  ;;  %v25137_v34 = vmul.f32 %v20369_v17, %v26105_v5 }
 0xf3f   :  { %v25139_v30 = vpop.eup %20384  ;;  %v15066_v28 = vrot.slane %v15065_v20, 4  ;;  %v15074_v47 = vadd.f32 %v15073_v3, %v15072_v54  ;;  %v15142_v8 = vcombine.high %v20383_v44, %v20383_v44  ;;  %v25142_v51 = vmul.f32 %v20383_v44, %v25025_v55 }
 0xf40   :  { %v25144_v29 = vpop.eup %20386  ;;  %v25148_v56 = vmul.f32 %v25019_v22, %v26106_v15  ;;  %15453 = vperm.xlu1 %19691, %v15183_v26  }
 0xf41   :  { %v25150_v45 = vpop.eup %20388  ;;  %v15067_v0 = vadd.f32 %v15066_v28, %v15065_v20  ;;  %v15075_v62 = vrot.slane %v15074_v47, 4  ;;  %15513 = vperm.xlu0 %19690, %v15188_v46   ;;  %v15197_v48 = vmul.f32 %v25033_v63, %v15142_v8  ;;  %v15082_v21 = vsel %vm14555_vm10, %v25144_v29, 0.0 }
 0xf42   :  { %v25153_v52 = vpop.eup %20390  ;;  %v14937_v59 = vcombine.low %v25139_v30, %v25150_v45 }
 0xf43   :  { %v25157_v55 = vpop.eup %20392  ;;  %v15068_v12 = vrot.slane %v15067_v0, 2  ;;  %v15076_v23 = vadd.f32 %v15075_v62, %v15074_v47  ;;  %v15219_v47 = vlaneseq }
 0xf44   :  { %v25159_v10 = vpop.eup %20394  ;;  %v15081_v22 = vsel %vm14553_vm11, %v14937_v59, 0.0  ;;  %v15091_v58 = vsel %vm14555_vm10, %v25157_v55, 0.0  ;;  %15441 = vperm.xlu1 %19691, %v15182_v37   ;;  %v26107_v59 = vld [vmem:[#allocation113_spill] sm:$0xff] }
 0xf45   :  { %v15069_v17 = vadd.f32 %v15068_v12, %v15067_v0  ;;  %v15077_v9 = vrot.slane %v15076_v23, 2  ;;  %v14938_v63 = vcombine.low %v25153_v52, %v25159_v10  ;;  %v15083_v35 = vadd.f32 %v15082_v21, %v15081_v22  ;;  %15561 = vperm.xlu0 %19690, %v15192_v38  }
 0xf47   :  { %v15070_v50 = vrot.slane %v15069_v17, 1  ;;  %v15078_v49 = vadd.f32 %v15077_v9, %v15076_v23  ;;  %v15084_v43 = vrot.slane %v15083_v35, 4  ;;  %v15090_v24 = vsel %vm14553_vm11, %v14938_v63, 0.0  ;;  %v26109_v23 = vld [vmem:[#allocation34_spill] sm:$0xff] }
 0xf48   :  { %v15092_v26 = vadd.f32 %v15091_v58, %v15090_v24  ;;  %15477 = vperm.xlu1 %19691, %v15185_v33   ;;  %v26110_v24 = vld [vmem:[#allocation13_spill] sm:$0xff] }
 0xf49   :  { %v15071_v32 = vadd.f32 %v15070_v50, %v15069_v17  ;;  %v15079_v40 = vrot.slane %v15078_v49, 1  ;;  %v15085_v14 = vadd.f32 %v15084_v43, %v15083_v35  ;;  %15549 = vperm.xlu0 %19690, %v15191_v25  }
 0xf4a   :  { %v15093_v27 = vrot.slane %v15092_v26, 4 }
 0xf4b   :  { %20396 = vrcp.f32 %v15071_v32  ;;  %v15080_v42 = vadd.f32 %v15079_v40, %v15078_v49  ;;  %v15086_v36 = vrot.slane %v15085_v14, 2 }
 0xf4c   :  { %v15094_v38 = vadd.f32 %v15093_v27, %v15092_v26  ;;  %15501 = vperm.xlu1 %19691, %v25114_v19   ;;  %v26111_v27 = vld [vmem:[#allocation117_spill] sm:$0xff] }
 0xf4d   :  { %20398 = vrcp.f32 %v15080_v42  ;;  %v15087_v46 = vadd.f32 %v15086_v36, %v15085_v14  ;;  %15597 = vperm.xlu0 %19690, %v15195_v2   ;;  %v26112_v36 = vld [vmem:[#allocation103_spill] sm:$0xff] }
 0xf4e   :  { %v15095_v53 = vrot.slane %v15094_v38, 2 }
 0xf4f   :  { %v15088_v37 = vrot.slane %v15087_v46, 1 }
 0xf50   :  { %v15096_v39 = vadd.f32 %v15095_v53, %v15094_v38  ;;  %15525 = vperm.xlu1 %19691, %v25124_v11  }
 0xf51   :  { %v15089_v18 = vadd.f32 %v15088_v37, %v15087_v46  ;;  %15585 = vperm.xlu0 %19690, %v15194_v61  }
 0xf52   :  { %v15097_v31 = vrot.slane %v15096_v39, 1 }
 0xf53   :  { %20400 = vrcp.f32 %v15089_v18 }
 0xf54   :  { %v15098_v7 = vadd.f32 %v15097_v31, %v15096_v39  ;;  %15537 = vperm.xlu1 %19691, %v25131_v16   ;;  %v26113_v39 = vld [vmem:[#allocation6_spill] sm:$0xff] }
 0xf55   :  { %v20397_v33 = vpop.eup %20396  ;;  %15633 = vperm.xlu0 %19690, %v15198_v4  }
 0xf56   :  { %20402 = vrcp.f32 %v15098_v7  ;;  %v15201_v44 = vmul.f32 %v20397_v33, %v25087_v57  ;;  %v15199_v2 = vmul.f32 %v20397_v33, %v25080_v1  ;;  %v15143_v20 = vcombine.high %v20397_v33, %v20397_v33 }
 0xf57   :  { %v20399_v19 = vpop.eup %20398 }
 0xf58   :  { %v15200_v3 = vmul.f32 %v25093_v41, %v15143_v20  ;;  %v15204_v25 = vmul.f32 %v20399_v19, %v25117_v60  ;;  %v15202_v54 = vmul.f32 %v20399_v19, %v25101_v6  ;;  %v15144_v11 = vcombine.high %v20399_v19, %v20399_v19  ;;  %15573 = vperm.xlu1 %19691, %v25137_v34  }
 0xf59   :  { %15621 = vperm.xlu0 %19690, %v15197_v48  }
 0xf5a   :  { %v15203_v61 = vmul.f32 %v25107_v13, %v15144_v11 }
 0xf5c   :  { %15609 = vperm.xlu1 %19691, %v25142_v51   ;;  %v15220_v51 = vshrl.u32 %v15219_v47, 7 }
 0xf5d   :  { %v20401_v4 = vpop.eup %20400  ;;  %15669 = vperm.xlu0 %19690, %v15201_v44  }
 0xf5e   :  { %v15205_v1 = vmul.f32 %v20401_v4, %v25139_v30  ;;  %v15207_v57 = vmul.f32 %v20401_v4, %v25144_v29  ;;  %v15145_v16 = vcombine.high %v20401_v4, %v20401_v4  ;;  %v20420_v30 = vmov 839922192  }
 0xf5f   :  { %v15217_v28 = vunpack.c.l.s4 %v20420_v30 }
 0xf60   :  { %v20403_v41 = vpop.eup %20402  ;;  %v15206_v60 = vmul.f32 %v25150_v45, %v15145_v16  ;;  %15645 = vperm.xlu1 %19691, %v15199_v2   ;;  %v26114_v2 = vld [vmem:[#allocation17_spill] sm:$0xff] }
 0xf61   :  { %15657 = vperm.xlu0 %19690, %v15200_v3   ;;  %v15208_v6 = vmul.f32 %v20403_v41, %v25153_v52  ;;  %v15146_v5 = vcombine.high %v20403_v41, %v20403_v41  ;;  %v15210_v34 = vmul.f32 %v20403_v41, %v25157_v55  ;;  %v15218_v8 = vunpack.c.0.s8 %v15217_v28  ;;  %v26108_v55 = vld [vmem:[#allocation32_spill] sm:$0xff] }
 0xf63   :  { %v15209_v13 = vmul.f32 %v25159_v10, %v15146_v5  ;;  %v25187_v15 = vsub.s32 %v15218_v8, %v15220_v51 }
 0xf64   :  { %15681 = vperm.xlu1 %19691, %v15202_v54  }
 0xf65   :  { %15705 = vperm.xlu0 %19690, %v15204_v25  }
 0xf68   :  { %15717 = vperm.xlu1 %19691, %v15205_v1  }
 0xf69   :  { %15693 = vperm.xlu0 %19690, %v15203_v61  }
 0xf6c   :  { %15753 = vperm.xlu1 %19691, %v15208_v6  }
 0xf6d   :  { %15741 = vperm.xlu0 %19690, %v15207_v57   ;;  %v26115_v57 = vld [vmem:[#allocation109_spill] sm:$0xff] }
 0xf70   :  { %15489 = vperm.xlu1 %19691, %v25148_v56  }
 0xf71   :  { %15729 = vperm.xlu0 %19690, %v15206_v60  }
 0xf75   :  { %15765 = vperm.xlu0 %19690, %v15209_v13  }
 0xf78   :  { %v15238_v29 = vpop.permute.xlu1 %15237 }
 0xf79   :  { %15777 = vperm.xlu0 %19690, %v15210_v34   ;;  %v15246_v0 = vrot.slane %v15238_v29, %v25187_v15  ;;  %v26116_v29 = vld [vmem:[#allocation115_spill] sm:$0xff] }
 0xf7a   :  { %v15214_v45 = vpop.permute.xlu0 %15213 }
 0xf7b   :  { %v15222_v62 = vrot.slane %v15214_v45, %v25187_v15  ;;  %v15805_v56 = vmul.f32 %v15246_v0, %v26107_v59  ;;  %v26117_v0 = vld [vmem:[#allocation108_spill] sm:$0xff] }
 0xf7d   :  { %v15803_v12 = vmul.f32 %v15222_v62, %v26108_v55  ;;  %v15917_v17 = vsel %vm15916_vm12, %v15805_v56, 0.0 }
 0xf90   :  { %v15274_v22 = vpop.permute.xlu0 %15273 }
 0xf91   :  { %v15226_v48 = vpop.permute.xlu1 %15225  ;;  %v15282_v58 = vrot.slane %v15274_v22, %v25187_v15  ;;  %v26118_v22 = vld [vmem:[#allocation114_spill] sm:$0xff] }
 0xf92   :  { %v15234_v52 = vrot.slane %v15226_v48, %v25187_v15 }
 0xf93   :  { %v15808_v42 = vmul.f32 %v15282_v58, %v26111_v27 }
 0xf94   :  { %v15804_v10 = vmul.f32 %v15234_v52, %v26109_v23 }
 0xf95   :  { %v15926_v33 = vsel %vm15916_vm12, %v15808_v42, 0.0 }
 0xf96   :  { %v15883_v21 = vcombine.low %v15803_v12, %v15804_v10  ;;  %v15250_v63 = vpop.permute.xlu1 %15249 }
 0xf97   :  { %v15258_v50 = vrot.slane %v15250_v63, %v25187_v15 }
 0xf98   :  { %v15915_v9 = vsel %vm138_vm0, %v15883_v21, 0.0  ;;  %v15262_v49 = vpop.permute.xlu0 %15261 }
 0xf99   :  { %v15918_v35 = vadd.f32 %v15917_v17, %v15915_v9  ;;  %v15806_v26 = vmul.f32 %v15258_v50, %v26110_v24  ;;  %v15270_v32 = vrot.slane %v15262_v49, %v25187_v15 }
 0xf9a   :  { %v15286_v40 = vpop.permute.xlu1 %15285 }
 0xf9b   :  { %v15919_v43 = vrot.slane %v15918_v35, 4  ;;  %v15807_v38 = vmul.f32 %v15270_v32, %v26112_v36  ;;  %v15294_v46 = vrot.slane %v15286_v40, %v25187_v15 }
 0xf9c   :  { %v15298_v53 = vpop.permute.xlu0 %15297 }
 0xf9d   :  { %v15920_v14 = vadd.f32 %v15919_v43, %v15918_v35  ;;  %v15884_v37 = vcombine.low %v15806_v26, %v15807_v38  ;;  %v15809_v18 = vmul.f32 %v15294_v46, %v26113_v39  ;;  %v15306_v31 = vrot.slane %v15298_v53, %v25187_v15 }
 0xf9f   :  { %v15921_v7 = vrot.slane %v15920_v14, 2  ;;  %v15925_v44 = vsel %vm138_vm0, %v15884_v37, 0.0  ;;  %v15810_v20 = vmul.f32 %v15306_v31, %v26114_v2 }
 0xfa0   :  { %v15927_v19 = vadd.f32 %v15926_v33, %v15925_v44  ;;  %v15310_v11 = vpop.permute.xlu1 %15309 }
 0xfa1   :  { %v15885_v3 = vcombine.low %v15809_v18, %v15810_v20  ;;  %v15922_v54 = vadd.f32 %v15921_v7, %v15920_v14  ;;  %v15318_v4 = vrot.slane %v15310_v11, %v25187_v15  ;;  %v26120_v11 = vld [vmem:[#allocation106_spill] sm:$0xff] }
 0xfa2   :  { %v15928_v25 = vrot.slane %v15927_v19, 4 }
 0xfa3   :  { %v15811_v16 = vmul.f32 %v15318_v4, %v26115_v57  ;;  %v15923_v41 = vrot.slane %v15922_v54, 1  ;;  %v15934_v5 = vsel %vm138_vm0, %v15885_v3, 0.0 }
 0xfa4   :  { %v15929_v61 = vadd.f32 %v15928_v25, %v15927_v19  ;;  %v15322_v30 = vpop.permute.xlu1 %15321  ;;  %v26119_v19 = vld [vmem:[#allocation112_spill] sm:$0xff] }
 0xfa5   :  { %v15935_v34 = vsel %vm15916_vm12, %v15811_v16, 0.0  ;;  %v15330_v47 = vrot.slane %v15322_v30, %v25187_v15  ;;  %v15924_v48 = vadd.f32 %v15923_v41, %v15922_v54  ;;  %v26121_v16 = vld [vmem:[#allocation81_spill] sm:$0xff] }
 0xfa6   :  { %v15930_v1 = vrot.slane %v15929_v61, 2  ;;  %v15936_v28 = vadd.f32 %v15935_v34, %v15934_v5 }
 0xfa7   :  { %v15334_v60 = vpop.permute.xlu0 %15333  ;;  %v15812_v62 = vmul.f32 %v15330_v47, %v26117_v0 }
 0xfa8   :  { %v15931_v6 = vadd.f32 %v15930_v1, %v15929_v61  ;;  %v15342_v13 = vrot.slane %v15334_v60, %v25187_v15  ;;  %v15937_v51 = vrot.slane %v15936_v28, 4  ;;  %v15346_v59 = vpop.permute.xlu1 %15345 }
 0xfa9   :  { %v15354_v12 = vrot.slane %v15346_v59, %v25187_v15 }
 0xfaa   :  { %v15932_v8 = vrot.slane %v15931_v6, 1  ;;  %v15813_v45 = vmul.f32 %v15342_v13, %v26116_v29  ;;  %v15938_v56 = vadd.f32 %v15937_v51, %v15936_v28  ;;  %v26122_v28 = vld [vmem:[#allocation76_spill] sm:$0xff]  ;;  %v26123_v29 = vld [vmem:[#allocation69_spill] sm:$0xff] }
 0xfab   :  { %v15814_v21 = vmul.f32 %v15354_v12, %v26118_v22 }
 0xfac   :  { %v15933_v52 = vadd.f32 %v15932_v8, %v15931_v6  ;;  %v15886_v55 = vcombine.low %v15812_v62, %v15813_v45  ;;  %v15939_v10 = vrot.slane %v15938_v56, 2 }
 0xfad   :  { %v15944_v58 = vsel %vm15916_vm12, %v15814_v21, 0.0 }
 0xfae   :  { %v16077_v23 = vsel %vm16076_vm13, %v15933_v52, %v15924_v48  ;;  %v15940_v63 = vadd.f32 %v15939_v10, %v15938_v56  ;;  %v15943_v35 = vsel %vm138_vm0, %v15886_v55, 0.0  ;;  %v26124_v55 = vld [vmem:[#allocation70_spill] sm:$0xff] }
 0xfaf   :  { %v15382_v9 = vpop.permute.xlu1 %15381  ;;  %v15945_v50 = vadd.f32 %v15944_v58, %v15943_v35 }
 0xfb0   :  { %v15358_v17 = vpop.permute.xlu0 %15357  ;;  %v15941_v49 = vrot.slane %v15940_v63, 1  ;;  %v15390_v54 = vrot.slane %v15382_v9, %v25187_v15 }
 0xfb1   :  { %v15946_v24 = vrot.slane %v15945_v50, 4  ;;  %v15366_v2 = vrot.slane %v15358_v17, %v25187_v15  ;;  %v26125_v17 = vld [vmem:[#allocation73_spill] sm:$0xff] }
 0xfb2   :  { %v15942_v32 = vadd.f32 %v15941_v49, %v15940_v63  ;;  %v15817_v41 = vmul.f32 %v15390_v54, %v26121_v16 }
 0xfb3   :  { %v15370_v26 = vpop.permute.xlu1 %15369  ;;  %v15947_v40 = vadd.f32 %v15946_v24, %v15945_v50  ;;  %v15815_v61 = vmul.f32 %v15366_v2, %v26120_v11  ;;  %v26126_v50 = vld [vmem:[#allocation72_spill] sm:$0xff]  ;;  %v26130_v11 = vld [vmem:[#allocation79_spill] sm:$0xff] }
 0xfb4   :  { %v15394_v43 = vpop.permute.xlu0 %15393  ;;  %v16079_v14 = vsel %vm16078_vm14, %v15942_v32, %v16077_v23  ;;  %v15378_v33 = vrot.slane %v15370_v26, %v25187_v15  ;;  %v15953_v30 = vsel %vm15916_vm12, %v15817_v41, 0.0  ;;  %v26127_v32 = vld [vmem:[#allocation83_spill] sm:$0xff] }
 0xfb5   :  { %v15948_v42 = vrot.slane %v15947_v40, 2  ;;  %v15402_v34 = vrot.slane %v15394_v43, %v25187_v15 }
 0xfb6   :  { %v15816_v3 = vmul.f32 %v15378_v33, %v26119_v19  ;;  %v26129_v19 = vld [vmem:[#allocation71_spill] sm:$0xff] }
 0xfb7   :  { %v15418_v36 = vpop.permute.xlu1 %15417  ;;  %v15949_v38 = vadd.f32 %v15948_v42, %v15947_v40  ;;  %v15818_v45 = vmul.f32 %v15402_v34, %v26123_v29 }
 0xfb8   :  { %v15430_v27 = vpop.permute.xlu0 %15429  ;;  %v15887_v1 = vcombine.low %v15815_v61, %v15816_v3  ;;  %v15426_v0 = vrot.slane %v15418_v36, %v25187_v15 }
 0xfb9   :  { %v15950_v53 = vrot.slane %v15949_v38, 1  ;;  %v15438_v23 = vrot.slane %v15430_v27, %v25187_v15 }
 0xfba   :  { %v15952_v5 = vsel %vm138_vm0, %v15887_v1, 0.0  ;;  %v15820_v12 = vmul.f32 %v15426_v0, %v26124_v55 }
 0xfbb   :  { %v15406_v37 = vpop.permute.xlu1 %15405  ;;  %v15951_v39 = vadd.f32 %v15950_v53, %v15949_v38  ;;  %v15954_v51 = vadd.f32 %v15953_v30, %v15952_v5  ;;  %v15821_v49 = vmul.f32 %v15438_v23, %v26126_v50  ;;  %v26132_v5 = vld [vmem:[#allocation77_spill] sm:$0xff]  ;;  %v26133_v30 = vld [vmem:[#allocation2_spill] sm:$0xff]  ;;  %v26138_v23 = vld [vmem:[#allocation87_spill] sm:$0xff] }
 0xfbc   :  { %v25223_v46 = vpop.permute.xlu0 %15465  ;;  %v15414_v60 = vrot.slane %v15406_v37, %v25187_v15  ;;  %v15962_v58 = vsel %vm15916_vm12, %v15820_v12, 0.0  ;;  %v26137_v12 = vld [vmem:[#allocation3_spill] sm:$0xff] }
 0xfbd   :  { %v25226_v31 = vsel %vm16080_vm15, %v15951_v39, %v16079_v14  ;;  %v15955_v56 = vrot.slane %v15954_v51, 4 }
 0xfbe   :  { %v15819_v47 = vmul.f32 %v15414_v60, %v26122_v28  ;;  %v26131_v60 = vld [vmem:[#allocation93_spill] sm:$0xff] }
 0xfbf   :  { %v15454_v7 = vpop.permute.xlu1 %15453  ;;  %v15956_v35 = vadd.f32 %v15955_v56, %v15954_v51 }
 0xfc0   :  { %v15514_v18 = vpop.permute.xlu0 %15513  ;;  %v15888_v48 = vcombine.low %v15818_v45, %v15819_v47  ;;  %v15462_v10 = vrot.slane %v15454_v7, %v25187_v15  ;;  %v26134_v47 = vld [vmem:[#allocation16_spill] sm:$0xff]  ;;  %v26135_v45 = vld [vmem:[#allocation98_spill] sm:$0xff] }
 0xfc1   :  { %v15522_v43 = vrot.slane %v15514_v18, %v25187_v15  ;;  %v15957_v37 = vrot.slane %v15956_v35, 2  ;;  %v26128_v18 = vld [vmem:[#allocation14_spill] sm:$0xff] }
 0xfc2   :  { %v15961_v21 = vsel %vm138_vm0, %v15888_v48, 0.0  ;;  %v15823_v40 = vmul.f32 %v15462_v10, %v26127_v32  ;;  %v26136_v48 = vld [vmem:[#allocation25_spill] sm:$0xff] }
 0xfc3   :  { %v15442_v20 = vpop.permute.xlu1 %15441  ;;  %v15963_v26 = vadd.f32 %v15962_v58, %v15961_v21  ;;  %v15828_v33 = vmul.f32 %v15522_v43, %v26128_v18  ;;  %v26140_v58 = vld [vmem:[#allocation80_spill] sm:$0xff] }
 0xfc4   :  { %v25229_v44 = vpop.permute.xlu0 %15561  ;;  %v15450_v52 = vrot.slane %v15442_v20, %v25187_v15 }
 0xfc5   :  { %v15570_v2 = vrot.slane %v25229_v44, %v25187_v15  ;;  %v15964_v54 = vrot.slane %v15963_v26, 4 }
 0xfc6   :  { %v15822_v9 = vmul.f32 %v15450_v52, %v26125_v17 }
 0xfc7   :  { %v25235_v4 = vpop.permute.xlu1 %15477  ;;  %v15832_v0 = vmul.f32 %v15570_v2, %v26135_v45  ;;  %v26147_v45 = vld [vmem:[#allocation35_spill] sm:$0xff] }
 0xfc8   :  { %v15550_v25 = vpop.permute.xlu0 %15549  ;;  %v15889_v42 = vcombine.low %v15821_v49, %v15822_v9  ;;  %v15474_v9 = vrot.slane %v25223_v46, %v25187_v15 }
 0xfc9   :  { %v15558_v36 = vrot.slane %v15550_v25, %v25187_v15  ;;  %v15971_v25 = vsel %vm15916_vm12, %v15823_v40, 0.0 }
 0xfca   :  { %v15970_v41 = vsel %vm138_vm0, %v15889_v42, 0.0 }
 0xfcb   :  { %v15502_v6 = vpop.permute.xlu1 %15501 }
 0xfcc   :  { %v25237_v57 = vpop.permute.xlu0 %15597  ;;  %v15510_v38 = vrot.slane %v15502_v6, %v25187_v15  ;;  %v15831_v6 = vmul.f32 %v15558_v36, %v26131_v60 }
 0xfcd   :  { %v15606_v44 = vrot.slane %v25237_v57, %v25187_v15 }
 0xfce   :  { %v15827_v34 = vmul.f32 %v15510_v38, %v26132_v5 }
 0xfcf   :  { %v15526_v8 = vpop.permute.xlu1 %15525  ;;  %v15835_v50 = vmul.f32 %v15606_v44, %v26140_v58 }
 0xfd0   :  { %v15586_v13 = vpop.permute.xlu0 %15585  ;;  %v15534_v20 = vrot.slane %v15526_v8, %v25187_v15  ;;  %v15891_v32 = vcombine.low %v15827_v34, %v15828_v33  ;;  %v26142_v33 = vld [vmem:[#allocation23_spill] sm:$0xff]  ;;  %v26145_v34 = vld [vmem:[#allocation89_spill] sm:$0xff] }
 0xfd1   :  { %v15594_v39 = vrot.slane %v15586_v13, %v25187_v15  ;;  %v16007_v18 = vsel %vm15916_vm12, %v15835_v50, 0.0 }
 0xfd2   :  { %v15829_v52 = vmul.f32 %v15534_v20, %v26136_v48 }
 0xfd3   :  { %v15538_v59 = vpop.permute.xlu1 %15537  ;;  %v15834_v28 = vmul.f32 %v15594_v39, %v26133_v30 }
 0xfd4   :  { %v25247_v62 = vpop.permute.xlu0 %15633  ;;  %v15546_v24 = vrot.slane %v15538_v59, %v25187_v15  ;;  %v15989_v42 = vsel %vm15916_vm12, %v15829_v52, 0.0 }
 0xfd5   :  { %v15642_v56 = vrot.slane %v25247_v62, %v25187_v15  ;;  %v15965_v62 = vadd.f32 %v15964_v54, %v15963_v26  ;;  %v15486_v26 = vrot.slane %v25235_v4, %v25187_v15  ;;  %v26143_v4 = vld [vmem:[#allocation36_spill] sm:$0xff] }
 0xfd6   :  { %v15830_v3 = vmul.f32 %v15546_v24, %v26129_v19  ;;  %v25293_v24 = vadd.f32 %v15957_v37, %v15956_v35  ;;  %v15988_v19 = vsel %vm138_vm0, %v15891_v32, 0.0 }
 0xfd7   :  { %v15574_v63 = vpop.permute.xlu1 %15573 }
 0xfd8   :  { %v15622_v22 = vpop.permute.xlu0 %15621  ;;  %v15582_v14 = vrot.slane %v15574_v63, %v25187_v15  ;;  %v15892_v59 = vcombine.low %v15830_v3, %v15831_v6  ;;  %v15972_v63 = vadd.f32 %v15971_v25, %v15970_v41  ;;  %v26144_v6 = vld [vmem:[#allocation26_spill] sm:$0xff] }
 0xfd9   :  { %v15630_v1 = vrot.slane %v15622_v22, %v25187_v15  ;;  %v26139_v22 = vld [vmem:[#allocation78_spill] sm:$0xff] }
 0xfda   :  { %v15833_v61 = vmul.f32 %v15582_v14, %v26130_v11  ;;  %v15998_v14 = vsel %vm15916_vm12, %v15832_v0, 0.0  ;;  %v15997_v36 = vsel %vm138_vm0, %v15892_v59, 0.0  ;;  %v15973_v37 = vrot.slane %v15972_v63, 4 }
 0xfdb   :  { %v15610_v53 = vpop.permute.xlu1 %15609  ;;  %v15837_v57 = vmul.f32 %v15630_v1, %v26137_v12  ;;  %v15999_v3 = vadd.f32 %v15998_v14, %v15997_v36  ;;  %v15966_v11 = vrot.slane %v15965_v62, 2  ;;  %v15824_v0 = vmul.f32 %v15474_v9, %v26147_v45 }
 0xfdc   :  { %v15670_v27 = vpop.permute.xlu0 %15669  ;;  %v15618_v7 = vrot.slane %v15610_v53, %v25187_v15  ;;  %v15893_v55 = vcombine.low %v15833_v61, %v15834_v28  ;;  %v26141_v53 = vld [vmem:[#allocation95_spill] sm:$0xff]  ;;  %v15990_v61 = vadd.f32 %v15989_v42, %v15988_v19  ;;  %v15974_v30 = vadd.f32 %v15973_v37, %v15972_v63  ;;  %v26146_v28 = vld [vmem:[#allocation22_spill] sm:$0xff]  ;;  %v26151_v37 = vld [vmem:[#allocation5_spill] sm:$0xff] }
 0xfdd   :  { %v15678_v49 = vrot.slane %v15670_v27, %v25187_v15  ;;  %v15838_v46 = vmul.f32 %v15642_v56, %v26141_v53  ;;  %v16000_v48 = vrot.slane %v15999_v3, 4  ;;  %v15959_v56 = vrot.slane %v25293_v24, 1 }
 0xfde   :  { %v15836_v8 = vmul.f32 %v15618_v7, %v26134_v47  ;;  %v16006_v39 = vsel %vm138_vm0, %v15893_v55, 0.0  ;;  %v15825_v47 = vmul.f32 %v15486_v26, %v26146_v28  ;;  %v15991_v55 = vrot.slane %v15990_v61, 4 }
 0xfdf   :  { %v15646_v13 = vpop.permute.xlu1 %15645  ;;  %v15841_v2 = vmul.f32 %v15678_v49, %v26142_v33  ;;  %v16008_v1 = vadd.f32 %v16007_v18, %v16006_v39  ;;  %v16016_v41 = vsel %vm15916_vm12, %v15838_v46, 0.0  ;;  %v15975_v63 = vrot.slane %v15974_v30, 2  ;;  %v26149_v46 = vld [vmem:[#allocation86_spill] sm:$0xff] }
 0xfe0   :  { %v15658_v16 = vpop.permute.xlu0 %15657  ;;  %v15654_v51 = vrot.slane %v15646_v13, %v25187_v15  ;;  %v15894_v40 = vcombine.low %v15836_v8, %v15837_v57  ;;  %v15890_v58 = vcombine.low %v15824_v0, %v15825_v47  ;;  %v15992_v42 = vadd.f32 %v15991_v55, %v15990_v61 }
 0xfe1   :  { %v15666_v29 = vrot.slane %v15658_v16, %v25187_v15  ;;  %v16009_v12 = vrot.slane %v16008_v1, 4  ;;  %v15976_v33 = vadd.f32 %v15975_v63, %v15974_v30 }
 0xfe2   :  { %v15839_v10 = vmul.f32 %v15654_v51, %v26138_v23  ;;  %v16015_v54 = vsel %vm138_vm0, %v15894_v40, 0.0  ;;  %v16025_v51 = vsel %vm15916_vm12, %v15841_v2, 0.0  ;;  %v15967_v23 = vadd.f32 %v15966_v11, %v15965_v62 }
 0xfe3   :  { %v15840_v21 = vmul.f32 %v15666_v29, %v26139_v22  ;;  %v15682_v43 = vpop.permute.xlu1 %15681  ;;  %v16017_v8 = vadd.f32 %v16016_v41, %v16015_v54  ;;  %v16010_v62 = vadd.f32 %v16009_v12, %v16008_v1  ;;  %v15993_v61 = vrot.slane %v15992_v42, 2  ;;  %v26152_v41 = vld [vmem:[#allocation9_spill] sm:$0xff] }
 0xfe4   :  { %v15706_v17 = vpop.permute.xlu0 %15705  ;;  %v15690_v27 = vrot.slane %v15682_v43, %v25187_v15  ;;  %v16001_v43 = vadd.f32 %v16000_v48, %v15999_v3  ;;  %v15968_v30 = vrot.slane %v15967_v23, 1  ;;  %v15960_v48 = vadd.f32 %v15959_v56, %v25293_v24 }
 0xfe5   :  { %v15895_v38 = vcombine.low %v15839_v10, %v15840_v21  ;;  %v15714_v7 = vrot.slane %v15706_v17, %v25187_v15  ;;  %v16018_v9 = vrot.slane %v16017_v8, 4  ;;  %v15977_v12 = vrot.slane %v15976_v33, 1 }
 0xfe6   :  { %v15842_v5 = vmul.f32 %v15690_v27, %v26144_v6  ;;  %v26150_v27 = vld [vmem:[#allocation82_spill] sm:$0xff]  ;;  %v16002_v3 = vrot.slane %v16001_v43, 2 }
 0xfe7   :  { %v15718_v20 = vpop.permute.xlu1 %15717  ;;  %v16024_v16 = vsel %vm138_vm0, %v15895_v38, 0.0  ;;  %v15844_v60 = vmul.f32 %v15714_v7, %v26143_v4  ;;  %v26148_v38 = vld [vmem:[#allocation19_spill] sm:$0xff]  ;;  %v16019_v2 = vadd.f32 %v16018_v9, %v16017_v8 }
 0xfe8   :  { %v15694_v35 = vpop.permute.xlu0 %15693  ;;  %v16026_v52 = vadd.f32 %v16025_v51, %v16024_v16  ;;  %v15726_v57 = vrot.slane %v15718_v20, %v25187_v15  ;;  %v15979_v20 = vsel %vm138_vm0, %v15890_v58, 0.0  ;;  %v16003_v51 = vadd.f32 %v16002_v3, %v16001_v43 }
 0xfe9   :  { %v15702_v25 = vrot.slane %v15694_v35, %v25187_v15  ;;  %v16034_v10 = vsel %vm15916_vm12, %v15844_v60, 0.0  ;;  %v16011_v60 = vrot.slane %v16010_v62, 2  ;;  %v16020_v28 = vrot.slane %v16019_v2, 2 }
 0xfea   :  { %v16027_v32 = vrot.slane %v16026_v52, 4  ;;  %v15845_v53 = vmul.f32 %v15726_v57, %v26148_v38  ;;  %v15994_v57 = vadd.f32 %v15993_v61, %v15992_v42  ;;  %v15978_v42 = vadd.f32 %v15977_v12, %v15976_v33 }
 0xfeb   :  { %v15843_v44 = vmul.f32 %v15702_v25, %v26145_v34  ;;  %v15754_v29 = vpop.permute.xlu1 %15753  ;;  %v16021_v63 = vadd.f32 %v16020_v28, %v16019_v2 }
 0xfec   :  { %v15742_v13 = vpop.permute.xlu0 %15741  ;;  %v15762_v7 = vrot.slane %v15754_v29, %v25187_v15  ;;  %v16028_v54 = vadd.f32 %v16027_v32, %v16026_v52 }
 0xfed   :  { %v15896_v59 = vcombine.low %v15842_v5, %v15843_v44  ;;  %v15750_v21 = vrot.slane %v15742_v13, %v25187_v15  ;;  %v26153_v5 = vld [vmem:[#allocation104_spill] sm:$0xff] }
 0xfee   :  { %v15848_v34 = vmul.f32 %v15762_v7, %v26153_v5  ;;  %v16029_v29 = vrot.slane %v16028_v54, 2 }
 0xfef   :  { %v16033_v22 = vsel %vm138_vm0, %v15896_v59, 0.0  ;;  %v15490_v49 = vpop.permute.xlu1 %15489  ;;  %v15847_v39 = vmul.f32 %v15750_v21, %v26149_v46 }
 0xff0   :  { %v15730_v17 = vpop.permute.xlu0 %15729  ;;  %v16035_v50 = vadd.f32 %v16034_v10, %v16033_v22  ;;  %v15498_v14 = vrot.slane %v15490_v49, %v25187_v15  ;;  %v16012_v10 = vadd.f32 %v16011_v60, %v16010_v62  ;;  %v26154_v22 = vld [vmem:[#allocation96_spill] sm:$0xff]  ;;  %v16030_v49 = vadd.f32 %v16029_v29, %v16028_v54 }
 0xff1   :  { %v15738_v40 = vrot.slane %v15730_v17, %v25187_v15  ;;  %v16043_v6 = vsel %vm15916_vm12, %v15847_v39, 0.0  ;;  %v15969_v17 = vadd.f32 %v15968_v30, %v15967_v23  ;;  %v15995_v62 = vrot.slane %v15994_v57, 1 }
 0xff2   :  { %v16036_v36 = vrot.slane %v16035_v50, 4  ;;  %v15826_v26 = vmul.f32 %v15498_v14, %v26151_v37  ;;  %v16083_v14 = vsel %vm16082_vm1, %v15960_v48, %v25226_v31  ;;  %v16022_v23 = vrot.slane %v16021_v63, 1 }
 0xff3   :  { %v15846_v35 = vmul.f32 %v15738_v40, %v26150_v27  ;;  %v16085_v39 = vsel %vm16084_vm2, %v15969_v17, %v16083_v14  ;;  %v16031_v7 = vrot.slane %v16030_v49, 1  ;;  %v15996_v31 = vadd.f32 %v15995_v62, %v15994_v57 }
 0xff4   :  { %v15766_v18 = vpop.permute.xlu0 %15765  ;;  %v15980_v11 = vsel %vm15916_vm12, %v15826_v26, 0.0  ;;  %v16037_v1 = vadd.f32 %v16036_v36, %v16035_v50  ;;  %v16004_v50 = vrot.slane %v16003_v51, 1  ;;  %v16013_v36 = vrot.slane %v16012_v10, 1 }
 0xff5   :  { %v15774_v19 = vrot.slane %v15766_v18, %v25187_v15  ;;  %v15897_v25 = vcombine.low %v15845_v53, %v15846_v35  ;;  %v15981_v16 = vadd.f32 %v15980_v11, %v15979_v20  ;;  %v16087_v18 = vsel %vm16086_vm3, %v15978_v42, %v16085_v39 }
 0xff6   :  { %v16038_v52 = vrot.slane %v16037_v1, 2  ;;  %v16005_v27 = vadd.f32 %v16004_v50, %v16003_v51  ;;  %v16014_v2 = vadd.f32 %v16013_v36, %v16012_v10  ;;  %v16023_v33 = vadd.f32 %v16022_v23, %v16021_v63 }
 0xff7   :  { %v15849_v4 = vmul.f32 %v15774_v19, %v26152_v41  ;;  %v16042_v44 = vsel %vm138_vm0, %v15897_v25, 0.0  ;;  %v15982_v8 = vrot.slane %v15981_v16, 4  ;;  %v16032_v54 = vadd.f32 %v16031_v7, %v16030_v49 }
 0xff8   :  { %v15778_v13 = vpop.permute.xlu0 %15777  ;;  %v16044_v47 = vadd.f32 %v16043_v6, %v16042_v44  ;;  %v16039_v32 = vadd.f32 %v16038_v52, %v16037_v1  ;;  %v16090_v25 = vsel %vm16076_vm13, %v16005_v27, %v15996_v31 }
 0xff9   :  { %v15898_v45 = vcombine.low %v15848_v34, %v15849_v4  ;;  %v15786_v0 = vrot.slane %v15778_v13, %v25187_v15  ;;  %v15983_v55 = vadd.f32 %v15982_v8, %v15981_v16  ;;  %v16091_v1 = vsel %vm16078_vm14, %v16014_v2, %v16090_v25 }
 0xffa   :  { %v16045_v59 = vrot.slane %v16044_v47, 4  ;;  %v16040_v35 = vrot.slane %v16039_v32, 1  ;;  %v16092_v41 = vsel %vm16080_vm15, %v16023_v33, %v16091_v1 }
 0xffb   :  { %v15850_v21 = vmul.f32 %v15786_v0, %v26154_v22  ;;  %v15984_v9 = vrot.slane %v15983_v55, 2  ;;  %v16051_v43 = vsel %vm138_vm0, %v15898_v45, 0.0  ;;  %v16093_v60 = vsel %vm16082_vm1, %v16032_v54, %v16092_v41 }
 0xffc   :  { %v16046_v58 = vadd.f32 %v16045_v59, %v16044_v47  ;;  %v16041_v11 = vadd.f32 %v16040_v35, %v16039_v32 }
 0xffd   :  { %v16052_v15 = vsel %vm15916_vm12, %v15850_v21, 0.0  ;;  %v15985_v56 = vadd.f32 %v15984_v9, %v15983_v55 }
 0xffe   :  { %v16047_v24 = vrot.slane %v16046_v58, 2  ;;  %v16053_v40 = vadd.f32 %v16052_v15, %v16051_v43  ;;  %v16094_v6 = vsel %vm16084_vm2, %v16041_v11, %v16093_v60 }
 0xfff   :  { %v15986_v53 = vrot.slane %v15985_v56, 1 }
0x1000   :  { %v16048_v38 = vadd.f32 %v16047_v24, %v16046_v58  ;;  %v16054_v46 = vrot.slane %v16053_v40, 4 }
0x1001   :  { %v15987_v37 = vadd.f32 %v15986_v53, %v15985_v56 }
0x1002   :  { %v16055_v26 = vadd.f32 %v16054_v46, %v16053_v40  ;;  %v16049_v20 = vrot.slane %v16048_v38, 1 }
0x1003   :  { %v16089_v19 = vsel %vm16088_vm4, %v15987_v37, %v16087_v18 }
0x1004   :  { %v16056_v3 = vrot.slane %v16055_v26, 2  ;;  %16099 = vst.msk [vmem:[%s25367_s6] sm:$0xff] %vm138_vm0, %v16089_v19  ;;  %v16050_v16 = vadd.f32 %v16049_v20, %v16048_v38 }
0x1006   :  { %v16057_v61 = vadd.f32 %v16056_v3, %v16055_v26  ;;  %v16095_v34 = vsel %vm16086_vm3, %v16050_v16, %v16094_v6 }
0x1008   :  { %v16058_v4 = vrot.slane %v16057_v61, 1 }
0x100a   :  { %v16059_v5 = vadd.f32 %v16058_v4, %v16057_v61 }
0x100c   :  { %v16096_v44 = vsel %vm16088_vm4, %v16059_v5, %v16095_v34 }
0x100d   :  { %16100 = vst.msk [vmem:[%s25367_s6 + $0x8] sm:$0xff] %vm138_vm0, %v16096_v44 }

</bundles_post_ra>
